<compile_context>
chip_gen: v7x
topology: tpu7x:2x2x1
jax: 0.10.0
libtpu: 0.0.40
codegen_flags: <defaults>
</compile_context>

<pallas_src>
import functools

import jax
import jax.numpy as jnp
from jax.experimental import pallas as pl
from jax.experimental.pallas import tpu as pltpu


# ---------------------------------------------------------------------------
# Pallas kernel: direct convolution (im2col done in-kernel via shifted windows)
# with fused per-channel affine (BatchNorm) and optional PReLU epilogue.
# ---------------------------------------------------------------------------
def _make_conv_kernel(positions, ho, wo, cin, cout, use_prelu):
    """positions: static tuple of (plane, row_off, col_off), one per kernel tap,
    ordered to match the packed weight's leading (kh*kw) axis."""
    m = ho * wo

    def body(x_ref, w_ref, scale_ref, shift_ref, alpha_ref, o_ref):
        acc = jnp.zeros((m, cout), jnp.float32)
        for idx, (p, oi, oj) in enumerate(positions):
            # (1, ho, wo, cin) bf16 window, contiguous static slice of the plane.
            win = x_ref[p:p + 1, oi:oi + ho, oj:oj + wo, :]
            acc = acc + jnp.dot(win.reshape(m, cin), w_ref[idx],
                                preferred_element_type=jnp.float32)
        y = acc * scale_ref[...] + shift_ref[...]
        if use_prelu:
            y = jnp.where(y >= 0.0, y, y * alpha_ref[...])
        o_ref[...] = y.reshape(1, m, cout).astype(o_ref.dtype)

    if use_prelu:
        def kernel(x_ref, w_ref, scale_ref, shift_ref, alpha_ref, o_ref):
            body(x_ref, w_ref, scale_ref, shift_ref, alpha_ref, o_ref)
    else:
        def kernel(x_ref, w_ref, scale_ref, shift_ref, o_ref):
            body(x_ref, w_ref, scale_ref, shift_ref, None, o_ref)
    return kernel


# ---------------------------------------------------------------------------
# Wrapper: NHWC conv (kernel in {1,3}) + fused BN affine / PReLU epilogue.
# ---------------------------------------------------------------------------
def _conv_bn_act(x, pw, *, kernel, stride, pad, bn_in=None, prelu=False,
                 out_dtype=jnp.float32):
    n, h, w, cin = x.shape
    cout = pw["w"].shape[-1]

    # Pre-conv BatchNorm fused into the (already required) pad + bf16 cast pass.
    if bn_in is not None:
        x = x * bn_in[0] + bn_in[1]

    if kernel == 1:
        if stride > 1:                                   # 1x1/stride == subsample + 1x1
            x = x[:, ::stride, ::stride, :]
        planes = x.astype(jnp.bfloat16)[:, None]         # (n, 1, ho, wo, cin)
        _, _, hp, wp, _ = planes.shape
        ho, wo, num_planes = hp, wp, 1
        positions = ((0, 0, 0),)
    else:                                                # 3x3
        ho = (h + 2 * pad - 3) // stride + 1
        wo = (w + 2 * pad - 3) // stride + 1
        xp = jnp.pad(x, ((0, 0), (pad, pad), (pad, pad), (0, 0))).astype(jnp.bfloat16)
        hp, wp = h + 2 * pad, w + 2 * pad
        if stride == 1:
            planes = xp[:, None]                         # (n, 1, hp, wp, cin)
            num_planes = 1
            positions = tuple((0, di, dj) for di in range(3) for dj in range(3))
        else:                                            # stride 2: parity-plane split
            if hp % 2:
                xp = jnp.pad(xp, ((0, 0), (0, 1), (0, 0), (0, 0)))
                hp += 1
            if wp % 2:
                xp = jnp.pad(xp, ((0, 0), (0, 0), (0, 1), (0, 0)))
                wp += 1
            hp, wp = hp // 2, wp // 2
            planes = xp.reshape(n, hp, 2, wp, 2, cin).transpose(0, 2, 4, 1, 3, 5)
            num_planes = 4
            # plane = 2*(row parity) + (col parity); in-plane offsets are di//2, dj//2.
            positions = tuple((2 * (di % 2) + (dj % 2), di // 2, dj // 2)
                              for di in range(3) for dj in range(3))

    planes = planes.reshape(n * num_planes, hp, wp, cin)
    m = ho * wo
    kk = pw["w"].shape[0]

    args = [planes, pw["w"], pw["scale"], pw["shift"]]
    in_specs = [
        pl.BlockSpec((num_planes, hp, wp, cin), lambda b: (b, 0, 0, 0)),
        pl.BlockSpec((kk, cin, cout), lambda b: (0, 0, 0)),   # weight: VMEM-resident
        pl.BlockSpec((1, cout), lambda b: (0, 0)),
        pl.BlockSpec((1, cout), lambda b: (0, 0)),
    ]
    if prelu:
        args.append(pw["alpha"])
        in_specs.append(pl.BlockSpec((1, cout), lambda b: (0, 0)))

    out = pl.pallas_call(
        _make_conv_kernel(positions, ho, wo, cin, cout, prelu),
        out_shape=jax.ShapeDtypeStruct((n, m, cout), out_dtype),
        grid_spec=pltpu.PrefetchScalarGridSpec(
            num_scalar_prefetch=0,
            grid=(n,),
            in_specs=in_specs,
            out_specs=pl.BlockSpec((1, m, cout), lambda b: (b, 0, 0)),
        ),
        compiler_params=pltpu.CompilerParams(
            dimension_semantics=("parallel",)),
    )(*args)
    return out.reshape(n, ho, wo, cout)


# ---------------------------------------------------------------------------
# Parameter construction (deterministic, synthetic). Weights packed once at init.
# ---------------------------------------------------------------------------
def _pack_conv(w, scale, shift, alpha=None):
    kh, kw, cin, cout = w.shape
    packed = {
        "w": w.reshape(kh * kw, cin, cout).astype(jnp.bfloat16),
        "scale": scale.reshape(1, cout).astype(jnp.float32),
        "shift": shift.reshape(1, cout).astype(jnp.float32),
    }
    if alpha is not None:
        packed["alpha"] = alpha.reshape(1, cout).astype(jnp.float32)
    return packed


def _bn_scale_shift(key, c, eps=1e-5):
    k1, k2, k3, k4 = jax.random.split(key, 4)
    gamma = 1.0 + 0.1 * jax.random.normal(k1, (c,), jnp.float32)
    beta = 0.1 * jax.random.normal(k2, (c,), jnp.float32)
    mean = 0.05 * jax.random.normal(k3, (c,), jnp.float32)
    var = 1.0 + 0.1 * jax.random.uniform(k4, (c,), jnp.float32)
    scale = gamma / jnp.sqrt(var + eps)          # inference BN (running stats)
    shift = beta - mean * scale
    return scale, shift


def _conv_w(key, kh, kw, cin, cout):
    return (jax.random.normal(key, (kh, kw, cin, cout), jnp.float32)
            / jnp.sqrt(kh * kw * cin))


def init_block(key, cin, cout, stride):
    cfg = {"cin": cin, "cout": cout, "stride": stride,
           "conv_shortcut": cin != cout}
    ks = jax.random.split(key, 8)
    r = max(cout // 16, 1)

    bn1_s, bn1_b = _bn_scale_shift(ks[0], cin)
    conv1_w = _conv_w(ks[1], 3, 3, cin, cout)
    prelu = jnp.full((cout,), 0.25, jnp.float32)
    conv2_w = _conv_w(ks[2], 3, 3, cout, cout)
    bn2_s, bn2_b = _bn_scale_shift(ks[3], cout)
    se_w1 = jax.random.normal(ks[4], (cout, r), jnp.float32) / jnp.sqrt(cout)
    se_w2 = jax.random.normal(ks[5], (r, cout), jnp.float32) / jnp.sqrt(r)
    ones = jnp.ones((cout,), jnp.float32)
    zeros = jnp.zeros((cout,), jnp.float32)

    weights = {
        "bn1_scale": bn1_s, "bn1_shift": bn1_b,                 # fused into conv1 prep
        "conv1": _pack_conv(conv1_w, ones, zeros, alpha=prelu),  # Conv3x3 + PReLU
        "conv2": _pack_conv(conv2_w, bn2_s, bn2_b),              # Conv3x3 + BN
        "se_w1": se_w1, "se_w2": se_w2,
    }
    raw = {
        "bn1_scale": bn1_s, "bn1_shift": bn1_b,
        "conv1_w": conv1_w, "prelu": prelu,
        "conv2_w": conv2_w, "bn2_scale": bn2_s, "bn2_shift": bn2_b,
        "se_w1": se_w1, "se_w2": se_w2,
    }
    if cfg["conv_shortcut"]:
        short_w = _conv_w(ks[6], 1, 1, cin, cout)
        sh_s, sh_b = _bn_scale_shift(ks[7], cout)
        weights["short"] = _pack_conv(short_w, sh_s, sh_b)       # Conv1x1 + BN
        raw.update({"short_w": short_w, "short_scale": sh_s, "short_shift": sh_b})
    return cfg, weights, raw


# ---------------------------------------------------------------------------
# Forward pass
# ---------------------------------------------------------------------------
def bottleneck_ir_se(x, w, cfg):
    stride = cfg["stride"]
    if cfg["conv_shortcut"]:
        h = _conv_bn_act(x, w["short"], kernel=1, stride=stride, pad=0,
                         prelu=False, out_dtype=jnp.float32)       # Conv1x1 + BN
    else:
        h = x[:, ::stride, ::stride, :]                            # MaxPool2d(1, stride)
    # BatchNorm(in) fused into conv1's pad + bf16-cast pass (no standalone kernel).
    y = _conv_bn_act(x, w["conv1"], kernel=3, stride=1, pad=1,
                     bn_in=(w["bn1_scale"], w["bn1_shift"]),
                     prelu=True, out_dtype=jnp.bfloat16)           # Conv3x3 + PReLU
    y = _conv_bn_act(y, w["conv2"], kernel=3, stride=stride, pad=1,
                     prelu=False, out_dtype=jnp.float32)           # Conv3x3 + BN
    # SEModule: tiny per-sample matmuls + sigmoid gate -> plain XLA (Pallas overhead
    # would dominate at these sizes).
    s = y.mean(axis=(1, 2))
    s = jnp.maximum(jnp.dot(s, w["se_w1"]), 0.0)
    s = jax.nn.sigmoid(jnp.dot(s, w["se_w2"]))
    return y * s[:, None, None, :] + h


def network_forward(cfgs, weights_list, x_nchw):
    x = jnp.transpose(x_nchw.astype(jnp.float32), (0, 2, 3, 1))    # NCHW -> NHWC
    for cfg, w in zip(cfgs, weights_list):
        x = bottleneck_ir_se(x, w, cfg)
    return jnp.transpose(x, (0, 3, 1, 2))                          # NHWC -> NCHW


# ---------------------------------------------------------------------------
# Pure-JAX reference (correctness validation of the Pallas path)
# ---------------------------------------------------------------------------
def _ref_conv(x, w, stride, pad):
    return jax.lax.conv_general_dilated(
        x, w, (stride, stride), [(pad, pad), (pad, pad)],
        dimension_numbers=("NHWC", "HWIO", "NHWC"))


def _ref_block(x, raw, cfg):
    s = cfg["stride"]
    if cfg["conv_shortcut"]:
        h = _ref_conv(x, raw["short_w"], s, 0) * raw["short_scale"] + raw["short_shift"]
    else:
        h = x[:, ::s, ::s, :]
    y = x * raw["bn1_scale"] + raw["bn1_shift"]
    y = _ref_conv(y, raw["conv1_w"], 1, 1)
    y = jnp.where(y >= 0, y, y * raw["prelu"])
    y = _ref_conv(y, raw["conv2_w"], s, 1)
    y = y * raw["bn2_scale"] + raw["bn2_shift"]
    p = y.mean(axis=(1, 2))
    p = jnp.maximum(p @ raw["se_w1"], 0.0)
    p = jax.nn.sigmoid(p @ raw["se_w2"])
    return y * p[:, None, None, :] + h


def ref_forward(cfgs, raws, x_nchw):
    x = jnp.transpose(x_nchw.astype(jnp.float32), (0, 2, 3, 1))
    for cfg, raw in zip(cfgs, raws):
        x = _ref_block(x, raw, cfg)
    return jnp.transpose(x, (0, 3, 1, 2))


if __name__ == "__main__":
    BATCH, IN_CH, SPATIAL = 2, 16, 16

    key = jax.random.PRNGKey(0)
    k_x, k_b1, k_b2 = jax.random.split(key, 3)

    # Two stacked IR-SE bottlenecks: conv shortcut (16->32, stride 2) and
    # maxpool shortcut (32->32, stride 2) — exercises both branches.
    cfg1, w1, raw1 = init_block(k_b1, IN_CH, 32, stride=2)
    cfg2, w2, raw2 = init_block(k_b2, 32, 32, stride=2)
    cfgs, weights, raws = (cfg1, cfg2), (w1, w2), (raw1, raw2)

    x = jax.random.normal(k_x, (BATCH, IN_CH, SPATIAL, SPATIAL), jnp.float32)  # NCHW

    # Static config is closed over (NOT a jit argument) -> no str/int tracing issues.
    fwd = jax.jit(functools.partial(network_forward, cfgs))
    out = fwd(weights, x)
    jax.block_until_ready(out)

    assert out.shape == (BATCH, 32, SPATIAL // 4, SPATIAL // 4)
    assert bool(jnp.all(jnp.isfinite(out)))

    # Validate against the f32 XLA reference (bf16 MXU inputs -> loose tolerance).
    ref = ref_forward(cfgs, raws, x)
    err = float(jnp.max(jnp.abs(out - ref)))
    scale = float(jnp.max(jnp.abs(ref))) + 1e-6
    assert err <= 5e-2 * scale + 1e-3, f"mismatch: max abs err {err} vs ref scale {scale}"

    print("KERNEL_OK")
</pallas_src>

<mosaic_0001>
module attributes {stable_mosaic.version = 11 : i64} {
  func.func @kernel(%arg0: i32, %arg1: memref<1x8x8x16xbf16, #tpu.memory_space<vmem>>, %arg2: memref<1x16x32xbf16, #tpu.memory_space<vmem>>, %arg3: memref<1x32xf32, #tpu.memory_space<vmem>>, %arg4: memref<1x32xf32, #tpu.memory_space<vmem>>, %arg5: memref<1x64x32xf32, #tpu.memory_space<vmem>>) attributes {dimension_semantics = [#tpu.dimension_semantics<parallel>], iteration_bounds = array<i64: 2>, scalar_prefetch = 0 : i64, scratch_operands = 0 : i64, tpu.core_type = #tpu.core_type<tc>, window_params = [{transform_indices = @transform_0, window_bounds = array<i64: 1, 8, 8, 16>}, {pipeline_mode = #tpu.pipeline_mode<synchronous>, transform_indices = @transform_1, window_bounds = array<i64: 1, 16, 32>}, {pipeline_mode = #tpu.pipeline_mode<synchronous>, transform_indices = @transform_2, window_bounds = array<i64: 1, 32>}, {pipeline_mode = #tpu.pipeline_mode<synchronous>, transform_indices = @transform_3, window_bounds = array<i64: 1, 32>}, {transform_indices = @transform_4, window_bounds = array<i64: 1, 64, 32>}]} {
    %cst = arith.constant 0.000000e+00 : f32
    %0 = vector.broadcast %cst : f32 to vector<64x32xf32>
    %c0 = arith.constant 0 : index
    %c0_0 = arith.constant 0 : index
    %c0_1 = arith.constant 0 : index
    %c0_2 = arith.constant 0 : index
    %1 = vector.load %arg1[%c0, %c0_0, %c0_1, %c0_2] : memref<1x8x8x16xbf16, #tpu.memory_space<vmem>>, vector<1x8x8x16xbf16>
    %2 = vector.shape_cast %1 : vector<1x8x8x16xbf16> to vector<64x16xbf16>
    %c0_3 = arith.constant 0 : index
    %c0_4 = arith.constant 0 : index
    %c0_5 = arith.constant 0 : index
    %3 = vector.load %arg2[%c0_3, %c0_4, %c0_5] : memref<1x16x32xbf16, #tpu.memory_space<vmem>>, vector<1x16x32xbf16>
    %4 = vector.shape_cast %3 : vector<1x16x32xbf16> to vector<16x32xbf16>
    %cst_6 = arith.constant dense<0.000000e+00> : vector<64x32xf32>
    %5 = tpu.matmul %2, %4, %cst_6 {dimension_numbers = #tpu.dot_dimension_numbers<[1], [0], [0], [1], [0, 0, 1, 1], [], []>} : vector<64x16xbf16>, vector<16x32xbf16>, vector<64x32xf32> -> vector<64x32xf32>
    %6 = arith.addf %0, %5 : vector<64x32xf32>
    %c0_7 = arith.constant 0 : index
    %c0_8 = arith.constant 0 : index
    %7 = vector.load %arg3[%c0_7, %c0_8] : memref<1x32xf32, #tpu.memory_space<vmem>>, vector<1x32xf32>
    %8 = vector.broadcast %7 : vector<1x32xf32> to vector<64x32xf32>
    %9 = arith.mulf %6, %8 : vector<64x32xf32>
    %c0_9 = arith.constant 0 : index
    %c0_10 = arith.constant 0 : index
    %10 = vector.load %arg4[%c0_9, %c0_10] : memref<1x32xf32, #tpu.memory_space<vmem>>, vector<1x32xf32>
    %11 = vector.broadcast %10 : vector<1x32xf32> to vector<64x32xf32>
    %12 = arith.addf %9, %11 : vector<64x32xf32>
    %13 = vector.shape_cast %12 : vector<64x32xf32> to vector<1x64x32xf32>
    %c0_11 = arith.constant 0 : index
    %c0_12 = arith.constant 0 : index
    %c0_13 = arith.constant 0 : index
    %14 = vector.load %arg5[%c0_11, %c0_12, %c0_13] : memref<1x64x32xf32, #tpu.memory_space<vmem>>, vector<1x64x32xf32>
    tpu.vector_store %arg5[%c0_11, %c0_12, %c0_13], %13 {strides = array<i32>} : memref<1x64x32xf32, #tpu.memory_space<vmem>>, vector<1x64x32xf32>,
    return
  }
  func.func @transform_0(%arg0: i32) -> (i32, i32, i32, i32) {
    %c0_i32 = arith.constant 0 : i32
    %c0_i32_0 = arith.constant 0 : i32
    %c0_i32_1 = arith.constant 0 : i32
    %c0_i32_2 = arith.constant 0 : i32
    return %arg0, %c0_i32, %c0_i32_0, %c0_i32_1 : i32, i32, i32, i32
  }
  func.func @transform_1(%arg0: i32) -> (i32, i32, i32) {
    %c0_i32 = arith.constant 0 : i32
    %c0_i32_0 = arith.constant 0 : i32
    %c0_i32_1 = arith.constant 0 : i32
    %c0_i32_2 = arith.constant 0 : i32
    return %c0_i32, %c0_i32_0, %c0_i32_1 : i32, i32, i32
  }
  func.func @transform_2(%arg0: i32) -> (i32, i32) {
    %c0_i32 = arith.constant 0 : i32
    %c0_i32_0 = arith.constant 0 : i32
    %c0_i32_1 = arith.constant 0 : i32
    return %c0_i32, %c0_i32_0 : i32, i32
  }
  func.func @transform_3(%arg0: i32) -> (i32, i32) {
    %c0_i32 = arith.constant 0 : i32
    %c0_i32_0 = arith.constant 0 : i32
    %c0_i32_1 = arith.constant 0 : i32
    return %c0_i32, %c0_i32_0 : i32, i32
  }
  func.func @transform_4(%arg0: i32) -> (i32, i32, i32) {
    %c0_i32 = arith.constant 0 : i32
    %c0_i32_0 = arith.constant 0 : i32
    %c0_i32_1 = arith.constant 0 : i32
    return %arg0, %c0_i32, %c0_i32_0 : i32, i32, i32
  }
}

module attributes {stable_mosaic.version = 11 : i64} {
  func.func @kernel(%arg0: i32, %arg1: memref<1x18x18x16xbf16, #tpu.memory_space<vmem>>, %arg2: memref<9x16x32xbf16, #tpu.memory_space<vmem>>, %arg3: memref<1x32xf32, #tpu.memory_space<vmem>>, %arg4: memref<1x32xf32, #tpu.memory_space<vmem>>, %arg5: memref<1x32xf32, #tpu.memory_space<vmem>>, %arg6: memref<1x256x32xbf16, #tpu.memory_space<vmem>>) attributes {dimension_semantics = [#tpu.dimension_semantics<parallel>], iteration_bounds = array<i64: 2>, scalar_prefetch = 0 : i64, scratch_operands = 0 : i64, tpu.core_type = #tpu.core_type<tc>, window_params = [{transform_indices = @transform_0, window_bounds = array<i64: 1, 18, 18, 16>}, {pipeline_mode = #tpu.pipeline_mode<synchronous>, transform_indices = @transform_1, window_bounds = array<i64: 9, 16, 32>}, {pipeline_mode = #tpu.pipeline_mode<synchronous>, transform_indices = @transform_2, window_bounds = array<i64: 1, 32>}, {pipeline_mode = #tpu.pipeline_mode<synchronous>, transform_indices = @transform_3, window_bounds = array<i64: 1, 32>}, {pipeline_mode = #tpu.pipeline_mode<synchronous>, transform_indices = @transform_4, window_bounds = array<i64: 1, 32>}, {transform_indices = @transform_5, window_bounds = array<i64: 1, 256, 32>}]} {
    %cst = arith.constant 0.000000e+00 : f32
    %0 = vector.broadcast %cst : f32 to vector<256x32xf32>
    %c0 = arith.constant 0 : index
    %c0_0 = arith.constant 0 : index
    %c0_1 = arith.constant 0 : index
    %c0_2 = arith.constant 0 : index
    %1 = vector.load %arg1[%c0, %c0_0, %c0_1, %c0_2] : memref<1x18x18x16xbf16, #tpu.memory_space<vmem>>, vector<1x16x16x16xbf16>
    %2 = vector.shape_cast %1 : vector<1x16x16x16xbf16> to vector<256x16xbf16>
    %c0_3 = arith.constant 0 : index
    %c0_4 = arith.constant 0 : index
    %c0_5 = arith.constant 0 : index
    %3 = vector.load %arg2[%c0_3, %c0_4, %c0_5] : memref<9x16x32xbf16, #tpu.memory_space<vmem>>, vector<1x16x32xbf16>
    %4 = vector.shape_cast %3 : vector<1x16x32xbf16> to vector<16x32xbf16>
    %cst_6 = arith.constant dense<0.000000e+00> : vector<256x32xf32>
    %5 = tpu.matmul %2, %4, %cst_6 {dimension_numbers = #tpu.dot_dimension_numbers<[1], [0], [0], [1], [0, 0, 1, 1], [], []>} : vector<256x16xbf16>, vector<16x32xbf16>, vector<256x32xf32> -> vector<256x32xf32>
    %6 = arith.addf %0, %5 : vector<256x32xf32>
    %c0_7 = arith.constant 0 : index
    %c0_8 = arith.constant 0 : index
    %c1 = arith.constant 1 : index
    %c0_9 = arith.constant 0 : index
    %7 = vector.load %arg1[%c0_7, %c0_8, %c1, %c0_9] : memref<1x18x18x16xbf16, #tpu.memory_space<vmem>>, vector<1x16x16x16xbf16>
    %8 = vector.shape_cast %7 : vector<1x16x16x16xbf16> to vector<256x16xbf16>
    %c1_10 = arith.constant 1 : index
    %c0_11 = arith.constant 0 : index
    %c0_12 = arith.constant 0 : index
    %9 = vector.load %arg2[%c1_10, %c0_11, %c0_12] : memref<9x16x32xbf16, #tpu.memory_space<vmem>>, vector<1x16x32xbf16>
    %10 = vector.shape_cast %9 : vector<1x16x32xbf16> to vector<16x32xbf16>
    %cst_13 = arith.constant dense<0.000000e+00> : vector<256x32xf32>
    %11 = tpu.matmul %8, %10, %cst_13 {dimension_numbers = #tpu.dot_dimension_numbers<[1], [0], [0], [1], [0, 0, 1, 1], [], []>} : vector<256x16xbf16>, vector<16x32xbf16>, vector<256x32xf32> -> vector<256x32xf32>
    %12 = arith.addf %6, %11 : vector<256x32xf32>
    %c0_14 = arith.constant 0 : index
    %c0_15 = arith.constant 0 : index
    %c2 = arith.constant 2 : index
    %c0_16 = arith.constant 0 : index
    %13 = vector.load %arg1[%c0_14, %c0_15, %c2, %c0_16] : memref<1x18x18x16xbf16, #tpu.memory_space<vmem>>, vector<1x16x16x16xbf16>
    %14 = vector.shape_cast %13 : vector<1x16x16x16xbf16> to vector<256x16xbf16>
    %c2_17 = arith.constant 2 : index
    %c0_18 = arith.constant 0 : index
    %c0_19 = arith.constant 0 : index
    %15 = vector.load %arg2[%c2_17, %c0_18, %c0_19] : memref<9x16x32xbf16, #tpu.memory_space<vmem>>, vector<1x16x32xbf16>
    %16 = vector.shape_cast %15 : vector<1x16x32xbf16> to vector<16x32xbf16>
    %cst_20 = arith.constant dense<0.000000e+00> : vector<256x32xf32>
    %17 = tpu.matmul %14, %16, %cst_20 {dimension_numbers = #tpu.dot_dimension_numbers<[1], [0], [0], [1], [0, 0, 1, 1], [], []>} : vector<256x16xbf16>, vector<16x32xbf16>, vector<256x32xf32> -> vector<256x32xf32>
    %18 = arith.addf %12, %17 : vector<256x32xf32>
    %c0_21 = arith.constant 0 : index
    %c1_22 = arith.constant 1 : index
    %c0_23 = arith.constant 0 : index
    %c0_24 = arith.constant 0 : index
    %19 = vector.load %arg1[%c0_21, %c1_22, %c0_23, %c0_24] : memref<1x18x18x16xbf16, #tpu.memory_space<vmem>>, vector<1x16x16x16xbf16>
    %20 = vector.shape_cast %19 : vector<1x16x16x16xbf16> to vector<256x16xbf16>
    %c3 = arith.constant 3 : index
    %c0_25 = arith.constant 0 : index
    %c0_26 = arith.constant 0 : index
    %21 = vector.load %arg2[%c3, %c0_25, %c0_26] : memref<9x16x32xbf16, #tpu.memory_space<vmem>>, vector<1x16x32xbf16>
    %22 = vector.shape_cast %21 : vector<1x16x32xbf16> to vector<16x32xbf16>
    %cst_27 = arith.constant dense<0.000000e+00> : vector<256x32xf32>
    %23 = tpu.matmul %20, %22, %cst_27 {dimension_numbers = #tpu.dot_dimension_numbers<[1], [0], [0], [1], [0, 0, 1, 1], [], []>} : vector<256x16xbf16>, vector<16x32xbf16>, vector<256x32xf32> -> vector<256x32xf32>
    %24 = arith.addf %18, %23 : vector<256x32xf32>
    %c0_28 = arith.constant 0 : index
    %c1_29 = arith.constant 1 : index
    %c1_30 = arith.constant 1 : index
    %c0_31 = arith.constant 0 : index
    %25 = vector.load %arg1[%c0_28, %c1_29, %c1_30, %c0_31] : memref<1x18x18x16xbf16, #tpu.memory_space<vmem>>, vector<1x16x16x16xbf16>
    %26 = vector.shape_cast %25 : vector<1x16x16x16xbf16> to vector<256x16xbf16>
    %c4 = arith.constant 4 : index
    %c0_32 = arith.constant 0 : index
    %c0_33 = arith.constant 0 : index
    %27 = vector.load %arg2[%c4, %c0_32, %c0_33] : memref<9x16x32xbf16, #tpu.memory_space<vmem>>, vector<1x16x32xbf16>
    %28 = vector.shape_cast %27 : vector<1x16x32xbf16> to vector<16x32xbf16>
    %cst_34 = arith.constant dense<0.000000e+00> : vector<256x32xf32>
    %29 = tpu.matmul %26, %28, %cst_34 {dimension_numbers = #tpu.dot_dimension_numbers<[1], [0], [0], [1], [0, 0, 1, 1], [], []>} : vector<256x16xbf16>, vector<16x32xbf16>, vector<256x32xf32> -> vector<256x32xf32>
    %30 = arith.addf %24, %29 : vector<256x32xf32>
    %c0_35 = arith.constant 0 : index
    %c1_36 = arith.constant 1 : index
    %c2_37 = arith.constant 2 : index
    %c0_38 = arith.constant 0 : index
    %31 = vector.load %arg1[%c0_35, %c1_36, %c2_37, %c0_38] : memref<1x18x18x16xbf16, #tpu.memory_space<vmem>>, vector<1x16x16x16xbf16>
    %32 = vector.shape_cast %31 : vector<1x16x16x16xbf16> to vector<256x16xbf16>
    %c5 = arith.constant 5 : index
    %c0_39 = arith.constant 0 : index
    %c0_40 = arith.constant 0 : index
    %33 = vector.load %arg2[%c5, %c0_39, %c0_40] : memref<9x16x32xbf16, #tpu.memory_space<vmem>>, vector<1x16x32xbf16>
    %34 = vector.shape_cast %33 : vector<1x16x32xbf16> to vector<16x32xbf16>
    %cst_41 = arith.constant dense<0.000000e+00> : vector<256x32xf32>
    %35 = tpu.matmul %32, %34, %cst_41 {dimension_numbers = #tpu.dot_dimension_numbers<[1], [0], [0], [1], [0, 0, 1, 1], [], []>} : vector<256x16xbf16>, vector<16x32xbf16>, vector<256x32xf32> -> vector<256x32xf32>
    %36 = arith.addf %30, %35 : vector<256x32xf32>
    %c0_42 = arith.constant 0 : index
    %c2_43 = arith.constant 2 : index
    %c0_44 = arith.constant 0 : index
    %c0_45 = arith.constant 0 : index
    %37 = vector.load %arg1[%c0_42, %c2_43, %c0_44, %c0_45] : memref<1x18x18x16xbf16, #tpu.memory_space<vmem>>, vector<1x16x16x16xbf16>
    %38 = vector.shape_cast %37 : vector<1x16x16x16xbf16> to vector<256x16xbf16>
    %c6 = arith.constant 6 : index
    %c0_46 = arith.constant 0 : index
    %c0_47 = arith.constant 0 : index
    %39 = vector.load %arg2[%c6, %c0_46, %c0_47] : memref<9x16x32xbf16, #tpu.memory_space<vmem>>, vector<1x16x32xbf16>
    %40 = vector.shape_cast %39 : vector<1x16x32xbf16> to vector<16x32xbf16>
    %cst_48 = arith.constant dense<0.000000e+00> : vector<256x32xf32>
    %41 = tpu.matmul %38, %40, %cst_48 {dimension_numbers = #tpu.dot_dimension_numbers<[1], [0], [0], [1], [0, 0, 1, 1], [], []>} : vector<256x16xbf16>, vector<16x32xbf16>, vector<256x32xf32> -> vector<256x32xf32>
    %42 = arith.addf %36, %41 : vector<256x32xf32>
    %c0_49 = arith.constant 0 : index
    %c2_50 = arith.constant 2 : index
    %c1_51 = arith.constant 1 : index
    %c0_52 = arith.constant 0 : index
    %43 = vector.load %arg1[%c0_49, %c2_50, %c1_51, %c0_52] : memref<1x18x18x16xbf16, #tpu.memory_space<vmem>>, vector<1x16x16x16xbf16>
    %44 = vector.shape_cast %43 : vector<1x16x16x16xbf16> to vector<256x16xbf16>
    %c7 = arith.constant 7 : index
    %c0_53 = arith.constant 0 : index
    %c0_54 = arith.constant 0 : index
    %45 = vector.load %arg2[%c7, %c0_53, %c0_54] : memref<9x16x32xbf16, #tpu.memory_space<vmem>>, vector<1x16x32xbf16>
    %46 = vector.shape_cast %45 : vector<1x16x32xbf16> to vector<16x32xbf16>
    %cst_55 = arith.constant dense<0.000000e+00> : vector<256x32xf32>
    %47 = tpu.matmul %44, %46, %cst_55 {dimension_numbers = #tpu.dot_dimension_numbers<[1], [0], [0], [1], [0, 0, 1, 1], [], []>} : vector<256x16xbf16>, vector<16x32xbf16>, vector<256x32xf32> -> vector<256x32xf32>
    %48 = arith.addf %42, %47 : vector<256x32xf32>
    %c0_56 = arith.constant 0 : index
    %c2_57 = arith.constant 2 : index
    %c2_58 = arith.constant 2 : index
    %c0_59 = arith.constant 0 : index
    %49 = vector.load %arg1[%c0_56, %c2_57, %c2_58, %c0_59] : memref<1x18x18x16xbf16, #tpu.memory_space<vmem>>, vector<1x16x16x16xbf16>
    %50 = vector.shape_cast %49 : vector<1x16x16x16xbf16> to vector<256x16xbf16>
    %c8 = arith.constant 8 : index
    %c0_60 = arith.constant 0 : index
    %c0_61 = arith.constant 0 : index
    %51 = vector.load %arg2[%c8, %c0_60, %c0_61] : memref<9x16x32xbf16, #tpu.memory_space<vmem>>, vector<1x16x32xbf16>
    %52 = vector.shape_cast %51 : vector<1x16x32xbf16> to vector<16x32xbf16>
    %cst_62 = arith.constant dense<0.000000e+00> : vector<256x32xf32>
    %53 = tpu.matmul %50, %52, %cst_62 {dimension_numbers = #tpu.dot_dimension_numbers<[1], [0], [0], [1], [0, 0, 1, 1], [], []>} : vector<256x16xbf16>, vector<16x32xbf16>, vector<256x32xf32> -> vector<256x32xf32>
    %54 = arith.addf %48, %53 : vector<256x32xf32>
    %c0_63 = arith.constant 0 : index
    %c0_64 = arith.constant 0 : index
    %55 = vector.load %arg3[%c0_63, %c0_64] : memref<1x32xf32, #tpu.memory_space<vmem>>, vector<1x32xf32>
    %56 = vector.broadcast %55 : vector<1x32xf32> to vector<256x32xf32>
    %57 = arith.mulf %54, %56 : vector<256x32xf32>
    %c0_65 = arith.constant 0 : index
    %c0_66 = arith.constant 0 : index
    %58 = vector.load %arg4[%c0_65, %c0_66] : memref<1x32xf32, #tpu.memory_space<vmem>>, vector<1x32xf32>
    %59 = vector.broadcast %58 : vector<1x32xf32> to vector<256x32xf32>
    %60 = arith.addf %57, %59 : vector<256x32xf32>
    %cst_67 = arith.constant 0.000000e+00 : f32
    %61 = vector.broadcast %cst_67 : f32 to vector<256x32xf32>
    %62 = arith.cmpf oge, %60, %61 : vector<256x32xf32>
    %c0_68 = arith.constant 0 : index
    %c0_69 = arith.constant 0 : index
    %63 = vector.load %arg5[%c0_68, %c0_69] : memref<1x32xf32, #tpu.memory_space<vmem>>, vector<1x32xf32>
    %64 = vector.broadcast %63 : vector<1x32xf32> to vector<256x32xf32>
    %65 = arith.mulf %60, %64 : vector<256x32xf32>
    %66 = arith.select %62, %60, %65 : vector<256x32xi1>, vector<256x32xf32>
    %67 = vector.shape_cast %66 : vector<256x32xf32> to vector<1x256x32xf32>
    %68 = arith.truncf %67 : vector<1x256x32xf32> to vector<1x256x32xbf16>
    %c0_70 = arith.constant 0 : index
    %c0_71 = arith.constant 0 : index
    %c0_72 = arith.constant 0 : index
    %69 = vector.load %arg6[%c0_70, %c0_71, %c0_72] : memref<1x256x32xbf16, #tpu.memory_space<vmem>>, vector<1x256x32xbf16>
    tpu.vector_store %arg6[%c0_70, %c0_71, %c0_72], %68 {strides = array<i32>} : memref<1x256x32xbf16, #tpu.memory_space<vmem>>, vector<1x256x32xbf16>,
    return
  }
  func.func @transform_0(%arg0: i32) -> (i32, i32, i32, i32) {
    %c0_i32 = arith.constant 0 : i32
    %c0_i32_0 = arith.constant 0 : i32
    %c0_i32_1 = arith.constant 0 : i32
    %c0_i32_2 = arith.constant 0 : i32
    return %arg0, %c0_i32, %c0_i32_0, %c0_i32_1 : i32, i32, i32, i32
  }
  func.func @transform_1(%arg0: i32) -> (i32, i32, i32) {
    %c0_i32 = arith.constant 0 : i32
    %c0_i32_0 = arith.constant 0 : i32
    %c0_i32_1 = arith.constant 0 : i32
    %c0_i32_2 = arith.constant 0 : i32
    return %c0_i32, %c0_i32_0, %c0_i32_1 : i32, i32, i32
  }
  func.func @transform_2(%arg0: i32) -> (i32, i32) {
    %c0_i32 = arith.constant 0 : i32
    %c0_i32_0 = arith.constant 0 : i32
    %c0_i32_1 = arith.constant 0 : i32
    return %c0_i32, %c0_i32_0 : i32, i32
  }
  func.func @transform_3(%arg0: i32) -> (i32, i32) {
    %c0_i32 = arith.constant 0 : i32
    %c0_i32_0 = arith.constant 0 : i32
    %c0_i32_1 = arith.constant 0 : i32
    return %c0_i32, %c0_i32_0 : i32, i32
  }
  func.func @transform_4(%arg0: i32) -> (i32, i32) {
    %c0_i32 = arith.constant 0 : i32
    %c0_i32_0 = arith.constant 0 : i32
    %c0_i32_1 = arith.constant 0 : i32
    return %c0_i32, %c0_i32_0 : i32, i32
  }
  func.func @transform_5(%arg0: i32) -> (i32, i32, i32) {
    %c0_i32 = arith.constant 0 : i32
    %c0_i32_0 = arith.constant 0 : i32
    %c0_i32_1 = arith.constant 0 : i32
    return %arg0, %c0_i32, %c0_i32_0 : i32, i32, i32
  }
}

module attributes {stable_mosaic.version = 11 : i64} {
  func.func @kernel(%arg0: i32, %arg1: memref<4x9x9x32xbf16, #tpu.memory_space<vmem>>, %arg2: memref<9x32x32xbf16, #tpu.memory_space<vmem>>, %arg3: memref<1x32xf32, #tpu.memory_space<vmem>>, %arg4: memref<1x32xf32, #tpu.memory_space<vmem>>, %arg5: memref<1x64x32xf32, #tpu.memory_space<vmem>>) attributes {dimension_semantics = [#tpu.dimension_semantics<parallel>], iteration_bounds = array<i64: 2>, scalar_prefetch = 0 : i64, scratch_operands = 0 : i64, tpu.core_type = #tpu.core_type<tc>, window_params = [{transform_indices = @transform_0, window_bounds = array<i64: 4, 9, 9, 32>}, {pipeline_mode = #tpu.pipeline_mode<synchronous>, transform_indices = @transform_1, window_bounds = array<i64: 9, 32, 32>}, {pipeline_mode = #tpu.pipeline_mode<synchronous>, transform_indices = @transform_2, window_bounds = array<i64: 1, 32>}, {pipeline_mode = #tpu.pipeline_mode<synchronous>, transform_indices = @transform_3, window_bounds = array<i64: 1, 32>}, {transform_indices = @transform_4, window_bounds = array<i64: 1, 64, 32>}]} {
    %cst = arith.constant 0.000000e+00 : f32
    %0 = vector.broadcast %cst : f32 to vector<64x32xf32>
    %c0 = arith.constant 0 : index
    %c0_0 = arith.constant 0 : index
    %c0_1 = arith.constant 0 : index
    %c0_2 = arith.constant 0 : index
    %1 = vector.load %arg1[%c0, %c0_0, %c0_1, %c0_2] : memref<4x9x9x32xbf16, #tpu.memory_space<vmem>>, vector<1x8x8x32xbf16>
    %2 = vector.shape_cast %1 : vector<1x8x8x32xbf16> to vector<64x32xbf16>
    %c0_3 = arith.constant 0 : index
    %c0_4 = arith.constant 0 : index
    %c0_5 = arith.constant 0 : index
    %3 = vector.load %arg2[%c0_3, %c0_4, %c0_5] : memref<9x32x32xbf16, #tpu.memory_space<vmem>>, vector<1x32x32xbf16>
    %4 = vector.shape_cast %3 : vector<1x32x32xbf16> to vector<32x32xbf16>
    %cst_6 = arith.constant dense<0.000000e+00> : vector<64x32xf32>
    %5 = tpu.matmul %2, %4, %cst_6 {dimension_numbers = #tpu.dot_dimension_numbers<[1], [0], [0], [1], [0, 0, 1, 1], [], []>} : vector<64x32xbf16>, vector<32x32xbf16>, vector<64x32xf32> -> vector<64x32xf32>
    %6 = arith.addf %0, %5 : vector<64x32xf32>
    %c1 = arith.constant 1 : index
    %c0_7 = arith.constant 0 : index
    %c0_8 = arith.constant 0 : index
    %c0_9 = arith.constant 0 : index
    %7 = vector.load %arg1[%c1, %c0_7, %c0_8, %c0_9] : memref<4x9x9x32xbf16, #tpu.memory_space<vmem>>, vector<1x8x8x32xbf16>
    %8 = vector.shape_cast %7 : vector<1x8x8x32xbf16> to vector<64x32xbf16>
    %c1_10 = arith.constant 1 : index
    %c0_11 = arith.constant 0 : index
    %c0_12 = arith.constant 0 : index
    %9 = vector.load %arg2[%c1_10, %c0_11, %c0_12] : memref<9x32x32xbf16, #tpu.memory_space<vmem>>, vector<1x32x32xbf16>
    %10 = vector.shape_cast %9 : vector<1x32x32xbf16> to vector<32x32xbf16>
    %cst_13 = arith.constant dense<0.000000e+00> : vector<64x32xf32>
    %11 = tpu.matmul %8, %10, %cst_13 {dimension_numbers = #tpu.dot_dimension_numbers<[1], [0], [0], [1], [0, 0, 1, 1], [], []>} : vector<64x32xbf16>, vector<32x32xbf16>, vector<64x32xf32> -> vector<64x32xf32>
    %12 = arith.addf %6, %11 : vector<64x32xf32>
    %c0_14 = arith.constant 0 : index
    %c0_15 = arith.constant 0 : index
    %c1_16 = arith.constant 1 : index
    %c0_17 = arith.constant 0 : index
    %13 = vector.load %arg1[%c0_14, %c0_15, %c1_16, %c0_17] : memref<4x9x9x32xbf16, #tpu.memory_space<vmem>>, vector<1x8x8x32xbf16>
    %14 = vector.shape_cast %13 : vector<1x8x8x32xbf16> to vector<64x32xbf16>
    %c2 = arith.constant 2 : index
    %c0_18 = arith.constant 0 : index
    %c0_19 = arith.constant 0 : index
    %15 = vector.load %arg2[%c2, %c0_18, %c0_19] : memref<9x32x32xbf16, #tpu.memory_space<vmem>>, vector<1x32x32xbf16>
    %16 = vector.shape_cast %15 : vector<1x32x32xbf16> to vector<32x32xbf16>
    %cst_20 = arith.constant dense<0.000000e+00> : vector<64x32xf32>
    %17 = tpu.matmul %14, %16, %cst_20 {dimension_numbers = #tpu.dot_dimension_numbers<[1], [0], [0], [1], [0, 0, 1, 1], [], []>} : vector<64x32xbf16>, vector<32x32xbf16>, vector<64x32xf32> -> vector<64x32xf32>
    %18 = arith.addf %12, %17 : vector<64x32xf32>
    %c2_21 = arith.constant 2 : index
    %c0_22 = arith.constant 0 : index
    %c0_23 = arith.constant 0 : index
    %c0_24 = arith.constant 0 : index
    %19 = vector.load %arg1[%c2_21, %c0_22, %c0_23, %c0_24] : memref<4x9x9x32xbf16, #tpu.memory_space<vmem>>, vector<1x8x8x32xbf16>
    %20 = vector.shape_cast %19 : vector<1x8x8x32xbf16> to vector<64x32xbf16>
    %c3 = arith.constant 3 : index
    %c0_25 = arith.constant 0 : index
    %c0_26 = arith.constant 0 : index
    %21 = vector.load %arg2[%c3, %c0_25, %c0_26] : memref<9x32x32xbf16, #tpu.memory_space<vmem>>, vector<1x32x32xbf16>
    %22 = vector.shape_cast %21 : vector<1x32x32xbf16> to vector<32x32xbf16>
    %cst_27 = arith.constant dense<0.000000e+00> : vector<64x32xf32>
    %23 = tpu.matmul %20, %22, %cst_27 {dimension_numbers = #tpu.dot_dimension_numbers<[1], [0], [0], [1], [0, 0, 1, 1], [], []>} : vector<64x32xbf16>, vector<32x32xbf16>, vector<64x32xf32> -> vector<64x32xf32>
    %24 = arith.addf %18, %23 : vector<64x32xf32>
    %c3_28 = arith.constant 3 : index
    %c0_29 = arith.constant 0 : index
    %c0_30 = arith.constant 0 : index
    %c0_31 = arith.constant 0 : index
    %25 = vector.load %arg1[%c3_28, %c0_29, %c0_30, %c0_31] : memref<4x9x9x32xbf16, #tpu.memory_space<vmem>>, vector<1x8x8x32xbf16>
    %26 = vector.shape_cast %25 : vector<1x8x8x32xbf16> to vector<64x32xbf16>
    %c4 = arith.constant 4 : index
    %c0_32 = arith.constant 0 : index
    %c0_33 = arith.constant 0 : index
    %27 = vector.load %arg2[%c4, %c0_32, %c0_33] : memref<9x32x32xbf16, #tpu.memory_space<vmem>>, vector<1x32x32xbf16>
    %28 = vector.shape_cast %27 : vector<1x32x32xbf16> to vector<32x32xbf16>
    %cst_34 = arith.constant dense<0.000000e+00> : vector<64x32xf32>
    %29 = tpu.matmul %26, %28, %cst_34 {dimension_numbers = #tpu.dot_dimension_numbers<[1], [0], [0], [1], [0, 0, 1, 1], [], []>} : vector<64x32xbf16>, vector<32x32xbf16>, vector<64x32xf32> -> vector<64x32xf32>
    %30 = arith.addf %24, %29 : vector<64x32xf32>
    %c2_35 = arith.constant 2 : index
    %c0_36 = arith.constant 0 : index
    %c1_37 = arith.constant 1 : index
    %c0_38 = arith.constant 0 : index
    %31 = vector.load %arg1[%c2_35, %c0_36, %c1_37, %c0_38] : memref<4x9x9x32xbf16, #tpu.memory_space<vmem>>, vector<1x8x8x32xbf16>
    %32 = vector.shape_cast %31 : vector<1x8x8x32xbf16> to vector<64x32xbf16>
    %c5 = arith.constant 5 : index
    %c0_39 = arith.constant 0 : index
    %c0_40 = arith.constant 0 : index
    %33 = vector.load %arg2[%c5, %c0_39, %c0_40] : memref<9x32x32xbf16, #tpu.memory_space<vmem>>, vector<1x32x32xbf16>
    %34 = vector.shape_cast %33 : vector<1x32x32xbf16> to vector<32x32xbf16>
    %cst_41 = arith.constant dense<0.000000e+00> : vector<64x32xf32>
    %35 = tpu.matmul %32, %34, %cst_41 {dimension_numbers = #tpu.dot_dimension_numbers<[1], [0], [0], [1], [0, 0, 1, 1], [], []>} : vector<64x32xbf16>, vector<32x32xbf16>, vector<64x32xf32> -> vector<64x32xf32>
    %36 = arith.addf %30, %35 : vector<64x32xf32>
    %c0_42 = arith.constant 0 : index
    %c1_43 = arith.constant 1 : index
    %c0_44 = arith.constant 0 : index
    %c0_45 = arith.constant 0 : index
    %37 = vector.load %arg1[%c0_42, %c1_43, %c0_44, %c0_45] : memref<4x9x9x32xbf16, #tpu.memory_space<vmem>>, vector<1x8x8x32xbf16>
    %38 = vector.shape_cast %37 : vector<1x8x8x32xbf16> to vector<64x32xbf16>
    %c6 = arith.constant 6 : index
    %c0_46 = arith.constant 0 : index
    %c0_47 = arith.constant 0 : index
    %39 = vector.load %arg2[%c6, %c0_46, %c0_47] : memref<9x32x32xbf16, #tpu.memory_space<vmem>>, vector<1x32x32xbf16>
    %40 = vector.shape_cast %39 : vector<1x32x32xbf16> to vector<32x32xbf16>
    %cst_48 = arith.constant dense<0.000000e+00> : vector<64x32xf32>
    %41 = tpu.matmul %38, %40, %cst_48 {dimension_numbers = #tpu.dot_dimension_numbers<[1], [0], [0], [1], [0, 0, 1, 1], [], []>} : vector<64x32xbf16>, vector<32x32xbf16>, vector<64x32xf32> -> vector<64x32xf32>
    %42 = arith.addf %36, %41 : vector<64x32xf32>
    %c1_49 = arith.constant 1 : index
    %c1_50 = arith.constant 1 : index
    %c0_51 = arith.constant 0 : index
    %c0_52 = arith.constant 0 : index
    %43 = vector.load %arg1[%c1_49, %c1_50, %c0_51, %c0_52] : memref<4x9x9x32xbf16, #tpu.memory_space<vmem>>, vector<1x8x8x32xbf16>
    %44 = vector.shape_cast %43 : vector<1x8x8x32xbf16> to vector<64x32xbf16>
    %c7 = arith.constant 7 : index
    %c0_53 = arith.constant 0 : index
    %c0_54 = arith.constant 0 : index
    %45 = vector.load %arg2[%c7, %c0_53, %c0_54] : memref<9x32x32xbf16, #tpu.memory_space<vmem>>, vector<1x32x32xbf16>
    %46 = vector.shape_cast %45 : vector<1x32x32xbf16> to vector<32x32xbf16>
    %cst_55 = arith.constant dense<0.000000e+00> : vector<64x32xf32>
    %47 = tpu.matmul %44, %46, %cst_55 {dimension_numbers = #tpu.dot_dimension_numbers<[1], [0], [0], [1], [0, 0, 1, 1], [], []>} : vector<64x32xbf16>, vector<32x32xbf16>, vector<64x32xf32> -> vector<64x32xf32>
    %48 = arith.addf %42, %47 : vector<64x32xf32>
    %c0_56 = arith.constant 0 : index
    %c1_57 = arith.constant 1 : index
    %c1_58 = arith.constant 1 : index
    %c0_59 = arith.constant 0 : index
    %49 = vector.load %arg1[%c0_56, %c1_57, %c1_58, %c0_59] : memref<4x9x9x32xbf16, #tpu.memory_space<vmem>>, vector<1x8x8x32xbf16>
    %50 = vector.shape_cast %49 : vector<1x8x8x32xbf16> to vector<64x32xbf16>
    %c8 = arith.constant 8 : index
    %c0_60 = arith.constant 0 : index
    %c0_61 = arith.constant 0 : index
    %51 = vector.load %arg2[%c8, %c0_60, %c0_61] : memref<9x32x32xbf16, #tpu.memory_space<vmem>>, vector<1x32x32xbf16>
    %52 = vector.shape_cast %51 : vector<1x32x32xbf16> to vector<32x32xbf16>
    %cst_62 = arith.constant dense<0.000000e+00> : vector<64x32xf32>
    %53 = tpu.matmul %50, %52, %cst_62 {dimension_numbers = #tpu.dot_dimension_numbers<[1], [0], [0], [1], [0, 0, 1, 1], [], []>} : vector<64x32xbf16>, vector<32x32xbf16>, vector<64x32xf32> -> vector<64x32xf32>
    %54 = arith.addf %48, %53 : vector<64x32xf32>
    %c0_63 = arith.constant 0 : index
    %c0_64 = arith.constant 0 : index
    %55 = vector.load %arg3[%c0_63, %c0_64] : memref<1x32xf32, #tpu.memory_space<vmem>>, vector<1x32xf32>
    %56 = vector.broadcast %55 : vector<1x32xf32> to vector<64x32xf32>
    %57 = arith.mulf %54, %56 : vector<64x32xf32>
    %c0_65 = arith.constant 0 : index
    %c0_66 = arith.constant 0 : index
    %58 = vector.load %arg4[%c0_65, %c0_66] : memref<1x32xf32, #tpu.memory_space<vmem>>, vector<1x32xf32>
    %59 = vector.broadcast %58 : vector<1x32xf32> to vector<64x32xf32>
    %60 = arith.addf %57, %59 : vector<64x32xf32>
    %61 = vector.shape_cast %60 : vector<64x32xf32> to vector<1x64x32xf32>
    %c0_67 = arith.constant 0 : index
    %c0_68 = arith.constant 0 : index
    %c0_69 = arith.constant 0 : index
    %62 = vector.load %arg5[%c0_67, %c0_68, %c0_69] : memref<1x64x32xf32, #tpu.memory_space<vmem>>, vector<1x64x32xf32>
    tpu.vector_store %arg5[%c0_67, %c0_68, %c0_69], %61 {strides = array<i32>} : memref<1x64x32xf32, #tpu.memory_space<vmem>>, vector<1x64x32xf32>,
    return
  }
  func.func @transform_0(%arg0: i32) -> (i32, i32, i32, i32) {
    %c0_i32 = arith.constant 0 : i32
    %c0_i32_0 = arith.constant 0 : i32
    %c0_i32_1 = arith.constant 0 : i32
    %c0_i32_2 = arith.constant 0 : i32
    return %arg0, %c0_i32, %c0_i32_0, %c0_i32_1 : i32, i32, i32, i32
  }
  func.func @transform_1(%arg0: i32) -> (i32, i32, i32) {
    %c0_i32 = arith.constant 0 : i32
    %c0_i32_0 = arith.constant 0 : i32
    %c0_i32_1 = arith.constant 0 : i32
    %c0_i32_2 = arith.constant 0 : i32
    return %c0_i32, %c0_i32_0, %c0_i32_1 : i32, i32, i32
  }
  func.func @transform_2(%arg0: i32) -> (i32, i32) {
    %c0_i32 = arith.constant 0 : i32
    %c0_i32_0 = arith.constant 0 : i32
    %c0_i32_1 = arith.constant 0 : i32
    return %c0_i32, %c0_i32_0 : i32, i32
  }
  func.func @transform_3(%arg0: i32) -> (i32, i32) {
    %c0_i32 = arith.constant 0 : i32
    %c0_i32_0 = arith.constant 0 : i32
    %c0_i32_1 = arith.constant 0 : i32
    return %c0_i32, %c0_i32_0 : i32, i32
  }
  func.func @transform_4(%arg0: i32) -> (i32, i32, i32) {
    %c0_i32 = arith.constant 0 : i32
    %c0_i32_0 = arith.constant 0 : i32
    %c0_i32_1 = arith.constant 0 : i32
    return %arg0, %c0_i32, %c0_i32_0 : i32, i32, i32
  }
}

module attributes {stable_mosaic.version = 11 : i64} {
  func.func @kernel(%arg0: i32, %arg1: memref<1x10x10x32xbf16, #tpu.memory_space<vmem>>, %arg2: memref<9x32x32xbf16, #tpu.memory_space<vmem>>, %arg3: memref<1x32xf32, #tpu.memory_space<vmem>>, %arg4: memref<1x32xf32, #tpu.memory_space<vmem>>, %arg5: memref<1x32xf32, #tpu.memory_space<vmem>>, %arg6: memref<1x64x32xbf16, #tpu.memory_space<vmem>>) attributes {dimension_semantics = [#tpu.dimension_semantics<parallel>], iteration_bounds = array<i64: 2>, scalar_prefetch = 0 : i64, scratch_operands = 0 : i64, tpu.core_type = #tpu.core_type<tc>, window_params = [{transform_indices = @transform_0, window_bounds = array<i64: 1, 10, 10, 32>}, {pipeline_mode = #tpu.pipeline_mode<synchronous>, transform_indices = @transform_1, window_bounds = array<i64: 9, 32, 32>}, {pipeline_mode = #tpu.pipeline_mode<synchronous>, transform_indices = @transform_2, window_bounds = array<i64: 1, 32>}, {pipeline_mode = #tpu.pipeline_mode<synchronous>, transform_indices = @transform_3, window_bounds = array<i64: 1, 32>}, {pipeline_mode = #tpu.pipeline_mode<synchronous>, transform_indices = @transform_4, window_bounds = array<i64: 1, 32>}, {transform_indices = @transform_5, window_bounds = array<i64: 1, 64, 32>}]} {
    %cst = arith.constant 0.000000e+00 : f32
    %0 = vector.broadcast %cst : f32 to vector<64x32xf32>
    %c0 = arith.constant 0 : index
    %c0_0 = arith.constant 0 : index
    %c0_1 = arith.constant 0 : index
    %c0_2 = arith.constant 0 : index
    %1 = vector.load %arg1[%c0, %c0_0, %c0_1, %c0_2] : memref<1x10x10x32xbf16, #tpu.memory_space<vmem>>, vector<1x8x8x32xbf16>
    %2 = vector.shape_cast %1 : vector<1x8x8x32xbf16> to vector<64x32xbf16>
    %c0_3 = arith.constant 0 : index
    %c0_4 = arith.constant 0 : index
    %c0_5 = arith.constant 0 : index
    %3 = vector.load %arg2[%c0_3, %c0_4, %c0_5] : memref<9x32x32xbf16, #tpu.memory_space<vmem>>, vector<1x32x32xbf16>
    %4 = vector.shape_cast %3 : vector<1x32x32xbf16> to vector<32x32xbf16>
    %cst_6 = arith.constant dense<0.000000e+00> : vector<64x32xf32>
    %5 = tpu.matmul %2, %4, %cst_6 {dimension_numbers = #tpu.dot_dimension_numbers<[1], [0], [0], [1], [0, 0, 1, 1], [], []>} : vector<64x32xbf16>, vector<32x32xbf16>, vector<64x32xf32> -> vector<64x32xf32>
    %6 = arith.addf %0, %5 : vector<64x32xf32>
    %c0_7 = arith.constant 0 : index
    %c0_8 = arith.constant 0 : index
    %c1 = arith.constant 1 : index
    %c0_9 = arith.constant 0 : index
    %7 = vector.load %arg1[%c0_7, %c0_8, %c1, %c0_9] : memref<1x10x10x32xbf16, #tpu.memory_space<vmem>>, vector<1x8x8x32xbf16>
    %8 = vector.shape_cast %7 : vector<1x8x8x32xbf16> to vector<64x32xbf16>
    %c1_10 = arith.constant 1 : index
    %c0_11 = arith.constant 0 : index
    %c0_12 = arith.constant 0 : index
    %9 = vector.load %arg2[%c1_10, %c0_11, %c0_12] : memref<9x32x32xbf16, #tpu.memory_space<vmem>>, vector<1x32x32xbf16>
    %10 = vector.shape_cast %9 : vector<1x32x32xbf16> to vector<32x32xbf16>
    %cst_13 = arith.constant dense<0.000000e+00> : vector<64x32xf32>
    %11 = tpu.matmul %8, %10, %cst_13 {dimension_numbers = #tpu.dot_dimension_numbers<[1], [0], [0], [1], [0, 0, 1, 1], [], []>} : vector<64x32xbf16>, vector<32x32xbf16>, vector<64x32xf32> -> vector<64x32xf32>
    %12 = arith.addf %6, %11 : vector<64x32xf32>
    %c0_14 = arith.constant 0 : index
    %c0_15 = arith.constant 0 : index
    %c2 = arith.constant 2 : index
    %c0_16 = arith.constant 0 : index
    %13 = vector.load %arg1[%c0_14, %c0_15, %c2, %c0_16] : memref<1x10x10x32xbf16, #tpu.memory_space<vmem>>, vector<1x8x8x32xbf16>
    %14 = vector.shape_cast %13 : vector<1x8x8x32xbf16> to vector<64x32xbf16>
    %c2_17 = arith.constant 2 : index
    %c0_18 = arith.constant 0 : index
    %c0_19 = arith.constant 0 : index
    %15 = vector.load %arg2[%c2_17, %c0_18, %c0_19] : memref<9x32x32xbf16, #tpu.memory_space<vmem>>, vector<1x32x32xbf16>
    %16 = vector.shape_cast %15 : vector<1x32x32xbf16> to vector<32x32xbf16>
    %cst_20 = arith.constant dense<0.000000e+00> : vector<64x32xf32>
    %17 = tpu.matmul %14, %16, %cst_20 {dimension_numbers = #tpu.dot_dimension_numbers<[1], [0], [0], [1], [0, 0, 1, 1], [], []>} : vector<64x32xbf16>, vector<32x32xbf16>, vector<64x32xf32> -> vector<64x32xf32>
    %18 = arith.addf %12, %17 : vector<64x32xf32>
    %c0_21 = arith.constant 0 : index
    %c1_22 = arith.constant 1 : index
    %c0_23 = arith.constant 0 : index
    %c0_24 = arith.constant 0 : index
    %19 = vector.load %arg1[%c0_21, %c1_22, %c0_23, %c0_24] : memref<1x10x10x32xbf16, #tpu.memory_space<vmem>>, vector<1x8x8x32xbf16>
    %20 = vector.shape_cast %19 : vector<1x8x8x32xbf16> to vector<64x32xbf16>
    %c3 = arith.constant 3 : index
    %c0_25 = arith.constant 0 : index
    %c0_26 = arith.constant 0 : index
    %21 = vector.load %arg2[%c3, %c0_25, %c0_26] : memref<9x32x32xbf16, #tpu.memory_space<vmem>>, vector<1x32x32xbf16>
    %22 = vector.shape_cast %21 : vector<1x32x32xbf16> to vector<32x32xbf16>
    %cst_27 = arith.constant dense<0.000000e+00> : vector<64x32xf32>
    %23 = tpu.matmul %20, %22, %cst_27 {dimension_numbers = #tpu.dot_dimension_numbers<[1], [0], [0], [1], [0, 0, 1, 1], [], []>} : vector<64x32xbf16>, vector<32x32xbf16>, vector<64x32xf32> -> vector<64x32xf32>
    %24 = arith.addf %18, %23 : vector<64x32xf32>
    %c0_28 = arith.constant 0 : index
    %c1_29 = arith.constant 1 : index
    %c1_30 = arith.constant 1 : index
    %c0_31 = arith.constant 0 : index
    %25 = vector.load %arg1[%c0_28, %c1_29, %c1_30, %c0_31] : memref<1x10x10x32xbf16, #tpu.memory_space<vmem>>, vector<1x8x8x32xbf16>
    %26 = vector.shape_cast %25 : vector<1x8x8x32xbf16> to vector<64x32xbf16>
    %c4 = arith.constant 4 : index
    %c0_32 = arith.constant 0 : index
    %c0_33 = arith.constant 0 : index
    %27 = vector.load %arg2[%c4, %c0_32, %c0_33] : memref<9x32x32xbf16, #tpu.memory_space<vmem>>, vector<1x32x32xbf16>
    %28 = vector.shape_cast %27 : vector<1x32x32xbf16> to vector<32x32xbf16>
    %cst_34 = arith.constant dense<0.000000e+00> : vector<64x32xf32>
    %29 = tpu.matmul %26, %28, %cst_34 {dimension_numbers = #tpu.dot_dimension_numbers<[1], [0], [0], [1], [0, 0, 1, 1], [], []>} : vector<64x32xbf16>, vector<32x32xbf16>, vector<64x32xf32> -> vector<64x32xf32>
    %30 = arith.addf %24, %29 : vector<64x32xf32>
    %c0_35 = arith.constant 0 : index
    %c1_36 = arith.constant 1 : index
    %c2_37 = arith.constant 2 : index
    %c0_38 = arith.constant 0 : index
    %31 = vector.load %arg1[%c0_35, %c1_36, %c2_37, %c0_38] : memref<1x10x10x32xbf16, #tpu.memory_space<vmem>>, vector<1x8x8x32xbf16>
    %32 = vector.shape_cast %31 : vector<1x8x8x32xbf16> to vector<64x32xbf16>
    %c5 = arith.constant 5 : index
    %c0_39 = arith.constant 0 : index
    %c0_40 = arith.constant 0 : index
    %33 = vector.load %arg2[%c5, %c0_39, %c0_40] : memref<9x32x32xbf16, #tpu.memory_space<vmem>>, vector<1x32x32xbf16>
    %34 = vector.shape_cast %33 : vector<1x32x32xbf16> to vector<32x32xbf16>
    %cst_41 = arith.constant dense<0.000000e+00> : vector<64x32xf32>
    %35 = tpu.matmul %32, %34, %cst_41 {dimension_numbers = #tpu.dot_dimension_numbers<[1], [0], [0], [1], [0, 0, 1, 1], [], []>} : vector<64x32xbf16>, vector<32x32xbf16>, vector<64x32xf32> -> vector<64x32xf32>
    %36 = arith.addf %30, %35 : vector<64x32xf32>
    %c0_42 = arith.constant 0 : index
    %c2_43 = arith.constant 2 : index
    %c0_44 = arith.constant 0 : index
    %c0_45 = arith.constant 0 : index
    %37 = vector.load %arg1[%c0_42, %c2_43, %c0_44, %c0_45] : memref<1x10x10x32xbf16, #tpu.memory_space<vmem>>, vector<1x8x8x32xbf16>
    %38 = vector.shape_cast %37 : vector<1x8x8x32xbf16> to vector<64x32xbf16>
    %c6 = arith.constant 6 : index
    %c0_46 = arith.constant 0 : index
    %c0_47 = arith.constant 0 : index
    %39 = vector.load %arg2[%c6, %c0_46, %c0_47] : memref<9x32x32xbf16, #tpu.memory_space<vmem>>, vector<1x32x32xbf16>
    %40 = vector.shape_cast %39 : vector<1x32x32xbf16> to vector<32x32xbf16>
    %cst_48 = arith.constant dense<0.000000e+00> : vector<64x32xf32>
    %41 = tpu.matmul %38, %40, %cst_48 {dimension_numbers = #tpu.dot_dimension_numbers<[1], [0], [0], [1], [0, 0, 1, 1], [], []>} : vector<64x32xbf16>, vector<32x32xbf16>, vector<64x32xf32> -> vector<64x32xf32>
    %42 = arith.addf %36, %41 : vector<64x32xf32>
    %c0_49 = arith.constant 0 : index
    %c2_50 = arith.constant 2 : index
    %c1_51 = arith.constant 1 : index
    %c0_52 = arith.constant 0 : index
    %43 = vector.load %arg1[%c0_49, %c2_50, %c1_51, %c0_52] : memref<1x10x10x32xbf16, #tpu.memory_space<vmem>>, vector<1x8x8x32xbf16>
    %44 = vector.shape_cast %43 : vector<1x8x8x32xbf16> to vector<64x32xbf16>
    %c7 = arith.constant 7 : index
    %c0_53 = arith.constant 0 : index
    %c0_54 = arith.constant 0 : index
    %45 = vector.load %arg2[%c7, %c0_53, %c0_54] : memref<9x32x32xbf16, #tpu.memory_space<vmem>>, vector<1x32x32xbf16>
    %46 = vector.shape_cast %45 : vector<1x32x32xbf16> to vector<32x32xbf16>
    %cst_55 = arith.constant dense<0.000000e+00> : vector<64x32xf32>
    %47 = tpu.matmul %44, %46, %cst_55 {dimension_numbers = #tpu.dot_dimension_numbers<[1], [0], [0], [1], [0, 0, 1, 1], [], []>} : vector<64x32xbf16>, vector<32x32xbf16>, vector<64x32xf32> -> vector<64x32xf32>
    %48 = arith.addf %42, %47 : vector<64x32xf32>
    %c0_56 = arith.constant 0 : index
    %c2_57 = arith.constant 2 : index
    %c2_58 = arith.constant 2 : index
    %c0_59 = arith.constant 0 : index
    %49 = vector.load %arg1[%c0_56, %c2_57, %c2_58, %c0_59] : memref<1x10x10x32xbf16, #tpu.memory_space<vmem>>, vector<1x8x8x32xbf16>
    %50 = vector.shape_cast %49 : vector<1x8x8x32xbf16> to vector<64x32xbf16>
    %c8 = arith.constant 8 : index
    %c0_60 = arith.constant 0 : index
    %c0_61 = arith.constant 0 : index
    %51 = vector.load %arg2[%c8, %c0_60, %c0_61] : memref<9x32x32xbf16, #tpu.memory_space<vmem>>, vector<1x32x32xbf16>
    %52 = vector.shape_cast %51 : vector<1x32x32xbf16> to vector<32x32xbf16>
    %cst_62 = arith.constant dense<0.000000e+00> : vector<64x32xf32>
    %53 = tpu.matmul %50, %52, %cst_62 {dimension_numbers = #tpu.dot_dimension_numbers<[1], [0], [0], [1], [0, 0, 1, 1], [], []>} : vector<64x32xbf16>, vector<32x32xbf16>, vector<64x32xf32> -> vector<64x32xf32>
    %54 = arith.addf %48, %53 : vector<64x32xf32>
    %c0_63 = arith.constant 0 : index
    %c0_64 = arith.constant 0 : index
    %55 = vector.load %arg3[%c0_63, %c0_64] : memref<1x32xf32, #tpu.memory_space<vmem>>, vector<1x32xf32>
    %56 = vector.broadcast %55 : vector<1x32xf32> to vector<64x32xf32>
    %57 = arith.mulf %54, %56 : vector<64x32xf32>
    %c0_65 = arith.constant 0 : index
    %c0_66 = arith.constant 0 : index
    %58 = vector.load %arg4[%c0_65, %c0_66] : memref<1x32xf32, #tpu.memory_space<vmem>>, vector<1x32xf32>
    %59 = vector.broadcast %58 : vector<1x32xf32> to vector<64x32xf32>
    %60 = arith.addf %57, %59 : vector<64x32xf32>
    %cst_67 = arith.constant 0.000000e+00 : f32
    %61 = vector.broadcast %cst_67 : f32 to vector<64x32xf32>
    %62 = arith.cmpf oge, %60, %61 : vector<64x32xf32>
    %c0_68 = arith.constant 0 : index
    %c0_69 = arith.constant 0 : index
    %63 = vector.load %arg5[%c0_68, %c0_69] : memref<1x32xf32, #tpu.memory_space<vmem>>, vector<1x32xf32>
    %64 = vector.broadcast %63 : vector<1x32xf32> to vector<64x32xf32>
    %65 = arith.mulf %60, %64 : vector<64x32xf32>
    %66 = arith.select %62, %60, %65 : vector<64x32xi1>, vector<64x32xf32>
    %67 = vector.shape_cast %66 : vector<64x32xf32> to vector<1x64x32xf32>
    %68 = arith.truncf %67 : vector<1x64x32xf32> to vector<1x64x32xbf16>
    %c0_70 = arith.constant 0 : index
    %c0_71 = arith.constant 0 : index
    %c0_72 = arith.constant 0 : index
    %69 = vector.load %arg6[%c0_70, %c0_71, %c0_72] : memref<1x64x32xbf16, #tpu.memory_space<vmem>>, vector<1x64x32xbf16>
    tpu.vector_store %arg6[%c0_70, %c0_71, %c0_72], %68 {strides = array<i32>} : memref<1x64x32xbf16, #tpu.memory_space<vmem>>, vector<1x64x32xbf16>,
    return
  }
  func.func @transform_0(%arg0: i32) -> (i32, i32, i32, i32) {
    %c0_i32 = arith.constant 0 : i32
    %c0_i32_0 = arith.constant 0 : i32
    %c0_i32_1 = arith.constant 0 : i32
    %c0_i32_2 = arith.constant 0 : i32
    return %arg0, %c0_i32, %c0_i32_0, %c0_i32_1 : i32, i32, i32, i32
  }
  func.func @transform_1(%arg0: i32) -> (i32, i32, i32) {
    %c0_i32 = arith.constant 0 : i32
    %c0_i32_0 = arith.constant 0 : i32
    %c0_i32_1 = arith.constant 0 : i32
    %c0_i32_2 = arith.constant 0 : i32
    return %c0_i32, %c0_i32_0, %c0_i32_1 : i32, i32, i32
  }
  func.func @transform_2(%arg0: i32) -> (i32, i32) {
    %c0_i32 = arith.constant 0 : i32
    %c0_i32_0 = arith.constant 0 : i32
    %c0_i32_1 = arith.constant 0 : i32
    return %c0_i32, %c0_i32_0 : i32, i32
  }
  func.func @transform_3(%arg0: i32) -> (i32, i32) {
    %c0_i32 = arith.constant 0 : i32
    %c0_i32_0 = arith.constant 0 : i32
    %c0_i32_1 = arith.constant 0 : i32
    return %c0_i32, %c0_i32_0 : i32, i32
  }
  func.func @transform_4(%arg0: i32) -> (i32, i32) {
    %c0_i32 = arith.constant 0 : i32
    %c0_i32_0 = arith.constant 0 : i32
    %c0_i32_1 = arith.constant 0 : i32
    return %c0_i32, %c0_i32_0 : i32, i32
  }
  func.func @transform_5(%arg0: i32) -> (i32, i32, i32) {
    %c0_i32 = arith.constant 0 : i32
    %c0_i32_0 = arith.constant 0 : i32
    %c0_i32_1 = arith.constant 0 : i32
    return %arg0, %c0_i32, %c0_i32_0 : i32, i32, i32
  }
}

module attributes {stable_mosaic.version = 11 : i64} {
  func.func @kernel(%arg0: i32, %arg1: memref<4x5x5x32xbf16, #tpu.memory_space<vmem>>, %arg2: memref<9x32x32xbf16, #tpu.memory_space<vmem>>, %arg3: memref<1x32xf32, #tpu.memory_space<vmem>>, %arg4: memref<1x32xf32, #tpu.memory_space<vmem>>, %arg5: memref<1x16x32xf32, #tpu.memory_space<vmem>>) attributes {dimension_semantics = [#tpu.dimension_semantics<parallel>], iteration_bounds = array<i64: 2>, scalar_prefetch = 0 : i64, scratch_operands = 0 : i64, tpu.core_type = #tpu.core_type<tc>, window_params = [{transform_indices = @transform_0, window_bounds = array<i64: 4, 5, 5, 32>}, {pipeline_mode = #tpu.pipeline_mode<synchronous>, transform_indices = @transform_1, window_bounds = array<i64: 9, 32, 32>}, {pipeline_mode = #tpu.pipeline_mode<synchronous>, transform_indices = @transform_2, window_bounds = array<i64: 1, 32>}, {pipeline_mode = #tpu.pipeline_mode<synchronous>, transform_indices = @transform_3, window_bounds = array<i64: 1, 32>}, {transform_indices = @transform_4, window_bounds = array<i64: 1, 16, 32>}]} {
    %cst = arith.constant 0.000000e+00 : f32
    %0 = vector.broadcast %cst : f32 to vector<16x32xf32>
    %c0 = arith.constant 0 : index
    %c0_0 = arith.constant 0 : index
    %c0_1 = arith.constant 0 : index
    %c0_2 = arith.constant 0 : index
    %1 = vector.load %arg1[%c0, %c0_0, %c0_1, %c0_2] : memref<4x5x5x32xbf16, #tpu.memory_space<vmem>>, vector<1x4x4x32xbf16>
    %2 = vector.shape_cast %1 : vector<1x4x4x32xbf16> to vector<16x32xbf16>
    %c0_3 = arith.constant 0 : index
    %c0_4 = arith.constant 0 : index
    %c0_5 = arith.constant 0 : index
    %3 = vector.load %arg2[%c0_3, %c0_4, %c0_5] : memref<9x32x32xbf16, #tpu.memory_space<vmem>>, vector<1x32x32xbf16>
    %4 = vector.shape_cast %3 : vector<1x32x32xbf16> to vector<32x32xbf16>
    %cst_6 = arith.constant dense<0.000000e+00> : vector<16x32xf32>
    %5 = tpu.matmul %2, %4, %cst_6 {dimension_numbers = #tpu.dot_dimension_numbers<[1], [0], [0], [1], [0, 0, 1, 1], [], []>} : vector<16x32xbf16>, vector<32x32xbf16>, vector<16x32xf32> -> vector<16x32xf32>
    %6 = arith.addf %0, %5 : vector<16x32xf32>
    %c1 = arith.constant 1 : index
    %c0_7 = arith.constant 0 : index
    %c0_8 = arith.constant 0 : index
    %c0_9 = arith.constant 0 : index
    %7 = vector.load %arg1[%c1, %c0_7, %c0_8, %c0_9] : memref<4x5x5x32xbf16, #tpu.memory_space<vmem>>, vector<1x4x4x32xbf16>
    %8 = vector.shape_cast %7 : vector<1x4x4x32xbf16> to vector<16x32xbf16>
    %c1_10 = arith.constant 1 : index
    %c0_11 = arith.constant 0 : index
    %c0_12 = arith.constant 0 : index
    %9 = vector.load %arg2[%c1_10, %c0_11, %c0_12] : memref<9x32x32xbf16, #tpu.memory_space<vmem>>, vector<1x32x32xbf16>
    %10 = vector.shape_cast %9 : vector<1x32x32xbf16> to vector<32x32xbf16>
    %cst_13 = arith.constant dense<0.000000e+00> : vector<16x32xf32>
    %11 = tpu.matmul %8, %10, %cst_13 {dimension_numbers = #tpu.dot_dimension_numbers<[1], [0], [0], [1], [0, 0, 1, 1], [], []>} : vector<16x32xbf16>, vector<32x32xbf16>, vector<16x32xf32> -> vector<16x32xf32>
    %12 = arith.addf %6, %11 : vector<16x32xf32>
    %c0_14 = arith.constant 0 : index
    %c0_15 = arith.constant 0 : index
    %c1_16 = arith.constant 1 : index
    %c0_17 = arith.constant 0 : index
    %13 = vector.load %arg1[%c0_14, %c0_15, %c1_16, %c0_17] : memref<4x5x5x32xbf16, #tpu.memory_space<vmem>>, vector<1x4x4x32xbf16>
    %14 = vector.shape_cast %13 : vector<1x4x4x32xbf16> to vector<16x32xbf16>
    %c2 = arith.constant 2 : index
    %c0_18 = arith.constant 0 : index
    %c0_19 = arith.constant 0 : index
    %15 = vector.load %arg2[%c2, %c0_18, %c0_19] : memref<9x32x32xbf16, #tpu.memory_space<vmem>>, vector<1x32x32xbf16>
    %16 = vector.shape_cast %15 : vector<1x32x32xbf16> to vector<32x32xbf16>
    %cst_20 = arith.constant dense<0.000000e+00> : vector<16x32xf32>
    %17 = tpu.matmul %14, %16, %cst_20 {dimension_numbers = #tpu.dot_dimension_numbers<[1], [0], [0], [1], [0, 0, 1, 1], [], []>} : vector<16x32xbf16>, vector<32x32xbf16>, vector<16x32xf32> -> vector<16x32xf32>
    %18 = arith.addf %12, %17 : vector<16x32xf32>
    %c2_21 = arith.constant 2 : index
    %c0_22 = arith.constant 0 : index
    %c0_23 = arith.constant 0 : index
    %c0_24 = arith.constant 0 : index
    %19 = vector.load %arg1[%c2_21, %c0_22, %c0_23, %c0_24] : memref<4x5x5x32xbf16, #tpu.memory_space<vmem>>, vector<1x4x4x32xbf16>
    %20 = vector.shape_cast %19 : vector<1x4x4x32xbf16> to vector<16x32xbf16>
    %c3 = arith.constant 3 : index
    %c0_25 = arith.constant 0 : index
    %c0_26 = arith.constant 0 : index
    %21 = vector.load %arg2[%c3, %c0_25, %c0_26] : memref<9x32x32xbf16, #tpu.memory_space<vmem>>, vector<1x32x32xbf16>
    %22 = vector.shape_cast %21 : vector<1x32x32xbf16> to vector<32x32xbf16>
    %cst_27 = arith.constant dense<0.000000e+00> : vector<16x32xf32>
    %23 = tpu.matmul %20, %22, %cst_27 {dimension_numbers = #tpu.dot_dimension_numbers<[1], [0], [0], [1], [0, 0, 1, 1], [], []>} : vector<16x32xbf16>, vector<32x32xbf16>, vector<16x32xf32> -> vector<16x32xf32>
    %24 = arith.addf %18, %23 : vector<16x32xf32>
    %c3_28 = arith.constant 3 : index
    %c0_29 = arith.constant 0 : index
    %c0_30 = arith.constant 0 : index
    %c0_31 = arith.constant 0 : index
    %25 = vector.load %arg1[%c3_28, %c0_29, %c0_30, %c0_31] : memref<4x5x5x32xbf16, #tpu.memory_space<vmem>>, vector<1x4x4x32xbf16>
    %26 = vector.shape_cast %25 : vector<1x4x4x32xbf16> to vector<16x32xbf16>
    %c4 = arith.constant 4 : index
    %c0_32 = arith.constant 0 : index
    %c0_33 = arith.constant 0 : index
    %27 = vector.load %arg2[%c4, %c0_32, %c0_33] : memref<9x32x32xbf16, #tpu.memory_space<vmem>>, vector<1x32x32xbf16>
    %28 = vector.shape_cast %27 : vector<1x32x32xbf16> to vector<32x32xbf16>
    %cst_34 = arith.constant dense<0.000000e+00> : vector<16x32xf32>
    %29 = tpu.matmul %26, %28, %cst_34 {dimension_numbers = #tpu.dot_dimension_numbers<[1], [0], [0], [1], [0, 0, 1, 1], [], []>} : vector<16x32xbf16>, vector<32x32xbf16>, vector<16x32xf32> -> vector<16x32xf32>
    %30 = arith.addf %24, %29 : vector<16x32xf32>
    %c2_35 = arith.constant 2 : index
    %c0_36 = arith.constant 0 : index
    %c1_37 = arith.constant 1 : index
    %c0_38 = arith.constant 0 : index
    %31 = vector.load %arg1[%c2_35, %c0_36, %c1_37, %c0_38] : memref<4x5x5x32xbf16, #tpu.memory_space<vmem>>, vector<1x4x4x32xbf16>
    %32 = vector.shape_cast %31 : vector<1x4x4x32xbf16> to vector<16x32xbf16>
    %c5 = arith.constant 5 : index
    %c0_39 = arith.constant 0 : index
    %c0_40 = arith.constant 0 : index
    %33 = vector.load %arg2[%c5, %c0_39, %c0_40] : memref<9x32x32xbf16, #tpu.memory_space<vmem>>, vector<1x32x32xbf16>
    %34 = vector.shape_cast %33 : vector<1x32x32xbf16> to vector<32x32xbf16>
    %cst_41 = arith.constant dense<0.000000e+00> : vector<16x32xf32>
    %35 = tpu.matmul %32, %34, %cst_41 {dimension_numbers = #tpu.dot_dimension_numbers<[1], [0], [0], [1], [0, 0, 1, 1], [], []>} : vector<16x32xbf16>, vector<32x32xbf16>, vector<16x32xf32> -> vector<16x32xf32>
    %36 = arith.addf %30, %35 : vector<16x32xf32>
    %c0_42 = arith.constant 0 : index
    %c1_43 = arith.constant 1 : index
    %c0_44 = arith.constant 0 : index
    %c0_45 = arith.constant 0 : index
    %37 = vector.load %arg1[%c0_42, %c1_43, %c0_44, %c0_45] : memref<4x5x5x32xbf16, #tpu.memory_space<vmem>>, vector<1x4x4x32xbf16>
    %38 = vector.shape_cast %37 : vector<1x4x4x32xbf16> to vector<16x32xbf16>
    %c6 = arith.constant 6 : index
    %c0_46 = arith.constant 0 : index
    %c0_47 = arith.constant 0 : index
    %39 = vector.load %arg2[%c6, %c0_46, %c0_47] : memref<9x32x32xbf16, #tpu.memory_space<vmem>>, vector<1x32x32xbf16>
    %40 = vector.shape_cast %39 : vector<1x32x32xbf16> to vector<32x32xbf16>
    %cst_48 = arith.constant dense<0.000000e+00> : vector<16x32xf32>
    %41 = tpu.matmul %38, %40, %cst_48 {dimension_numbers = #tpu.dot_dimension_numbers<[1], [0], [0], [1], [0, 0, 1, 1], [], []>} : vector<16x32xbf16>, vector<32x32xbf16>, vector<16x32xf32> -> vector<16x32xf32>
    %42 = arith.addf %36, %41 : vector<16x32xf32>
    %c1_49 = arith.constant 1 : index
    %c1_50 = arith.constant 1 : index
    %c0_51 = arith.constant 0 : index
    %c0_52 = arith.constant 0 : index
    %43 = vector.load %arg1[%c1_49, %c1_50, %c0_51, %c0_52] : memref<4x5x5x32xbf16, #tpu.memory_space<vmem>>, vector<1x4x4x32xbf16>
    %44 = vector.shape_cast %43 : vector<1x4x4x32xbf16> to vector<16x32xbf16>
    %c7 = arith.constant 7 : index
    %c0_53 = arith.constant 0 : index
    %c0_54 = arith.constant 0 : index
    %45 = vector.load %arg2[%c7, %c0_53, %c0_54] : memref<9x32x32xbf16, #tpu.memory_space<vmem>>, vector<1x32x32xbf16>
    %46 = vector.shape_cast %45 : vector<1x32x32xbf16> to vector<32x32xbf16>
    %cst_55 = arith.constant dense<0.000000e+00> : vector<16x32xf32>
    %47 = tpu.matmul %44, %46, %cst_55 {dimension_numbers = #tpu.dot_dimension_numbers<[1], [0], [0], [1], [0, 0, 1, 1], [], []>} : vector<16x32xbf16>, vector<32x32xbf16>, vector<16x32xf32> -> vector<16x32xf32>
    %48 = arith.addf %42, %47 : vector<16x32xf32>
    %c0_56 = arith.constant 0 : index
    %c1_57 = arith.constant 1 : index
    %c1_58 = arith.constant 1 : index
    %c0_59 = arith.constant 0 : index
    %49 = vector.load %arg1[%c0_56, %c1_57, %c1_58, %c0_59] : memref<4x5x5x32xbf16, #tpu.memory_space<vmem>>, vector<1x4x4x32xbf16>
    %50 = vector.shape_cast %49 : vector<1x4x4x32xbf16> to vector<16x32xbf16>
    %c8 = arith.constant 8 : index
    %c0_60 = arith.constant 0 : index
    %c0_61 = arith.constant 0 : index
    %51 = vector.load %arg2[%c8, %c0_60, %c0_61] : memref<9x32x32xbf16, #tpu.memory_space<vmem>>, vector<1x32x32xbf16>
    %52 = vector.shape_cast %51 : vector<1x32x32xbf16> to vector<32x32xbf16>
    %cst_62 = arith.constant dense<0.000000e+00> : vector<16x32xf32>
    %53 = tpu.matmul %50, %52, %cst_62 {dimension_numbers = #tpu.dot_dimension_numbers<[1], [0], [0], [1], [0, 0, 1, 1], [], []>} : vector<16x32xbf16>, vector<32x32xbf16>, vector<16x32xf32> -> vector<16x32xf32>
    %54 = arith.addf %48, %53 : vector<16x32xf32>
    %c0_63 = arith.constant 0 : index
    %c0_64 = arith.constant 0 : index
    %55 = vector.load %arg3[%c0_63, %c0_64] : memref<1x32xf32, #tpu.memory_space<vmem>>, vector<1x32xf32>
    %56 = vector.broadcast %55 : vector<1x32xf32> to vector<16x32xf32>
    %57 = arith.mulf %54, %56 : vector<16x32xf32>
    %c0_65 = arith.constant 0 : index
    %c0_66 = arith.constant 0 : index
    %58 = vector.load %arg4[%c0_65, %c0_66] : memref<1x32xf32, #tpu.memory_space<vmem>>, vector<1x32xf32>
    %59 = vector.broadcast %58 : vector<1x32xf32> to vector<16x32xf32>
    %60 = arith.addf %57, %59 : vector<16x32xf32>
    %61 = vector.shape_cast %60 : vector<16x32xf32> to vector<1x16x32xf32>
    %c0_67 = arith.constant 0 : index
    %c0_68 = arith.constant 0 : index
    %c0_69 = arith.constant 0 : index
    %62 = vector.load %arg5[%c0_67, %c0_68, %c0_69] : memref<1x16x32xf32, #tpu.memory_space<vmem>>, vector<1x16x32xf32>
    tpu.vector_store %arg5[%c0_67, %c0_68, %c0_69], %61 {strides = array<i32>} : memref<1x16x32xf32, #tpu.memory_space<vmem>>, vector<1x16x32xf32>,
    return
  }
  func.func @transform_0(%arg0: i32) -> (i32, i32, i32, i32) {
    %c0_i32 = arith.constant 0 : i32
    %c0_i32_0 = arith.constant 0 : i32
    %c0_i32_1 = arith.constant 0 : i32
    %c0_i32_2 = arith.constant 0 : i32
    return %arg0, %c0_i32, %c0_i32_0, %c0_i32_1 : i32, i32, i32, i32
  }
  func.func @transform_1(%arg0: i32) -> (i32, i32, i32) {
    %c0_i32 = arith.constant 0 : i32
    %c0_i32_0 = arith.constant 0 : i32
    %c0_i32_1 = arith.constant 0 : i32
    %c0_i32_2 = arith.constant 0 : i32
    return %c0_i32, %c0_i32_0, %c0_i32_1 : i32, i32, i32
  }
  func.func @transform_2(%arg0: i32) -> (i32, i32) {
    %c0_i32 = arith.constant 0 : i32
    %c0_i32_0 = arith.constant 0 : i32
    %c0_i32_1 = arith.constant 0 : i32
    return %c0_i32, %c0_i32_0 : i32, i32
  }
  func.func @transform_3(%arg0: i32) -> (i32, i32) {
    %c0_i32 = arith.constant 0 : i32
    %c0_i32_0 = arith.constant 0 : i32
    %c0_i32_1 = arith.constant 0 : i32
    return %c0_i32, %c0_i32_0 : i32, i32
  }
  func.func @transform_4(%arg0: i32) -> (i32, i32, i32) {
    %c0_i32 = arith.constant 0 : i32
    %c0_i32_0 = arith.constant 0 : i32
    %c0_i32_1 = arith.constant 0 : i32
    return %arg0, %c0_i32, %c0_i32_0 : i32, i32, i32
  }
}

</mosaic_0001>

<bundles_post_ra>
// kernel: network_forward.5
= control target key start
LH: loop header
LB: loop body
LE: loop exit
PB: predicated region body
PF: predicated region fallthrough
CT: control target
= control target key end

     0   :  { %s494_s15 = smov 0   ;;  %s528_s0 = inlined_call_operand.vmem [shape: bf16[2,8,8,16], index: 0, kind: input, shape index: {}]   ;;  %s529_s1 = inlined_call_operand.vmem [shape: bf16[1,16,32], index: 1, kind: input, shape index: {}]   ;;  %s530_s2 = inlined_call_operand.vmem [shape: f32[1,32], index: 2, kind: input, shape index: {}]   ;;  %s531_s3 = inlined_call_operand.vmem [shape: f32[1,32], index: 3, kind: input, shape index: {}]   ;;  %s532_s4 = inlined_call_operand.vmem [shape: f32[2,64,32], index: 4, kind: output, shape index: {}]  }
   0x1 LB: > { %s407_s16 = sadd.s32 4294967295, %s467_s15   ;;  %p411_p0 = scmp.ge.s32.totalorder %s467_s15, 1  ;;  %s467_s15 = sphi %s494_s15, %s14_s15  }
   0x2   : > { %p162_p1 = scmp.lt.s32.totalorder %s467_s15, 3 }
   0x4   : > { %p163_p2 = pnand %p411_p0, %p162_p1 }
   0x5   : > { %v456_v0 = vld [vmem:[%s529_s1] sm:$0xff] (!%p163_p2)   ;;  %p188_p3 = scmp.lt.s32.totalorder (!%p163_p2), %s407_s16, 1  ;;  %vm235_vm0 = vcmask (!%p163_p2), 130048   ;;  %vm343_vm1 = vcmask (!%p163_p2), 261120  }
   0x6   : > { %166 = sbr.rel (%p163_p2) target bundleno = 238 (0xee), region = 36  ;;  %436 = vmatprep.subr.bf16.mxu0 (!%p163_p2), %v456_v0  ;;  %446 = vmatprep.subr.bf16.mxu1 (!%p163_p2), %v456_v0  ;;  %v425_v5 = vld [vmem:[%s530_s2] ss:$0 sm:$0xff] (!%p163_p2) }
   0x7   : > { %437 = vmatpush3.bf16.msra.mxu0 (!%p163_p2), %v456_v0  ;;  %447 = vmatpush3.bf16.msra.mxu1 (!%p163_p2), %v456_v0  ;;  %v426_v7 = vld [vmem:[%s531_s3] ss:$0 sm:$0xff] (!%p163_p2) }
   0xd   : > { %s534_s16 = smov (!%p188_p3, %s407_s16), 1 }
   0xe   : > { %s429_s19 = sshll.u32 %s534_s16, 5  ;;  %s430_s25 = sshll.u32 %s534_s16, 6 }
   0xf   : > { %s192_s22 = scalar_lea.vmem %s528_s0, %s429_s19  ;;  %s197_s30 = scalar_lea.vmem %s532_s4, %s430_s25 }
  0x10   : > { %v457_v1 = vld [vmem:[%s192_s22] sm:$0xff]   ;;  %v458_v2 = vld [vmem:[%s192_s22 + $0x10] sm:$0xff]   ;;  %v459_v3 = vld [vmem:[%s192_s22 + $0x8] sm:$0xff]  }
  0x11   : > { %438 = vmatprep.mubr.msk.bf16.mxu0 %vm235_vm0, %v457_v1  ;;  %442 = vmatprep.mubr.msk.bf16.mxu1 %vm235_vm0, %v458_v2  ;;  %v460_v4 = vld [vmem:[%s192_s22 + $0x18] sm:$0xff]  }
  0x12   : > { %439 = vmatmul.mubr.msk.bf16.vlgmr.msra.gmra.mrb[0].mxu0 %vm235_vm0, %v459_v3  ;;  %443 = vmatmul.mubr.msk.bf16.vlgmr.msra.gmra.mrb[0].mxu1 %vm235_vm0, %v460_v4 }
  0xe5   : > { %v440_v6 = vpop.f32.mrb[0].mxu0  ;;  %v444_v9 = vpop.f32.mrb[0].mxu1 }
  0xe6   : > { %v322_v8 = vmul.f32 %v440_v6, %v425_v5  ;;  %v282_v10 = vpop.f32.mrb[1].mxu0  ;;  %v326_v11 = vmul.f32 %v444_v9, %v425_v5  ;;  %v298_v13 = vpop.f32.mrb[1].mxu1 }
  0xe7   : > { %v320_v12 = vmul.f32 %v425_v5, %v282_v10  ;;  %v441_v14 = vpop.f32.mrb[2].mxu0  ;;  %v324_v16 = vmul.f32 %v425_v5, %v298_v13  ;;  %v445_v18 = vpop.f32.mrb[2].mxu1 }
  0xe8   : > { %v337_v15 = vadd.f32 %v426_v7, %v322_v8  ;;  %v323_v17 = vmul.f32 %v441_v14, %v425_v5  ;;  %v285_v19 = vpop.f32.mrb[3].mxu0  ;;  %v341_v20 = vadd.f32 %v426_v7, %v326_v11  ;;  %v327_v22 = vmul.f32 %v445_v18, %v425_v5  ;;  %v301_v24 = vpop.f32.mrb[3].mxu1 }
  0xe9   : > { %v335_v21 = vadd.f32 %v426_v7, %v320_v12  ;;  %v321_v23 = vmul.f32 %v425_v5, %v285_v19  ;;  %v339_v25 = vadd.f32 %v426_v7, %v324_v16  ;;  %v325_v27 = vmul.f32 %v425_v5, %v301_v24 }
  0xea   : > { %346 = vst.msk [vmem:[%s197_s30 + $0x10] sm:$0xff] %vm343_vm1, %v337_v15  ;;  %v338_v26 = vadd.f32 %v426_v7, %v323_v17  ;;  %350 = vst.msk [vmem:[%s197_s30 + $0x30] sm:$0xff] %vm343_vm1, %v341_v20  ;;  %v342_v28 = vadd.f32 %v426_v7, %v327_v22 }
  0xeb   : > { %344 = vst.msk [vmem:[%s197_s30] sm:$0xff] %vm343_vm1, %v335_v21  ;;  %v336_v29 = vadd.f32 %v426_v7, %v321_v23  ;;  %348 = vst.msk [vmem:[%s197_s30 + $0x20] sm:$0xff] %vm343_vm1, %v339_v25  ;;  %v340_v30 = vadd.f32 %v426_v7, %v325_v27 }
  0xec   : > { %347 = vst.msk [vmem:[%s197_s30 + $0x18] sm:$0xff] %vm343_vm1, %v338_v26  ;;  %351 = vst.msk [vmem:[%s197_s30 + $0x38] sm:$0xff] %vm343_vm1, %v342_v28 }
  0xed   : > { %345 = vst.msk [vmem:[%s197_s30 + $0x8] sm:$0xff] %vm343_vm1, %v336_v29  ;;  %349 = vst.msk [vmem:[%s197_s30 + $0x28] sm:$0xff] %vm343_vm1, %v340_v30 }
  0xee PF: > { %s14_s15 = sadd.s32 1, %s467_s15  }
  0xef   : > { %p11_p4 = scmp.ge.s32.totalorder %s14_s15, 4  }
  0xf1   :  { %13 = sbr.rel (!%p11_p4) target bundleno = 1 (0x1), region = 66 }

// kernel: network_forward.7
= control target key start
LH: loop header
LB: loop body
LE: loop exit
PB: predicated region body
PF: predicated region fallthrough
CT: control target
= control target key end

     0   :  { %s2317_s15 = smov 0   ;;  %s2609_s0 = inlined_call_operand.vmem [shape: bf16[8,9,9,32], index: 0, kind: input, shape index: {}]   ;;  %s2610_s1 = inlined_call_operand.vmem [shape: bf16[9,32,32], index: 1, kind: input, shape index: {}]   ;;  %s2611_s2 = inlined_call_operand.vmem [shape: f32[1,32], index: 2, kind: input, shape index: {}]   ;;  %s2612_s3 = inlined_call_operand.vmem [shape: f32[1,32], index: 3, kind: input, shape index: {}]   ;;  %s2613_s4 = inlined_call_operand.vmem [shape: f32[2,64,32], index: 4, kind: output, shape index: {}]  }
   0x1 LB: > { %s2323_s16 = sadd.s32 4294967295, %s2290_s15   ;;  %p1799_p0 = scmp.ge.s32.totalorder %s2290_s15, 1  ;;  %s2290_s15 = sphi %s2317_s15, %s14_s15  }
   0x2   : > { %p164_p1 = scmp.lt.s32.totalorder %s2290_s15, 3 }
   0x4   : > { %p165_p2 = pnand %p1799_p0, %p164_p1 }
   0x5   : > { %v2242_v0 = vld [vmem:[%s2610_s1 + $0x10] sm:$0xff] (!%p165_p2)   ;;  %s1800_s19 = sshll.u32 (!%p165_p2), %s2323_s16, 2  ;;  %v2334_v1 = vld [vmem:[%s2610_s1 + $0x40] sm:$0xff] (!%p165_p2)   ;;  %v2244_v2 = vld [vmem:[%s2610_s1 + $0x18] sm:$0xff] (!%p165_p2)   ;;  %vm262_vm0 = vcmask (!%p165_p2), 261120   ;;  %p198_p4 = scmp.lt.s32.totalorder (!%p165_p2), %s2323_s16, 1 }
   0x6   : > { %168 = sbr.rel (%p165_p2) target bundleno = 316 (0x13c), region = 36  ;;  %p192_p3 = scmp.lt.s32.totalorder (!%p165_p2), %s1800_s19, 7  ;;  %2057 = vmatprep.subr.bf16.mxu1 (!%p165_p2), %v2242_v0  ;;  %2105 = vmatprep.subr.bf16.mxu0 (!%p165_p2), %v2334_v1  ;;  %v2343_v3 = vld [vmem:[%s2610_s1 + $0x48] sm:$0xff] (!%p165_p2)   ;;  %v2247_v4 = vld [vmem:[%s2610_s1] sm:$0xff] (!%p165_p2)   ;;  %v2249_v5 = vld [vmem:[%s2610_s1 + $0x50] sm:$0xff] (!%p165_p2)  }
   0x7   : > { %2058 = vmatpush3.bf16.msra.mxu1 (!%p165_p2), %v2242_v0  ;;  %2106 = vmatpush3.bf16.msra.mxu0 (!%p165_p2), %v2334_v1  ;;  %v2252_v8 = vld [vmem:[%s2610_s1 + $0x58] sm:$0xff] (!%p165_p2)   ;;  %v2254_v9 = vld [vmem:[%s2610_s1 + $0x8] sm:$0xff] (!%p165_p2)   ;;  %vm465_vm1 = vsmask.f32 (!%p165_p2), 3328  ;;  %vm466_vm2 = vsmask.f32 (!%p165_p2), 7440 }
   0x8   : > { %2059 = vmatprep.subr.bf16.mxu1 (!%p165_p2), %v2244_v2  ;;  %2107 = vmatprep.subr.bf16.mxu0 (!%p165_p2), %v2343_v3  ;;  %v2383_v23 = vld [vmem:[%s2610_s1 + $0x60] sm:$0xff] (!%p165_p2)   ;;  %vm2394_vm3 = vmor (!%p165_p2), %vm465_vm1, %vm466_vm2  ;;  %v2262_v63 = vld [vmem:[%s2610_s1 + $0x28] sm:$0xff] (!%p165_p2)  }
   0x9   : > { %v2258_v27 = vld [vmem:[%s2610_s1 + $0x20] sm:$0xff] (!%p165_p2)  }
   0xb   : > { %2060 = vmatpush3.bf16.msra.mxu1 (!%p165_p2), %v2244_v2  ;;  %2108 = vmatpush3.bf16.msra.mxu0 (!%p165_p2), %v2343_v3 }
   0xc   : > { %2069 = vmatprep.subr.bf16.mxu1 (!%p165_p2), %v2247_v4  ;;  %2117 = vmatprep.subr.bf16.mxu0 (!%p165_p2), %v2249_v5 }
   0xd   : > { %s2617_s19 = smov (!%p192_p3, %s1800_s19), 7  ;;  %s2619_s16 = smov (!%p198_p4, %s2323_s16), 1 }
   0xe   : > { %s2233_s28 = smul.u32 72, %s2617_s19  ;;  %s2002_s10 = sshll.u32 %s2619_s16, 6 }
   0xf   : > { %s2588_s17 = scalar_lea.vmem %s2613_s4, %s2002_s10 }
  0x10   : > { %s2356_s7 = scalar_lea.vmem %s2609_s0, %s2233_s28 }
  0x11   : > { %v2246_v6 = vld [vmem:[%s2356_s7 + $0x48] ss:$8 sps:$4 sm:$0xff]   ;;  %v2248_v7 = vld [vmem:[%s2356_s7 + $0xd8] ss:$8 sps:$4 sm:$0xff]   ;;  %v1895_v15 = vld [vmem:[%s2356_s7 + $0x94] sm:$0x1] }
  0x12   : > { %2061 = vmatprep.mubr.msk.bf16.mxu1 %vm262_vm0, %v2246_v6  ;;  %v2250_v10 = vld [vmem:[%s2356_s7 + $0x58] ss:$8 sps:$4 sm:$0xff]   ;;  %2109 = vmatprep.mubr.msk.bf16.mxu0 %vm262_vm0, %v2248_v7  ;;  %v2251_v11 = vld [vmem:[%s2356_s7 + $0xe8] ss:$8 sps:$4 sm:$0xff]   ;;  %v1897_v19 = vld [vmem:[%s2356_s7 + $0x9c] sm:$0x1] }
  0x13   : > { %2062 = vmatmul.mubr.msk.bf16.vlgmr.msra.gmra.mrb[0].mxu1 %vm262_vm0, %v2250_v10  ;;  %v2253_v12 = vld [vmem:[%s2356_s7 + $0x68] ss:$8 sps:$4 sm:$0xff]   ;;  %2110 = vmatmul.mubr.msk.bf16.vlgmr.msra.gmra.mrb[0].mxu0 %vm262_vm0, %v2251_v11  ;;  %v2255_v13 = vld [vmem:[%s2356_s7 + $0x78] ss:$8 sps:$4 sm:$0xff]   ;;  %v982_v20 = vshll.u32 %v1895_v15, 16  ;;  %v996_v26 = vshll.u32 %v1897_v19, 16 }
  0x14   : > { %2070 = vmatpush3.bf16.msra.mxu1 %v2247_v4  ;;  %2118 = vmatpush3.bf16.msra.mxu0 %v2249_v5  ;;  %v1894_v14 = vld [vmem:[%s2356_s7 + $0x90] sm:$0xf]  ;;  %v1896_v16 = vld [vmem:[%s2356_s7 + $0x98] sm:$0xf]  ;;  %v1898_v33 = vld [vmem:[%s2356_s7 + $0xa0] sm:$0xf] }
  0x15   : > { %2065 = vmatprep.mubr.msk.bf16.mxu1 %vm262_vm0, %v2253_v12  ;;  %2119 = vmatprep.subr.bf16.mxu0 %v2252_v8  ;;  %v973_v17 = vshrl.u32 %v1894_v14, 16  ;;  %v976_v18 = vshll.u32 %v1894_v14, 16  ;;  %v987_v21 = vshrl.u32 %v1896_v16, 16  ;;  %v990_v22 = vshll.u32 %v1896_v16, 16  ;;  %v1899_v34 = vld [vmem:[%s2356_s7 + $0xa4] sm:$0x1] }
  0x16   : > { %2071 = vmatprep.subr.bf16.mxu1 %v2254_v9  ;;  %v984_v31 = vrot.slane %v982_v20, 5  ;;  %v998_v32 = vrot.slane %v996_v26, 5  ;;  %v1900_v37 = vld [vmem:[%s2356_s7 + $0xa8] sm:$0xf]  ;;  %v1901_v38 = vld [vmem:[%s2356_s7 + $0xac] sm:$0x1] }
  0x17   : > { %v975_v24 = vrot.slane %v973_v17, 4  ;;  %v978_v25 = vrot.slane %v976_v18, 5  ;;  %v989_v28 = vrot.slane %v987_v21, 4  ;;  %v992_v29 = vrot.slane %v990_v22, 5  ;;  %v2257_v52 = vld [vmem:[%s2356_s7] ss:$8 sps:$4 sm:$0xff]  }
  0x18   : > { %2072 = vmatpush3.bf16.msra.mxu1 %v2254_v9  ;;  %2120 = vmatpush3.bf16.msra.mxu0 %v2252_v8  ;;  %v1001_v39 = vshrl.u32 %v1898_v33, 16  ;;  %v1004_v40 = vshll.u32 %v1898_v33, 16  ;;  %v1010_v42 = vshll.u32 %v1899_v34, 16  ;;  %v1015_v43 = vshrl.u32 %v1900_v37, 16  ;;  %v2259_v59 = vld [vmem:[%s2356_s7 + $0x10] ss:$8 sps:$4 sm:$0xff]  }
  0x19   : > { %v979_v30 = vor.u32 %v978_v25, %v975_v24  ;;  %2129 = vmatprep.subr.bf16.mxu0 %v2383_v23  ;;  %2081 = vmatprep.subr.bf16.mxu1 %v2258_v27  ;;  %v993_v36 = vor.u32 %v992_v29, %v989_v28  ;;  %v1018_v44 = vshll.u32 %v1900_v37, 16  ;;  %v1024_v48 = vshll.u32 %v1901_v38, 16  ;;  %v1902_v61 = vld [vmem:[%s2356_s7 + $0xb0] sm:$0xf]  ;;  %v1903_v62 = vld [vmem:[%s2356_s7 + $0xb4] sm:$0x1] }
  0x1a   : > { %v1003_v46 = vrot.slane %v1001_v39, 4  ;;  %v1006_v47 = vrot.slane %v1004_v40, 5  ;;  %v1017_v50 = vrot.slane %v1015_v43, 4  ;;  %v1012_v55 = vrot.slane %v1010_v42, 5  ;;  %v1904_v2 = vld [vmem:[%s2356_s7 + $0xb8] sm:$0xf] }
  0x1b   : > { %2066 = vmatmul.mubr.msk.bf16.gmra.mrb[4].mxu1 %vm262_vm0, %v2255_v13  ;;  %v980_v41 = vrot.slane %v979_v30, 4  ;;  %v994_v45 = vrot.slane %v993_v36, 4  ;;  %v1020_v51 = vrot.slane %v1018_v44, 5  ;;  %v1026_v56 = vrot.slane %v1024_v48, 5  ;;  %v1905_v4 = vld [vmem:[%s2356_s7 + $0xbc] sm:$0x1] }
  0x1c   : > { %v1007_v54 = vor.u32 %v1006_v47, %v1003_v46  ;;  %2073 = vmatprep.mubr.msk.bf16.mxu1 %vm262_vm0, %v2257_v52  ;;  %v1029_v5 = vshrl.u32 %v1902_v61, 16  ;;  %v1032_v7 = vshll.u32 %v1902_v61, 16  ;;  %v1038_v8 = vshll.u32 %v1903_v62, 16  ;;  %v2260_v14 = vld [vmem:[%s2610_s1 + $0x68] sm:$0xff]   ;;  %v1906_v19 = vld [vmem:[%s2356_s7 + $0xc0] sm:$0xf] }
  0x1d   : > { %v985_v49 = vsel %vm2394_vm3, %v980_v41, %v984_v31  ;;  %v999_v53 = vsel %vm2394_vm3, %v994_v45, %v998_v32  ;;  %v1021_v58 = vor.u32 %v1020_v51, %v1017_v50  ;;  %v1043_v9 = vshrl.u32 %v1904_v2, 16  ;;  %v2427_v20 = vld [vmem:[%s2610_s1 + $0x30] sm:$0xff]   ;;  %v1907_v24 = vld [vmem:[%s2356_s7 + $0xc4] sm:$0x1]  ;;  %v1908_v25 = vld [vmem:[%s2356_s7 + $0xc8] sm:$0xf] }
  0x1e   : > { %v1914_v57 = vcombine.low %v985_v49, %v999_v53  ;;  %v1008_v60 = vrot.slane %v1007_v54, 4  ;;  %v1031_v11 = vrot.slane %v1029_v5, 4  ;;  %v1046_v12 = vshll.u32 %v1904_v2, 16  ;;  %v2437_v36 = vld [vmem:[%s2610_s1 + $0x70] sm:$0xff]   ;;  %v2261_v44 = vld [vmem:[%s2356_s7 + $0x20] ss:$8 sps:$4 sm:$0xff]  }
  0x1f   : > { %v1022_v0 = vrot.slane %v1021_v58, 4  ;;  %v1052_v13 = vshll.u32 %v1905_v4, 16  ;;  %v1034_v16 = vrot.slane %v1032_v7, 5  ;;  %v1040_v17 = vrot.slane %v1038_v8, 5  ;;  %v2263_v49 = vld [vmem:[%s2356_s7 + $0x30] ss:$8 sps:$4 sm:$0xff]  }
  0x20   : > { %2121 = vmatprep.mubr.msk.bf16.mxu0 %vm262_vm0, %v1914_v57  ;;  %v1013_v6 = vsel %vm2394_vm3, %v1008_v60, %v1012_v55  ;;  %v1045_v18 = vrot.slane %v1043_v9, 4  ;;  %v1048_v21 = vrot.slane %v1046_v12, 5  ;;  %v1057_v28 = vshrl.u32 %v1906_v19, 16  ;;  %v2264_v54 = vld [vmem:[%s2356_s7 + $0x8] ss:$8 sps:$4 sm:$0xff]  }
  0x21   : > { %v1027_v10 = vsel %vm2394_vm3, %v1022_v0, %v1026_v56  ;;  %v1054_v22 = vrot.slane %v1052_v13, 5  ;;  %v1035_v26 = vor.u32 %v1034_v16, %v1031_v11  ;;  %v1060_v29 = vshll.u32 %v1906_v19, 16  ;;  %v449_v56 = vld [vmem:[%s2356_s7] sm:$0xf]  ;;  %v450_v57 = vld [vmem:[%s2356_s7 + $0x4] sm:$0x1] }
  0x22   : > { %v1915_v15 = vcombine.low %v1013_v6, %v1027_v10  ;;  %v1066_v30 = vshll.u32 %v1907_v24, 16  ;;  %v1049_v31 = vor.u32 %v1048_v21, %v1045_v18  ;;  %v1071_v32 = vshrl.u32 %v1908_v25, 16  ;;  %v451_v58 = vld [vmem:[%s2356_s7 + $0x8] sm:$0xf]  ;;  %v452_v60 = vld [vmem:[%s2356_s7 + $0xc] sm:$0x1] }
  0x23   : > { %2074 = vmatmul.mubr.msk.bf16.vlgmr.msra.gmra.mrb[0].mxu1 %vm262_vm0, %v2259_v59  ;;  %v1074_v33 = vshll.u32 %v1908_v25, 16  ;;  %v1036_v37 = vrot.slane %v1035_v26, 4  ;;  %v1059_v38 = vrot.slane %v1057_v28, 4  ;;  %v1062_v39 = vrot.slane %v1060_v29, 5  ;;  %v453_v11 = vld [vmem:[%s2356_s7 + $0x10] sm:$0xf] }
  0x24   : > { %2082 = vmatpush3.bf16.msra.mxu1 %v2258_v27  ;;  %2122 = vmatmul.mubr.msk.bf16.vlgmr.msra.gmra.mrb[0].mxu0 %vm262_vm0, %v1915_v15  ;;  %v1909_v27 = vld [vmem:[%s2356_s7 + $0xcc] sm:$0x1]  ;;  %v1068_v40 = vrot.slane %v1066_v30, 5  ;;  %v1073_v41 = vrot.slane %v1071_v32, 4  ;;  %v469_v61 = vshrl.u32 %v449_v56, 16  ;;  %v472_v62 = vshll.u32 %v449_v56, 16 }
  0x25   : > { %2083 = vmatprep.subr.bf16.mxu1 %v2262_v63  ;;  %2130 = vmatpush3.bf16.msra.mxu0 %v2383_v23  ;;  %v1080_v34 = vshll.u32 %v1909_v27, 16  ;;  %v1050_v23 = vrot.slane %v1049_v31, 4  ;;  %v1076_v42 = vrot.slane %v1074_v33, 5  ;;  %v1041_v45 = vsel %vm2394_vm3, %v1036_v37, %v1040_v17  ;;  %v2266_v12 = vld [vmem:[%s2356_s7 + $0x18] ss:$8 sps:$4 sm:$0xff]  }
  0x26   : > { %2131 = vmatprep.subr.bf16.mxu0 %v2260_v14  ;;  %v1063_v46 = vor.u32 %v1062_v39, %v1059_v38  ;;  %2077 = vmatprep.mubr.msk.bf16.mxu1 %vm262_vm0, %v2261_v44  ;;  %v483_v0 = vshrl.u32 %v451_v58, 16  ;;  %v486_v2 = vshll.u32 %v451_v58, 16  ;;  %v492_v4 = vshll.u32 %v452_v60, 16  ;;  %v455_v15 = vld [vmem:[%s2356_s7 + $0x18] sm:$0xf]  ;;  %v2480_v44 = vld [vmem:[%s2610_s1 + $0x80] sm:$0xff]  }
  0x27   : > { %v1082_v43 = vrot.slane %v1080_v34, 5  ;;  %v1055_v47 = vsel %vm2394_vm3, %v1050_v23, %v1054_v22  ;;  %v1077_v48 = vor.u32 %v1076_v42, %v1073_v41  ;;  %v471_v5 = vrot.slane %v469_v61, 4  ;;  %v456_v16 = vld [vmem:[%s2356_s7 + $0x1c] sm:$0x1]  ;;  %v2268_v30 = vld [vmem:[%s2356_s7 + $0x28] ss:$8 sps:$4 sm:$0xff]  }
  0x28   : > { %2084 = vmatpush3.bf16.msra.mxu1 %v2262_v63  ;;  %v1916_v50 = vcombine.low %v1041_v45, %v1055_v47  ;;  %v1064_v51 = vrot.slane %v1063_v46, 4  ;;  %v478_v63 = vshll.u32 %v450_v57, 16  ;;  %v474_v6 = vrot.slane %v472_v62, 5  ;;  %v2269_v37 = vld [vmem:[%s2610_s1 + $0x78] sm:$0xff]   ;;  %v457_v42 = vld [vmem:[%s2356_s7 + $0x20] sm:$0xf] }
  0x29   : > { %2093 = vmatprep.subr.bf16.mxu1 %v2427_v20  ;;  %2132 = vmatpush3.bf16.msra.mxu0 %v2260_v14  ;;  %v1078_v52 = vrot.slane %v1077_v48, 4  ;;  %v485_v8 = vrot.slane %v483_v0, 4  ;;  %v488_v9 = vrot.slane %v486_v2, 5  ;;  %v494_v10 = vrot.slane %v492_v4, 5  ;;  %v454_v14 = vld [vmem:[%s2356_s7 + $0x14] sm:$0x1] }
  0x2a   : > { %2141 = vmatprep.subr.bf16.mxu0 %v2437_v36  ;;  %2125 = vmatprep.mubr.msk.bf16.mxu0 %vm262_vm0, %v1916_v50  ;;  %v1069_v53 = vsel %vm2394_vm3, %v1064_v51, %v1068_v40  ;;  %v480_v7 = vrot.slane %v478_v63, 5  ;;  %v475_v13 = vor.u32 %v474_v6, %v471_v5  ;;  %v497_v18 = vshrl.u32 %v453_v11, 16  ;;  %v459_v46 = vld [vmem:[%s2356_s7 + $0x28] sm:$0xf]  ;;  %v460_v47 = vld [vmem:[%s2356_s7 + $0x2c] sm:$0x1] }
  0x2b   : > { %2078 = vmatmul.mubr.msk.bf16.gmra.mrb[4].mxu1 %vm262_vm0, %v2263_v49  ;;  %v1083_v55 = vsel %vm2394_vm3, %v1078_v52, %v1082_v43  ;;  %v489_v17 = vor.u32 %v488_v9, %v485_v8  ;;  %v500_v19 = vshll.u32 %v453_v11, 16  ;;  %v506_v21 = vshll.u32 %v454_v14, 16  ;;  %v458_v43 = vld [vmem:[%s2356_s7 + $0x24] sm:$0x1]  ;;  %v2270_v50 = vld [vmem:[%s2356_s7 + $0x38] ss:$8 sps:$4 sm:$0xff]  }
  0x2c   : > { %v1917_v59 = vcombine.low %v1069_v53, %v1083_v55  ;;  %v476_v22 = vrot.slane %v475_v13, 4  ;;  %v511_v24 = vshrl.u32 %v455_v15, 16  ;;  %v514_v25 = vshll.u32 %v455_v15, 16  ;;  %v2271_v61 = vld [vmem:[%s2610_s1 + $0x38] sm:$0xff]   ;;  %v461_v62 = vld [vmem:[%s2356_s7 + $0x30] sm:$0xf] }
  0x2d   : > { %v520_v26 = vshll.u32 %v456_v16, 16  ;;  %v490_v27 = vrot.slane %v489_v17, 4  ;;  %v499_v28 = vrot.slane %v497_v18, 4  ;;  %v502_v29 = vrot.slane %v500_v19, 5  ;;  %v462_v4 = vld [vmem:[%s2356_s7 + $0x34] sm:$0x1] }
  0x2e   : > { %2126 = vmatmul.mubr.msk.bf16.gmra.mrb[4].mxu0 %vm262_vm0, %v1917_v59  ;;  %v481_v31 = vsel %vm2394_vm3, %v476_v22, %v480_v7  ;;  %v508_v32 = vrot.slane %v506_v21, 5  ;;  %v513_v33 = vrot.slane %v511_v24, 4  ;;  %v516_v34 = vrot.slane %v514_v25, 5  ;;  %v463_v5 = vld [vmem:[%s2356_s7 + $0x38] sm:$0xf] }
  0x2f   : > { %2133 = vmatprep.mubr.msk.bf16.mxu0 %vm262_vm0, %v2264_v54  ;;  %v495_v38 = vsel %vm2394_vm3, %v490_v27, %v494_v10  ;;  %v503_v39 = vor.u32 %v502_v29, %v499_v28  ;;  %v522_v41 = vrot.slane %v520_v26, 5  ;;  %v525_v48 = vshrl.u32 %v457_v42, 16  ;;  %v464_v7 = vld [vmem:[%s2356_s7 + $0x3c] sm:$0x1]  ;;  %v2272_v24 = vld [vmem:[%s2356_s7 + $0x50] ss:$8 sps:$4 sm:$0xff]  }
  0x30   : > { %v1840_v40 = vcombine.low %v481_v31, %v495_v38  ;;  %v517_v23 = vor.u32 %v516_v34, %v513_v33  ;;  %v528_v51 = vshll.u32 %v457_v42, 16  ;;  %v534_v52 = vshll.u32 %v458_v43, 16  ;;  %v2274_v31 = vld [vmem:[%s2356_s7 + $0x60] ss:$8 sps:$4 sm:$0xff]   ;;  %v1969_v42 = vld [vmem:[%s2356_s7 + $0xc] sm:$0x1] }
  0x31   : > { %v504_v45 = vrot.slane %v503_v39, 4  ;;  %v539_v53 = vshrl.u32 %v459_v46, 16  ;;  %v527_v54 = vrot.slane %v525_v48, 4  ;;  %v542_v55 = vshll.u32 %v459_v46, 16  ;;  %v2278_v33 = vld [vmem:[%s2610_s1 + $0x88] sm:$0xff]  }
  0x32   : > { %2085 = vmatprep.mubr.msk.bf16.mxu1 %vm262_vm0, %v1840_v40  ;;  %v518_v49 = vrot.slane %v517_v23, 4  ;;  %v548_v56 = vshll.u32 %v460_v47, 16  ;;  %v530_v58 = vrot.slane %v528_v51, 5  ;;  %v536_v59 = vrot.slane %v534_v52, 5  ;;  %v2277_v39 = vld [vmem:[%s2356_s7 + $0x70] ss:$8 sps:$4 sm:$0xff]  }
  0x33   : > { %v541_v60 = vrot.slane %v539_v53, 4  ;;  %v544_v0 = vrot.slane %v542_v55, 5  ;;  %v553_v8 = vshrl.u32 %v461_v62, 16  ;;  %v556_v9 = vshll.u32 %v461_v62, 16  ;;  %v2279_v23 = vld [vmem:[%s2356_s7 + $0x80] ss:$8 sps:$4 sm:$0xff]  }
  0x34   : > { %v523_v57 = vsel %vm2394_vm3, %v518_v49, %v522_v41  ;;  %v550_v2 = vrot.slane %v548_v56, 5  ;;  %v531_v6 = vor.u32 %v530_v58, %v527_v54  ;;  %v562_v10 = vshll.u32 %v462_v4, 16  ;;  %v1968_v41 = vld [vmem:[%s2356_s7 + $0x8] sm:$0xf]  ;;  %v1970_v43 = vld [vmem:[%s2356_s7 + $0x10] sm:$0xf] }
  0x35   : > { %v545_v11 = vor.u32 %v544_v0, %v541_v60  ;;  %v570_v13 = vshll.u32 %v463_v5, 16  ;;  %v576_v14 = vshll.u32 %v464_v7, 16  ;;  %v555_v16 = vrot.slane %v553_v8, 4  ;;  %v1971_v46 = vld [vmem:[%s2356_s7 + $0x14] sm:$0x1] }
  0x36   : > { %2134 = vmatmul.mubr.msk.bf16.vlgmr.msra.gmra.mrb[0].mxu0 %vm262_vm0, %v2266_v12  ;;  %v567_v12 = vshrl.u32 %v463_v5, 16  ;;  %v532_v15 = vrot.slane %v531_v6, 4  ;;  %v558_v17 = vrot.slane %v556_v9, 5  ;;  %v564_v19 = vrot.slane %v562_v10, 5  ;;  %v1972_v53 = vld [vmem:[%s2356_s7 + $0x18] sm:$0xf] }
  0x37   : > { %2142 = vmatpush3.bf16.msra.mxu0 %v2437_v36  ;;  %2137 = vmatprep.mubr.msk.bf16.mxu0 %vm262_vm0, %v2268_v30  ;;  %v509_v36 = vsel %vm2394_vm3, %v504_v45, %v508_v32  ;;  %v546_v18 = vrot.slane %v545_v11, 4  ;;  %v572_v22 = vrot.slane %v570_v13, 5  ;;  %v578_v28 = vrot.slane %v576_v14, 5  ;;  %v2276_v45 = vld [vmem:[%s2356_s7 + $0xa0] ss:$8 sps:$4 sm:$0xff]  }
  0x38   : > { %2143 = vmatprep.subr.bf16.mxu0 %v2269_v37  ;;  %v1841_v63 = vcombine.low %v509_v36, %v523_v57  ;;  %v569_v21 = vrot.slane %v567_v12, 4  ;;  %v537_v25 = vsel %vm2394_vm3, %v532_v15, %v536_v59  ;;  %v559_v26 = vor.u32 %v558_v17, %v555_v16  ;;  %v1973_v36 = vld [vmem:[%s2356_s7 + $0x1c] sm:$0x1]  ;;  %v1974_v58 = vld [vmem:[%s2356_s7 + $0x20] sm:$0xf] }
  0x39   : > { %v1477_v47 = vshrl.u32 %v1968_v41, 16  ;;  %v1480_v48 = vshll.u32 %v1968_v41, 16  ;;  %v1491_v49 = vshrl.u32 %v1970_v43, 16  ;;  %v1494_v51 = vshll.u32 %v1970_v43, 16  ;;  %v1976_v17 = vld [vmem:[%s2356_s7 + $0x28] sm:$0xf] }
  0x3a   : > { %2086 = vmatmul.mubr.msk.bf16.vlgmr.msra.gmra.mrb[0].mxu1 %vm262_vm0, %v1841_v63  ;;  %v573_v27 = vor.u32 %v572_v22, %v569_v21  ;;  %v560_v30 = vrot.slane %v559_v26, 4  ;;  %v1500_v52 = vshll.u32 %v1971_v46, 16  ;;  %v1505_v62 = vshrl.u32 %v1972_v53, 16  ;;  %v1980_v43 = vld [vmem:[%s2356_s7 + $0x38] sm:$0xf] }
  0x3b   : > { %2144 = vmatpush3.bf16.msra.mxu0 %v2269_v37  ;;  %2094 = vmatpush3.bf16.msra.mxu1 %v2427_v20  ;;  %v551_v20 = vsel %vm2394_vm3, %v546_v18, %v550_v2  ;;  %v2275_v37 = vld [vmem:[%s2356_s7 + $0x90] ss:$8 sps:$4 sm:$0xff]   ;;  %v1479_v54 = vrot.slane %v1477_v47, 4  ;;  %v1482_v55 = vrot.slane %v1480_v48, 5  ;;  %v1493_v57 = vrot.slane %v1491_v49, 4 }
  0x3c   : > { %2153 = vmatprep.subr.bf16.mxu0 %v2480_v44  ;;  %2095 = vmatprep.subr.bf16.mxu1 %v2271_v61  ;;  %v1842_v29 = vcombine.low %v537_v25, %v551_v20  ;;  %v574_v32 = vrot.slane %v573_v27, 4  ;;  %v565_v34 = vsel %vm2394_vm3, %v560_v30, %v564_v19  ;;  %v1496_v59 = vrot.slane %v1494_v51, 5  ;;  %v1977_v18 = vld [vmem:[%s2356_s7 + $0x2c] sm:$0x1]  ;;  %v2281_v19 = vld [vmem:[%s2356_s7 + $0xc0] ss:$8 sps:$4 sm:$0xff]  }
  0x3d   : > { %v1502_v60 = vrot.slane %v1500_v52, 5  ;;  %v1508_v63 = vshll.u32 %v1972_v53, 16  ;;  %v1483_v0 = vor.u32 %v1482_v55, %v1479_v54  ;;  %v1514_v2 = vshll.u32 %v1973_v36, 16  ;;  %v1979_v25 = vld [vmem:[%s2356_s7 + $0x34] sm:$0x1] }
  0x3e   : > { %2138 = vmatmul.mubr.msk.bf16.gmra.mrb[4].mxu0 %vm262_vm0, %v2270_v50  ;;  %2089 = vmatprep.mubr.msk.bf16.mxu1 %vm262_vm0, %v1842_v29  ;;  %v579_v38 = vsel %vm2394_vm3, %v574_v32, %v578_v28  ;;  %v2280_v50 = vld [vmem:[%s2356_s7 + $0xb0] ss:$8 sps:$4 sm:$0xff]   ;;  %v1519_v4 = vshrl.u32 %v1974_v58, 16  ;;  %v1522_v5 = vshll.u32 %v1974_v58, 16  ;;  %v1497_v6 = vor.u32 %v1496_v59, %v1493_v57  ;;  %v1982_v48 = vld [vmem:[%s2356_s7 + $0x40] sm:$0xf] }
  0x3f   : > { %2145 = vmatprep.mubr.msk.bf16.mxu0 %vm262_vm0, %v2272_v24  ;;  %2096 = vmatpush3.bf16.msra.mxu1 %v2271_v61  ;;  %v1843_v40 = vcombine.low %v565_v34, %v579_v38  ;;  %v1975_v61 = vld [vmem:[%s2356_s7 + $0x24] sm:$0x1]  ;;  %v1507_v7 = vrot.slane %v1505_v62, 4  ;;  %v1510_v8 = vrot.slane %v1508_v63, 5  ;;  %v1484_v10 = vrot.slane %v1483_v0, 4 }
  0x40   : > { %2165 = vmatprep.subr.bf16.mxu1 %v2334_v1  ;;  %v1528_v9 = vshll.u32 %v1975_v61, 16  ;;  %v1516_v11 = vrot.slane %v1514_v2, 5  ;;  %v1521_v12 = vrot.slane %v1519_v4, 4  ;;  %v1524_v13 = vrot.slane %v1522_v5, 5  ;;  %v1978_v24 = vld [vmem:[%s2356_s7 + $0x30] sm:$0xf] }
  0x41   : > { %v1498_v14 = vrot.slane %v1497_v6, 4  ;;  %v1511_v15 = vor.u32 %v1510_v8, %v1507_v7  ;;  %v1533_v26 = vshrl.u32 %v1976_v17, 16  ;;  %v1536_v20 = vshll.u32 %v1976_v17, 16  ;;  %v2283_v8 = vld [vmem:[%s2356_s7 + $0x108] ss:$8 sps:$4 sm:$0xff]  }
  0x42   : > { %2090 = vmatmul.mubr.msk.bf16.gmra.mrb[4].mxu1 %vm262_vm0, %v1843_v40  ;;  %v1530_v16 = vrot.slane %v1528_v9, 5  ;;  %v1525_v22 = vor.u32 %v1524_v13, %v1521_v12  ;;  %v1542_v28 = vshll.u32 %v1977_v18, 16  ;;  %v1547_v29 = vshrl.u32 %v1978_v24, 16  ;;  %v1998_v17 = vld [vmem:[%s2611_s2] ss:$0 sm:$0xff] }
  0x43   : > { %2097 = vmatprep.mubr.msk.bf16.mxu1 %vm262_vm0, %v2275_v37  ;;  %v1512_v27 = vrot.slane %v1511_v15, 4  ;;  %v1535_v32 = vrot.slane %v1533_v26, 4  ;;  %v2282_v37 = vld [vmem:[%s2356_s7 + $0xf8] ss:$8 sps:$4 sm:$0xff]   ;;  %v1564_v51 = vshll.u32 %v1980_v43, 16  ;;  %v1575_v54 = vshrl.u32 %v1982_v48, 16 }
  0x44   : > { %v1549_v38 = vrot.slane %v1547_v29, 4  ;;  %v1544_v41 = vrot.slane %v1542_v28, 5  ;;  %v1578_v55 = vshll.u32 %v1982_v48, 16 }
  0x45   : > { %v1517_v34 = vsel %vm2394_vm3, %v1512_v27, %v1516_v11 }
  0x46   : > { %2146 = vmatmul.mubr.msk.bf16.vlgmr.msra.gmra.mrb[0].mxu0 %vm262_vm0, %v2274_v31  ;;  %v1526_v31 = vrot.slane %v1525_v22, 4  ;;  %v1580_v61 = vrot.slane %v1578_v55, 5 }
  0x47   : > { %2154 = vmatpush3.bf16.msra.mxu0 %v2480_v44  ;;  %2149 = vmatprep.mubr.msk.bf16.mxu0 %vm262_vm0, %v2277_v39  ;;  %v1486_v44 = vshll.u32 %v1969_v42, 16  ;;  %v1550_v39 = vshll.u32 %v1978_v24, 16  ;;  %v1556_v42 = vshll.u32 %v1979_v25, 16 }
  0x48   : > { %2155 = vmatprep.subr.bf16.mxu0 %v2278_v33  ;;  %v1531_v40 = vsel %vm2394_vm3, %v1526_v31, %v1530_v16 }
  0x49   : > { %v1488_v56 = vrot.slane %v1486_v44, 5  ;;  %v1989_v46 = vcombine.low %v1517_v34, %v1531_v40  ;;  %v1552_v47 = vrot.slane %v1550_v39, 5  ;;  %v1561_v44 = vshrl.u32 %v1980_v43, 16 }
  0x4a   : > { %2098 = vmatmul.mubr.msk.bf16.vlgmr.msra.gmra.mrb[0].mxu1 %vm262_vm0, %v2276_v45  ;;  %v1981_v45 = vld [vmem:[%s2356_s7 + $0x3c] sm:$0x1] }
  0x4b   : > { %2156 = vmatpush3.bf16.msra.mxu0 %v2278_v33  ;;  %2167 = vmatpush3.bf16.msra.mxu1 %v2334_v1  ;;  %v1489_v21 = vsel %vm2394_vm3, %v1484_v10, %v1488_v56  ;;  %v1503_v1 = vsel %vm2394_vm3, %v1498_v14, %v1502_v60  ;;  %v1538_v33 = vrot.slane %v1536_v20, 5  ;;  %v1570_v52 = vshll.u32 %v1981_v45, 16 }
  0x4c   : > { %2101 = vmatprep.mubr.msk.bf16.mxu1 %vm262_vm0, %v2280_v50  ;;  %2166 = vmatprep.subr.bf16.mxu1 %v2343_v3  ;;  %v1988_v30 = vcombine.low %v1489_v21, %v1503_v1  ;;  %v1558_v50 = vrot.slane %v1556_v42, 5  ;;  %v1553_v53 = vor.u32 %v1552_v47, %v1549_v38  ;;  %v1563_v36 = vrot.slane %v1561_v44, 4 }
  0x4d   : > { %v1566_v56 = vrot.slane %v1564_v51, 5  ;;  %v1577_v60 = vrot.slane %v1575_v54, 4  ;;  %v1572_v63 = vrot.slane %v1570_v52, 5 }
  0x4e   : > { %2150 = vmatmul.mubr.msk.bf16.gmra.mrb[4].mxu0 %vm262_vm0, %v2279_v23  ;;  %v1539_v23 = vor.u32 %v1538_v33, %v1535_v32  ;;  %v1554_v59 = vrot.slane %v1553_v53, 4 }
  0x4f   : > { %2168 = vmatpush3.bf16.msra.mxu1 %v2343_v3  ;;  %2157 = vmatprep.mubr.msk.bf16.mxu0 %vm262_vm0, %v1988_v30  ;;  %v1983_v3 = vld [vmem:[%s2356_s7 + $0x44] sm:$0x1]  ;;  %v1567_v62 = vor.u32 %v1566_v56, %v1563_v36  ;;  %v1581_v2 = vor.u32 %v1580_v61, %v1577_v60 }
  0x50   : > { %v1540_v49 = vrot.slane %v1539_v23, 4  ;;  %v1584_v57 = vshll.u32 %v1983_v3, 16  ;;  %v1559_v0 = vsel %vm2394_vm3, %v1554_v59, %v1558_v50 }
  0x51   : > { %v1568_v6 = vrot.slane %v1567_v62, 4  ;;  %v1582_v7 = vrot.slane %v1581_v2, 4 }
  0x52   : > { %2102 = vmatmul.mubr.msk.bf16.gmra.mrb[4].mxu1 %vm262_vm0, %v2281_v19  ;;  %v1545_v58 = vsel %vm2394_vm3, %v1540_v49, %v1544_v41  ;;  %v1586_v4 = vrot.slane %v1584_v57, 5  ;;  %v1999_v19 = vld [vmem:[%s2612_s3] ss:$0 sm:$0xff] }
  0x53   : > { %2113 = vmatprep.mubr.msk.bf16.mxu1 %vm262_vm0, %v2282_v37  ;;  %v1990_v5 = vcombine.low %v1545_v58, %v1559_v0  ;;  %v1573_v9 = vsel %vm2394_vm3, %v1568_v6, %v1572_v63 }
  0x54   : > { %v1587_v10 = vsel %vm2394_vm3, %v1582_v7, %v1586_v4 }
  0x55   : > { %v1991_v11 = vcombine.low %v1573_v9, %v1587_v10 }
  0x56   : > { %2158 = vmatmul.mubr.msk.bf16.vlgmr.msra.gmra.mrb[0].mxu0 %vm262_vm0, %v1989_v46 }
  0x57   : > { %2161 = vmatprep.mubr.msk.bf16.mxu0 %vm262_vm0, %v1990_v5 }
  0x5e   : > { %2114 = vmatmul.mubr.msk.bf16.vlgmr.msra.gmra.mrb[4].mxu1 %vm262_vm0, %v2283_v8  ;;  %2162 = vmatmul.mubr.msk.bf16.gmra.mrb[4].mxu0 %vm262_vm0, %v1991_v11 }
 0x11d   : > { %v2099_v12 = vpop.f32.mrb[0].mxu1 }
 0x11e   : > { %v786_v13 = vpop.f32.mrb[1].mxu1 }
 0x11f   : > { %v2100_v14 = vpop.f32.mrb[2].mxu1 }
 0x120   : > { %v789_v15 = vpop.f32.mrb[3].mxu1 }
 0x129   : > { %v2159_v16 = vpop.f32.mrb[0].mxu0 }
 0x12a   : > { %v2169_v18 = vadd.f32 %v2159_v16, %v2099_v12  ;;  %v1663_v35 = vpop.f32.mrb[1].mxu0 }
 0x12b   : > { %v2170_v21 = vadd.f32 %v1663_v35, %v786_v13  ;;  %v2160_v22 = vpop.f32.mrb[2].mxu0 }
 0x12c   : > { %v1711_v24 = vmul.f32 %v2169_v18, %v1998_v17  ;;  %v2171_v25 = vadd.f32 %v2160_v22, %v2100_v14  ;;  %v1666_v26 = vpop.f32.mrb[3].mxu0 }
 0x12d   : > { %v1709_v20 = vmul.f32 %v2170_v21, %v1998_v17  ;;  %v2172_v1 = vadd.f32 %v1666_v26, %v789_v15 }
 0x12e   : > { %v1726_v27 = vadd.f32 %v1999_v19, %v1711_v24  ;;  %v1712_v28 = vmul.f32 %v2171_v25, %v1998_v17 }
 0x12f   : > { %v1724_v29 = vadd.f32 %v1999_v19, %v1709_v20  ;;  %v1710_v30 = vmul.f32 %v2172_v1, %v1998_v17 }
 0x130   : > { %1734 = vst.msk [vmem:[%s2588_s17 + $0x10] sm:$0xff] %vm262_vm0, %v1726_v27  ;;  %v1727_v31 = vadd.f32 %v1999_v19, %v1712_v28 }
 0x131   : > { %1732 = vst.msk [vmem:[%s2588_s17] sm:$0xff] %vm262_vm0, %v1724_v29  ;;  %v1725_v32 = vadd.f32 %v1999_v19, %v1710_v30  ;;  %v2115_v33 = vpop.f32.mrb[4].mxu1  ;;  %v2163_v34 = vpop.f32.mrb[4].mxu0 }
 0x132   : > { %1735 = vst.msk [vmem:[%s2588_s17 + $0x18] sm:$0xff] %vm262_vm0, %v1727_v31  ;;  %v2173_v37 = vadd.f32 %v2163_v34, %v2115_v33  ;;  %v933_v38 = vpop.f32.mrb[5].mxu1  ;;  %v1679_v39 = vpop.f32.mrb[5].mxu0 }
 0x133   : > { %1733 = vst.msk [vmem:[%s2588_s17 + $0x8] sm:$0xff] %vm262_vm0, %v1725_v32  ;;  %v2174_v40 = vadd.f32 %v1679_v39, %v933_v38  ;;  %v2116_v23 = vpop.f32.mrb[6].mxu1  ;;  %v2164_v41 = vpop.f32.mrb[6].mxu0 }
 0x134   : > { %v1715_v42 = vmul.f32 %v2173_v37, %v1998_v17  ;;  %v2175_v43 = vadd.f32 %v2164_v41, %v2116_v23  ;;  %v936_v45 = vpop.f32.mrb[7].mxu1  ;;  %v1682_v46 = vpop.f32.mrb[7].mxu0 }
 0x135   : > { %v1713_v47 = vmul.f32 %v2174_v40, %v1998_v17  ;;  %v2176_v48 = vadd.f32 %v1682_v46, %v936_v45 }
 0x136   : > { %v1730_v3 = vadd.f32 %v1999_v19, %v1715_v42  ;;  %v1716_v44 = vmul.f32 %v2175_v43, %v1998_v17 }
 0x137   : > { %v1728_v49 = vadd.f32 %v1999_v19, %v1713_v47  ;;  %v1714_v50 = vmul.f32 %v2176_v48, %v1998_v17 }
 0x138   : > { %1738 = vst.msk [vmem:[%s2588_s17 + $0x30] sm:$0xff] %vm262_vm0, %v1730_v3  ;;  %v1731_v51 = vadd.f32 %v1999_v19, %v1716_v44 }
 0x139   : > { %1736 = vst.msk [vmem:[%s2588_s17 + $0x20] sm:$0xff] %vm262_vm0, %v1728_v49  ;;  %v1729_v52 = vadd.f32 %v1999_v19, %v1714_v50 }
 0x13a   : > { %1739 = vst.msk [vmem:[%s2588_s17 + $0x38] sm:$0xff] %vm262_vm0, %v1731_v51 }
 0x13b   : > { %1737 = vst.msk [vmem:[%s2588_s17 + $0x28] sm:$0xff] %vm262_vm0, %v1729_v52 }
 0x13c PF: > { %s14_s15 = sadd.s32 1, %s2290_s15  }
 0x13d   : > { %p11_p5 = scmp.ge.s32.totalorder %s14_s15, 4  }
 0x13f   :  { %13 = sbr.rel (!%p11_p5) target bundleno = 1 (0x1), region = 79 }

// kernel: network_forward.6
= control target key start
LH: loop header
LB: loop body
LE: loop exit
PB: predicated region body
PF: predicated region fallthrough
CT: control target
= control target key end

     0   :  { %s6728_s18 = smov 0   ;;  %s8626_s0 = inlined_call_operand.vmem [shape: bf16[2,18,18,16], index: 0, kind: input, shape index: {}]   ;;  %s8627_s1 = inlined_call_operand.vmem [shape: bf16[9,16,32], index: 1, kind: input, shape index: {}]   ;;  %s8628_s2 = inlined_call_operand.vmem [shape: f32[1,32], index: 2, kind: input, shape index: {}]   ;;  %s8629_s3 = inlined_call_operand.vmem [shape: f32[1,32], index: 3, kind: input, shape index: {}]   ;;  %s8630_s4 = inlined_call_operand.vmem [shape: f32[1,32], index: 4, kind: input, shape index: {}]   ;;  %s8631_s5 = inlined_call_operand.vmem [shape: bf16[2,256,32], index: 5, kind: output, shape index: {}]  }
   0x1 LB: > { %s5217_s19 = sadd.s32 4294967295, %s6696_s18   ;;  %p5221_p0 = scmp.ge.s32.totalorder %s6696_s18, 1  ;;  %s6696_s18 = sphi %s6728_s18, %s15_s18  }
   0x2   : > { %p187_p1 = scmp.lt.s32.totalorder %s6696_s18, 3 }
   0x4   : > { %p188_p2 = pnand %p5221_p0, %p187_p1 }
   0x6   : > { %191 = sbr.rel (%p188_p2) target bundleno = 594 (0x252), region = 40 }
   0xd   : > { %v6574_v0 = vld [vmem:[%s8627_s1 + $0x8] sm:$0xff]   ;;  %p215_p3 = scmp.lt.s32.totalorder %s5217_s19, 1  ;;  %v6575_v1 = vld [vmem:[%s8627_s1 + $0x20] sm:$0xff]   ;;  %vm276_vm0 = vsmask.f32 3328  ;;  %vm720_vm3 = vcmask 130048  }
   0xe   : > { %6001 = vmatprep.subr.bf16.mxu1 %v6574_v0  ;;  %v6747_v2 = vld [vmem:[%s8627_s1] sm:$0xff]   ;;  %6137 = vmatprep.subr.bf16.mxu0 %v6575_v1  ;;  %v6754_v3 = vld [vmem:[%s8627_s1 + $0x28] sm:$0xff]   ;;  %vm277_vm1 = vsmask.f32 7440  ;;  %vm1273_vm4 = vcmask 1042432   ;;  %vm1274_vm5 = vcmask 1046532  }
   0xf   : > { %s8697_s19 = smov (!%p215_p3, %s5217_s19), 1  ;;  %6002 = vmatpush3.bf16.msra.mxu1 %v6574_v0  ;;  %6138 = vmatpush3.bf16.msra.mxu0 %v6575_v1  ;;  %vm6778_vm2 = vmor %vm276_vm0, %vm277_vm1  ;;  %vm5129_vm8 = vcmask 257024  }
  0x10   : > { %s6565_s26 = smul.u32 216, %s8697_s19  ;;  %6035 = vmatprep.subr.bf16.mxu1 %v6747_v2  ;;  %6171 = vmatprep.subr.bf16.mxu0 %v6754_v3  ;;  %vm7000_vm6 = vmor %vm1273_vm4, %vm1274_vm5  ;;  %s5815_s29 = sshll.u32 %s8697_s19, 7 }
  0x11   : > { %s8463_s19 = scalar_lea.vmem %s8631_s5, %s5815_s29 }
  0x12   : > { %s6759_s6 = scalar_lea.vmem %s8626_s0, %s6565_s26 }
  0x13   : > { %v226_v4 = vld [vmem:[%s6759_s6] sm:$0xf]  ;;  %v227_v5 = vld [vmem:[%s6759_s6 + $0x4] sm:$0xf]  ;;  %v260_v6 = vld [vmem:[%s6759_s6 + $0x8] sm:$0x1] }
  0x14   : > { %v280_v7 = vshrl.u32 %v226_v4, 16  ;;  %v283_v8 = vshll.u32 %v226_v4, 16  ;;  %v289_v9 = vshll.u32 %v227_v5, 16  ;;  %v293_v10 = vshrl.u32 %v227_v5, 16  ;;  %v5411_v11 = vld [vmem:[%s6759_s6 + $0xc] sm:$0xf] }
  0x15   : > { %v299_v12 = vshll.u32 %v260_v6, 16  ;;  %v6767_v13 = vld [vmem:[%s6759_s6 + $0x10] sm:$0xf]  ;;  %v6770_v14 = vld [vmem:[%s6759_s6 + $0x14] sm:$0x1]  ;;  %v2098_v20 = vshrl.u32 %v5411_v11, 16 }
  0x16   : > { %v282_v15 = vrot.slane %v280_v7, 4  ;;  %v285_v16 = vrot.slane %v283_v8, 5  ;;  %v291_v17 = vrot.slane %v289_v9, 5  ;;  %v295_v18 = vrot.slane %v293_v10, 4  ;;  %v228_v27 = vld [vmem:[%s6759_s6 + $0xc] sm:$0xf] }
  0x17   : > { %v301_v19 = vrot.slane %v299_v12, 5  ;;  %v2101_v21 = vshll.u32 %v5411_v11, 16  ;;  %v2107_v22 = vshll.u32 %v6767_v13, 16  ;;  %v2111_v25 = vshrl.u32 %v6767_v13, 16  ;;  %v229_v32 = vld [vmem:[%s6759_s6 + $0x10] sm:$0xf] }
  0x18   : > { %v286_v23 = vor.u32 %v285_v16, %v282_v15  ;;  %v296_v24 = vor.u32 %v295_v18, %v291_v17  ;;  %v2117_v26 = vshll.u32 %v6770_v14, 16  ;;  %v2100_v29 = vrot.slane %v2098_v20, 4  ;;  %v261_v38 = vld [vmem:[%s6759_s6 + $0x14] sm:$0x1]  ;;  %v5414_v49 = vld [vmem:[%s6759_s6 + $0x18] sm:$0xf] }
  0x19   : > { %v2103_v30 = vrot.slane %v2101_v21, 5  ;;  %v2109_v31 = vrot.slane %v2107_v22, 5  ;;  %v2113_v35 = vrot.slane %v2111_v25, 4  ;;  %v304_v39 = vshrl.u32 %v228_v27, 16  ;;  %v6790_v54 = vld [vmem:[%s6759_s6 + $0x1c] sm:$0xf] }
  0x1a   : > { %v287_v33 = vrot.slane %v286_v23, 4  ;;  %v297_v34 = vrot.slane %v296_v24, 4  ;;  %v2119_v37 = vrot.slane %v2117_v26, 5  ;;  %v307_v40 = vshll.u32 %v228_v27, 16  ;;  %v6798_v59 = vld [vmem:[%s6759_s6 + $0x20] sm:$0x1] }
  0x1b   : > { %v2104_v36 = vor.u32 %v2103_v30, %v2100_v29  ;;  %v2114_v43 = vor.u32 %v2113_v35, %v2109_v31  ;;  %v313_v44 = vshll.u32 %v229_v32, 16  ;;  %v306_v47 = vrot.slane %v304_v39, 4  ;;  %v230_v10 = vld [vmem:[%s6759_s6 + $0x18] sm:$0xf]  ;;  %v262_v24 = vld [vmem:[%s6759_s6 + $0x20] sm:$0x1] }
  0x1c   : > { %v292_v41 = vsel %vm6778_vm2, %v287_v33, %v291_v17  ;;  %v302_v42 = vsel %vm6778_vm2, %v297_v34, %v301_v19  ;;  %v309_v48 = vrot.slane %v307_v40, 5  ;;  %v317_v52 = vshrl.u32 %v229_v32, 16  ;;  %v231_v17 = vld [vmem:[%s6759_s6 + $0x1c] sm:$0xf]  ;;  %v5417_v32 = vld [vmem:[%s6759_s6 + $0x24] sm:$0xf] }
  0x1d   : > { %v5227_v45 = vcombine.low %v292_v41, %v302_v42  ;;  %v2105_v46 = vrot.slane %v2104_v36, 4  ;;  %v2115_v50 = vrot.slane %v2114_v43, 4  ;;  %v315_v51 = vrot.slane %v313_v44, 5 }
  0x1e   : > { %v323_v53 = vshll.u32 %v261_v38, 16  ;;  %v2845_v56 = vrot.slane %v6767_v13, 5  ;;  %v2848_v57 = vrot.slane %v6770_v14, 5  ;;  %v310_v58 = vor.u32 %v309_v48, %v306_v47  ;;  %v6580_v38 = vld [vmem:[%s8627_s1 + $0x10] sm:$0xff]   ;;  %v7033_v14 = vld [vmem:[%s6759_s6 + $0x7c] sm:$0xf] }
  0x1f   : > { %6003 = vmatprep.mubr.msk.bf16.mxu1 %vm720_vm3, %v5227_v45  ;;  %v2110_v55 = vsel %vm6778_vm2, %v2105_v46, %v2109_v31  ;;  %v2120_v60 = vsel %vm6778_vm2, %v2115_v50, %v2119_v37  ;;  %v319_v61 = vrot.slane %v317_v52, 4  ;;  %v2122_v63 = vshrl.u32 %v5414_v49, 16  ;;  %v6821_v37 = vld [vmem:[%s6759_s6 + $0x28] sm:$0xf]  ;;  %v6830_v45 = vld [vmem:[%s6759_s6 + $0x2c] sm:$0x1] }
  0x20   : > { %v325_v62 = vrot.slane %v323_v53, 5  ;;  %v5461_v0 = vcombine.low %v2110_v55, %v2120_v60  ;;  %v311_v1 = vrot.slane %v310_v58, 4  ;;  %v2125_v4 = vshll.u32 %v5414_v49, 16  ;;  %v232_v52 = vld [vmem:[%s6759_s6 + $0x24] sm:$0xf] }
  0x21   : > { %v2131_v5 = vshll.u32 %v6790_v54, 16  ;;  %v320_v6 = vor.u32 %v319_v61, %v315_v51  ;;  %v2124_v7 = vrot.slane %v2122_v63, 4  ;;  %v2135_v8 = vshrl.u32 %v6790_v54, 16  ;;  %v233_v61 = vld [vmem:[%s6759_s6 + $0x28] sm:$0xf] }
  0x22   : > { %v2141_v9 = vshll.u32 %v6798_v59, 16  ;;  %6139 = vmatprep.mubr.msk.bf16.mxu0 %vm720_vm3, %v5461_v0  ;;  %v316_v11 = vsel %vm6778_vm2, %v311_v1, %v315_v51  ;;  %v2127_v12 = vrot.slane %v2125_v4, 5  ;;  %v2852_v16 = vrot.slane %v6790_v54, 5 }
  0x23   : > { %v2133_v15 = vrot.slane %v2131_v5, 5  ;;  %v321_v18 = vrot.slane %v320_v6, 4  ;;  %v2137_v19 = vrot.slane %v2135_v8, 4  ;;  %v2855_v21 = vrot.slane %v6798_v59, 5  ;;  %v263_v6 = vld [vmem:[%s6759_s6 + $0x2c] sm:$0x1] }
  0x24   : > { %v2143_v20 = vrot.slane %v2141_v9, 5  ;;  %v2128_v22 = vor.u32 %v2127_v12, %v2124_v7  ;;  %v6814_v23 = vrot.slane %v2852_v16, 4  ;;  %v328_v25 = vshrl.u32 %v230_v10, 16 }
  0x25   : > { %v331_v26 = vshll.u32 %v230_v10, 16  ;;  %v326_v27 = vsel %vm6778_vm2, %v321_v18, %v325_v62  ;;  %v2138_v29 = vor.u32 %v2137_v19, %v2133_v15  ;;  %v337_v30 = vshll.u32 %v231_v17, 16  ;;  %v6841_v62 = vld [vmem:[%s8627_s1 + $0x30] sm:$0xff]  }
  0x26   : > { %v341_v31 = vshrl.u32 %v231_v17, 16  ;;  %v5228_v33 = vcombine.low %v316_v11, %v326_v27  ;;  %v2129_v34 = vrot.slane %v2128_v22, 4  ;;  %v330_v35 = vrot.slane %v328_v25, 4  ;;  %v6854_v22 = vld [vmem:[%s6759_s6 + $0x34] sm:$0xf] }
  0x27   : > { %v333_v36 = vrot.slane %v331_v26, 5  ;;  %v2139_v39 = vrot.slane %v2138_v29, 4  ;;  %v339_v40 = vrot.slane %v337_v30, 5  ;;  %v347_v42 = vshll.u32 %v262_v24, 16  ;;  %v6861_v30 = vld [vmem:[%s6759_s6 + $0x38] sm:$0x1] }
  0x28   : > { %v343_v41 = vrot.slane %v341_v31, 4  ;;  %6004 = vmatmul.mubr.msk.bf16.vlgmr.msra.gmra.mrb[0].mxu1 %vm720_vm3, %v5228_v33  ;;  %v2134_v43 = vsel %vm6778_vm2, %v2129_v34, %v2133_v15  ;;  %v2146_v46 = vshrl.u32 %v5417_v32, 16  ;;  %v2149_v47 = vshll.u32 %v5417_v32, 16  ;;  %v5420_v15 = vld [vmem:[%s6759_s6 + $0x30] sm:$0xf] }
  0x29   : > { %v334_v44 = vor.u32 %v333_v36, %v330_v35  ;;  %6036 = vmatpush3.bf16.msra.mxu1 %v6747_v2  ;;  %v2144_v48 = vsel %vm6778_vm2, %v2139_v39, %v2143_v20  ;;  %v349_v50 = vrot.slane %v347_v42, 5  ;;  %v2155_v51 = vshll.u32 %v6821_v37, 16  ;;  %v234_v42 = vld [vmem:[%s6759_s6 + $0x30] sm:$0xf] }
  0x2a   : > { %v344_v49 = vor.u32 %v343_v41, %v339_v40  ;;  %v5462_v53 = vcombine.low %v2134_v43, %v2144_v48  ;;  %v2148_v58 = vrot.slane %v2146_v46, 4  ;;  %v2151_v60 = vrot.slane %v2149_v47, 5  ;;  %6069 = vmatprep.subr.bf16.mxu1 %v6580_v38  ;;  %v235_v48 = vld [vmem:[%s6759_s6 + $0x34] sm:$0xf] }
  0x2b   : > { %v335_v55 = vrot.slane %v334_v44, 4  ;;  %v2157_v63 = vrot.slane %v2155_v51, 5  ;;  %v2159_v0 = vshrl.u32 %v6821_v37, 16  ;;  %v2165_v1 = vshll.u32 %v6830_v45, 16 }
  0x2c   : > { %v345_v2 = vrot.slane %v344_v49, 4  ;;  %6140 = vmatmul.mubr.msk.bf16.vlgmr.msra.gmra.mrb[0].mxu0 %vm720_vm3, %v5462_v53  ;;  %v2152_v5 = vor.u32 %v2151_v60, %v2148_v58  ;;  %v352_v7 = vshrl.u32 %v232_v52, 16  ;;  %v355_v8 = vshll.u32 %v232_v52, 16  ;;  %v264_v53 = vld [vmem:[%s6759_s6 + $0x38] sm:$0x1] }
  0x2d   : > { %v340_v4 = vsel %vm6778_vm2, %v335_v55, %v339_v40  ;;  %6172 = vmatpush3.bf16.msra.mxu0 %v6754_v3  ;;  %v2161_v10 = vrot.slane %v2159_v0, 4  ;;  %v2167_v11 = vrot.slane %v2165_v1, 5  ;;  %v361_v12 = vshll.u32 %v233_v61, 16 }
  0x2e   : > { %v350_v9 = vsel %vm6778_vm2, %v345_v2, %v349_v50  ;;  %v2153_v18 = vrot.slane %v2152_v5, 4  ;;  %v354_v19 = vrot.slane %v352_v7, 4  ;;  %v357_v20 = vrot.slane %v355_v8, 5  ;;  %6205 = vmatprep.subr.bf16.mxu0 %v6841_v62 }
  0x2f   : > { %v5229_v17 = vcombine.low %v340_v4, %v350_v9  ;;  %v2162_v24 = vor.u32 %v2161_v10, %v2157_v63  ;;  %v363_v25 = vrot.slane %v361_v12, 5  ;;  %v365_v26 = vshrl.u32 %v233_v61, 16  ;;  %v5423_v4 = vld [vmem:[%s6759_s6 + $0x3c] sm:$0xf]  ;;  %v6878_v9 = vld [vmem:[%s6759_s6 + $0x40] sm:$0xf] }
  0x30   : > { %v371_v3 = vshll.u32 %v263_v6, 16  ;;  %v2158_v27 = vsel %vm6778_vm2, %v2153_v18, %v2157_v63  ;;  %v358_v29 = vor.u32 %v357_v20, %v354_v19  ;;  %v2170_v31 = vshrl.u32 %v5420_v15, 16  ;;  %v6883_v20 = vld [vmem:[%s6759_s6 + $0x44] sm:$0x1] }
  0x31   : > { %6007 = vmatprep.mubr.msk.bf16.mxu1 %vm720_vm3, %v5229_v17  ;;  %v2173_v32 = vshll.u32 %v5420_v15, 16  ;;  %v2163_v33 = vrot.slane %v2162_v24, 4  ;;  %v367_v34 = vrot.slane %v365_v26, 4  ;;  %v2179_v36 = vshll.u32 %v6854_v22, 16 }
  0x32   : > { %v373_v35 = vrot.slane %v371_v3, 5  ;;  %v359_v38 = vrot.slane %v358_v29, 4  ;;  %v2172_v39 = vrot.slane %v2170_v31, 4  ;;  %v2183_v41 = vshrl.u32 %v6854_v22, 16  ;;  %v236_v29 = vld [vmem:[%s6759_s6 + $0x3c] sm:$0xf] }
  0x33   : > { %v2175_v40 = vrot.slane %v2173_v32, 5  ;;  %v2168_v43 = vsel %vm6778_vm2, %v2163_v33, %v2167_v11  ;;  %v368_v44 = vor.u32 %v367_v34, %v363_v25  ;;  %v2181_v46 = vrot.slane %v2179_v36, 5 }
  0x34   : > { %v2189_v47 = vshll.u32 %v6861_v30, 16  ;;  %v5463_v49 = vcombine.low %v2158_v27, %v2168_v43  ;;  %v364_v50 = vsel %vm6778_vm2, %v359_v38, %v363_v25  ;;  %v2185_v52 = vrot.slane %v2183_v41, 4 }
  0x35   : > { %v2176_v51 = vor.u32 %v2175_v40, %v2172_v39  ;;  %v369_v55 = vrot.slane %v368_v44, 4  ;;  %v376_v60 = vshrl.u32 %v234_v42, 16  ;;  %v379_v61 = vshll.u32 %v234_v42, 16 }
  0x36   : > { %v2191_v58 = vrot.slane %v2189_v47, 5  ;;  %6143 = vmatprep.mubr.msk.bf16.mxu0 %vm720_vm3, %v5463_v49  ;;  %v2186_v63 = vor.u32 %v2185_v52, %v2181_v46  ;;  %v385_v0 = vshll.u32 %v235_v48, 16  ;;  %v389_v1 = vshrl.u32 %v235_v48, 16  ;;  %v265_v49 = vld [vmem:[%s6759_s6 + $0x44] sm:$0x1] }
  0x37   : > { %v2177_v2 = vrot.slane %v2176_v51, 4  ;;  %v374_v5 = vsel %vm6778_vm2, %v369_v55, %v373_v35  ;;  %v378_v6 = vrot.slane %v376_v60, 4  ;;  %v381_v7 = vrot.slane %v379_v61, 5  ;;  %v237_v35 = vld [vmem:[%s6759_s6 + $0x40] sm:$0xf] }
  0x38   : > { %v395_v8 = vshll.u32 %v264_v53, 16  ;;  %v5230_v10 = vcombine.low %v364_v50, %v374_v5  ;;  %v2187_v12 = vrot.slane %v2186_v63, 4  ;;  %v387_v15 = vrot.slane %v385_v0, 5  ;;  %v5426_v51 = vld [vmem:[%s6759_s6 + $0x48] sm:$0xf] }
  0x39   : > { %v2182_v11 = vsel %vm6778_vm2, %v2177_v2, %v2181_v46  ;;  %v382_v17 = vor.u32 %v381_v7, %v378_v6  ;;  %v391_v18 = vrot.slane %v389_v1, 4  ;;  %v2194_v24 = vshrl.u32 %v5423_v4, 16  ;;  %v6901_v60 = vld [vmem:[%s6759_s6 + $0x4c] sm:$0xf] }
  0x3a   : > { %v397_v19 = vrot.slane %v395_v8, 5  ;;  %6008 = vmatmul.mubr.msk.bf16.gmra.mrb[4].mxu1 %vm720_vm3, %v5230_v10  ;;  %v2192_v25 = vsel %vm6778_vm2, %v2187_v12, %v2191_v58  ;;  %v2197_v26 = vshll.u32 %v5423_v4, 16  ;;  %v2203_v3 = vshll.u32 %v6878_v9, 16  ;;  %v6909_v10 = vld [vmem:[%s6759_s6 + $0x50] sm:$0x1] }
  0x3b   : > { %v2207_v27 = vshrl.u32 %v6878_v9, 16  ;;  %v5464_v31 = vcombine.low %v2182_v11, %v2192_v25  ;;  %v383_v32 = vrot.slane %v382_v17, 4  ;;  %v392_v33 = vor.u32 %v391_v18, %v387_v15  ;;  %v6916_v25 = vld [vmem:[%s6759_s6 + $0x4c] sm:$0xf] }
  0x3c   : > { %v2196_v34 = vrot.slane %v2194_v24, 4  ;;  %v2199_v36 = vrot.slane %v2197_v26, 5  ;;  %v2205_v38 = vrot.slane %v2203_v3, 5  ;;  %v2213_v40 = vshll.u32 %v6883_v20, 16 }
  0x3d   : > { %v2209_v39 = vrot.slane %v2207_v27, 4  ;;  %6144 = vmatmul.mubr.msk.bf16.gmra.mrb[4].mxu0 %vm720_vm3, %v5464_v31  ;;  %v388_v41 = vsel %vm6778_vm2, %v383_v32, %v387_v15  ;;  %v393_v42 = vrot.slane %v392_v33, 4  ;;  %v400_v43 = vshrl.u32 %v236_v29, 16  ;;  %v6913_v15 = vld [vmem:[%s6759_s6 + $0x48] sm:$0xf] }
  0x3e   : > { %v403_v44 = vshll.u32 %v236_v29, 16  ;;  %v2200_v46 = vor.u32 %v2199_v36, %v2196_v34  ;;  %v2215_v48 = vrot.slane %v2213_v40, 5  ;;  %v409_v50 = vshll.u32 %v237_v35, 16  ;;  %v266_v34 = vld [vmem:[%s6759_s6 + $0x50] sm:$0x1] }
  0x3f   : > { %v2210_v47 = vor.u32 %v2209_v39, %v2205_v38  ;;  %v398_v52 = vsel %vm6778_vm2, %v393_v42, %v397_v19  ;;  %v402_v53 = vrot.slane %v400_v43, 4  ;;  %v413_v58 = vshrl.u32 %v237_v35, 16 }
  0x40   : > { %v405_v55 = vrot.slane %v403_v44, 5  ;;  %v5231_v61 = vcombine.low %v388_v41, %v398_v52  ;;  %v2201_v2 = vrot.slane %v2200_v46, 4  ;;  %v411_v0 = vrot.slane %v409_v50, 5  ;;  %v5429_v41 = vld [vmem:[%s6759_s6 + $0x54] sm:$0xf] }
  0x41   : > { %v2211_v63 = vrot.slane %v2210_v47, 4  ;;  %v415_v4 = vrot.slane %v413_v58, 4  ;;  %v419_v5 = vshll.u32 %v265_v49, 16  ;;  %v2218_v6 = vshrl.u32 %v5426_v51, 16 }
  0x42   : > { %v406_v1 = vor.u32 %v405_v55, %v402_v53  ;;  %6011 = vmatprep.mubr.msk.bf16.mxu1 %vm720_vm3, %v5231_v61  ;;  %v2206_v7 = vsel %vm6778_vm2, %v2201_v2, %v2205_v38  ;;  %v2221_v11 = vshll.u32 %v5426_v51, 16  ;;  %v2227_v12 = vshll.u32 %v6901_v60, 16  ;;  %v6932_v51 = vld [vmem:[%s6759_s6 + $0x58] sm:$0xf] }
  0x43   : > { %v2216_v8 = vsel %vm6778_vm2, %v2211_v63, %v2215_v48  ;;  %v416_v19 = vor.u32 %v415_v4, %v411_v0  ;;  %v421_v24 = vrot.slane %v419_v5, 5  ;;  %v2220_v26 = vrot.slane %v2218_v6, 4 }
  0x44   : > { %v5465_v17 = vcombine.low %v2206_v7, %v2216_v8  ;;  %v407_v18 = vrot.slane %v406_v1, 4  ;;  %v2223_v3 = vrot.slane %v2221_v11, 5  ;;  %v2229_v27 = vrot.slane %v2227_v12, 5  ;;  %v6942_v8 = vld [vmem:[%s6759_s6 + $0x54] sm:$0xf] }
  0x45   : > { %v2231_v29 = vshrl.u32 %v6901_v60, 16  ;;  %v417_v32 = vrot.slane %v416_v19, 4  ;;  %v2237_v33 = vshll.u32 %v6909_v10, 16  ;;  %v424_v35 = vshrl.u32 %v6913_v15, 16  ;;  %v6948_v19 = vld [vmem:[%s6759_s6 + $0x58] sm:$0xf] }
  0x46   : > { %6147 = vmatprep.mubr.msk.bf16.mxu0 %vm720_vm3, %v5465_v17  ;;  %v412_v31 = vsel %vm6778_vm2, %v407_v18, %v411_v0  ;;  %v2224_v36 = vor.u32 %v2223_v3, %v2220_v26  ;;  %v427_v39 = vshll.u32 %v6913_v15, 16  ;;  %v433_v40 = vshll.u32 %v6916_v25, 16  ;;  %v6938_v0 = vld [vmem:[%s6759_s6 + $0x5c] sm:$0x1] }
  0x47   : > { %v2233_v38 = vrot.slane %v2231_v29, 4  ;;  %v422_v42 = vsel %vm6778_vm2, %v417_v32, %v421_v24  ;;  %v2239_v43 = vrot.slane %v2237_v33, 5  ;;  %v426_v44 = vrot.slane %v424_v35, 4  ;;  %v267_v33 = vld [vmem:[%s6759_s6 + $0x5c] sm:$0x1] }
  0x48   : > { %v437_v46 = vshrl.u32 %v6916_v25, 16  ;;  %v5232_v47 = vcombine.low %v412_v31, %v422_v42  ;;  %v2225_v48 = vrot.slane %v2224_v36, 4  ;;  %v429_v50 = vrot.slane %v427_v39, 5 }
  0x49   : > { %v2234_v49 = vor.u32 %v2233_v38, %v2229_v27  ;;  %v435_v52 = vrot.slane %v433_v40, 5  ;;  %v443_v55 = vshll.u32 %v266_v34, 16  ;;  %v2242_v58 = vshrl.u32 %v5429_v41, 16  ;;  %v5432_v40 = vld [vmem:[%s6759_s6 + $0x60] sm:$0xf] }
  0x4a   : > { %v439_v53 = vrot.slane %v437_v46, 4  ;;  %6012 = vmatmul.mubr.msk.bf16.gmra.mrb[8].mxu1 %vm720_vm3, %v5232_v47  ;;  %v2230_v61 = vsel %vm6778_vm2, %v2225_v48, %v2229_v27  ;;  %v430_v63 = vor.u32 %v429_v50, %v426_v44  ;;  %v2245_v1 = vshll.u32 %v5429_v41, 16  ;;  %v6962_v46 = vld [vmem:[%s6759_s6 + $0x64] sm:$0xf] }
  0x4b   : > { %v2235_v2 = vrot.slane %v2234_v49, 4  ;;  %v445_v5 = vrot.slane %v443_v55, 5  ;;  %v2244_v6 = vrot.slane %v2242_v58, 4  ;;  %v2251_v7 = vshll.u32 %v6932_v51, 16  ;;  %v6969_v55 = vld [vmem:[%s6759_s6 + $0x68] sm:$0x1] }
  0x4c   : > { %v440_v4 = vor.u32 %v439_v53, %v435_v52  ;;  %v431_v12 = vrot.slane %v430_v63, 4  ;;  %v2247_v17 = vrot.slane %v2245_v1, 5  ;;  %v2255_v18 = vshrl.u32 %v6932_v51, 16 }
  0x4d   : > { %v2240_v11 = vsel %vm6778_vm2, %v2235_v2, %v2239_v43  ;;  %v2253_v3 = vrot.slane %v2251_v7, 5  ;;  %v2261_v27 = vshll.u32 %v6938_v0, 16  ;;  %v448_v34 = vshrl.u32 %v6942_v8, 16 }
  0x4e   : > { %v5466_v24 = vcombine.low %v2230_v61, %v2240_v11  ;;  %v441_v26 = vrot.slane %v440_v4, 4  ;;  %v436_v29 = vsel %vm6778_vm2, %v431_v12, %v435_v52  ;;  %v2248_v31 = vor.u32 %v2247_v17, %v2244_v6  ;;  %v6979_v17 = vld [vmem:[%s6759_s6 + $0x64] sm:$0xf] }
  0x4f   : > { %v2257_v32 = vrot.slane %v2255_v18, 4  ;;  %v2263_v36 = vrot.slane %v2261_v27, 5  ;;  %v451_v38 = vshll.u32 %v6942_v8, 16  ;;  %v457_v39 = vshll.u32 %v6948_v19, 16 }
  0x50   : > { %6148 = vmatmul.mubr.msk.bf16.gmra.mrb[8].mxu0 %vm720_vm3, %v5466_v24  ;;  %v446_v35 = vsel %vm6778_vm2, %v441_v26, %v445_v5  ;;  %v2249_v42 = vrot.slane %v2248_v31, 4  ;;  %v450_v44 = vrot.slane %v448_v34, 4  ;;  %v461_v49 = vshrl.u32 %v6948_v19, 16  ;;  %v6973_v5 = vld [vmem:[%s6759_s6 + $0x60] sm:$0xf] }
  0x51   : > { %v5233_v41 = vcombine.low %v436_v29, %v446_v35  ;;  %v2258_v43 = vor.u32 %v2257_v32, %v2253_v3  ;;  %v453_v47 = vrot.slane %v451_v38, 5  ;;  %v459_v48 = vrot.slane %v457_v39, 5  ;;  %v268_v35 = vld [vmem:[%s6759_s6 + $0x68] sm:$0x1] }
  0x52   : > { %v467_v50 = vshll.u32 %v267_v33, 16  ;;  %v2254_v52 = vsel %vm6778_vm2, %v2249_v42, %v2253_v3  ;;  %v2266_v58 = vshrl.u32 %v5432_v40, 16  ;;  %v2269_v61 = vshll.u32 %v5432_v40, 16 }
  0x53   : > { %6015 = vmatprep.mubr.msk.bf16.mxu1 %vm720_vm3, %v5233_v41  ;;  %v2259_v53 = vrot.slane %v2258_v43, 4  ;;  %v454_v2 = vor.u32 %v453_v47, %v450_v44  ;;  %v463_v63 = vrot.slane %v461_v49, 4  ;;  %v2275_v4 = vshll.u32 %v6962_v46, 16  ;;  %v5494_v43 = vld [vmem:[%s6759_s6 + $0xc] sm:$0xe] }
  0x54   : > { %v469_v1 = vrot.slane %v467_v50, 5  ;;  %v2268_v7 = vrot.slane %v2266_v58, 4  ;;  %v2271_v11 = vrot.slane %v2269_v61, 5  ;;  %v2279_v12 = vshrl.u32 %v6962_v46, 16 }
  0x55   : > { %v2264_v6 = vsel %vm6778_vm2, %v2259_v53, %v2263_v36  ;;  %v455_v24 = vrot.slane %v454_v2, 4  ;;  %v464_v26 = vor.u32 %v463_v63, %v459_v48  ;;  %v2277_v3 = vrot.slane %v2275_v4, 5 }
  0x56   : > { %v5467_v18 = vcombine.low %v2254_v52, %v2264_v6  ;;  %v2272_v27 = vor.u32 %v2271_v11, %v2268_v7  ;;  %v2281_v29 = vrot.slane %v2279_v12, 4  ;;  %v2285_v31 = vshll.u32 %v6969_v55, 16  ;;  %v7007_v7 = vld [vmem:[%s6759_s6 + $0x70] sm:$0xf] }
  0x57   : > { %v472_v32 = vshrl.u32 %v6973_v5, 16  ;;  %v460_v33 = vsel %vm6778_vm2, %v455_v24, %v459_v48  ;;  %v465_v34 = vrot.slane %v464_v26, 4  ;;  %v475_v36 = vshll.u32 %v6973_v5, 16  ;;  %v6994_v48 = vld [vmem:[%s6759_s6 + $0x6c] sm:$0xf] }
  0x58   : > { %6151 = vmatprep.mubr.msk.bf16.mxu0 %vm720_vm3, %v5467_v18  ;;  %v481_v38 = vshll.u32 %v6979_v17, 16  ;;  %v2273_v39 = vrot.slane %v2272_v27, 4  ;;  %v2282_v40 = vor.u32 %v2281_v29, %v2277_v3  ;;  %v2287_v41 = vrot.slane %v2285_v31, 5  ;;  %v269_v31 = vld [vmem:[%s6759_s6 + $0x74] sm:$0x1] }
  0x59   : > { %v474_v42 = vrot.slane %v472_v32, 4  ;;  %v470_v44 = vsel %vm6778_vm2, %v465_v34, %v469_v1  ;;  %v477_v47 = vrot.slane %v475_v36, 5  ;;  %v485_v50 = vshrl.u32 %v6979_v17, 16  ;;  %v5495_v32 = vld [vmem:[%s6759_s6 + $0x18] sm:$0xe] }
  0x5a   : > { %v483_v49 = vrot.slane %v481_v38, 5  ;;  %v5234_v52 = vcombine.low %v460_v33, %v470_v44  ;;  %v2278_v53 = vsel %vm6778_vm2, %v2273_v39, %v2277_v3  ;;  %v2283_v58 = vrot.slane %v2282_v40, 4  ;;  %v7026_v38 = vld [vmem:[%s6759_s6 + $0x78] sm:$0xf] }
  0x5b   : > { %v491_v61 = vshll.u32 %v268_v35, 16  ;;  %v478_v63 = vor.u32 %v477_v47, %v474_v42  ;;  %v487_v1 = vrot.slane %v485_v50, 4  ;;  %v5510_v4 = vrot.slane %v5494_v43, 9  ;;  %v5496_v47 = vld [vmem:[%s6759_s6 + $0x24] sm:$0xe] }
  0x5c   : > { %v2847_v6 = vrot.slane %v2845_v56, 4  ;;  %6016 = vmatmul.mubr.msk.bf16.gmra.mrb[12].mxu1 %vm720_vm3, %v5234_v52  ;;  %v2288_v11 = vsel %vm6778_vm2, %v2283_v58, %v2287_v41  ;;  %v496_v18 = vshrl.u32 %v6994_v48, 16  ;;  %v499_v24 = vshll.u32 %v6994_v48, 16  ;;  %v270_v41 = vld [vmem:[%s6759_s6 + $0x80] sm:$0x1] }
  0x5d   : > { %v493_v12 = vrot.slane %v491_v61, 5  ;;  %v5468_v26 = vcombine.low %v2278_v53, %v2288_v11  ;;  %v479_v3 = vrot.slane %v478_v63, 4  ;;  %v488_v27 = vor.u32 %v487_v1, %v483_v49 }
  0x5e   : > { %v2846_v29 = vsel %vm7000_vm6, %v5510_v4, %v2845_v56  ;;  %v2849_v33 = vsel %vm7000_vm6, %v2847_v6, %v2848_v57  ;;  %v498_v34 = vrot.slane %v496_v18, 4  ;;  %v501_v35 = vrot.slane %v499_v24, 5  ;;  %v7060_v24 = vld [vmem:[%s6759_s6 + $0x88] sm:$0xf] }
  0x5f   : > { %v505_v36 = vshll.u32 %v7007_v7, 16  ;;  %6152 = vmatmul.mubr.msk.bf16.gmra.mrb[12].mxu0 %vm720_vm3, %v5468_v26  ;;  %v484_v13 = vsel %vm6778_vm2, %v479_v3, %v483_v49  ;;  %v489_v56 = vrot.slane %v488_v27, 4  ;;  %v5528_v39 = vcombine.low %v2846_v29, %v2849_v33 }
  0x60   : > { %v509_v40 = vshrl.u32 %v7007_v7, 16  ;;  %v502_v57 = vor.u32 %v501_v35, %v498_v34  ;;  %v515_v43 = vshll.u32 %v269_v31, 16  ;;  %v5511_v44 = vrot.slane %v5495_v32, 9  ;;  %v271_v35 = vld [vmem:[%s6759_s6 + $0x8c] sm:$0x1] }
  0x61   : > { %v507_v42 = vrot.slane %v505_v36, 5  ;;  %v494_v50 = vsel %vm6778_vm2, %v489_v56, %v493_v12  ;;  %6173 = vmatprep.mubr.msk.bf16.mxu0 %vm720_vm3, %v5528_v39  ;;  %v2856_v49 = vsel %vm7000_vm6, %v6814_v23, %v2855_v21  ;;  %v520_v53 = vshrl.u32 %v7026_v38, 16  ;;  %v7052_v12 = vld [vmem:[%s6759_s6 + $0x84] sm:$0xf] }
  0x62   : > { %v511_v52 = vrot.slane %v509_v40, 4  ;;  %v5235_v58 = vcombine.low %v484_v13, %v494_v50  ;;  %v503_v61 = vrot.slane %v502_v57, 4  ;;  %v517_v63 = vrot.slane %v515_v43, 5  ;;  %v5497_v40 = vld [vmem:[%s6759_s6 + $0x30] sm:$0xe] }
  0x63   : > { %v2853_v1 = vsel %vm7000_vm6, %v5511_v44, %v2852_v16  ;;  %v522_v11 = vrot.slane %v520_v53, 4  ;;  %v523_v59 = vshll.u32 %v7026_v38, 16  ;;  %v529_v23 = vshll.u32 %v7033_v14, 16  ;;  %v7065_v16 = vld [vmem:[%s8627_s1 + $0x38] sm:$0xff]   ;;  %v7084_v50 = vld [vmem:[%s6759_s6 + $0x90] sm:$0xf] }
  0x64   : > { %v512_v4 = vor.u32 %v511_v52, %v507_v42  ;;  %v5529_v6 = vcombine.low %v2853_v1, %v2856_v49  ;;  %6019 = vmatprep.mubr.msk.bf16.mxu1 %vm720_vm3, %v5235_v58  ;;  %v508_v21 = vsel %vm6778_vm2, %v503_v61, %v507_v42  ;;  %v533_v54 = vshrl.u32 %v7033_v14, 16  ;;  %v7089_v58 = vld [vmem:[%s6759_s6 + $0x94] sm:$0xf] }
  0x65   : > { %v539_v18 = vshll.u32 %v270_v41, 16  ;;  %v525_v3 = vrot.slane %v523_v59, 5  ;;  %v5512_v27 = vrot.slane %v5496_v47, 9  ;;  %v2859_v29 = vrot.slane %v6821_v37, 5 }
  0x66   : > { %v513_v26 = vrot.slane %v512_v4, 4  ;;  %v531_v31 = vrot.slane %v529_v23, 5  ;;  %v535_v32 = vrot.slane %v533_v54, 4  ;;  %v2862_v34 = vrot.slane %v6830_v45, 5  ;;  %v272_v23 = vld [vmem:[%s6759_s6 + $0x98] sm:$0x1] }
  0x67   : > { %v541_v33 = vrot.slane %v539_v18, 5  ;;  %6174 = vmatmul.mubr.msk.bf16.vlgmr.msra.gmra.mrb[0].mxu0 %vm720_vm3, %v5529_v6  ;;  %v526_v13 = vor.u32 %v525_v3, %v522_v11  ;;  %v2860_v56 = vsel %vm7000_vm6, %v5512_v27, %v2859_v29  ;;  %v2861_v39 = vrot.slane %v2859_v29, 4  ;;  %v5498_v27 = vld [vmem:[%s6759_s6 + $0x3c] sm:$0xe] }
  0x68   : > { %v518_v36 = vsel %vm6778_vm2, %v513_v26, %v517_v63  ;;  %6206 = vmatpush3.bf16.msra.mxu0 %v6841_v62  ;;  %v536_v37 = vor.u32 %v535_v32, %v531_v31  ;;  %v544_v45 = vshrl.u32 %v7052_v12, 16  ;;  %v547_v57 = vshll.u32 %v7052_v12, 16 }
  0x69   : > { %v5236_v41 = vcombine.low %v508_v21, %v518_v36  ;;  %v527_v42 = vrot.slane %v526_v13, 4  ;;  %v2863_v43 = vsel %vm7000_vm6, %v2861_v39, %v2862_v34  ;;  %v553_v44 = vshll.u32 %v7060_v24, 16  ;;  %6239 = vmatprep.subr.bf16.mxu0 %v7065_v16 }
  0x6a   : > { %v557_v47 = vshrl.u32 %v7060_v24, 16  ;;  %v537_v62 = vrot.slane %v536_v37, 4  ;;  %v5530_v52 = vcombine.low %v2860_v56, %v2863_v43  ;;  %v546_v49 = vrot.slane %v544_v45, 4 }
  0x6b   : > { %6020 = vmatmul.mubr.msk.bf16.gmra.mrb[16].mxu1 %vm720_vm3, %v5236_v41  ;;  %v549_v53 = vrot.slane %v547_v57, 5  ;;  %v532_v61 = vsel %vm6778_vm2, %v527_v42, %v531_v31  ;;  %v555_v63 = vrot.slane %v553_v44, 5  ;;  %v563_v4 = vshll.u32 %v271_v35, 16  ;;  %v7117_v42 = vld [vmem:[%s6759_s6 + $0xa0] sm:$0xf] }
  0x6c   : > { %v559_v1 = vrot.slane %v557_v47, 4  ;;  %v542_v6 = vsel %vm6778_vm2, %v537_v62, %v541_v33  ;;  %6177 = vmatprep.mubr.msk.bf16.mxu0 %vm720_vm3, %v5530_v52  ;;  %v5513_v59 = vrot.slane %v5497_v40, 9  ;;  %v2866_v21 = vrot.slane %v6854_v22, 5  ;;  %v7112_v40 = vld [vmem:[%s6759_s6 + $0x9c] sm:$0xf] }
  0x6d   : > { %v550_v11 = vor.u32 %v549_v53, %v546_v49  ;;  %v5237_v54 = vcombine.low %v532_v61, %v542_v6  ;;  %v565_v26 = vrot.slane %v563_v4, 5  ;;  %v2869_v3 = vrot.slane %v6861_v30, 5  ;;  %v273_v52 = vld [vmem:[%s6759_s6 + $0xa4] sm:$0x1] }
  0x6e   : > { %v560_v18 = vor.u32 %v559_v1, %v555_v63  ;;  %v2867_v31 = vsel %vm7000_vm6, %v5513_v59, %v2866_v21  ;;  %v2868_v32 = vrot.slane %v2866_v21, 4  ;;  %v568_v33 = vshrl.u32 %v7084_v50, 16  ;;  %v5499_v59 = vld [vmem:[%s6759_s6 + $0x48] sm:$0xe] }
  0x6f   : > { %v551_v29 = vrot.slane %v550_v11, 4  ;;  %6023 = vmatprep.mubr.msk.bf16.mxu1 %vm720_vm3, %v5237_v54  ;;  %v571_v22 = vshll.u32 %v7084_v50, 16  ;;  %v577_v35 = vshll.u32 %v7089_v58, 16  ;;  %v581_v36 = vshrl.u32 %v7089_v58, 16 }
  0x70   : > { %v561_v34 = vrot.slane %v560_v18, 4  ;;  %v2870_v13 = vsel %vm7000_vm6, %v2868_v32, %v2869_v3  ;;  %v570_v56 = vrot.slane %v568_v33, 4  ;;  %v587_v39 = vshll.u32 %v272_v23, 16  ;;  %v7136_v33 = vld [vmem:[%s6759_s6 + $0xa8] sm:$0xf] }
  0x71   : > { %v556_v30 = vsel %vm6778_vm2, %v551_v29, %v555_v63  ;;  %v5531_v37 = vcombine.low %v2867_v31, %v2870_v13  ;;  %v573_v45 = vrot.slane %v571_v22, 5  ;;  %v579_v57 = vrot.slane %v577_v35, 5 }
  0x72   : > { %v566_v41 = vsel %vm6778_vm2, %v561_v34, %v565_v26  ;;  %v583_v44 = vrot.slane %v581_v36, 4  ;;  %v589_v47 = vrot.slane %v587_v39, 5  ;;  %v5514_v62 = vrot.slane %v5498_v27, 9 }
  0x73   : > { %v5238_v43 = vcombine.low %v556_v30, %v566_v41  ;;  %6178 = vmatmul.mubr.msk.bf16.gmra.mrb[4].mxu0 %vm720_vm3, %v5531_v37  ;;  %v574_v49 = vor.u32 %v573_v45, %v570_v56  ;;  %v2873_v53 = vrot.slane %v6878_v9, 5  ;;  %v2876_v61 = vrot.slane %v6883_v20, 5  ;;  %v7141_v30 = vld [vmem:[%s6759_s6 + $0xac] sm:$0xf]  ;;  %v274_v37 = vld [vmem:[%s6759_s6 + $0xb0] sm:$0x1] }
  0x74   : > { %v592_v63 = vshrl.u32 %v7112_v40, 16  ;;  %v584_v1 = vor.u32 %v583_v44, %v579_v57  ;;  %v595_v4 = vshll.u32 %v7112_v40, 16  ;;  %v601_v6 = vshll.u32 %v7117_v42, 16  ;;  %v5500_v45 = vld [vmem:[%s6759_s6 + $0x54] sm:$0xe] }
  0x75   : > { %6024 = vmatmul.mubr.msk.bf16.gmra.mrb[20].mxu1 %vm720_vm3, %v5238_v43  ;;  %v605_v11 = vshrl.u32 %v7117_v42, 16  ;;  %v575_v21 = vrot.slane %v574_v49, 4  ;;  %v2874_v23 = vsel %vm7000_vm6, %v5514_v62, %v2873_v53  ;;  %v2875_v9 = vrot.slane %v2873_v53, 4  ;;  %v7151_v62 = vld [vmem:[%s6759_s6 + $0xb4] sm:$0xf] }
  0x76   : > { %v594_v20 = vrot.slane %v592_v63, 4  ;;  %v585_v54 = vrot.slane %v584_v1, 4  ;;  %v597_v18 = vrot.slane %v595_v4, 5  ;;  %v603_v26 = vrot.slane %v601_v6, 5  ;;  %v7163_v4 = vld [vmem:[%s6759_s6 + $0xb8] sm:$0xf] }
  0x77   : > { %v607_v3 = vrot.slane %v605_v11, 4  ;;  %v580_v27 = vsel %vm6778_vm2, %v575_v21, %v579_v57  ;;  %v2877_v29 = vsel %vm7000_vm6, %v2875_v9, %v2876_v61  ;;  %v611_v31 = vshll.u32 %v273_v52, 16 }
  0x78   : > { %v5515_v32 = vrot.slane %v5499_v59, 9  ;;  %v590_v34 = vsel %vm6778_vm2, %v585_v54, %v589_v47  ;;  %v5532_v22 = vcombine.low %v2874_v23, %v2877_v29  ;;  %v598_v35 = vor.u32 %v597_v18, %v594_v20  ;;  %v275_v18 = vld [vmem:[%s6759_s6 + $0xbc] sm:$0x1] }
  0x79   : > { %v608_v36 = vor.u32 %v607_v3, %v603_v26  ;;  %v5239_v13 = vcombine.low %v580_v27, %v590_v34  ;;  %v613_v56 = vrot.slane %v611_v31, 5  ;;  %v2880_v39 = vrot.slane %v6901_v60, 5  ;;  %v5501_v31 = vld [vmem:[%s6759_s6 + $0x60] sm:$0xe] }
  0x7a   : > { %v2883_v41 = vrot.slane %v6909_v10, 5  ;;  %6181 = vmatprep.mubr.msk.bf16.mxu0 %vm720_vm3, %v5532_v22  ;;  %v599_v57 = vrot.slane %v598_v35, 4  ;;  %v616_v44 = vshrl.u32 %v7136_v33, 16  ;;  %v619_v47 = vshll.u32 %v7136_v33, 16 }
  0x7b   : > { %v609_v43 = vrot.slane %v608_v36, 4  ;;  %6027 = vmatprep.mubr.msk.bf16.mxu1 %vm720_vm3, %v5239_v13  ;;  %v2881_v60 = vsel %vm7000_vm6, %v5515_v32, %v2880_v39  ;;  %v2882_v52 = vrot.slane %v2880_v39, 4  ;;  %v625_v10 = vshll.u32 %v7141_v30, 16  ;;  %v5502_v36 = vld [vmem:[%s6759_s6 + $0x6c] sm:$0xe] }
  0x7c   : > { %v629_v49 = vshrl.u32 %v7141_v30, 16  ;;  %v604_v53 = vsel %vm6778_vm2, %v599_v57, %v603_v26  ;;  %v618_v63 = vrot.slane %v616_v44, 4  ;;  %v621_v1 = vrot.slane %v619_v47, 5 }
  0x7d   : > { %v614_v61 = vsel %vm6778_vm2, %v609_v43, %v613_v56  ;;  %v2884_v11 = vsel %vm7000_vm6, %v2882_v52, %v2883_v41  ;;  %v627_v59 = vrot.slane %v625_v10, 5  ;;  %v635_v20 = vshll.u32 %v274_v37, 16  ;;  %v5437_v52 = vld [vmem:[%s6759_s6 + $0x74] sm:$0x1] }
  0x7e   : > { %v5240_v6 = vcombine.low %v604_v53, %v614_v61  ;;  %v631_v21 = vrot.slane %v629_v49, 4  ;;  %v5533_v23 = vcombine.low %v2881_v60, %v2884_v11  ;;  %v622_v9 = vor.u32 %v621_v1, %v618_v63  ;;  %v5436_v60 = vld [vmem:[%s6759_s6 + $0x70] sm:$0xf] }
  0x7f   : > { %v5516_v54 = vrot.slane %v5500_v45, 9  ;;  %v2887_v3 = vrot.slane %v6932_v51, 5  ;;  %v2890_v27 = vrot.slane %v6938_v0, 5  ;;  %v640_v29 = vshrl.u32 %v7151_v62, 16 }
  0x80   : > { %6028 = vmatmul.mubr.msk.bf16.gmra.mrb[24].mxu1 %vm720_vm3, %v5240_v6  ;;  %v632_v26 = vor.u32 %v631_v21, %v627_v59  ;;  %6182 = vmatmul.mubr.msk.bf16.gmra.mrb[8].mxu0 %vm720_vm3, %v5533_v23  ;;  %v623_v32 = vrot.slane %v622_v9, 4  ;;  %v637_v34 = vrot.slane %v635_v20, 5  ;;  %v643_v22 = vshll.u32 %v7151_v62, 16 }
  0x81   : > { %v649_v35 = vshll.u32 %v7163_v4, 16  ;;  %v2888_v51 = vsel %vm7000_vm6, %v5516_v54, %v2887_v3  ;;  %v2889_v56 = vrot.slane %v2887_v3, 4  ;;  %v642_v0 = vrot.slane %v640_v29, 4  ;;  %v5503_v54 = vld [vmem:[%s6759_s6 + $0x78] sm:$0xe] }
  0x82   : > { %v633_v13 = vrot.slane %v632_v26, 4  ;;  %v628_v39 = vsel %vm6778_vm2, %v623_v32, %v627_v59  ;;  %v645_v41 = vrot.slane %v643_v22, 5  ;;  %v653_v45 = vshrl.u32 %v7163_v4, 16  ;;  %v6631_v29 = vld [vmem:[%s6759_s6] sm:$0xf] }
  0x83   : > { %v651_v37 = vrot.slane %v649_v35, 5  ;;  %v2891_v43 = vsel %vm7000_vm6, %v2889_v56, %v2890_v27  ;;  %v659_v44 = vshll.u32 %v275_v18, 16  ;;  %v5517_v47 = vrot.slane %v5501_v31, 9  ;;  %v7203_v31 = vld [vmem:[%s6759_s6 + $0x4] sm:$0xf] }
  0x84   : > { %v638_v57 = vsel %vm6778_vm2, %v633_v13, %v637_v34  ;;  %v5534_v49 = vcombine.low %v2888_v51, %v2891_v43  ;;  %v646_v53 = vor.u32 %v645_v41, %v642_v0  ;;  %v655_v61 = vrot.slane %v653_v45, 4  ;;  %v7207_v34 = vld [vmem:[%s6759_s6 + $0x7c] sm:$0xf]  ;;  %v7210_v22 = vld [vmem:[%s6759_s6 + $0x80] sm:$0x1] }
  0x85   : > { %v5241_v10 = vcombine.low %v628_v39, %v638_v57  ;;  %v661_v63 = vrot.slane %v659_v44, 5  ;;  %v2894_v1 = vrot.slane %v6962_v46, 5  ;;  %v2897_v6 = vrot.slane %v6969_v55, 5  ;;  %v5504_v35 = vld [vmem:[%s6759_s6 + $0x84] sm:$0xe] }
  0x86   : > { %v5518_v11 = vrot.slane %v5502_v36, 9  ;;  %6185 = vmatprep.mubr.msk.bf16.mxu0 %vm720_vm3, %v5534_v49  ;;  %v647_v59 = vrot.slane %v646_v53, 4  ;;  %v656_v21 = vor.u32 %v655_v61, %v651_v37  ;;  %v2901_v23 = vrot.slane %v5436_v60, 5  ;;  %v5442_v0 = vld [vmem:[%s6759_s6 + $0x88] sm:$0xf] }
  0x87   : > { %6031 = vmatprep.mubr.msk.bf16.mxu1 %vm720_vm3, %v5241_v10  ;;  %v2904_v9 = vrot.slane %v5437_v52, 5  ;;  %v2895_v20 = vsel %vm7000_vm6, %v5517_v47, %v2894_v1  ;;  %v2896_v46 = vrot.slane %v2894_v1, 4  ;;  %v5260_v32 = vcombine.low %v6631_v29, %v7203_v31  ;;  %v5443_v39 = vld [vmem:[%s6759_s6 + $0x8c] sm:$0x1]  ;;  %v5445_v45 = vld [vmem:[%s6759_s6 + $0x94] sm:$0xf] }
  0x88   : > { %v652_v55 = vsel %vm6778_vm2, %v647_v59, %v651_v37  ;;  %v657_v18 = vrot.slane %v656_v21, 4  ;;  %v2902_v26 = vsel %vm7000_vm6, %v5518_v11, %v2901_v23  ;;  %v2903_v3 = vrot.slane %v2901_v23, 4  ;;  %v5446_v52 = vld [vmem:[%s6759_s6 + $0x98] sm:$0x1]  ;;  %v5505_v10 = vld [vmem:[%s6759_s6 + $0x90] sm:$0xe] }
  0x89   : > { %v2898_v27 = vsel %vm7000_vm6, %v2896_v46, %v2897_v6  ;;  %v5519_v56 = vrot.slane %v5503_v54, 9  ;;  %v2908_v57 = vrot.slane %v7207_v34, 5  ;;  %v2911_v43 = vrot.slane %v7210_v22, 5  ;;  %v5449_v11 = vld [vmem:[%s6759_s6 + $0xa4] sm:$0x1] }
  0x8a   : > { %v662_v36 = vsel %vm6778_vm2, %v657_v18, %v661_v63  ;;  %v5535_v13 = vcombine.low %v2895_v20, %v2898_v27  ;;  %v2905_v51 = vsel %vm7000_vm6, %v2903_v3, %v2904_v9  ;;  %v5520_v44 = vrot.slane %v5504_v35, 9  ;;  %v5448_v63 = vld [vmem:[%s6759_s6 + $0xa0] sm:$0xf]  ;;  %v5506_v59 = vld [vmem:[%s6759_s6 + $0x9c] sm:$0xe] }
  0x8b   : > { %v5242_v41 = vcombine.low %v652_v55, %v662_v36  ;;  %v5536_v37 = vcombine.low %v2902_v26, %v2905_v51  ;;  %v2915_v47 = vrot.slane %v5442_v0, 5  ;;  %v2918_v60 = vrot.slane %v5443_v39, 5  ;;  %v6633_v21 = vld [vmem:[%s6759_s6 + $0xc] sm:$0xf]  ;;  %v7237_v23 = vld [vmem:[%s6759_s6 + $0x10] sm:$0xf] }
  0x8c   : > { %6186 = vmatmul.mubr.msk.bf16.gmra.mrb[12].mxu0 %vm720_vm3, %v5535_v13  ;;  %v2909_v49 = vsel %vm7000_vm6, %v5519_v56, %v2908_v57  ;;  %v2910_v53 = vrot.slane %v2908_v57, 4  ;;  %v2922_v61 = vrot.slane %v5445_v45, 5  ;;  %v5261_v9 = vcombine.low %v6633_v21, %v7237_v23  ;;  %v6635_v27 = vld [vmem:[%s6759_s6 + $0x18] sm:$0xf]  ;;  %v7246_v29 = vld [vmem:[%s6759_s6 + $0x1c] sm:$0xf] }
  0x8d   : > { %6032 = vmatmul.mubr.msk.bf16.gmra.mrb[28].mxu1 %vm720_vm3, %v5242_v41  ;;  %6189 = vmatprep.mubr.msk.bf16.mxu0 %vm720_vm3, %v5536_v37  ;;  %v2916_v1 = vsel %vm7000_vm6, %v5520_v44, %v2915_v47  ;;  %v2917_v6 = vrot.slane %v2915_v47, 4  ;;  %v5521_v46 = vrot.slane %v5505_v10, 9  ;;  %v2925_v54 = vrot.slane %v5446_v52, 5  ;;  %v5451_v51 = vld [vmem:[%s6759_s6 + $0xac] sm:$0xf]  ;;  %v7254_v39 = vld [vmem:[%s8627_s1 + $0x18] sm:$0xff]  }
  0x8e   : > { %6037 = vmatprep.mubr.msk.bf16.mxu1 %vm720_vm3, %v5260_v32  ;;  %v2912_v20 = vsel %vm7000_vm6, %v2910_v53, %v2911_v43  ;;  %v2924_v26 = vrot.slane %v2922_v61, 4  ;;  %v2929_v3 = vrot.slane %v5448_v63, 5  ;;  %v5262_v32 = vcombine.low %v6635_v27, %v7246_v29  ;;  %v5454_v0 = vld [vmem:[%s6759_s6 + $0xb8] sm:$0xf]  ;;  %v6637_v57 = vld [vmem:[%s8627_s1 + $0x10] sm:$0xff]  }
  0x8f   : > { %v5537_v55 = vcombine.low %v2909_v49, %v2912_v20  ;;  %v2919_v18 = vsel %vm7000_vm6, %v2917_v6, %v2918_v60  ;;  %v5522_v36 = vrot.slane %v5506_v59, 9  ;;  %v2932_v13 = vrot.slane %v5449_v11, 5  ;;  %v5452_v47 = vld [vmem:[%s6759_s6 + $0xb0] sm:$0x1]  ;;  %v5507_v60 = vld [vmem:[%s6759_s6 + $0xa8] sm:$0xe] }
  0x90   : > { %v5538_v35 = vcombine.low %v2916_v1, %v2919_v18  ;;  %v2931_v56 = vrot.slane %v2929_v3, 4  ;;  %v2923_v41 = vsel %vm7000_vm6, %v5521_v46, %v2922_v61  ;;  %v2926_v37 = vsel %vm7000_vm6, %v2924_v26, %v2925_v54  ;;  %v5455_v10 = vld [vmem:[%s6759_s6 + $0xbc] sm:$0x1]  ;;  %v5508_v49 = vld [vmem:[%s6759_s6 + $0xb4] sm:$0xe] }
  0x91   : > { %v2936_v45 = vrot.slane %v5451_v51, 5  ;;  %v2930_v43 = vsel %vm7000_vm6, %v5522_v36, %v2929_v3  ;;  %v2943_v52 = vrot.slane %v5454_v0, 5  ;;  %v6638_v53 = vld [vmem:[%s6759_s6 + $0x24] sm:$0xf]  ;;  %v7278_v61 = vld [vmem:[%s6759_s6 + $0x28] sm:$0xf]  ;;  %v5539_v1 = vcombine.low %v2923_v41, %v2926_v37 }
  0x92   : > { %v2933_v44 = vsel %vm7000_vm6, %v2931_v56, %v2932_v13  ;;  %v5263_v63 = vcombine.low %v6638_v53, %v7278_v61  ;;  %v5457_v6 = vld [vmem:[%s6759_s6 + $0xc4] sm:$0xf]  ;;  %v5523_v59 = vrot.slane %v5507_v60, 9  ;;  %v6640_v20 = vld [vmem:[%s6759_s6 + $0x30] sm:$0xf]  ;;  %v2946_v26 = vrot.slane %v5455_v10, 5 }
  0x93   : > { %v5540_v11 = vcombine.low %v2930_v43, %v2933_v44  ;;  %v2938_v21 = vrot.slane %v2936_v45, 4  ;;  %v7284_v46 = vld [vmem:[%s6759_s6 + $0x34] sm:$0xf]  ;;  %v2945_v18 = vrot.slane %v2943_v52, 4  ;;  %v5458_v13 = vld [vmem:[%s6759_s6 + $0xc8] sm:$0x1] }
  0x94   : > { %6190 = vmatmul.mubr.msk.bf16.gmra.mrb[16].mxu0 %vm720_vm3, %v5537_v55  ;;  %v5264_v54 = vcombine.low %v6640_v20, %v7284_v46  ;;  %v5524_v55 = vrot.slane %v5508_v49, 9  ;;  %v2937_v3 = vsel %vm7000_vm6, %v5523_v59, %v2936_v45  ;;  %v5509_v51 = vld [vmem:[%s6759_s6 + $0xc0] sm:$0xe]  ;;  %v6642_v56 = vld [vmem:[%s6759_s6 + $0x3c] sm:$0xf]  ;;  %v2953_v44 = vrot.slane %v5458_v13, 5 }
  0x95   : > { %6038 = vmatmul.mubr.msk.bf16.vlgmr.msra.gmra.mrb[0].mxu1 %vm720_vm3, %v5261_v9  ;;  %6193 = vmatprep.mubr.msk.bf16.mxu0 %vm720_vm3, %v5538_v35  ;;  %v2939_v9 = vrot.slane %v5452_v47, 5  ;;  %v2947_v36 = vsel %vm7000_vm6, %v2945_v18, %v2946_v26  ;;  %v7303_v0 = vld [vmem:[%s6759_s6 + $0x40] sm:$0xf]  ;;  %v5266_v47 = vcombine.low %v6913_v15, %v6916_v25  ;;  %v2323_v10 = vshll.u32 %v7207_v34, 16  ;;  %v6589_v53 = vld [vmem:[%s6759_s6 + $0x18] sm:$0xff]  }
  0x96   : > { %6070 = vmatpush3.bf16.msra.mxu1 %v6637_v57  ;;  %6041 = vmatprep.mubr.msk.bf16.mxu1 %vm720_vm3, %v5262_v32  ;;  %v2950_v32 = vrot.slane %v5457_v6, 5  ;;  %v2944_v35 = vsel %vm7000_vm6, %v5524_v55, %v2943_v52  ;;  %v5265_v41 = vcombine.low %v6642_v56, %v7303_v0  ;;  %v5525_v57 = vrot.slane %v5509_v51, 9 }
  0x97   : > { %6103 = vmatprep.subr.bf16.mxu1 %v7254_v39  ;;  %v2940_v27 = vsel %vm7000_vm6, %v2938_v21, %v2939_v9  ;;  %v5542_v45 = vcombine.low %v2944_v35, %v2947_v36  ;;  %v2327_v15 = vshrl.u32 %v7207_v34, 16  ;;  %v5267_v49 = vcombine.low %v6942_v8, %v6948_v19  ;;  %v1225_v8 = vld [vmem:[%s6759_s6] sm:$0xe]  ;;  %v1226_v19 = vld [vmem:[%s6759_s6 + $0xc] sm:$0xe] }
  0x98   : > { %v5541_v37 = vcombine.low %v2937_v3, %v2940_v27  ;;  %v2952_v43 = vrot.slane %v2950_v32, 4  ;;  %v2951_v60 = vsel %vm7000_vm6, %v5525_v57, %v2950_v32  ;;  %v1285_v21 = vrot.slane %v7237_v23, 5  ;;  %v1227_v34 = vld [vmem:[%s6759_s6 + $0x18] sm:$0xe]  ;;  %v6592_v27 = vld [vmem:[%s6759_s6 + $0x24] sm:$0xff]   ;;  %v6594_v32 = vld [vmem:[%s6759_s6 + $0x30] sm:$0xff]  }
  0x99   : > { %v2329_v6 = vrot.slane %v2327_v15, 4  ;;  %v2333_v9 = vshll.u32 %v7210_v22, 16  ;;  %v1278_v23 = vrot.slane %v7203_v31, 5  ;;  %v1292_v20 = vrot.slane %v7246_v29, 5  ;;  %v1229_v36 = vld [vmem:[%s6759_s6 + $0x30] sm:$0xe] }
  0x9a   : > { %v2954_v52 = vsel %vm7000_vm6, %v2952_v43, %v2953_v44  ;;  %v5269_v18 = vcombine.low %v6994_v48, %v7007_v7  ;;  %v1299_v26 = vrot.slane %v7278_v61, 5  ;;  %v1306_v3 = vrot.slane %v7284_v46, 5  ;;  %v6646_v48 = vld [vmem:[%s6759_s6 + $0x20] sm:$0x1]  ;;  %v6647_v57 = vld [vmem:[%s6759_s6 + $0x2c] sm:$0x1] }
  0x9b   : > { %v5543_v25 = vcombine.low %v2951_v60, %v2954_v52  ;;  %v5270_v22 = vcombine.low %v7026_v38, %v7033_v14  ;;  %v5271_v31 = vcombine.low %v7052_v12, %v7060_v24  ;;  %v5293_v29 = vrot.slane %v1225_v8, 9  ;;  %v7355_v46 = vld [vmem:[%s8627_s1 + $0x40] sm:$0xff]  }
  0x9c   : > { %6194 = vmatmul.mubr.msk.bf16.gmra.mrb[20].mxu0 %vm720_vm3, %v5539_v1  ;;  %v7323_v1 = vrot.slane %v2323_v10, 5  ;;  %v5294_v35 = vrot.slane %v1226_v19, 9  ;;  %v1287_v13 = vrot.slane %v1285_v21, 4  ;;  %v5295_v51 = vrot.slane %v1227_v34, 9  ;;  %v6648_v10 = vld [vmem:[%s6759_s6 + $0x38] sm:$0x1] }
  0x9d   : > { %6042 = vmatmul.mubr.msk.bf16.gmra.mrb[4].mxu1 %vm720_vm3, %v5263_v63  ;;  %6197 = vmatprep.mubr.msk.bf16.mxu0 %vm720_vm3, %v5540_v11  ;;  %v5268_v63 = vcombine.low %v6973_v5, %v6979_v17  ;;  %v6644_v11 = vld [vmem:[%s6759_s6 + $0x8] sm:$0x1]  ;;  %v6645_v5 = vld [vmem:[%s6759_s6 + $0x14] sm:$0x1]  ;;  %v1295_v7 = vrot.slane %v6646_v48, 5  ;;  %v5272_v38 = vcombine.low %v7084_v50, %v7089_v58  ;;  %v5273_v14 = vcombine.low %v7112_v40, %v7117_v42 }
  0x9e   : > { %6045 = vmatprep.mubr.msk.bf16.mxu1 %vm720_vm3, %v5264_v54  ;;  %8648 = vst [vmem:[#allocation2_spill] sm:$0xff] %v7323_v1  ;;  %v1281_v59 = vrot.slane %v6644_v11, 5  ;;  %v1288_v17 = vrot.slane %v6645_v5, 5  ;;  %v1228_v54 = vld [vmem:[%s6759_s6 + $0x24] sm:$0xe]  ;;  %v2330_v55 = vor.u32 %v2329_v6, %v7323_v1  ;;  %v1280_v56 = vrot.slane %v1278_v23, 4 }
  0x9f   : > { %v5296_v61 = vrot.slane %v1228_v54, 9  ;;  %v1302_v43 = vrot.slane %v6647_v57, 5  ;;  %v5297_v44 = vrot.slane %v1229_v36, 9  ;;  %v5274_v60 = vcombine.low %v7136_v33, %v7141_v30  ;;  %v1231_v6 = vld [vmem:[%s6759_s6 + $0x48] sm:$0xe]  ;;  %v6600_v58 = vld [vmem:[%s6759_s6 + $0x54] sm:$0xff]  }
  0xa0   : > { %v7368_v52 = vsel %vm7000_vm6, %v5293_v29, %v1278_v23  ;;  %v1309_v15 = vrot.slane %v6648_v10, 5  ;;  %v7389_v11 = vrot.slane %v2330_v55, 4  ;;  %v5628_v34 = vld [vmem:[%s6759_s6 + $0x18] sm:$0xf]  ;;  %v6598_v5 = vld [vmem:[%s6759_s6 + $0x48] sm:$0xff]  }
  0xa1   : > { %v7404_v19 = vsel %vm7000_vm6, %v5296_v61, %v1299_v26  ;;  %v6649_v23 = vld [vmem:[%s6759_s6 + $0x44] sm:$0x1]  ;;  %v1232_v55 = vld [vmem:[%s6759_s6 + $0x54] sm:$0xe]  ;;  %v3668_v48 = vshll.u32 %v5628_v34, 16 }
  0xa2   : > { %8650 = vst [vmem:[#allocation4_spill] sm:$0xff] %v7389_v11  ;;  %v5300_v10 = vrot.slane %v1232_v55, 9  ;;  %v5634_v55 = vld [vmem:[%s6759_s6 + $0x30] sm:$0xf]  ;;  %v5635_v50 = vld [vmem:[%s6759_s6 + $0x34] sm:$0xf] }
  0xa3   : > { %v3670_v24 = vrot.slane %v3668_v48, 5 }
  0xa4   : > { %6198 = vmatmul.mubr.msk.bf16.gmra.mrb[24].mxu0 %vm720_vm3, %v5541_v37  ;;  %v1230_v37 = vld [vmem:[%s6759_s6 + $0x3c] sm:$0xe] }
  0xa5   : > { %6046 = vmatmul.mubr.msk.bf16.gmra.mrb[8].mxu1 %vm720_vm3, %v5265_v41  ;;  %6201 = vmatprep.mubr.msk.bf16.mxu0 %vm720_vm3, %v5542_v45  ;;  %v1294_v41 = vrot.slane %v1292_v20, 4  ;;  %v1301_v45 = vrot.slane %v1299_v26, 4 }
  0xa6   : > { %6049 = vmatprep.mubr.msk.bf16.mxu1 %vm720_vm3, %v5266_v47  ;;  %v1308_v47 = vrot.slane %v1306_v3, 4 }
  0xa7   : > { %v7400_v8 = vsel %vm7000_vm6, %v1294_v41, %v1295_v7  ;;  %v7419_v26 = vsel %vm7000_vm6, %v1301_v45, %v1302_v43  ;;  %v6651_v45 = vld [vmem:[%s6759_s6 + $0x50] sm:$0x1]  ;;  %v3722_v41 = vshll.u32 %v5635_v50, 16 }
  0xa8   : > { %v1323_v57 = vrot.slane %v6651_v45, 5  ;;  %v8658_v11 = vcombine.low %v7404_v19, %v7419_v26 }
  0xac   : > { %6202 = vmatmul.mubr.msk.bf16.gmra.mrb[28].mxu0 %vm720_vm3, %v5543_v25  ;;  %v1313_v25 = vrot.slane %v7303_v0, 5  ;;  %v7386_v0 = vsel %vm7000_vm6, %v5295_v51, %v1292_v20  ;;  %v1316_v20 = vrot.slane %v6649_v23, 5  ;;  %v3665_v51 = vshrl.u32 %v5628_v34, 16  ;;  %v7463_v34 = vld [vmem:[%s6759_s6 + $0x5c] sm:$0x1] }
  0xad   : > { %6050 = vmatmul.mubr.msk.bf16.gmra.mrb[12].mxu1 %vm720_vm3, %v5267_v49  ;;  %6207 = vmatprep.mubr.msk.bf16.mxu0 %vm720_vm3, %v6589_v53  ;;  %v7372_v49 = vrot.slane %v2333_v9, 5  ;;  %v7378_v53 = vsel %vm7000_vm6, %v5294_v35, %v1285_v21  ;;  %v7396_v21 = vsel %vm7000_vm6, %v1280_v56, %v1281_v59  ;;  %v5298_v9 = vrot.slane %v1230_v37, 9  ;;  %v6650_v59 = vld [vmem:[%s6759_s6 + $0x4c] sm:$0xf] }
  0xae   : > { %6053 = vmatprep.mubr.msk.bf16.mxu1 %vm720_vm3, %v5268_v63  ;;  %v7382_v63 = vsel %vm7000_vm6, %v1287_v13, %v1288_v17  ;;  %v7410_v17 = vsel %vm7000_vm6, %v5297_v44, %v1306_v3  ;;  %v1320_v54 = vrot.slane %v6650_v59, 5  ;;  %v1315_v3 = vrot.slane %v1313_v25, 4  ;;  %v7434_v13 = vld [vmem:[%s6759_s6 + $0x60] sm:$0xe] }
  0xaf   : > { %8649 = vst [vmem:[#allocation3_spill] sm:$0xff] %v7372_v49  ;;  %v7444_v43 = vsel %vm7000_vm6, %v5298_v9, %v1313_v25  ;;  %v6652_v25 = vld [vmem:[%s6759_s6 + $0x58] sm:$0xf]  ;;  %v1330_v9 = vrot.slane %v7463_v34, 5  ;;  %v5301_v23 = vrot.slane %v7434_v13, 9  ;;  %v3667_v12 = vrot.slane %v3665_v51, 4 }
  0xb0   : > { %v1322_v37 = vrot.slane %v1320_v54, 4  ;;  %v7448_v44 = vsel %vm7000_vm6, %v1315_v3, %v1316_v20  ;;  %v6654_v20 = vld [vmem:[%s6759_s6 + $0x64] sm:$0xf]  ;;  %v6655_v34 = vld [vmem:[%s6759_s6 + $0x70] sm:$0xf]  ;;  %v3726_v56 = vshrl.u32 %v5635_v50, 16 }
  0xb1   : > { %v1334_v59 = vrot.slane %v6654_v20, 5  ;;  %v1341_v20 = vrot.slane %v6655_v34, 5  ;;  %v5633_v34 = vld [vmem:[%s6759_s6 + $0x2c] sm:$0x1] }
  0xb2   : > { %v7480_v3 = vsel %vm7000_vm6, %v1322_v37, %v1323_v57  ;;  %v3713_v37 = vshrl.u32 %v5634_v55, 16  ;;  %v3716_v57 = vshll.u32 %v5634_v55, 16 }
  0xb3   : > { %v1336_v36 = vrot.slane %v1334_v59, 4 }
  0xb4   : > { %6208 = vmatmul.mubr.msk.bf16.vlgmr.msra.gmra.mrb[0].mxu0 %vm720_vm3, %v6592_v27  ;;  %v7423_v27 = vsel %vm7000_vm6, %v1308_v47, %v1309_v15  ;;  %v5630_v15 = vld [vmem:[%s6759_s6 + $0x20] sm:$0x1]  ;;  %v3718_v50 = vrot.slane %v3716_v57, 5  ;;  %v6606_v57 = vld [vmem:[%s6759_s6 + $0x78] sm:$0xff]  }
  0xb5   : > { %6054 = vmatmul.mubr.msk.bf16.gmra.mrb[16].mxu1 %vm720_vm3, %v5269_v18  ;;  %6240 = vmatpush3.bf16.msra.mxu0 %v7065_v16  ;;  %v6596_v16 = vld [vmem:[%s6759_s6 + $0x3c] sm:$0xff]   ;;  %v3684_v48 = vshll.u32 %v5630_v15, 16 }
  0xb6   : > { %6057 = vmatprep.mubr.msk.bf16.mxu1 %vm720_vm3, %v5270_v22  ;;  %6211 = vmatprep.mubr.msk.bf16.mxu0 %vm720_vm3, %v6594_v32  ;;  %v5629_v18 = vld [vmem:[%s6759_s6 + $0x1c] sm:$0xf]  ;;  %v5299_v22 = vrot.slane %v1231_v6, 9  ;;  %v5631_v6 = vld [vmem:[%s6759_s6 + $0x24] sm:$0xf] }
  0xb7   : > { %6273 = vmatprep.subr.bf16.mxu0 %v7355_v46  ;;  %v3674_v7 = vshll.u32 %v5629_v18, 16  ;;  %v3678_v61 = vshrl.u32 %v5629_v18, 16  ;;  %v3692_v13 = vshll.u32 %v5631_v6, 16  ;;  %v3671_v18 = vor.u32 %v3670_v24, %v3667_v12 }
  0xb8   : > { %v7452_v47 = vsel %vm7000_vm6, %v5299_v22, %v1320_v54  ;;  %v5632_v54 = vld [vmem:[%s6759_s6 + $0x28] sm:$0xf]  ;;  %v3689_v22 = vshrl.u32 %v5631_v6, 16  ;;  %v1343_v24 = vrot.slane %v1341_v20, 4 }
  0xb9   : > { %v3694_v29 = vrot.slane %v3692_v13, 5  ;;  %v3715_v13 = vrot.slane %v3713_v37, 4  ;;  %v3672_v40 = vrot.slane %v3671_v18, 4 }
  0xba   : > { %v3691_v15 = vrot.slane %v3689_v22, 4  ;;  %v5636_v22 = vld [vmem:[%s6759_s6 + $0x38] sm:$0x1] }
  0xbb   : > { %v3732_v37 = vshll.u32 %v5636_v22, 16 }
  0xbc   : > { %6212 = vmatmul.mubr.msk.bf16.gmra.mrb[4].mxu0 %vm720_vm3, %v6596_v16  ;;  %v1327_v16 = vrot.slane %v6652_v25, 5  ;;  %v1234_v25 = vld [vmem:[%s6759_s6 + $0x6c] sm:$0xe] }
  0xbd   : > { %6058 = vmatmul.mubr.msk.bf16.gmra.mrb[20].mxu1 %vm720_vm3, %v5271_v31  ;;  %6215 = vmatprep.mubr.msk.bf16.mxu0 %vm720_vm3, %v6598_v5  ;;  %v7473_v31 = vrot.slane %v3674_v7, 5  ;;  %v3680_v5 = vrot.slane %v3678_v61, 4  ;;  %v3698_v7 = vshll.u32 %v5632_v54, 16  ;;  %v3702_v61 = vshrl.u32 %v5632_v54, 16 }
  0xbe   : > { %6061 = vmatprep.mubr.msk.bf16.mxu1 %vm720_vm3, %v5272_v38  ;;  %v6602_v38 = vld [vmem:[%s6759_s6 + $0x60] sm:$0xff]   ;;  %v7487_v51 = vsel %vm7000_vm6, %v5300_v10, %v1327_v16  ;;  %v1329_v45 = vrot.slane %v1327_v16, 4  ;;  %v6656_v10 = vld [vmem:[%s6759_s6 + $0x68] sm:$0x1]  ;;  %v7494_v16 = vrot.slane %v3684_v48, 5  ;;  %v5302_v54 = vrot.slane %v1234_v25, 9 }
  0xbf   : > { %v3681_v6 = vor.u32 %v3680_v5, %v7473_v31  ;;  %v1337_v35 = vrot.slane %v6656_v10, 5  ;;  %v7497_v32 = vrot.slane %v3698_v7, 5  ;;  %v3704_v12 = vrot.slane %v3702_v61, 4  ;;  %v6657_v5 = vld [vmem:[%s6759_s6 + $0x74] sm:$0x1]  ;;  %v6604_v25 = vld [vmem:[%s6759_s6 + $0x6c] sm:$0xff]  }
  0xc0   : > { %v1344_v55 = vrot.slane %v6657_v5, 5  ;;  %v7516_v48 = vsel %vm7000_vm6, %v5301_v23, %v1334_v59  ;;  %v3695_v7 = vor.u32 %v3694_v29, %v3691_v15  ;;  %v3708_v61 = vshll.u32 %v5633_v34, 16  ;;  %v6659_v10 = vld [vmem:[%s6759_s6 + $0x88] sm:$0xf] }
  0xc1   : > { %v3682_v42 = vrot.slane %v3681_v6, 4  ;;  %v7521_v33 = vsel %vm7000_vm6, %v1329_v45, %v1330_v9  ;;  %v7529_v23 = vsel %vm7000_vm6, %v1336_v36, %v1337_v35  ;;  %v7533_v29 = vsel %vm7000_vm6, %v5302_v54, %v1341_v20  ;;  %v1236_v45 = vld [vmem:[%s6759_s6 + $0x84] sm:$0xe]  ;;  %v5637_v20 = vld [vmem:[%s6759_s6 + $0x3c] sm:$0xf] }
  0xc2   : > { %v7537_v9 = vsel %vm7000_vm6, %v1343_v24, %v1344_v55  ;;  %v3719_v59 = vor.u32 %v3718_v50, %v3715_v13  ;;  %v3677_v6 = vsel %vm6778_vm2, %v3672_v40, %v7473_v31  ;;  %v1355_v15 = vrot.slane %v6659_v10, 5  ;;  %v6660_v24 = vld [vmem:[%s6759_s6 + $0x80] sm:$0x1] }
  0xc3   : > { %v3687_v35 = vsel %vm6778_vm2, %v3682_v42, %v7494_v16  ;;  %v3696_v54 = vrot.slane %v3695_v7, 4  ;;  %v3710_v34 = vrot.slane %v3708_v61, 5  ;;  %v1351_v5 = vrot.slane %v6660_v24, 5  ;;  %v7551_v55 = vld [vmem:[%s6759_s6 + $0x40] sm:$0xf] }
  0xc4   : > { %6216 = vmatmul.mubr.msk.bf16.gmra.mrb[8].mxu0 %vm720_vm3, %v6600_v58  ;;  %v3728_v58 = vrot.slane %v3726_v56, 4  ;;  %v1235_v56 = vld [vmem:[%s6759_s6 + $0x78] sm:$0xe]  ;;  %8651 = vst [vmem:[#allocation5_spill] sm:$0xff] %v7551_v55  ;;  %v3734_v13 = vrot.slane %v3732_v37, 5  ;;  %v5304_v16 = vrot.slane %v1236_v45, 9  ;;  %v8652_v50 = vcombine.low %v7151_v62, %v7163_v4 }
  0xc5   : > { %6062 = vmatmul.mubr.msk.bf16.gmra.mrb[24].mxu1 %vm720_vm3, %v5273_v14  ;;  %6219 = vmatprep.mubr.msk.bf16.mxu0 %vm720_vm3, %v6602_v38  ;;  %v7510_v14 = vrot.slane %v3722_v41, 5  ;;  %v6658_v41 = vld [vmem:[%s6759_s6 + $0x7c] sm:$0xf]  ;;  %v3720_v40 = vrot.slane %v3719_v59, 4  ;;  %v6661_v42 = vld [vmem:[%s6759_s6 + $0x8c] sm:$0x1]  ;;  %v3701_v45 = vsel %vm6778_vm2, %v3696_v54, %v7497_v32 }
  0xc6   : > { %6065 = vmatprep.mubr.msk.bf16.mxu1 %vm720_vm3, %v5274_v60  ;;  %v3705_v60 = vor.u32 %v3704_v12, %v7497_v32  ;;  %v1348_v18 = vrot.slane %v6658_v41, 5  ;;  %v5303_v12 = vrot.slane %v1235_v56, 9  ;;  %v3737_v7 = vshrl.u32 %v5637_v20, 16  ;;  %v6607_v41 = vld [vmem:[%s6759_s6 + $0x84] sm:$0xff]   ;;  %v6608_v59 = vld [vmem:[%s6759_s6 + $0x90] sm:$0xff]  }
  0xc7   : > { %v3729_v36 = vor.u32 %v3728_v58, %v7510_v14  ;;  %v1358_v58 = vrot.slane %v6661_v42, 5  ;;  %v3740_v61 = vshll.u32 %v5637_v20, 16  ;;  %v1357_v56 = vrot.slane %v1355_v15, 4  ;;  %v7591_v20 = vld [vmem:[%s6759_s6 + $0x4c] sm:$0xf] }
  0xc8   : > { %v3706_v31 = vrot.slane %v3705_v60, 4  ;;  %v1350_v22 = vrot.slane %v1348_v18, 4  ;;  %v3746_v62 = vshll.u32 %v7551_v55, 16  ;;  %v3750_v4 = vshrl.u32 %v7551_v55, 16  ;;  %v7669_v37 = vld [vmem:[%s6759_s6 + $0x5c] sm:$0x1] }
  0xc9   : > { %v3730_v60 = vrot.slane %v3729_v36, 4  ;;  %v7583_v10 = vsel %vm7000_vm6, %v5303_v12, %v1348_v18  ;;  %v3725_v24 = vsel %vm6778_vm2, %v3720_v40, %v7510_v14  ;;  %v7598_v32 = vsel %vm7000_vm6, %v5304_v16, %v1355_v15  ;;  %v7602_v18 = vld [vmem:[%s6759_s6 + $0x58] sm:$0xf]  ;;  %v7616_v40 = vld [vmem:[%s6759_s6 + $0x90] sm:$0xe] }
  0xca   : > { %v3711_v36 = vsel %vm6778_vm2, %v3706_v31, %v3710_v34  ;;  %v3739_v54 = vrot.slane %v3737_v7, 4  ;;  %v3742_v34 = vrot.slane %v3740_v61, 5  ;;  %v5643_v31 = vld [vmem:[%s6759_s6 + $0x54] sm:$0xf]  ;;  %v3752_v14 = vrot.slane %v3750_v4, 4 }
  0xcb   : > { %v3735_v12 = vsel %vm6778_vm2, %v3730_v60, %v3734_v13  ;;  %v3770_v42 = vshll.u32 %v7591_v20, 16  ;;  %v3774_v7 = vshrl.u32 %v7591_v20, 16  ;;  %v3785_v13 = vshrl.u32 %v5643_v31, 16  ;;  %v1238_v38 = vld [vmem:[%s6759_s6 + $0x9c] sm:$0xe] }
  0xcc   : > { %6220 = vmatmul.mubr.msk.bf16.gmra.mrb[12].mxu0 %vm720_vm3, %v6604_v25  ;;  %v8653_v25 = vcombine.low %v7368_v52, %v7396_v21  ;;  %v7571_v52 = vcombine.low %v3677_v6, %v3687_v35  ;;  %v7587_v6 = vsel %vm7000_vm6, %v1350_v22, %v1351_v5  ;;  %v5640_v35 = vld [vmem:[%s6759_s6 + $0x48] sm:$0xf]  ;;  %v7608_v5 = vsel %vm7000_vm6, %v1357_v56, %v1358_v58  ;;  %v7611_v22 = vld [vmem:[%s6759_s6 + $0x44] sm:$0x1] }
  0xcd   : > { %6066 = vmatmul.mubr.msk.bf16.gmra.mrb[28].mxu1 %vm720_vm3, %v8652_v50  ;;  %6223 = vmatprep.mubr.msk.bf16.mxu0 %vm720_vm3, %v6606_v57  ;;  %8654 = vst [vmem:[#allocation6_spill] sm:$0xff] %v7611_v22  ;;  %v7613_v50 = vrot.slane %v3746_v62, 5  ;;  %v3761_v15 = vshrl.u32 %v5640_v35, 16  ;;  %v3764_v16 = vshll.u32 %v5640_v35, 16  ;;  %v3788_v61 = vshll.u32 %v5643_v31, 16 }
  0xce   : > { %6071 = vmatprep.mubr.msk.bf16.mxu1 %vm720_vm3, %v8653_v25  ;;  %v3794_v58 = vshll.u32 %v7602_v18, 16  ;;  %v3798_v25 = vshrl.u32 %v7602_v18, 16  ;;  %v8655_v60 = vcombine.low %v7378_v53, %v7382_v63  ;;  %v7628_v56 = vcombine.low %v3701_v45, %v3711_v36  ;;  %v7645_v35 = vld [vmem:[%s6759_s6 + $0x50] sm:$0x1]  ;;  %v6664_v62 = vld [vmem:[%s6759_s6 + $0x98] sm:$0x1] }
  0xcf   : > { %v7632_v4 = vcombine.low %v3725_v24, %v3735_v12  ;;  %v8656_v53 = vcombine.low %v7386_v0, %v7400_v8  ;;  %v3753_v45 = vor.u32 %v3752_v14, %v7613_v50  ;;  %v5646_v24 = vld [vmem:[%s6759_s6 + $0x60] sm:$0xf]  ;;  %v3763_v31 = vrot.slane %v3761_v15, 4  ;;  %v7651_v8 = vld [vmem:[%s6759_s6 + $0x64] sm:$0xf]  ;;  %v6610_v14 = vld [vmem:[%s6759_s6 + $0xa8] sm:$0xff]  }
  0xd0   : > { %v7648_v12 = vrot.slane %v3770_v42, 5  ;;  %v3776_v0 = vrot.slane %v3774_v7, 4  ;;  %v3790_v15 = vrot.slane %v3788_v61, 5  ;;  %v6663_v7 = vld [vmem:[%s6759_s6 + $0x94] sm:$0xf]  ;;  %v1365_v21 = vrot.slane %v6664_v62, 5 }
  0xd1   : > { %v1362_v63 = vrot.slane %v6663_v7, 5  ;;  %v3780_v57 = vshll.u32 %v7645_v35, 16  ;;  %v3809_v36 = vshrl.u32 %v5646_v24, 16  ;;  %v3822_v61 = vshrl.u32 %v7651_v8, 16  ;;  %v6665_v7 = vld [vmem:[%s6759_s6 + $0xa0] sm:$0xf] }
  0xd2   : > { %v1369_v55 = vrot.slane %v6665_v7, 5  ;;  %v3754_v62 = vrot.slane %v3753_v45, 4  ;;  %v1376_v45 = vrot.slane %v7141_v30, 5  ;;  %v7696_v7 = vld [vmem:[%s6759_s6 + $0x68] sm:$0x1]  ;;  %v6611_v30 = vld [vmem:[%s6759_s6 + $0xb4] sm:$0xff]  }
  0xd3   : > { %v3811_v19 = vrot.slane %v3809_v36, 4  ;;  %8660 = vst [vmem:[#allocation8_spill] sm:$0xff] %v7696_v7  ;;  %v6612_v36 = vld [vmem:[%s6759_s6 + $0xc0] sm:$0xff]  }
  0xd4   : > { %6224 = vmatmul.mubr.msk.bf16.gmra.mrb[16].mxu0 %vm720_vm3, %v6607_v41  ;;  %v3756_v41 = vshll.u32 %v7611_v22, 16  ;;  %v3812_v22 = vshll.u32 %v5646_v24, 16  ;;  %v3804_v24 = vshll.u32 %v7669_v37, 16 }
  0xd5   : > { %6072 = vmatmul.mubr.msk.bf16.vlgmr.msra.gmra.mrb[0].mxu1 %vm720_vm3, %v8655_v60  ;;  %6227 = vmatprep.mubr.msk.bf16.mxu0 %vm720_vm3, %v6608_v59  ;;  %v3743_v59 = vor.u32 %v3742_v34, %v3739_v54  ;;  %v7656_v54 = vld [vmem:[%s8627_s1 + $0x20] sm:$0xff]   ;;  %v3787_v60 = vrot.slane %v3785_v13, 4  ;;  %v3818_v13 = vshll.u32 %v7651_v8, 16 }
  0xd6   : > { %6104 = vmatpush3.bf16.msra.mxu1 %v7254_v39  ;;  %6075 = vmatprep.mubr.msk.bf16.mxu1 %vm720_vm3, %v8656_v53  ;;  %v3766_v39 = vrot.slane %v3764_v16, 5  ;;  %8657 = vst [vmem:[#allocation7_spill] sm:$0xff] %v7656_v54  ;;  %v6609_v34 = vld [vmem:[%s6759_s6 + $0x9c] sm:$0xff]   ;;  %v7661_v53 = vrot.slane %v3794_v58, 5  ;;  %v3800_v16 = vrot.slane %v3798_v25, 4  ;;  %v7663_v42 = vrot.slane %v3756_v41, 5 }
  0xd7   : > { %6307 = vmatprep.subr.bf16.mxu1 %v7656_v54  ;;  %v7674_v58 = vrot.slane %v3743_v59, 4  ;;  %v3777_v41 = vor.u32 %v3776_v0, %v7648_v12  ;;  %v3791_v54 = vor.u32 %v3790_v15, %v3787_v60  ;;  %v1364_v59 = vrot.slane %v1362_v63, 4  ;;  %v1239_v0 = vld [vmem:[%s6759_s6 + $0xa8] sm:$0xe] }
  0xd8   : > { %v3767_v25 = vor.u32 %v3766_v39, %v3763_v31  ;;  %v3801_v1 = vor.u32 %v3800_v16, %v7661_v53  ;;  %v3782_v31 = vrot.slane %v3780_v57, 5  ;;  %v5306_v39 = vrot.slane %v1238_v38, 9  ;;  %v6666_v57 = vld [vmem:[%s6759_s6 + $0xa4] sm:$0x1] }
  0xd9   : > { %v3814_v26 = vrot.slane %v3812_v22, 5  ;;  %v7692_v60 = vrot.slane %v3818_v13, 5  ;;  %v3778_v15 = vrot.slane %v3777_v41, 4  ;;  %v1371_v16 = vrot.slane %v1369_v55, 4  ;;  %v6667_v41 = vld [vmem:[%s6759_s6 + $0xb0] sm:$0x1] }
  0xda   : > { %v1372_v38 = vrot.slane %v6666_v57, 5  ;;  %v5307_v49 = vrot.slane %v1239_v0, 9  ;;  %v3749_v22 = vsel %vm6778_vm2, %v7674_v58, %v7613_v50  ;;  %v8661_v13 = vrot.slane %v7616_v40, 9  ;;  %v1240_v50 = vld [vmem:[%s6759_s6 + $0xb4] sm:$0xe] }
  0xdb   : > { %v1379_v57 = vrot.slane %v6667_v41, 5  ;;  %v3828_v0 = vshll.u32 %v7696_v7, 16  ;;  %v5649_v58 = vld [vmem:[%s6759_s6 + $0x6c] sm:$0xf]  ;;  %v7720_v40 = vsel %vm7000_vm6, %v1364_v59, %v1365_v21  ;;  %v8663_v59 = vcombine.low %v7444_v43, %v7448_v44 }
  0xdc   : > { %6228 = vmatmul.mubr.msk.bf16.gmra.mrb[20].mxu0 %vm720_vm3, %v6609_v34  ;;  %v8659_v34 = vcombine.low %v7410_v17, %v7423_v27  ;;  %v3792_v17 = vrot.slane %v3791_v54, 4  ;;  %v3802_v27 = vrot.slane %v3801_v1, 4  ;;  %v3759_v1 = vsel %vm6778_vm2, %v3754_v62, %v7663_v42 }
  0xdd   : > { %6076 = vmatmul.mubr.msk.bf16.gmra.mrb[4].mxu1 %vm720_vm3, %v8658_v11  ;;  %6231 = vmatprep.mubr.msk.bf16.mxu0 %vm720_vm3, %v6610_v14  ;;  %v3824_v11 = vrot.slane %v3822_v61, 4  ;;  %v3768_v14 = vrot.slane %v3767_v25, 4  ;;  %v7708_v61 = vsel %vm7000_vm6, %v8661_v13, %v1362_v63  ;;  %v1378_v25 = vrot.slane %v1376_v45, 4 }
  0xde   : > { %6079 = vmatprep.mubr.msk.bf16.mxu1 %vm720_vm3, %v8659_v34  ;;  %v3806_v34 = vrot.slane %v3804_v24, 5  ;;  %v3815_v54 = vor.u32 %v3814_v26, %v3811_v19  ;;  %v7727_v42 = vsel %vm7000_vm6, %v5306_v39, %v1369_v55  ;;  %v7731_v62 = vsel %vm7000_vm6, %v1371_v16, %v1372_v38  ;;  %v6668_v39 = vld [vmem:[%s6759_s6 + $0xb8] sm:$0xf] }
  0xdf   : > { %v3825_v24 = vor.u32 %v3824_v11, %v7692_v60  ;;  %v3773_v63 = vsel %vm6778_vm2, %v3768_v14, %v7648_v12  ;;  %v3783_v19 = vsel %vm6778_vm2, %v3778_v15, %v3782_v31  ;;  %v3797_v21 = vsel %vm6778_vm2, %v3792_v17, %v7661_v53  ;;  %v7780_v17 = vld [vmem:[%s6759_s6 + $0x7c] sm:$0xf] }
  0xe0   : > { %v3807_v12 = vsel %vm6778_vm2, %v3802_v27, %v3806_v34  ;;  %v7743_v55 = vsel %vm7000_vm6, %v5307_v49, %v1376_v45  ;;  %v7752_v31 = vsel %vm7000_vm6, %v1378_v25, %v1379_v57  ;;  %v5308_v53 = vrot.slane %v1240_v50, 9  ;;  %v7756_v49 = vld [vmem:[%s6759_s6 + $0x70] sm:$0xf]  ;;  %8667 = vst [vmem:[#allocation12_spill] sm:$0xff] %v7780_v17  ;;  %v5655_v27 = vld [vmem:[%s6759_s6 + $0x84] sm:$0xf] }
  0xe1   : > { %8662 = vst [vmem:[#allocation9_spill] sm:$0xff] %v7743_v55  ;;  %8664 = vst [vmem:[#allocation10_spill] sm:$0xff] %v7752_v31  ;;  %v1383_v26 = vrot.slane %v6668_v39, 5  ;;  %v3833_v45 = vshrl.u32 %v5649_v58, 16  ;;  %v8666_v43 = vcombine.low %v7452_v47, %v7480_v3  ;;  %v7762_v44 = vcombine.low %v3749_v22, %v3759_v1  ;;  %v5652_v3 = vld [vmem:[%s6759_s6 + $0x78] sm:$0xf] }
  0xe2   : > { %8665 = vst [vmem:[#allocation11_spill] sm:$0xff] %v7756_v49  ;;  %v7764_v11 = vrot.slane %v3815_v54, 4  ;;  %v7766_v14 = vrot.slane %v3825_v24, 4  ;;  %v7768_v15 = vrot.slane %v3828_v0, 5  ;;  %v7772_v38 = vcombine.low %v3773_v63, %v3783_v19  ;;  %v6613_v34 = vld [vmem:[%s6759_s6 + $0xcc] sm:$0xff]  }
  0xe3   : > { %v7776_v47 = vcombine.low %v3797_v21, %v3807_v12  ;;  %v7787_v22 = vld [vmem:[%s6759_s6 + $0xbc] sm:$0x1]  ;;  %v3836_v25 = vshll.u32 %v5649_v58, 16  ;;  %v3842_v41 = vshll.u32 %v7756_v49, 16  ;;  %v7792_v57 = vld [vmem:[%s6759_s6 + $0x88] sm:$0xf]  ;;  %v7796_v1 = vsel %vm7000_vm6, %v5308_v53, %v1383_v26 }
  0xe4   : > { %6232 = vmatmul.mubr.msk.bf16.gmra.mrb[24].mxu0 %vm720_vm3, %v6611_v30  ;;  %8668 = vst [vmem:[#allocation13_spill] sm:$0xff] %v7792_v57  ;;  %v7798_v54 = vrot.slane %v1383_v26, 4  ;;  %v7800_v24 = vrot.slane %v3833_v45, 4  ;;  %v3846_v0 = vshrl.u32 %v7756_v49, 16  ;;  %v5658_v50 = vld [vmem:[%s6759_s6 + $0x90] sm:$0xf]  ;;  %v8671_v58 = vcombine.low %v7487_v51, %v7521_v33 }
  0xe5   : > { %6080 = vmatmul.mubr.msk.bf16.gmra.mrb[8].mxu1 %vm720_vm3, %v8663_v59  ;;  %6235 = vmatprep.mubr.msk.bf16.mxu0 %vm720_vm3, %v6612_v36  ;;  %v3857_v19 = vshrl.u32 %v5652_v3, 16  ;;  %v3860_v21 = vshll.u32 %v5652_v3, 16  ;;  %v7813_v12 = vld [vmem:[%s6759_s6 + $0x94] sm:$0xf]  ;;  %v3866_v53 = vshll.u32 %v7780_v17, 16  ;;  %v3870_v39 = vshrl.u32 %v7780_v17, 16 }
  0xe6   : > { %6083 = vmatprep.mubr.msk.bf16.mxu1 %vm720_vm3, %v8666_v43  ;;  %8669 = vst [vmem:[#allocation14_spill] sm:$0xff] %v7813_v12  ;;  %v7816_v59 = vld [vmem:[%s6759_s6 + $0x74] sm:$0x1]  ;;  %v3881_v26 = vshrl.u32 %v5655_v27, 16  ;;  %v3884_v45 = vshll.u32 %v5655_v27, 16  ;;  %v3890_v43 = vshll.u32 %v7792_v57, 16 }
  0xe7   : > { %8670 = vst [vmem:[#allocation15_spill] sm:$0xff] %v7816_v59  ;;  %v3894_v36 = vshrl.u32 %v7792_v57, 16  ;;  %v3905_v30 = vshrl.u32 %v5658_v50, 16  ;;  %v3908_v3 = vshll.u32 %v5658_v50, 16  ;;  %v3838_v63 = vrot.slane %v3836_v25, 5 }
  0xe8   : > { %v7829_v27 = vrot.slane %v3842_v41, 5  ;;  %v3914_v16 = vshll.u32 %v7813_v12, 16  ;;  %v3918_v13 = vshrl.u32 %v7813_v12, 16  ;;  %v8672_v50 = vcombine.low %v7516_v48, %v7529_v23  ;;  %v5661_v41 = vld [vmem:[%s6759_s6 + $0x9c] sm:$0xf] }
  0xe9   : > { %v3848_v51 = vrot.slane %v3846_v0, 4  ;;  %v3852_v33 = vshll.u32 %v7816_v59, 16  ;;  %v3862_v25 = vrot.slane %v3860_v21, 5  ;;  %v3872_v57 = vrot.slane %v3870_v39, 4  ;;  %v7845_v17 = vld [vmem:[%s6759_s6 + $0x8c] sm:$0x1] }
  0xea   : > { %v3883_v49 = vrot.slane %v3881_v26, 4  ;;  %v3886_v12 = vrot.slane %v3884_v45, 5  ;;  %v7847_v31 = vrot.slane %v3890_v43, 5  ;;  %v3896_v48 = vrot.slane %v3894_v36, 4  ;;  %v7853_v0 = vld [vmem:[%s6759_s6 + $0x98] sm:$0x1] }
  0xeb   : > { %v3907_v23 = vrot.slane %v3905_v30, 4  ;;  %v3910_v55 = vrot.slane %v3908_v3, 5  ;;  %v7855_v59 = vrot.slane %v3914_v16, 5  ;;  %v3929_v21 = vshrl.u32 %v5661_v41, 16 }
  0xec   : > { %6236 = vmatmul.mubr.msk.bf16.gmra.mrb[28].mxu0 %vm720_vm3, %v6613_v34  ;;  %v7832_v34 = vld [vmem:[%s6759_s6 + $0x80] sm:$0x1]  ;;  %v3839_v39 = vor.u32 %v3838_v63, %v7800_v24  ;;  %v3849_v7 = vor.u32 %v3848_v51, %v7829_v27  ;;  %v3887_v30 = vor.u32 %v3886_v12, %v3883_v49  ;;  %v3897_v16 = vor.u32 %v3896_v48, %v7847_v31 }
  0xed   : > { %6084 = vmatmul.mubr.msk.bf16.gmra.mrb[12].mxu1 %vm720_vm3, %v8671_v58  ;;  %6241 = vmatprep.mubr.msk.bf16.mxu0 %vm720_vm3, %v7571_v52  ;;  %v3859_v52 = vrot.slane %v3857_v19, 4  ;;  %v7842_v58 = vrot.slane %v3866_v53, 5  ;;  %v3920_v19 = vrot.slane %v3918_v13, 4  ;;  %v3932_v53 = vshll.u32 %v5661_v41, 16 }
  0xee   : > { %6087 = vmatprep.mubr.msk.bf16.mxu1 %vm720_vm3, %v8672_v50  ;;  %v7850_v50 = vld [vmem:[%s6759_s6 + $0xa0] sm:$0xf]  ;;  %v3876_v45 = vshll.u32 %v7832_v34, 16  ;;  %v3900_v13 = vshll.u32 %v7845_v17, 16  ;;  %v3911_v24 = vor.u32 %v3910_v55, %v3907_v23  ;;  %v3924_v63 = vshll.u32 %v7853_v0, 16 }
  0xef   : > { %v3863_v26 = vor.u32 %v3862_v25, %v3859_v52  ;;  %v3873_v36 = vor.u32 %v3872_v57, %v7842_v58  ;;  %v3938_v43 = vshll.u32 %v7850_v50, 16  ;;  %v3942_v3 = vshrl.u32 %v7850_v50, 16 }
  0xf0   : > { %v8673_v51 = vcombine.low %v7533_v29, %v7537_v9  ;;  %v3854_v49 = vrot.slane %v3852_v33, 5  ;;  %v3921_v57 = vor.u32 %v3920_v19, %v7855_v59  ;;  %v3931_v12 = vrot.slane %v3929_v21, 4 }
  0xf1   : > { %v8674_v52 = vcombine.low %v7583_v10, %v7587_v6  ;;  %v3840_v55 = vrot.slane %v3839_v39, 4  ;;  %v3850_v29 = vrot.slane %v3849_v7, 4  ;;  %v3864_v9 = vrot.slane %v3863_v26, 4 }
  0xf2   : > { %v3878_v25 = vrot.slane %v3876_v45, 5  ;;  %v3874_v33 = vrot.slane %v3873_v36, 4  ;;  %v3888_v41 = vrot.slane %v3887_v30, 4  ;;  %v7881_v48 = vrot.slane %v3938_v43, 5 }
  0xf3   : > { %v3944_v23 = vrot.slane %v3942_v3, 4  ;;  %v3898_v19 = vrot.slane %v3897_v16, 4  ;;  %v3902_v21 = vrot.slane %v3900_v13, 5  ;;  %v3912_v10 = vrot.slane %v3911_v24, 4 }
  0xf4   : > { %6242 = vmatmul.mubr.msk.bf16.vlgmr.msra.gmra.mrb[0].mxu0 %vm720_vm3, %v7628_v56  ;;  %v3934_v56 = vrot.slane %v3932_v53, 5  ;;  %v3926_v6 = vrot.slane %v3924_v63, 5  ;;  %v7884_v53 = vld [vmem:[%s6759_s6 + $0xa4] sm:$0x1]  ;;  %v8675_v26 = vrot.slane %v7787_v22, 5  ;;  %v3845_v36 = vsel %vm6778_vm2, %v3840_v55, %v7829_v27 }
  0xf5   : > { %6088 = vmatmul.mubr.msk.bf16.gmra.mrb[16].mxu1 %vm720_vm3, %v8673_v51  ;;  %6274 = vmatpush3.bf16.msra.mxu0 %v7355_v46  ;;  %v5664_v46 = vld [vmem:[%s6759_s6 + $0xa8] sm:$0xf]  ;;  %v3922_v51 = vrot.slane %v3921_v57, 4  ;;  %v3855_v30 = vsel %vm6778_vm2, %v3850_v29, %v3854_v49  ;;  %v3869_v43 = vsel %vm6778_vm2, %v3864_v9, %v7842_v58  ;;  %v3879_v22 = vsel %vm6778_vm2, %v3874_v33, %v3878_v25 }
  0xf6   : > { %6091 = vmatprep.mubr.msk.bf16.mxu1 %vm720_vm3, %v8674_v52  ;;  %6245 = vmatprep.mubr.msk.bf16.mxu0 %vm720_vm3, %v7632_v4  ;;  %v3935_v52 = vor.u32 %v3934_v56, %v3931_v12  ;;  %v7887_v4 = vld [vmem:[%s6759_s6 + $0xac] sm:$0xf]  ;;  %v3953_v7 = vshrl.u32 %v5664_v46, 16  ;;  %v3956_v39 = vshll.u32 %v5664_v46, 16  ;;  %v7894_v45 = vsel %vm7000_vm6, %v7798_v54, %v8675_v26 }
  0xf7   : > { %v3893_v54 = vsel %vm6778_vm2, %v3888_v41, %v7847_v31  ;;  %v3945_v3 = vor.u32 %v3944_v23, %v7881_v48  ;;  %v3948_v16 = vshll.u32 %v7884_v53, 16  ;;  %v3903_v27 = vsel %vm6778_vm2, %v3898_v19, %v3902_v21  ;;  %v5715_v31 = vld [vmem:[%s6759_s6 + $0x48] sm:$0xe]  ;;  %v5718_v26 = vld [vmem:[%s6759_s6 + $0x6c] sm:$0xe] }
  0xf8   : > { %v3917_v58 = vsel %vm6778_vm2, %v3912_v10, %v7855_v59  ;;  %v3962_v13 = vshll.u32 %v7887_v4, 16  ;;  %v3966_v24 = vshrl.u32 %v7887_v4, 16  ;;  %v8676_v63 = vcombine.low %v7598_v32, %v7608_v5  ;;  %v7930_v59 = vld [vmem:[%s6759_s6 + $0xb0] sm:$0x1] }
  0xf9   : > { %v3936_v49 = vrot.slane %v3935_v52, 4  ;;  %v3955_v57 = vrot.slane %v3953_v7, 4  ;;  %v3958_v12 = vrot.slane %v3956_v39, 5  ;;  %v8677_v56 = vcombine.low %v7708_v61, %v7720_v40  ;;  %v5667_v40 = vld [vmem:[%s6759_s6 + $0xb4] sm:$0xf] }
  0xfa   : > { %v8678_v32 = vsel %vm6778_vm2, %v7766_v14, %v7768_v15  ;;  %v8679_v5 = vsel %vm6778_vm2, %v7764_v11, %v7692_v60  ;;  %v5326_v55 = vcombine.low %v7796_v1, %v7894_v45  ;;  %v7948_v29 = vcombine.low %v3845_v36, %v3855_v30  ;;  %v5716_v15 = vld [vmem:[%s6759_s6 + $0x54] sm:$0xe] }
  0xfb   : > { %v7950_v61 = vcombine.low %v3869_v43, %v3879_v22  ;;  %v7953_v9 = vcombine.low %v3893_v54, %v3903_v27  ;;  %v3946_v25 = vrot.slane %v3945_v3, 4  ;;  %v3950_v46 = vrot.slane %v3948_v16, 5  ;;  %v8681_v16 = vld [vmem:[#allocation8_spill] sm:$0xff] }
  0xfc   : > { %6246 = vmatmul.mubr.msk.bf16.gmra.mrb[4].mxu0 %vm720_vm3, %v7762_v44  ;;  %v3927_v44 = vsel %vm6778_vm2, %v3922_v51, %v3926_v6  ;;  %v5731_v14 = vrot.slane %v5715_v31, 9  ;;  %v7958_v60 = vrot.slane %v3962_v13, 5  ;;  %v3968_v11 = vrot.slane %v3966_v24, 4  ;;  %v5717_v6 = vld [vmem:[%s6759_s6 + $0x60] sm:$0xe]  ;;  %v8682_v13 = vld [vmem:[#allocation9_spill] sm:$0xff] }
  0xfd   : > { %6092 = vmatmul.mubr.msk.bf16.gmra.mrb[20].mxu1 %vm720_vm3, %v8676_v63  ;;  %6249 = vmatprep.mubr.msk.bf16.mxu0 %vm720_vm3, %v7772_v38  ;;  %v5684_v38 = vcombine.low %v8679_v5, %v8678_v32  ;;  %v7956_v33 = vcombine.low %v3917_v58, %v3927_v44  ;;  %v3972_v41 = vshll.u32 %v7930_v59, 16  ;;  %v3941_v23 = vsel %vm6778_vm2, %v3936_v49, %v7881_v48  ;;  %v8683_v24 = vld [vmem:[#allocation10_spill] sm:$0xff]  ;;  %v8685_v63 = vld [vmem:[#allocation11_spill] sm:$0xff] }
  0xfe   : > { %6095 = vmatprep.mubr.msk.bf16.mxu1 %vm720_vm3, %v8677_v56  ;;  %v3959_v19 = vor.u32 %v3958_v12, %v3955_v57  ;;  %v4440_v21 = vrot.slane %v7591_v20, 5  ;;  %v4443_v10 = vrot.slane %v7645_v35, 5  ;;  %v3977_v51 = vshrl.u32 %v5667_v40, 16  ;;  %v7980_v35 = vld [vmem:[%s6759_s6 + $0xb8] sm:$0xf]  ;;  %v8686_v49 = vld [vmem:[#allocation15_spill] sm:$0xff] }
  0xff   : > { %v5732_v52 = vrot.slane %v5716_v15, 9  ;;  %v4447_v7 = vrot.slane %v7602_v18, 5  ;;  %v4450_v39 = vrot.slane %v7669_v37, 5  ;;  %v3951_v36 = vsel %vm6778_vm2, %v3946_v25, %v3950_v46  ;;  %v5670_v12 = vld [vmem:[%s6759_s6 + $0xc0] sm:$0xf] }
 0x100   : > { %v3980_v30 = vshll.u32 %v5667_v40, 16  ;;  %v7974_v48 = vsel %vm7000_vm6, %v5731_v14, %v4440_v21  ;;  %v4442_v43 = vrot.slane %v4440_v21, 4  ;;  %v3969_v20 = vor.u32 %v3968_v11, %v7958_v60  ;;  %v5719_v14 = vld [vmem:[%s6759_s6 + $0x78] sm:$0xe] }
 0x101   : > { %v7984_v37 = vsel %vm7000_vm6, %v5732_v52, %v4447_v7  ;;  %v4449_v18 = vrot.slane %v4447_v7, 4  ;;  %v5733_v22 = vrot.slane %v5717_v6, 9  ;;  %v8680_v54 = vcombine.low %v7727_v42, %v7731_v62  ;;  %v6615_v6 = vld [vmem:[%s6759_s6 + $0xc] sm:$0xff]  }
 0x102   : > { %v4454_v3 = vrot.slane %v7651_v8, 5  ;;  %v4457_v27 = vrot.slane %v8681_v16, 5  ;;  %v5734_v58 = vrot.slane %v5718_v26, 9  ;;  %v8684_v31 = vcombine.low %v8682_v13, %v8683_v24  ;;  %v8688_v13 = vld [vmem:[#allocation3_spill] sm:$0xff]  ;;  %v8689_v24 = vld [vmem:[#allocation4_spill] sm:$0xff] }
 0x103   : > { %v8005_v62 = vsel %vm7000_vm6, %v4449_v18, %v4450_v39  ;;  %v4461_v44 = vrot.slane %v8685_v63, 5  ;;  %v4464_v8 = vrot.slane %v8686_v49, 5  ;;  %v3986_v57 = vshll.u32 %v7980_v35, 16  ;;  %v8042_v39 = vld [vmem:[%s6759_s6 + $0xc4] sm:$0xf]  ;;  %v8690_v49 = vld [vmem:[#allocation13_spill] sm:$0xff] }
 0x104   : > { %6250 = vmatmul.mubr.msk.bf16.gmra.mrb[8].mxu0 %vm720_vm3, %v7776_v47  ;;  %v7993_v47 = vsel %vm7000_vm6, %v4442_v43, %v4443_v10  ;;  %v5750_v56 = vcombine.low %v7984_v37, %v8005_v62  ;;  %v8015_v32 = vsel %vm7000_vm6, %v5733_v22, %v4454_v3  ;;  %v4456_v5 = vrot.slane %v4454_v3, 4  ;;  %v5438_v10 = vld [vmem:[%s6759_s6 + $0x78] sm:$0xf]  ;;  %v8687_v22 = vld [vmem:[#allocation12_spill] sm:$0xff]  ;;  %v6680_v62 = vld [vmem:[%s6759_s6 + $0xa0] sm:$0xf] }
 0x105   : > { %6096 = vmatmul.mubr.msk.bf16.gmra.mrb[24].mxu1 %vm720_vm3, %v8680_v54  ;;  %6253 = vmatprep.mubr.msk.bf16.mxu0 %vm720_vm3, %v5684_v38  ;;  %v5749_v42 = vcombine.low %v7974_v48, %v7993_v47  ;;  %v8017_v38 = vrot.slane %v3972_v41, 5  ;;  %v3990_v40 = vshrl.u32 %v7980_v35, 16  ;;  %v8022_v25 = vsel %vm7000_vm6, %v5734_v58, %v4461_v44 }
 0x106   : > { %6099 = vmatprep.mubr.msk.bf16.mxu1 %vm720_vm3, %v8684_v31  ;;  %v4463_v46 = vrot.slane %v4461_v44, 4  ;;  %v8025_v15 = vcombine.low %v3941_v23, %v3951_v36  ;;  %v8027_v11 = vrot.slane %v3959_v19, 4  ;;  %v8029_v21 = vrot.slane %v3977_v51, 4 }
 0x107   : > { %v8033_v41 = vsel %vm7000_vm6, %v4456_v5, %v4457_v27  ;;  %v8037_v52 = vrot.slane %v3969_v20, 4  ;;  %v8039_v7 = vrot.slane %v3980_v30, 5  ;;  %v8050_v51 = vrot.slane %v3986_v57, 5  ;;  %v5720_v20 = vld [vmem:[%s6759_s6 + $0x84] sm:$0xe] }
 0x108   : > { %v5751_v23 = vcombine.low %v8015_v32, %v8033_v41  ;;  %v8048_v19 = vsel %vm7000_vm6, %v4463_v46, %v4464_v8  ;;  %v4001_v26 = vshrl.u32 %v5670_v12, 16  ;;  %v5735_v43 = vrot.slane %v5719_v14, 9  ;;  %v8058_v30 = vld [vmem:[%s6759_s6 + $0xbc] sm:$0x1]  ;;  %v5673_v5 = vld [vmem:[%s6759_s6 + $0xcc] sm:$0xf] }
 0x109   : > { %v5752_v36 = vcombine.low %v8022_v25, %v8048_v19  ;;  %v4004_v18 = vshll.u32 %v5670_v12, 16  ;;  %v4468_v54 = vrot.slane %v8687_v22, 5  ;;  %v4471_v3 = vrot.slane %v7832_v34, 5  ;;  %v6616_v14 = vld [vmem:[%s6759_s6 + $0x18] sm:$0xff]   ;;  %v5721_v22 = vld [vmem:[%s6759_s6 + $0x90] sm:$0xe] }
 0x10a   : > { %v2314_v16 = vshrl.u32 %v5438_v10, 16  ;;  %v4010_v27 = vshll.u32 %v8042_v39, 16  ;;  %v2317_v58 = vshll.u32 %v5438_v10, 16  ;;  %v2336_v34 = vsel %vm6778_vm2, %v8689_v24, %v8688_v13  ;;  %v8691_v24 = vld [vmem:[#allocation14_spill] sm:$0xff]  ;;  %v6684_v19 = vld [vmem:[%s6759_s6 + $0xac] sm:$0xf] }
 0x10b   : > { %v8077_v1 = vsel %vm7000_vm6, %v5735_v43, %v4468_v54  ;;  %v4470_v45 = vrot.slane %v4468_v54, 4  ;;  %v3992_v31 = vrot.slane %v3990_v40, 4  ;;  %v3996_v63 = vshll.u32 %v8058_v30, 16 }
 0x10c   : > { %6254 = vmatmul.mubr.msk.bf16.gmra.mrb[12].mxu0 %vm720_vm3, %v7948_v29  ;;  %v4014_v29 = vshrl.u32 %v8042_v39, 16  ;;  %v2319_v44 = vrot.slane %v2317_v58, 5  ;;  %v4475_v8 = vrot.slane %v8690_v49, 5  ;;  %v3965_v57 = vsel %vm6778_vm2, %v8027_v11, %v7958_v60  ;;  %v6617_v60 = vld [vmem:[%s6759_s6 + $0x24] sm:$0xff]  }
 0x10d   : > { %6100 = vmatmul.mubr.msk.bf16.gmra.mrb[28].mxu1 %vm720_vm3, %v5326_v55  ;;  %6257 = vmatprep.mubr.msk.bf16.mxu0 %vm720_vm3, %v7950_v61  ;;  %v2316_v55 = vrot.slane %v2314_v16, 4  ;;  %v5736_v61 = vrot.slane %v5720_v20, 9  ;;  %v3983_v12 = vor.u32 %v8039_v7, %v8029_v21  ;;  %v8090_v46 = vsel %vm7000_vm6, %v4470_v45, %v4471_v3  ;;  %v8101_v7 = vld [vmem:[%s6759_s6 + $0xd0] sm:$0xf] }
 0x10e   : > { %6105 = vmatprep.mubr.msk.bf16.mxu1 %vm720_vm3, %v6615_v6  ;;  %v4478_v40 = vrot.slane %v7845_v17, 5  ;;  %v4003_v10 = vrot.slane %v4001_v26, 4  ;;  %v4006_v6 = vrot.slane %v4004_v18, 5  ;;  %v5753_v43 = vcombine.low %v8077_v1, %v8090_v46  ;;  %v8113_v18 = vld [vmem:[%s6759_s6 + $0xc8] sm:$0x1] }
 0x10f   : > { %v2320_v20 = vor.u32 %v2319_v44, %v2316_v55  ;;  %v8098_v11 = vrot.slane %v4010_v27, 5  ;;  %v4016_v21 = vrot.slane %v4014_v29, 4  ;;  %v8105_v54 = vsel %vm7000_vm6, %v5736_v61, %v4475_v8  ;;  %v8692_v55 = vld [vmem:[#allocation2_spill] sm:$0xff] }
 0x110   : > { %v4477_v3 = vrot.slane %v4475_v8, 4  ;;  %v3975_v17 = vsel %vm6778_vm2, %v8037_v52, %v8017_v38  ;;  %v3993_v26 = vor.u32 %v3992_v31, %v8050_v51  ;;  %v4025_v16 = vshrl.u32 %v5673_v5, 16  ;;  %v8693_v31 = vld [vmem:[#allocation7_spill] sm:$0xff] }
 0x111   : > { %v2321_v27 = vrot.slane %v2320_v20, 4  ;;  %v4028_v29 = vshll.u32 %v5673_v5, 16  ;;  %v5737_v13 = vrot.slane %v5721_v22, 9  ;;  %v4482_v45 = vrot.slane %v8691_v24, 5 }
 0x112   : > { %v8119_v58 = vsel %vm7000_vm6, %v4477_v3, %v4478_v40  ;;  %v4034_v38 = vshll.u32 %v8101_v7, 16  ;;  %v4038_v52 = vshrl.u32 %v8101_v7, 16  ;;  %v4007_v44 = vor.u32 %v4006_v6, %v4003_v10  ;;  %v5722_v10 = vld [vmem:[%s6759_s6 + $0x9c] sm:$0xe]  ;;  %v6618_v6 = vld [vmem:[%s6759_s6 + $0x30] sm:$0xff]  }
 0x113   : > { %v5754_v61 = vcombine.low %v8105_v54, %v8119_v58  ;;  %v4020_v49 = vshll.u32 %v8113_v18, 16  ;;  %v3998_v5 = vrot.slane %v3996_v63, 5  ;;  %v8140_v40 = vsel %vm7000_vm6, %v5737_v13, %v4482_v45  ;;  %v6619_v13 = vld [vmem:[%s6759_s6 + $0x3c] sm:$0xff]  }
 0x114   : > { %6258 = vmatmul.mubr.msk.bf16.gmra.mrb[16].mxu0 %vm720_vm3, %v7953_v9  ;;  %v2326_v9 = vsel %vm6778_vm2, %v2321_v27, %v8692_v55  ;;  %v4485_v20 = vrot.slane %v7853_v0, 5  ;;  %v5690_v22 = vcombine.low %v3965_v57, %v3975_v17  ;;  %v3984_v3 = vrot.slane %v3983_v12, 4 }
 0x115   : > { %6106 = vmatmul.mubr.msk.bf16.vlgmr.msra.gmra.mrb[0].mxu1 %vm720_vm3, %v6616_v14  ;;  %6261 = vmatprep.mubr.msk.bf16.mxu0 %vm720_vm3, %v7956_v33  ;;  %v4017_v33 = vor.u32 %v4016_v21, %v8098_v11  ;;  %v8136_v8 = vcombine.low %v2326_v9, %v2336_v34  ;;  %v4484_v14 = vrot.slane %v4482_v45, 4  ;;  %v3994_v27 = vrot.slane %v3993_v26, 4  ;;  %v8146_v21 = vld [vmem:[%s6759_s6 + $0xd4] sm:$0x1]  ;;  %v5711_v9 = vld [vmem:[%s6759_s6 + $0x18] sm:$0xe] }
 0x116   : > { %6308 = vmatpush3.bf16.msra.mxu1 %v8693_v31  ;;  %6109 = vmatprep.mubr.msk.bf16.mxu1 %vm720_vm3, %v6617_v60  ;;  %v4027_v60 = vrot.slane %v4025_v16, 4  ;;  %v4030_v24 = vrot.slane %v4028_v29, 5  ;;  %v8148_v34 = vrot.slane %v4034_v38, 5  ;;  %v4040_v55 = vrot.slane %v4038_v52, 4 }
 0x117   : > { %v8152_v63 = vsel %vm7000_vm6, %v4484_v14, %v4485_v20  ;;  %v4008_v45 = vrot.slane %v4007_v44, 4  ;;  %v4018_v0 = vrot.slane %v4017_v33, 4  ;;  %v4022_v57 = vrot.slane %v4020_v49, 5  ;;  %v6670_v33 = vld [vmem:[%s6759_s6 + $0x1c] sm:$0xf] }
 0x118   : > { %v5755_v12 = vcombine.low %v8140_v40, %v8152_v63  ;;  %v5738_v17 = vrot.slane %v5722_v10, 9  ;;  %v4489_v26 = vrot.slane %v7850_v50, 5  ;;  %v3989_v16 = vsel %vm6778_vm2, %v3984_v3, %v8050_v51  ;;  %v5723_v14 = vld [vmem:[%s6759_s6 + $0xa8] sm:$0xe] }
 0x119   : > { %v3999_v29 = vsel %vm6778_vm2, %v3994_v27, %v3998_v5  ;;  %v4044_v38 = vshll.u32 %v8146_v21, 16  ;;  %v4492_v52 = vrot.slane %v7884_v53, 5  ;;  %v4031_v50 = vor.u32 %v4030_v24, %v4027_v60  ;;  %v6620_v60 = vld [vmem:[%s6759_s6 + $0x48] sm:$0xff]   ;;  %v6671_v24 = vld [vmem:[%s6759_s6 + $0x20] sm:$0x1] }
 0x11a   : > { %v8173_v51 = vsel %vm7000_vm6, %v5738_v17, %v4489_v26  ;;  %v4491_v31 = vrot.slane %v4489_v26, 4  ;;  %v4013_v53 = vsel %vm6778_vm2, %v4008_v45, %v8098_v11  ;;  %v4023_v44 = vsel %vm6778_vm2, %v4018_v0, %v4022_v57  ;;  %v5724_v26 = vld [vmem:[%s6759_s6 + $0xb4] sm:$0xe] }
 0x11b   : > { %v4412_v49 = vrot.slane %v6670_v33, 5  ;;  %v5691_v20 = vcombine.low %v3989_v16, %v3999_v29  ;;  %v5727_v3 = vrot.slane %v5711_v9, 9  ;;  %v5692_v11 = vcombine.low %v4013_v53, %v4023_v44  ;;  %v5713_v33 = vld [vmem:[%s6759_s6 + $0x30] sm:$0xe] }
 0x11c   : > { %6262 = vmatmul.mubr.msk.bf16.gmra.mrb[20].mxu0 %vm720_vm3, %v8025_v15  ;;  %v4041_v15 = vor.u32 %v4040_v55, %v8148_v34  ;;  %v8184_v5 = vsel %vm7000_vm6, %v4491_v31, %v4492_v52  ;;  %v4032_v10 = vrot.slane %v4031_v50, 4  ;;  %v4415_v55 = vrot.slane %v6671_v24, 5  ;;  %v5712_v52 = vld [vmem:[%s6759_s6 + $0x24] sm:$0xe]  ;;  %v6672_v50 = vld [vmem:[%s6759_s6 + $0x28] sm:$0xf] }
 0x11d   : > { %6110 = vmatmul.mubr.msk.bf16.gmra.mrb[4].mxu1 %vm720_vm3, %v6618_v6  ;;  %6265 = vmatprep.mubr.msk.bf16.mxu0 %vm720_vm3, %v5690_v22  ;;  %v4046_v22 = vrot.slane %v4044_v38, 5  ;;  %v5756_v27 = vcombine.low %v8173_v51, %v8184_v5  ;;  %v4414_v45 = vrot.slane %v4412_v49, 4  ;;  %v5739_v0 = vrot.slane %v5723_v14, 9  ;;  %v6673_v31 = vld [vmem:[%s6759_s6 + $0x34] sm:$0xf] }
 0x11e   : > { %6113 = vmatprep.mubr.msk.bf16.mxu1 %vm720_vm3, %v6619_v13  ;;  %v4042_v6 = vrot.slane %v4041_v15, 4  ;;  %v6621_v13 = vld [vmem:[%s6759_s6 + $0x54] sm:$0xff]   ;;  %v4496_v57 = vrot.slane %v7887_v4, 5  ;;  %v4499_v17 = vrot.slane %v7930_v59, 5  ;;  %v4037_v4 = vsel %vm6778_vm2, %v4032_v10, %v8148_v34  ;;  %v6622_v10 = vld [vmem:[%s6759_s6 + $0x60] sm:$0xff]  }
 0x11f   : > { %v4413_v38 = vsel %vm7000_vm6, %v5727_v3, %v4412_v49  ;;  %v4419_v15 = vrot.slane %v6672_v50, 5  ;;  %v4416_v9 = vsel %vm7000_vm6, %v4414_v45, %v4415_v55  ;;  %v4426_v53 = vrot.slane %v6673_v31, 5  ;;  %v6674_v3 = vld [vmem:[%s6759_s6 + $0x2c] sm:$0x1]  ;;  %v6689_v51 = vld [vmem:[%s6759_s6 + $0xc8] sm:$0x1] }
 0x120   : > { %v8198_v16 = vsel %vm7000_vm6, %v5739_v0, %v4496_v57  ;;  %v4498_v29 = vrot.slane %v4496_v57, 4  ;;  %v4047_v59 = vsel %vm6778_vm2, %v4042_v6, %v4046_v22  ;;  %v5740_v44 = vrot.slane %v5724_v26, 9  ;;  %v6623_v45 = vld [vmem:[%s6759_s6 + $0x6c] sm:$0xff]   ;;  %v5725_v26 = vld [vmem:[%s6759_s6 + $0xc0] sm:$0xe] }
 0x121   : > { %v4503_v14 = vrot.slane %v7980_v35, 5  ;;  %v5728_v22 = vrot.slane %v5712_v52, 9  ;;  %v5745_v6 = vcombine.low %v4413_v38, %v4416_v9  ;;  %v4421_v24 = vrot.slane %v4419_v15, 4  ;;  %v6675_v35 = vld [vmem:[%s6759_s6 + $0x38] sm:$0x1] }
 0x122   : > { %v8217_v34 = vsel %vm7000_vm6, %v4498_v29, %v4499_v17  ;;  %v5729_v0 = vrot.slane %v5713_v33, 9  ;;  %v4428_v57 = vrot.slane %v4426_v53, 4  ;;  %v4429_v17 = vrot.slane %v6675_v35, 5  ;;  %v8694_v38 = vld [vmem:[#allocation5_spill] sm:$0xff] }
 0x123   : > { %v5757_v49 = vcombine.low %v8198_v16, %v8217_v34  ;;  %v8228_v55 = vsel %vm7000_vm6, %v5740_v44, %v4503_v14  ;;  %v4433_v52 = vrot.slane %v8694_v38, 5  ;;  %v5741_v50 = vrot.slane %v5725_v26, 9  ;;  %v5714_v44 = vld [vmem:[%s6759_s6 + $0x3c] sm:$0xe]  ;;  %v6676_v38 = vld [vmem:[%s6759_s6 + $0x70] sm:$0xf] }
 0x124   : > { %6266 = vmatmul.mubr.msk.bf16.gmra.mrb[24].mxu0 %vm720_vm3, %v5691_v20  ;;  %v5693_v20 = vcombine.low %v4037_v4, %v4047_v59  ;;  %v4420_v4 = vsel %vm7000_vm6, %v5728_v22, %v4419_v15  ;;  %v4427_v9 = vsel %vm7000_vm6, %v5729_v0, %v4426_v53  ;;  %v4430_v31 = vsel %vm7000_vm6, %v4428_v57, %v4429_v17  ;;  %v5435_v22 = vld [vmem:[%s6759_s6 + $0x6c] sm:$0xf] }
 0x125   : > { %6114 = vmatmul.mubr.msk.bf16.gmra.mrb[8].mxu1 %vm720_vm3, %v6620_v60  ;;  %6269 = vmatprep.mubr.msk.bf16.mxu0 %vm720_vm3, %v5692_v11  ;;  %v4422_v60 = vrot.slane %v6674_v3, 5  ;;  %v4506_v11 = vrot.slane %v8058_v30, 5  ;;  %v4510_v33 = vrot.slane %v8042_v39, 5  ;;  %v4513_v15 = vrot.slane %v8113_v18, 5 }
 0x126   : > { %6117 = vmatprep.mubr.msk.bf16.mxu1 %vm720_vm3, %v6621_v13  ;;  %v4505_v13 = vrot.slane %v4503_v14, 4  ;;  %v5726_v14 = vld [vmem:[%s6759_s6 + $0xcc] sm:$0xe]  ;;  %v4435_v53 = vrot.slane %v4433_v52, 4  ;;  %v2290_v0 = vshrl.u32 %v5435_v22, 16  ;;  %v2293_v57 = vshll.u32 %v5435_v22, 16 }
 0x127   : > { %v4423_v59 = vsel %vm7000_vm6, %v4421_v24, %v4422_v60  ;;  %v8259_v3 = vsel %vm7000_vm6, %v5741_v50, %v4510_v33  ;;  %v4512_v60 = vrot.slane %v4510_v33, 4  ;;  %v8695_v24 = vld [vmem:[#allocation6_spill] sm:$0xff]  ;;  %v5742_v18 = vrot.slane %v5726_v14, 9 }
 0x128   : > { %v8235_v29 = vsel %vm7000_vm6, %v4505_v13, %v4506_v11  ;;  %v6624_v11 = vld [vmem:[%s6759_s6 + $0x78] sm:$0xff]   ;;  %v4436_v13 = vrot.slane %v8695_v24, 5  ;;  %v4517_v17 = vrot.slane %v8101_v7, 5  ;;  %v4520_v26 = vrot.slane %v8146_v21, 5 }
 0x129   : > { %v5758_v30 = vcombine.low %v8228_v55, %v8235_v29  ;;  %v8266_v39 = vsel %vm7000_vm6, %v4512_v60, %v4513_v15  ;;  %v2299_v50 = vshll.u32 %v6676_v38, 16  ;;  %v6626_v15 = vld [vmem:[%s6759_s6 + $0x90] sm:$0xff]   ;;  %v6627_v60 = vld [vmem:[%s6759_s6 + $0x9c] sm:$0xff]   ;;  %v2477_v5 = vshll.u32 %v6689_v51, 16 }
 0x12a   : > { %v5759_v35 = vcombine.low %v8259_v3, %v8266_v39  ;;  %v8283_v7 = vsel %vm7000_vm6, %v5742_v18, %v4517_v17  ;;  %v4519_v21 = vrot.slane %v4517_v17, 4  ;;  %v5444_v17 = vld [vmem:[%s6759_s6 + $0x90] sm:$0xf] }
 0x12b   : > { %v2301_v14 = vrot.slane %v2299_v50, 5 }
 0x12c   : > { %6270 = vmatmul.mubr.msk.bf16.gmra.mrb[28].mxu0 %vm720_vm3, %v5693_v20  ;;  %v5746_v20 = vcombine.low %v4420_v4, %v4423_v59  ;;  %v4437_v59 = vsel %vm7000_vm6, %v4435_v53, %v4436_v13 }
 0x12d   : > { %6118 = vmatmul.mubr.msk.bf16.gmra.mrb[12].mxu1 %vm720_vm3, %v6622_v10  ;;  %6275 = vmatprep.mubr.msk.bf16.mxu0 %vm720_vm3, %v5745_v6  ;;  %v5747_v10 = vcombine.low %v4427_v9, %v4430_v31  ;;  %v5730_v6 = vrot.slane %v5714_v44, 9  ;;  %v2303_v9 = vshrl.u32 %v6676_v38, 16  ;;  %v2292_v31 = vrot.slane %v2290_v0, 4  ;;  %v6629_v38 = vld [vmem:[%s6759_s6 + $0xb4] sm:$0xff]  }
 0x12e   : > { %6121 = vmatprep.mubr.msk.bf16.mxu1 %vm720_vm3, %v6623_v45  ;;  %v6625_v45 = vld [vmem:[%s6759_s6 + $0x84] sm:$0xff]   ;;  %v2295_v44 = vrot.slane %v2293_v57, 5 }
 0x12f   : > { %v4434_v4 = vsel %vm7000_vm6, %v5730_v6, %v4433_v52  ;;  %v8287_v52 = vsel %vm7000_vm6, %v4519_v21, %v4520_v26  ;;  %v6677_v6 = vld [vmem:[%s6759_s6 + $0x74] sm:$0x1]  ;;  %v6628_v26 = vld [vmem:[%s6759_s6 + $0xa8] sm:$0xff]   ;;  %v2362_v21 = vshrl.u32 %v5444_v17, 16 }
 0x130   : > { %v5748_v33 = vcombine.low %v4434_v4, %v4437_v59  ;;  %v5760_v22 = vcombine.low %v8283_v7, %v8287_v52  ;;  %v2309_v53 = vshll.u32 %v6677_v6, 16  ;;  %v5447_v59 = vld [vmem:[%s6759_s6 + $0x9c] sm:$0xf]  ;;  %v6681_v6 = vld [vmem:[%s6759_s6 + $0x8c] sm:$0x1] }
 0x132   : > { %v2311_v48 = vrot.slane %v2309_v53, 5  ;;  %v2357_v53 = vshll.u32 %v6681_v6, 16 }
 0x134   : > { %6276 = vmatmul.mubr.msk.bf16.vlgmr.msra.gmra.mrb[0].mxu0 %vm720_vm3, %v5746_v20  ;;  %v2305_v20 = vrot.slane %v2303_v9, 4 }
 0x135   : > { %6122 = vmatmul.mubr.msk.bf16.gmra.mrb[16].mxu1 %vm720_vm3, %v6624_v11  ;;  %6279 = vmatprep.mubr.msk.bf16.mxu0 %vm720_vm3, %v5747_v10  ;;  %v5441_v11 = vld [vmem:[%s6759_s6 + $0x84] sm:$0xf]  ;;  %v2296_v10 = vor.u32 %v2295_v44, %v2292_v31  ;;  %v2365_v31 = vshll.u32 %v5444_v17, 16 }
 0x136   : > { %6125 = vmatprep.mubr.msk.bf16.mxu1 %vm720_vm3, %v6625_v45  ;;  %v2306_v2 = vor.u32 %v2305_v20, %v2301_v14  ;;  %v2338_v24 = vshrl.u32 %v5441_v11, 16  ;;  %v2341_v13 = vshll.u32 %v5441_v11, 16  ;;  %v6678_v45 = vld [vmem:[%s6759_s6 + $0x88] sm:$0xf]  ;;  %v2389_v11 = vshll.u32 %v5447_v59, 16 }
 0x137   : > { %v2347_v18 = vshll.u32 %v6678_v45, 16  ;;  %v2351_v0 = vshrl.u32 %v6678_v45, 16  ;;  %v2297_v57 = vrot.slane %v2296_v10, 4  ;;  %v2395_v10 = vshll.u32 %v6680_v62, 16 }
 0x138   : > { %v2307_v4 = vrot.slane %v2306_v2, 4  ;;  %v2340_v47 = vrot.slane %v2338_v24, 4  ;;  %v2364_v24 = vrot.slane %v2362_v21, 4  ;;  %v2367_v32 = vrot.slane %v2365_v31, 5  ;;  %v6683_v31 = vld [vmem:[%s6759_s6 + $0xa4] sm:$0x1] }
 0x139   : > { %v8307_v50 = vrot.slane %v2347_v18, 5  ;;  %v2353_v9 = vrot.slane %v2351_v0, 4  ;;  %v2302_v44 = vsel %vm6778_vm2, %v2297_v57, %v2301_v14  ;;  %v2391_v45 = vrot.slane %v2389_v11, 5  ;;  %v6630_v18 = vld [vmem:[%s6759_s6 + $0xc0] sm:$0xff]  }
 0x13a   : > { %v2312_v14 = vsel %vm6778_vm2, %v2307_v4, %v2311_v48  ;;  %v8330_v17 = vrot.slane %v2395_v10, 5  ;;  %v5450_v4 = vld [vmem:[%s6759_s6 + $0xa8] sm:$0xf] }
 0x13b   : > { %v2354_v2 = vor.u32 %v2353_v9, %v8307_v50  ;;  %v5469_v0 = vcombine.low %v2302_v44, %v2312_v14  ;;  %v2405_v44 = vshll.u32 %v6683_v31, 16  ;;  %v2413_v25 = vshll.u32 %v5450_v4, 16 }
 0x13c   : > { %6280 = vmatmul.mubr.msk.bf16.gmra.mrb[4].mxu0 %vm720_vm3, %v5748_v33  ;;  %v6679_v33 = vld [vmem:[%s6759_s6 + $0x94] sm:$0xf] }
 0x13d   : > { %6126 = vmatmul.mubr.msk.bf16.gmra.mrb[20].mxu1 %vm720_vm3, %v6626_v15  ;;  %6283 = vmatprep.mubr.msk.bf16.mxu0 %vm720_vm3, %v5749_v42  ;;  %v2343_v42 = vrot.slane %v2341_v13, 5  ;;  %v2371_v15 = vshll.u32 %v6679_v33, 16  ;;  %v2375_v20 = vshrl.u32 %v6679_v33, 16  ;;  %v2355_v48 = vrot.slane %v2354_v2, 4 }
 0x13e   : > { %6129 = vmatprep.mubr.msk.bf16.mxu1 %vm720_vm3, %v6627_v60  ;;  %v2386_v60 = vshrl.u32 %v5447_v59, 16  ;;  %v6682_v59 = vld [vmem:[%s6759_s6 + $0x98] sm:$0x1]  ;;  %v2410_v33 = vshrl.u32 %v5450_v4, 16  ;;  %v5456_v4 = vld [vmem:[%s6759_s6 + $0xc0] sm:$0xf] }
 0x13f   : > { %v2344_v37 = vor.u32 %v2343_v42, %v2340_v47  ;;  %v8327_v41 = vrot.slane %v2371_v15, 5  ;;  %v2359_v47 = vrot.slane %v2357_v53, 5  ;;  %v2368_v42 = vor.u32 %v2367_v32, %v2364_v24  ;;  %v5453_v15 = vld [vmem:[%s6759_s6 + $0xb4] sm:$0xf] }
 0x140   : > { %v2388_v13 = vrot.slane %v2386_v60, 4  ;;  %v2423_v60 = vshrl.u32 %v6684_v19, 16  ;;  %v2434_v1 = vshrl.u32 %v5453_v15, 16  ;;  %v2437_v46 = vshll.u32 %v5453_v15, 16 }
 0x141   : > { %v2345_v57 = vrot.slane %v2344_v37, 4  ;;  %v2360_v14 = vsel %vm6778_vm2, %v2355_v48, %v2359_v47  ;;  %v2369_v37 = vrot.slane %v2368_v42, 4  ;;  %v2407_v53 = vrot.slane %v2405_v44, 5 }
 0x142   : > { %v2392_v21 = vor.u32 %v2391_v45, %v2388_v13  ;;  %v2412_v24 = vrot.slane %v2410_v33, 4  ;;  %v2425_v45 = vrot.slane %v2423_v60, 4  ;;  %v6688_v33 = vld [vmem:[%s6759_s6 + $0xbc] sm:$0x1] }
 0x143   : > { %v2350_v11 = vsel %vm6778_vm2, %v2345_v57, %v8307_v50  ;;  %v2374_v48 = vsel %vm6778_vm2, %v2369_v37, %v8327_v41  ;;  %v2453_v40 = vshll.u32 %v6688_v33, 16 }
 0x144   : > { %6284 = vmatmul.mubr.msk.bf16.gmra.mrb[8].mxu0 %vm720_vm3, %v5750_v56  ;;  %v2399_v56 = vshrl.u32 %v6680_v62, 16  ;;  %v2393_v6 = vrot.slane %v2392_v21, 4  ;;  %v5471_v50 = vcombine.low %v2350_v11, %v2360_v14 }
 0x145   : > { %6130 = vmatmul.mubr.msk.bf16.gmra.mrb[24].mxu1 %vm720_vm3, %v6628_v26  ;;  %6287 = vmatprep.mubr.msk.bf16.mxu0 %vm720_vm3, %v5751_v23  ;;  %v2377_v23 = vrot.slane %v2375_v20, 4 }
 0x146   : > { %6133 = vmatprep.mubr.msk.bf16.mxu1 %vm720_vm3, %v6629_v38  ;;  %v2401_v26 = vrot.slane %v2399_v56, 4  ;;  %v2381_v38 = vshll.u32 %v6682_v59, 16  ;;  %v2398_v42 = vsel %vm6778_vm2, %v2393_v6, %v8330_v17  ;;  %v2479_v6 = vrot.slane %v2477_v5, 5 }
 0x147   : > { %v2378_v9 = vor.u32 %v2377_v23, %v8327_v41  ;;  %v2415_v23 = vrot.slane %v2413_v25, 5  ;;  %v6686_v41 = vld [vmem:[%s6759_s6 + $0xb0] sm:$0x1] }
 0x148   : > { %v2402_v20 = vor.u32 %v2401_v26, %v8330_v17  ;;  %v2383_v62 = vrot.slane %v2381_v38, 5  ;;  %v2429_v59 = vshll.u32 %v6686_v41, 16  ;;  %v2458_v38 = vshrl.u32 %v5456_v4, 16 }
 0x149   : > { %v2379_v2 = vrot.slane %v2378_v9, 4  ;;  %v2416_v58 = vor.u32 %v2415_v23, %v2412_v24  ;;  %v2461_v17 = vshll.u32 %v5456_v4, 16  ;;  %v6687_v9 = vld [vmem:[%s6759_s6 + $0xc4] sm:$0xf] }
 0x14a   : > { %v2403_v32 = vrot.slane %v2402_v20, 4  ;;  %v2467_v21 = vshll.u32 %v6687_v9, 16  ;;  %v2471_v31 = vshrl.u32 %v6687_v9, 16  ;;  %v2431_v25 = vrot.slane %v2429_v59, 5  ;;  %v8448_v59 = vld [vmem:[%s8630_s4] ss:$0 sm:$0xff] }
 0x14b   : > { %v2384_v47 = vsel %vm6778_vm2, %v2379_v2, %v2383_v62  ;;  %v2417_v15 = vrot.slane %v2416_v58, 4  ;;  %v2455_v62 = vrot.slane %v2453_v40, 5 }
 0x14c   : > { %6288 = vmatmul.mubr.msk.bf16.gmra.mrb[12].mxu0 %vm720_vm3, %v5752_v36  ;;  %v2419_v36 = vshll.u32 %v6684_v19, 16  ;;  %v2408_v54 = vsel %vm6778_vm2, %v2403_v32, %v2407_v53  ;;  %v5472_v63 = vcombine.low %v2374_v48, %v2384_v47  ;;  %v2460_v19 = vrot.slane %v2458_v38, 4  ;;  %v8442_v47 = vld [vmem:[%s8629_s3] ss:$0 sm:$0xff] }
 0x14d   : > { %6134 = vmatmul.mubr.msk.bf16.gmra.mrb[28].mxu1 %vm720_vm3, %v6630_v18  ;;  %6291 = vmatprep.mubr.msk.bf16.mxu0 %vm720_vm3, %v5753_v43  ;;  %v6685_v43 = vld [vmem:[%s6759_s6 + $0xb8] sm:$0xf]  ;;  %v2436_v18 = vrot.slane %v2434_v1, 4  ;;  %v2469_v60 = vrot.slane %v2467_v21, 5  ;;  %v2473_v11 = vrot.slane %v2471_v31, 4 }
 0x14e   : > { %6155 = vmatprep.mubr.msk.bf16.mxu1 %vm720_vm3, %v5469_v0  ;;  %v2443_v10 = vshll.u32 %v6685_v43, 16  ;;  %v2447_v56 = vshrl.u32 %v6685_v43, 16  ;;  %v2421_v13 = vrot.slane %v2419_v36, 5  ;;  %v2439_v0 = vrot.slane %v2437_v46, 5 }
 0x14f   : > { %v2463_v36 = vrot.slane %v2461_v17, 5 }
 0x150   : > { %v2445_v57 = vrot.slane %v2443_v10, 5  ;;  %v2449_v26 = vrot.slane %v2447_v56, 4  ;;  %v2422_v1 = vsel %vm6778_vm2, %v2417_v15, %v2421_v13  ;;  %v2474_v10 = vor.u32 %v2473_v11, %v2469_v60 }
 0x151   : > { %v2464_v43 = vor.u32 %v2463_v36, %v2460_v19 }
 0x152   : > { %v2450_v44 = vor.u32 %v2449_v26, %v2445_v57  ;;  %v2475_v2 = vrot.slane %v2474_v10, 4  ;;  %v8437_v26 = vld [vmem:[%s8628_s2] ss:$0 sm:$0xff] }
 0x153   : > { %v2465_v56 = vrot.slane %v2464_v43, 4 }
 0x154   : > { %6292 = vmatmul.mubr.msk.bf16.gmra.mrb[16].mxu0 %vm720_vm3, %v5754_v61  ;;  %v2426_v61 = vor.u32 %v2425_v45, %v2421_v13  ;;  %v2451_v37 = vrot.slane %v2450_v44, 4  ;;  %v2480_v24 = vsel %vm6778_vm2, %v2475_v2, %v2479_v6 }
 0x155   : > { %6156 = vmatmul.mubr.msk.bf16.vlgmr.msra.gmra.mrb[16].mxu1 %vm720_vm3, %v8136_v8  ;;  %6295 = vmatprep.mubr.msk.bf16.mxu0 %vm720_vm3, %v5755_v12  ;;  %v2440_v8 = vor.u32 %v2439_v0, %v2436_v18  ;;  %v5473_v12 = vcombine.low %v2398_v42, %v2408_v54  ;;  %v2470_v53 = vsel %vm6778_vm2, %v2465_v56, %v2469_v60 }
 0x156   : > { %6159 = vmatprep.mubr.msk.bf16.mxu1 %vm720_vm3, %v5471_v50  ;;  %v2427_v20 = vrot.slane %v2426_v61, 4  ;;  %v2456_v16 = vsel %vm6778_vm2, %v2451_v37, %v2455_v62  ;;  %v5476_v32 = vcombine.low %v2470_v53, %v2480_v24 }
 0x157   : > { %v2441_v14 = vrot.slane %v2440_v8, 4 }
 0x158   : > { %v2432_v46 = vsel %vm6778_vm2, %v2427_v20, %v2431_v25 }
 0x159   : > { %v5474_v34 = vcombine.low %v2422_v1, %v2432_v46 }
 0x15c   : > { %6296 = vmatmul.mubr.msk.bf16.gmra.mrb[20].mxu0 %vm720_vm3, %v5756_v27  ;;  %v2446_v27 = vsel %vm6778_vm2, %v2441_v14, %v2445_v57 }
 0x15d   : > { %6160 = vmatmul.mubr.msk.bf16.gmra.mrb[20].mxu1 %vm720_vm3, %v5472_v63  ;;  %6299 = vmatprep.mubr.msk.bf16.mxu0 %vm720_vm3, %v5757_v49  ;;  %v5475_v49 = vcombine.low %v2446_v27, %v2456_v16 }
 0x15e   : > { %6163 = vmatprep.mubr.msk.bf16.mxu1 %vm720_vm3, %v5473_v12 }
 0x164   : > { %6300 = vmatmul.mubr.msk.bf16.gmra.mrb[24].mxu0 %vm720_vm3, %v5758_v30 }
 0x165   : > { %6164 = vmatmul.mubr.msk.bf16.gmra.mrb[24].mxu1 %vm720_vm3, %v5474_v34  ;;  %6303 = vmatprep.mubr.msk.bf16.mxu0 %vm720_vm3, %v5759_v35 }
 0x166   : > { %6167 = vmatprep.mubr.msk.bf16.mxu1 %vm720_vm3, %v5475_v49 }
 0x16c   : > { %6304 = vmatmul.mubr.msk.bf16.gmra.mrb[28].mxu0 %vm720_vm3, %v5760_v22 }
 0x16d   : > { %6168 = vmatmul.mubr.msk.bf16.gmra.mrb[28].mxu1 %vm720_vm3, %v5476_v32 }
 0x1e8   : > { %v6107_v55 = vpop.f32.mrb[0].mxu1 }
 0x1e9   : > { %v1890_v29 = vpop.f32.mrb[1].mxu1 }
 0x1ea   : > { %v6108_v30 = vpop.f32.mrb[2].mxu1 }
 0x1eb   : > { %v1893_v3 = vpop.f32.mrb[3].mxu1 }
 0x1f0   : > { %v6111_v39 = vpop.f32.mrb[4].mxu1 }
 0x1f1   : > { %v1906_v35 = vpop.f32.mrb[5].mxu1 }
 0x1f2   : > { %v6112_v23 = vpop.f32.mrb[6].mxu1 }
 0x1f3   : > { %v1909_v13 = vpop.f32.mrb[7].mxu1 }
 0x1f8   : > { %v8418_v45 = vpop.f32.mrb[8].mxu1 }
 0x1f9   : > { %v8420_v28 = vpop.f32.mrb[9].mxu1 }
 0x1fa   : > { %v8422_v50 = vpop.f32.mrb[10].mxu1 }
 0x1fb   : > { %v8424_v18 = vpop.f32.mrb[11].mxu1 }
 0x200   : > { %v8426_v7 = vpop.f32.mrb[12].mxu1 }
 0x201   : > { %v8428_v52 = vpop.f32.mrb[13].mxu1 }
 0x202   : > { %v8430_v22 = vpop.f32.mrb[14].mxu1 }
 0x203   : > { %v8432_v0 = vpop.f32.mrb[15].mxu1 }
 0x207   : > { %v6277_v57 = vpop.f32.mrb[0].mxu0 }
 0x208   : > { %v6309_v4 = vadd.f32 %v6277_v57, %v6107_v55  ;;  %v4661_v48 = vpop.f32.mrb[1].mxu0 }
 0x209   : > { %v6310_v42 = vadd.f32 %v4661_v48, %v1890_v29  ;;  %v6278_v54 = vpop.f32.mrb[2].mxu0 }
 0x20a   : > { %v4829_v58 = vmul.f32 %v6309_v4, %v8437_v26  ;;  %v6311_v61 = vadd.f32 %v6278_v54, %v6108_v30  ;;  %v4664_v41 = vpop.f32.mrb[3].mxu0 }
 0x20b   : > { %v4827_v38 = vmul.f32 %v6310_v42, %v8437_v26  ;;  %v6312_v17 = vadd.f32 %v4664_v41, %v1893_v3 }
 0x20c   : > { %v4868_v9 = vadd.f32 %v8442_v47, %v4829_v58  ;;  %v4830_v21 = vmul.f32 %v6311_v61, %v8437_v26 }
 0x20d   : > { %v4866_v31 = vadd.f32 %v8442_v47, %v4827_v38  ;;  %v4828_v8 = vmul.f32 %v6312_v17, %v8437_v26 }
 0x20e   : > { %vm4900_vm7 = vcmp.ge.f32.partialorder %v4868_v9, 0.0  ;;  %v4939_v44 = vmul.f32 %v8448_v59, %v4868_v9  ;;  %v4869_v33 = vadd.f32 %v8442_v47, %v4830_v21 }
 0x20f   : > { %vm4898_vm9 = vcmp.ge.f32.partialorder %v4866_v31, 0.0  ;;  %v4937_v40 = vmul.f32 %v8448_v59, %v4866_v31  ;;  %v4867_v63 = vadd.f32 %v8442_v47, %v4828_v8  ;;  %v6281_v12 = vpop.f32.mrb[4].mxu0 }
 0x210   : > { %v4971_v15 = vsel %vm4900_vm7, %v4868_v9, %v4939_v44  ;;  %vm4901_vm10 = vcmp.ge.f32.partialorder %v4869_v33, 0.0  ;;  %v4940_v20 = vmul.f32 %v8448_v59, %v4869_v33  ;;  %v6313_v25 = vadd.f32 %v6281_v12, %v6111_v39  ;;  %v4677_v19 = vpop.f32.mrb[5].mxu0 }
 0x211   : > { %v5818_v36 = vpack.c.bf16 %v4971_v15, %v4971_v15  ;;  %v4969_v60 = vsel %vm4898_vm9, %v4866_v31, %v4937_v40  ;;  %vm4899_vm11 = vcmp.ge.f32.partialorder %v4867_v63, 0.0  ;;  %v4938_v11 = vmul.f32 %v8448_v59, %v4867_v63  ;;  %v6282_v14 = vpop.f32.mrb[6].mxu0 }
 0x212   : > { %v5816_v37 = vpack.c.bf16 %v4969_v60, %v4969_v60  ;;  %v4972_v62 = vsel %vm4901_vm10, %v4869_v33, %v4940_v20  ;;  %v4833_v1 = vmul.f32 %v6313_v25, %v8437_v26  ;;  %v6314_v46 = vadd.f32 %v4677_v19, %v1906_v35  ;;  %v4680_v43 = vpop.f32.mrb[7].mxu0 }
 0x213   : > { %5132 = vst.msk [vmem:[%s8463_s19 + $0x8] sm:$0xf] %vm5129_vm8, %v5818_v36  ;;  %v5819_v10 = vpack.c.bf16 %v4972_v62, %v4972_v62  ;;  %v4970_v51 = vsel %vm4899_vm11, %v4867_v63, %v4938_v11  ;;  %v6315_v5 = vadd.f32 %v6282_v14, %v6112_v23  ;;  %v6316_v27 = vadd.f32 %v4680_v43, %v1909_v13 }
 0x214   : > { %5130 = vst.msk [vmem:[%s8463_s19] sm:$0xf] %vm5129_vm8, %v5816_v37  ;;  %v5817_v16 = vpack.c.bf16 %v4970_v51, %v4970_v51  ;;  %v4872_v34 = vadd.f32 %v8442_v47, %v4833_v1  ;;  %v4831_v49 = vmul.f32 %v6314_v46, %v8437_v26 }
 0x215   : > { %5133 = vst.msk [vmem:[%s8463_s19 + $0xc] sm:$0xf] %vm5129_vm8, %v5819_v10  ;;  %v4834_v56 = vmul.f32 %v6315_v5, %v8437_v26  ;;  %v4832_v2 = vmul.f32 %v6316_v27, %v8437_v26 }
 0x216   : > { %5131 = vst.msk [vmem:[%s8463_s19 + $0x4] sm:$0xf] %vm5129_vm8, %v5817_v16  ;;  %vm4904_vm12 = vcmp.ge.f32.partialorder %v4872_v34, 0.0  ;;  %v4943_v6 = vmul.f32 %v8448_v59, %v4872_v34  ;;  %v4870_v53 = vadd.f32 %v8442_v47, %v4831_v49 }
 0x217   : > { %v4873_v24 = vadd.f32 %v8442_v47, %v4834_v56  ;;  %v4871_v32 = vadd.f32 %v8442_v47, %v4832_v2  ;;  %v6285_v55 = vpop.f32.mrb[8].mxu0 }
 0x218   : > { %v4975_v29 = vsel %vm4904_vm12, %v4872_v34, %v4943_v6  ;;  %vm4902_vm13 = vcmp.ge.f32.partialorder %v4870_v53, 0.0  ;;  %v4941_v30 = vmul.f32 %v8448_v59, %v4870_v53  ;;  %v6317_v3 = vadd.f32 %v6285_v55, %v8418_v45  ;;  %v4693_v39 = vpop.f32.mrb[9].mxu0 }
 0x219   : > { %v5822_v35 = vpack.c.bf16 %v4975_v29, %v4975_v29  ;;  %vm4905_vm14 = vcmp.ge.f32.partialorder %v4873_v24, 0.0  ;;  %v4944_v23 = vmul.f32 %v8448_v59, %v4873_v24  ;;  %vm4903_vm15 = vcmp.ge.f32.partialorder %v4871_v32, 0.0  ;;  %v6286_v13 = vpop.f32.mrb[10].mxu0 }
 0x21a   : > { %v4973_v57 = vsel %vm4902_vm13, %v4870_v53, %v4941_v30  ;;  %v4942_v4 = vmul.f32 %v8448_v59, %v4871_v32  ;;  %v4837_v48 = vmul.f32 %v6317_v3, %v8437_v26  ;;  %v6318_v42 = vadd.f32 %v4693_v39, %v8420_v28  ;;  %v4696_v54 = vpop.f32.mrb[11].mxu0 }
 0x21b   : > { %5136 = vst.msk [vmem:[%s8463_s19 + $0x18] sm:$0xf] %vm5129_vm8, %v5822_v35  ;;  %v5820_v45 = vpack.c.bf16 %v4973_v57, %v4973_v57  ;;  %v4976_v58 = vsel %vm4905_vm14, %v4873_v24, %v4944_v23  ;;  %v6319_v61 = vadd.f32 %v6286_v13, %v8422_v50  ;;  %v6320_v41 = vadd.f32 %v4696_v54, %v8424_v18 }
 0x21c   : > { %v5823_v38 = vpack.c.bf16 %v4976_v58, %v4976_v58  ;;  %v4974_v17 = vsel %vm4903_vm15, %v4871_v32, %v4942_v4  ;;  %v4876_v9 = vadd.f32 %v8442_v47, %v4837_v48  ;;  %v4835_v21 = vmul.f32 %v6318_v42, %v8437_v26 }
 0x21d   : > { %5134 = vst.msk [vmem:[%s8463_s19 + $0x10] sm:$0xf] %vm5129_vm8, %v5820_v45  ;;  %v5821_v31 = vpack.c.bf16 %v4974_v17, %v4974_v17  ;;  %v4838_v28 = vmul.f32 %v6319_v61, %v8437_v26  ;;  %v4836_v8 = vmul.f32 %v6320_v41, %v8437_v26 }
 0x21e   : > { %5137 = vst.msk [vmem:[%s8463_s19 + $0x1c] sm:$0xf] %vm5129_vm8, %v5823_v38  ;;  %vm4908_vm0 = vcmp.ge.f32.partialorder %v4876_v9, 0.0  ;;  %v4947_v50 = vmul.f32 %v8448_v59, %v4876_v9  ;;  %v4874_v18 = vadd.f32 %v8442_v47, %v4835_v21 }
 0x21f   : > { %5135 = vst.msk [vmem:[%s8463_s19 + $0x14] sm:$0xf] %vm5129_vm8, %v5821_v31  ;;  %v4877_v44 = vadd.f32 %v8442_v47, %v4838_v28  ;;  %v4875_v33 = vadd.f32 %v8442_v47, %v4836_v8  ;;  %v6289_v40 = vpop.f32.mrb[12].mxu0 }
 0x220   : > { %v4979_v63 = vsel %vm4908_vm0, %v4876_v9, %v4947_v50  ;;  %vm4906_vm1 = vcmp.ge.f32.partialorder %v4874_v18, 0.0  ;;  %v4945_v12 = vmul.f32 %v8448_v59, %v4874_v18  ;;  %v6321_v15 = vadd.f32 %v6289_v40, %v8426_v7  ;;  %v4709_v20 = vpop.f32.mrb[13].mxu0 }
 0x221   : > { %v5826_v25 = vpack.c.bf16 %v4979_v63, %v4979_v63  ;;  %vm4909_vm2 = vcmp.ge.f32.partialorder %v4877_v44, 0.0  ;;  %v4948_v19 = vmul.f32 %v8448_v59, %v4877_v44  ;;  %vm4907_vm3 = vcmp.ge.f32.partialorder %v4875_v33, 0.0  ;;  %v6290_v36 = vpop.f32.mrb[14].mxu0 }
 0x222   : > { %v4977_v60 = vsel %vm4906_vm1, %v4874_v18, %v4945_v12  ;;  %v4946_v11 = vmul.f32 %v8448_v59, %v4875_v33  ;;  %v4841_v14 = vmul.f32 %v6321_v15, %v8437_v26  ;;  %v6322_v37 = vadd.f32 %v4709_v20, %v8428_v52  ;;  %v4712_v62 = vpop.f32.mrb[15].mxu0 }
 0x223   : > { %5140 = vst.msk [vmem:[%s8463_s19 + $0x28] sm:$0xf] %vm5129_vm8, %v5826_v25  ;;  %v5824_v7 = vpack.c.bf16 %v4977_v60, %v4977_v60  ;;  %v4980_v1 = vsel %vm4909_vm2, %v4877_v44, %v4948_v19  ;;  %v6323_v46 = vadd.f32 %v6290_v36, %v8430_v22  ;;  %v6324_v43 = vadd.f32 %v4712_v62, %v8432_v0 }
 0x224   : > { %v5827_v10 = vpack.c.bf16 %v4980_v1, %v4980_v1  ;;  %v4978_v51 = vsel %vm4907_vm3, %v4875_v33, %v4946_v11  ;;  %v4880_v5 = vadd.f32 %v8442_v47, %v4841_v14  ;;  %v4839_v27 = vmul.f32 %v6322_v37, %v8437_v26 }
 0x225   : > { %5138 = vst.msk [vmem:[%s8463_s19 + $0x20] sm:$0xf] %vm5129_vm8, %v5824_v7  ;;  %v5825_v16 = vpack.c.bf16 %v4978_v51, %v4978_v51  ;;  %v4842_v52 = vmul.f32 %v6323_v46, %v8437_v26  ;;  %v4840_v34 = vmul.f32 %v6324_v43, %v8437_v26 }
 0x226   : > { %5141 = vst.msk [vmem:[%s8463_s19 + $0x2c] sm:$0xf] %vm5129_vm8, %v5827_v10  ;;  %vm4912_vm4 = vcmp.ge.f32.partialorder %v4880_v5, 0.0  ;;  %v4951_v22 = vmul.f32 %v8448_v59, %v4880_v5  ;;  %v4878_v0 = vadd.f32 %v8442_v47, %v4839_v27 }
 0x227   : > { %5139 = vst.msk [vmem:[%s8463_s19 + $0x24] sm:$0xf] %vm5129_vm8, %v5825_v16  ;;  %v4881_v49 = vadd.f32 %v8442_v47, %v4842_v52  ;;  %v4879_v56 = vadd.f32 %v8442_v47, %v4840_v34  ;;  %v6293_v2 = vpop.f32.mrb[16].mxu0 }
 0x228   : > { %v4983_v6 = vsel %vm4912_vm4, %v4880_v5, %v4951_v22  ;;  %vm4910_vm5 = vcmp.ge.f32.partialorder %v4878_v0, 0.0  ;;  %v4949_v53 = vmul.f32 %v8448_v59, %v4878_v0  ;;  %v6157_v24 = vpop.f32.mrb[16].mxu1  ;;  %v4725_v32 = vpop.f32.mrb[17].mxu0 }
 0x229   : > { %v5830_v55 = vpack.c.bf16 %v4983_v6, %v4983_v6  ;;  %vm4913_vm6 = vcmp.ge.f32.partialorder %v4881_v49, 0.0  ;;  %v4952_v29 = vmul.f32 %v8448_v59, %v4881_v49  ;;  %vm4911_vm7 = vcmp.ge.f32.partialorder %v4879_v56, 0.0  ;;  %v2684_v30 = vpop.f32.mrb[17].mxu1  ;;  %v6294_v3 = vpop.f32.mrb[18].mxu0 }
 0x22a   : > { %v4981_v39 = vsel %vm4910_vm5, %v4878_v0, %v4949_v53  ;;  %v4950_v35 = vmul.f32 %v8448_v59, %v4879_v56  ;;  %v6325_v23 = vadd.f32 %v6293_v2, %v6157_v24  ;;  %v6326_v13 = vadd.f32 %v4725_v32, %v2684_v30  ;;  %v6158_v57 = vpop.f32.mrb[18].mxu1  ;;  %v4728_v4 = vpop.f32.mrb[19].mxu0 }
 0x22b   : > { %5144 = vst.msk [vmem:[%s8463_s19 + $0x38] sm:$0xf] %vm5129_vm8, %v5830_v55  ;;  %v5828_v48 = vpack.c.bf16 %v4981_v39, %v4981_v39  ;;  %v4984_v42 = vsel %vm4913_vm6, %v4881_v49, %v4952_v29  ;;  %v6327_v54 = vadd.f32 %v6294_v3, %v6158_v57  ;;  %v2687_v45 = vpop.f32.mrb[19].mxu1 }
 0x22c   : > { %v5831_v58 = vpack.c.bf16 %v4984_v42, %v4984_v42  ;;  %v4982_v61 = vsel %vm4911_vm7, %v4879_v56, %v4950_v35  ;;  %v4845_v41 = vmul.f32 %v6325_v23, %v8437_v26  ;;  %v4843_v38 = vmul.f32 %v6326_v13, %v8437_v26 }
 0x22d   : > { %5142 = vst.msk [vmem:[%s8463_s19 + $0x30] sm:$0xf] %vm5129_vm8, %v5828_v48  ;;  %v5829_v17 = vpack.c.bf16 %v4982_v61, %v4982_v61  ;;  %v4846_v9 = vmul.f32 %v6327_v54, %v8437_v26  ;;  %v6328_v21 = vadd.f32 %v4728_v4, %v2687_v45 }
 0x22e   : > { %5145 = vst.msk [vmem:[%s8463_s19 + $0x3c] sm:$0xf] %vm5129_vm8, %v5831_v58  ;;  %v4884_v31 = vadd.f32 %v8442_v47, %v4845_v41  ;;  %v4882_v28 = vadd.f32 %v8442_v47, %v4843_v38 }
 0x22f   : > { %5143 = vst.msk [vmem:[%s8463_s19 + $0x34] sm:$0xf] %vm5129_vm8, %v5829_v17  ;;  %v4885_v8 = vadd.f32 %v8442_v47, %v4846_v9  ;;  %v4844_v50 = vmul.f32 %v6328_v21, %v8437_v26  ;;  %v6297_v18 = vpop.f32.mrb[20].mxu0 }
 0x230   : > { %vm4916_vm9 = vcmp.ge.f32.partialorder %v4884_v31, 0.0  ;;  %v4955_v44 = vmul.f32 %v8448_v59, %v4884_v31  ;;  %vm4914_vm10 = vcmp.ge.f32.partialorder %v4882_v28, 0.0  ;;  %v4953_v33 = vmul.f32 %v8448_v59, %v4882_v28  ;;  %v6161_v40 = vpop.f32.mrb[20].mxu1  ;;  %v4741_v63 = vpop.f32.mrb[21].mxu0 }
 0x231   : > { %vm4917_vm11 = vcmp.ge.f32.partialorder %v4885_v8, 0.0  ;;  %v4956_v12 = vmul.f32 %v8448_v59, %v4885_v8  ;;  %v4883_v15 = vadd.f32 %v8442_v47, %v4844_v50  ;;  %v6329_v20 = vadd.f32 %v6297_v18, %v6161_v40  ;;  %v2700_v25 = vpop.f32.mrb[21].mxu1  ;;  %v6298_v19 = vpop.f32.mrb[22].mxu0 }
 0x232   : > { %v4987_v36 = vsel %vm4916_vm9, %v4884_v31, %v4955_v44  ;;  %v4985_v60 = vsel %vm4914_vm10, %v4882_v28, %v4953_v33  ;;  %v6330_v11 = vadd.f32 %v4741_v63, %v2700_v25  ;;  %v6162_v14 = vpop.f32.mrb[22].mxu1  ;;  %v4744_v37 = vpop.f32.mrb[23].mxu0 }
 0x233   : > { %v5834_v62 = vpack.c.bf16 %v4987_v36, %v4987_v36  ;;  %v5832_v7 = vpack.c.bf16 %v4985_v60, %v4985_v60  ;;  %v4988_v1 = vsel %vm4917_vm11, %v4885_v8, %v4956_v12  ;;  %vm4915_vm12 = vcmp.ge.f32.partialorder %v4883_v15, 0.0  ;;  %v2703_v46 = vpop.f32.mrb[23].mxu1 }
 0x234   : > { %v5835_v43 = vpack.c.bf16 %v4988_v1, %v4988_v1  ;;  %v4954_v10 = vmul.f32 %v8448_v59, %v4883_v15  ;;  %v4849_v51 = vmul.f32 %v6329_v20, %v8437_v26  ;;  %v4847_v5 = vmul.f32 %v6330_v11, %v8437_v26 }
 0x235   : > { %5148 = vst.msk [vmem:[%s8463_s19 + $0x48] sm:$0xf] %vm5129_vm8, %v5834_v62  ;;  %5146 = vst.msk [vmem:[%s8463_s19 + $0x40] sm:$0xf] %vm5129_vm8, %v5832_v7  ;;  %v6331_v27 = vadd.f32 %v6298_v19, %v6162_v14  ;;  %v6332_v16 = vadd.f32 %v4744_v37, %v2703_v46 }
 0x236   : > { %5149 = vst.msk [vmem:[%s8463_s19 + $0x4c] sm:$0xf] %vm5129_vm8, %v5835_v43  ;;  %v4986_v52 = vsel %vm4915_vm12, %v4883_v15, %v4954_v10  ;;  %v4888_v34 = vadd.f32 %v8442_v47, %v4849_v51  ;;  %v4886_v22 = vadd.f32 %v8442_v47, %v4847_v5 }
 0x237   : > { %v5833_v0 = vpack.c.bf16 %v4986_v52, %v4986_v52  ;;  %v4850_v49 = vmul.f32 %v6331_v27, %v8437_v26  ;;  %v4848_v56 = vmul.f32 %v6332_v16, %v8437_v26  ;;  %v6301_v2 = vpop.f32.mrb[24].mxu0 }
 0x238   : > { %vm4920_vm13 = vcmp.ge.f32.partialorder %v4888_v34, 0.0  ;;  %v4959_v6 = vmul.f32 %v8448_v59, %v4888_v34  ;;  %vm4918_vm14 = vcmp.ge.f32.partialorder %v4886_v22, 0.0  ;;  %v4957_v53 = vmul.f32 %v8448_v59, %v4886_v22  ;;  %v6165_v24 = vpop.f32.mrb[24].mxu1  ;;  %v4757_v32 = vpop.f32.mrb[25].mxu0 }
 0x239   : > { %5147 = vst.msk [vmem:[%s8463_s19 + $0x44] sm:$0xf] %vm5129_vm8, %v5833_v0  ;;  %v4889_v55 = vadd.f32 %v8442_v47, %v4850_v49  ;;  %v4887_v29 = vadd.f32 %v8442_v47, %v4848_v56  ;;  %v6333_v30 = vadd.f32 %v6301_v2, %v6165_v24  ;;  %v2716_v3 = vpop.f32.mrb[25].mxu1  ;;  %v6302_v39 = vpop.f32.mrb[26].mxu0 }
 0x23a   : > { %v4991_v35 = vsel %vm4920_vm13, %v4888_v34, %v4959_v6  ;;  %v4989_v23 = vsel %vm4918_vm14, %v4886_v22, %v4957_v53  ;;  %v6334_v13 = vadd.f32 %v4757_v32, %v2716_v3  ;;  %v6166_v57 = vpop.f32.mrb[26].mxu1  ;;  %v4760_v4 = vpop.f32.mrb[27].mxu0 }
 0x23b   : > { %v5838_v48 = vpack.c.bf16 %v4991_v35, %v4991_v35  ;;  %v5836_v42 = vpack.c.bf16 %v4989_v23, %v4989_v23  ;;  %vm4921_vm15 = vcmp.ge.f32.partialorder %v4889_v55, 0.0  ;;  %v4960_v54 = vmul.f32 %v8448_v59, %v4889_v55  ;;  %v2719_v45 = vpop.f32.mrb[27].mxu1 }
 0x23c   : > { %vm4919_vm0 = vcmp.ge.f32.partialorder %v4887_v29, 0.0  ;;  %v4958_v58 = vmul.f32 %v8448_v59, %v4887_v29  ;;  %v4853_v61 = vmul.f32 %v6333_v30, %v8437_v26  ;;  %v4851_v41 = vmul.f32 %v6334_v13, %v8437_v26 }
 0x23d   : > { %5152 = vst.msk [vmem:[%s8463_s19 + $0x58] sm:$0xf] %vm5129_vm8, %v5838_v48  ;;  %5150 = vst.msk [vmem:[%s8463_s19 + $0x50] sm:$0xf] %vm5129_vm8, %v5836_v42  ;;  %v4992_v38 = vsel %vm4921_vm15, %v4889_v55, %v4960_v54  ;;  %v6335_v17 = vadd.f32 %v6302_v39, %v6166_v57  ;;  %v6336_v9 = vadd.f32 %v4760_v4, %v2719_v45 }
 0x23e   : > { %v5839_v21 = vpack.c.bf16 %v4992_v38, %v4992_v38  ;;  %v4990_v31 = vsel %vm4919_vm0, %v4887_v29, %v4958_v58  ;;  %v4892_v28 = vadd.f32 %v8442_v47, %v4853_v61  ;;  %v4890_v8 = vadd.f32 %v8442_v47, %v4851_v41 }
 0x23f   : > { %v5837_v50 = vpack.c.bf16 %v4990_v31, %v4990_v31  ;;  %v4854_v18 = vmul.f32 %v6335_v17, %v8437_v26  ;;  %v4852_v44 = vmul.f32 %v6336_v9, %v8437_v26  ;;  %v6305_v33 = vpop.f32.mrb[28].mxu0 }
 0x240   : > { %5153 = vst.msk [vmem:[%s8463_s19 + $0x5c] sm:$0xf] %vm5129_vm8, %v5839_v21  ;;  %vm4924_vm1 = vcmp.ge.f32.partialorder %v4892_v28, 0.0  ;;  %v4963_v40 = vmul.f32 %v8448_v59, %v4892_v28  ;;  %vm4922_vm2 = vcmp.ge.f32.partialorder %v4890_v8, 0.0  ;;  %v4961_v63 = vmul.f32 %v8448_v59, %v4890_v8  ;;  %v6169_v12 = vpop.f32.mrb[28].mxu1  ;;  %v4773_v15 = vpop.f32.mrb[29].mxu0 }
 0x241   : > { %5151 = vst.msk [vmem:[%s8463_s19 + $0x54] sm:$0xf] %vm5129_vm8, %v5837_v50  ;;  %v4893_v20 = vadd.f32 %v8442_v47, %v4854_v18  ;;  %v4891_v25 = vadd.f32 %v8442_v47, %v4852_v44  ;;  %v6337_v19 = vadd.f32 %v6305_v33, %v6169_v12  ;;  %v2732_v36 = vpop.f32.mrb[29].mxu1  ;;  %v6306_v60 = vpop.f32.mrb[30].mxu0 }
 0x242   : > { %v4995_v11 = vsel %vm4924_vm1, %v4892_v28, %v4963_v40  ;;  %v4993_v14 = vsel %vm4922_vm2, %v4890_v8, %v4961_v63  ;;  %v6338_v37 = vadd.f32 %v4773_v15, %v2732_v36  ;;  %v6170_v62 = vpop.f32.mrb[30].mxu1  ;;  %v4776_v7 = vpop.f32.mrb[31].mxu0 }
 0x243   : > { %v5842_v1 = vpack.c.bf16 %v4995_v11, %v4995_v11  ;;  %v5840_v46 = vpack.c.bf16 %v4993_v14, %v4993_v14  ;;  %vm4925_vm3 = vcmp.ge.f32.partialorder %v4893_v20, 0.0  ;;  %v4964_v43 = vmul.f32 %v8448_v59, %v4893_v20  ;;  %v2735_v10 = vpop.f32.mrb[31].mxu1 }
 0x244   : > { %vm4923_vm4 = vcmp.ge.f32.partialorder %v4891_v25, 0.0  ;;  %v4962_v51 = vmul.f32 %v8448_v59, %v4891_v25  ;;  %v4857_v5 = vmul.f32 %v6337_v19, %v8437_v26  ;;  %v4855_v27 = vmul.f32 %v6338_v37, %v8437_v26 }
 0x245   : > { %5156 = vst.msk [vmem:[%s8463_s19 + $0x68] sm:$0xf] %vm5129_vm8, %v5842_v1  ;;  %5154 = vst.msk [vmem:[%s8463_s19 + $0x60] sm:$0xf] %vm5129_vm8, %v5840_v46  ;;  %v4996_v16 = vsel %vm4925_vm3, %v4893_v20, %v4964_v43  ;;  %v6339_v52 = vadd.f32 %v6306_v60, %v6170_v62  ;;  %v6340_v34 = vadd.f32 %v4776_v7, %v2735_v10 }
 0x246   : > { %v5843_v22 = vpack.c.bf16 %v4996_v16, %v4996_v16  ;;  %v4994_v0 = vsel %vm4923_vm4, %v4891_v25, %v4962_v51  ;;  %v4896_v49 = vadd.f32 %v8442_v47, %v4857_v5  ;;  %v4894_v56 = vadd.f32 %v8442_v47, %v4855_v27 }
 0x247   : > { %v5841_v2 = vpack.c.bf16 %v4994_v0, %v4994_v0  ;;  %v4858_v6 = vmul.f32 %v6339_v52, %v8437_v26  ;;  %v4856_v53 = vmul.f32 %v6340_v34, %v8437_v26 }
 0x248   : > { %5157 = vst.msk [vmem:[%s8463_s19 + $0x6c] sm:$0xf] %vm5129_vm8, %v5843_v22  ;;  %vm4928_vm5 = vcmp.ge.f32.partialorder %v4896_v49, 0.0  ;;  %v4967_v24 = vmul.f32 %v8448_v59, %v4896_v49  ;;  %vm4926_vm6 = vcmp.ge.f32.partialorder %v4894_v56, 0.0  ;;  %v4965_v32 = vmul.f32 %v8448_v59, %v4894_v56 }
 0x249   : > { %5155 = vst.msk [vmem:[%s8463_s19 + $0x64] sm:$0xf] %vm5129_vm8, %v5841_v2  ;;  %v4897_v55 = vadd.f32 %v8442_v47, %v4858_v6  ;;  %v4895_v29 = vadd.f32 %v8442_v47, %v4856_v53 }
 0x24a   : > { %v4999_v30 = vsel %vm4928_vm5, %v4896_v49, %v4967_v24  ;;  %v4997_v26 = vsel %vm4926_vm6, %v4894_v56, %v4965_v32 }
 0x24b   : > { %v5846_v3 = vpack.c.bf16 %v4999_v30, %v4999_v30  ;;  %v5844_v39 = vpack.c.bf16 %v4997_v26, %v4997_v26  ;;  %vm4929_vm7 = vcmp.ge.f32.partialorder %v4897_v55, 0.0  ;;  %v4968_v35 = vmul.f32 %v8448_v59, %v4897_v55 }
 0x24c   : > { %vm4927_vm9 = vcmp.ge.f32.partialorder %v4895_v29, 0.0  ;;  %v4966_v23 = vmul.f32 %v8448_v59, %v4895_v29 }
 0x24d   : > { %5160 = vst.msk [vmem:[%s8463_s19 + $0x78] sm:$0xf] %vm5129_vm8, %v5846_v3  ;;  %5158 = vst.msk [vmem:[%s8463_s19 + $0x70] sm:$0xf] %vm5129_vm8, %v5844_v39  ;;  %v5000_v13 = vsel %vm4929_vm7, %v4897_v55, %v4968_v35 }
 0x24e   : > { %v5847_v57 = vpack.c.bf16 %v5000_v13, %v5000_v13  ;;  %v4998_v4 = vsel %vm4927_vm9, %v4895_v29, %v4966_v23 }
 0x24f   : > { %v5845_v48 = vpack.c.bf16 %v4998_v4, %v4998_v4 }
 0x250   : > { %5161 = vst.msk [vmem:[%s8463_s19 + $0x7c] sm:$0xf] %vm5129_vm8, %v5847_v57 }
 0x251   : > { %5159 = vst.msk [vmem:[%s8463_s19 + $0x74] sm:$0xf] %vm5129_vm8, %v5845_v48 }
 0x252 PF: > { %s15_s18 = sadd.s32 1, %s6696_s18  }
 0x253   : > { %p12_p4 = scmp.ge.s32.totalorder %s15_s18, 4  }
 0x255   :  { %14 = sbr.rel (!%p12_p4) target bundleno = 1 (0x1), region = 80 }

// kernel: network_forward.8
= control target key start
LH: loop header
LB: loop body
LE: loop exit
PB: predicated region body
PF: predicated region fallthrough
CT: control target
= control target key end

     0   :  { %s2540_s18 = smov 0   ;;  %s3073_s0 = inlined_call_operand.vmem [shape: bf16[2,10,10,32], index: 0, kind: input, shape index: {}]   ;;  %s3074_s1 = inlined_call_operand.vmem [shape: bf16[9,32,32], index: 1, kind: input, shape index: {}]   ;;  %s3075_s2 = inlined_call_operand.vmem [shape: f32[1,32], index: 2, kind: input, shape index: {}]   ;;  %s3076_s3 = inlined_call_operand.vmem [shape: f32[1,32], index: 3, kind: input, shape index: {}]   ;;  %s3077_s4 = inlined_call_operand.vmem [shape: f32[1,32], index: 4, kind: input, shape index: {}]   ;;  %s3078_s5 = inlined_call_operand.vmem [shape: bf16[2,64,32], index: 5, kind: output, shape index: {}]  }
   0x1 LB: > { %s1993_s19 = sadd.s32 4294967295, %s2508_s18   ;;  %p1997_p0 = scmp.ge.s32.totalorder %s2508_s18, 1  ;;  %s2508_s18 = sphi %s2540_s18, %s15_s18  }
   0x2   : > { %p187_p1 = scmp.lt.s32.totalorder %s2508_s18, 3 }
   0x4   : > { %p188_p2 = pnand %p1997_p0, %p187_p1 }
   0x5   : > { %v2472_v0 = vld [vmem:[%s3074_s1 + $0x10] sm:$0xff] (!%p188_p2)   ;;  %p215_p3 = scmp.lt.s32.totalorder (!%p188_p2), %s1993_s19, 1  ;;  %v2554_v1 = vld [vmem:[%s3074_s1 + $0x40] sm:$0xff] (!%p188_p2)   ;;  %v2474_v2 = vld [vmem:[%s3074_s1 + $0x18] sm:$0xff] (!%p188_p2)   ;;  %vm246_vm0 = vsmask.f32 (!%p188_p2), 3328 }
   0x6   : > { %191 = sbr.rel (%p188_p2) target bundleno = 341 (0x155), region = 40  ;;  %2287 = vmatprep.subr.bf16.mxu1 (!%p188_p2), %v2472_v0  ;;  %2335 = vmatprep.subr.bf16.mxu0 (!%p188_p2), %v2554_v1  ;;  %v2565_v3 = vld [vmem:[%s3074_s1 + $0x48] sm:$0xff] (!%p188_p2)   ;;  %v2572_v4 = vld [vmem:[%s3074_s1] sm:$0xff] (!%p188_p2)   ;;  %v2583_v5 = vld [vmem:[%s3074_s1 + $0x50] sm:$0xff] (!%p188_p2)   ;;  %vm247_vm1 = vsmask.f32 (!%p188_p2), 7440 }
   0x7   : > { %2288 = vmatpush3.bf16.msra.mxu1 (!%p188_p2), %v2472_v0  ;;  %2336 = vmatpush3.bf16.msra.mxu0 (!%p188_p2), %v2554_v1  ;;  %vm2617_vm2 = vmor (!%p188_p2), %vm246_vm0, %vm247_vm1  ;;  %vm390_vm3 = vcmask (!%p188_p2), 261120   ;;  %vm601_vm4 = vcmask (!%p188_p2), 1042432   ;;  %vm602_vm5 = vcmask (!%p188_p2), 1046532   ;;  %v2212_v30 = vld [vmem:[%s3076_s3] ss:$0 sm:$0xff] (!%p188_p2)  ;;  %vm1929_vm9 = vcmask (!%p188_p2), 257024  }
   0x8   : > { %2289 = vmatprep.subr.bf16.mxu1 (!%p188_p2), %v2474_v2  ;;  %2337 = vmatprep.subr.bf16.mxu0 (!%p188_p2), %v2565_v3  ;;  %vm2724_vm6 = vmor (!%p188_p2), %vm601_vm4, %vm602_vm5 }
   0xb   : > { %2290 = vmatpush3.bf16.msra.mxu1 (!%p188_p2), %v2474_v2  ;;  %2338 = vmatpush3.bf16.msra.mxu0 (!%p188_p2), %v2565_v3 }
   0xc   : > { %2299 = vmatprep.subr.bf16.mxu1 (!%p188_p2), %v2572_v4  ;;  %2347 = vmatprep.subr.bf16.mxu0 (!%p188_p2), %v2583_v5 }
   0xd   : > { %s3084_s19 = smov (!%p215_p3, %s1993_s19), 1 }
   0xe   : > { %s2463_s28 = smul.u32 80, %s3084_s19  ;;  %s2224_s20 = sshll.u32 %s3084_s19, 5 }
   0xf   : > { %s3052_s23 = scalar_lea.vmem %s3078_s5, %s2224_s20 }
  0x10   : > { %s2578_s8 = scalar_lea.vmem %s3073_s0, %s2463_s28 }
  0x11   : > { %v2586_v6 = vld [vmem:[%s2578_s8] sm:$0xf]  ;;  %v2589_v7 = vld [vmem:[%s2578_s8 + $0x8] sm:$0xf]  ;;  %v2592_v8 = vld [vmem:[%s2578_s8 + $0x4] sm:$0x1] }
  0x12   : > { %v2596_v9 = vld [vmem:[%s2578_s8 + $0xc] sm:$0x1]  ;;  %v250_v10 = vshrl.u32 %v2586_v6, 16  ;;  %v253_v11 = vshll.u32 %v2586_v6, 16  ;;  %v259_v12 = vshll.u32 %v2592_v8, 16  ;;  %v264_v13 = vshrl.u32 %v2589_v7, 16 }
  0x13   : > { %v267_v14 = vshll.u32 %v2589_v7, 16  ;;  %v273_v15 = vshll.u32 %v2596_v9, 16  ;;  %v2069_v16 = vld [vmem:[%s2578_s8 + $0x8] sm:$0xf]  ;;  %v2608_v21 = vld [vmem:[%s2578_s8 + $0xc] sm:$0x1] }
  0x14   : > { %v252_v17 = vrot.slane %v250_v10, 4  ;;  %v255_v18 = vrot.slane %v253_v11, 5  ;;  %v261_v19 = vrot.slane %v259_v12, 5  ;;  %v266_v20 = vrot.slane %v264_v13, 4  ;;  %v2071_v24 = vld [vmem:[%s2578_s8 + $0x10] sm:$0xf] }
  0x15   : > { %v269_v22 = vrot.slane %v267_v14, 5  ;;  %v275_v23 = vrot.slane %v273_v15, 5  ;;  %v2612_v25 = vld [vmem:[%s2578_s8 + $0x14] sm:$0x1]  ;;  %v898_v27 = vshrl.u32 %v2069_v16, 16  ;;  %v901_v28 = vshll.u32 %v2069_v16, 16 }
  0x16   : > { %v256_v26 = vor.u32 %v255_v18, %v252_v17  ;;  %v907_v29 = vshll.u32 %v2608_v21, 16  ;;  %v912_v32 = vshrl.u32 %v2071_v24, 16  ;;  %v915_v33 = vshll.u32 %v2071_v24, 16  ;;  %v2623_v35 = vld [vmem:[%s2578_s8 + $0x10] sm:$0xf] }
  0x17   : > { %v270_v31 = vor.u32 %v269_v22, %v266_v20  ;;  %v921_v34 = vshll.u32 %v2612_v25, 16  ;;  %v900_v37 = vrot.slane %v898_v27, 4  ;;  %v903_v38 = vrot.slane %v901_v28, 5  ;;  %v2626_v39 = vld [vmem:[%s2578_s8 + $0x18] sm:$0xf] }
  0x18   : > { %v257_v36 = vrot.slane %v256_v26, 4  ;;  %v914_v41 = vrot.slane %v912_v32, 4  ;;  %v917_v42 = vrot.slane %v915_v33, 5  ;;  %v2629_v43 = vld [vmem:[%s2578_s8 + $0x14] sm:$0x1]  ;;  %v909_v46 = vrot.slane %v907_v29, 5 }
  0x19   : > { %v271_v40 = vrot.slane %v270_v31, 4  ;;  %v904_v45 = vor.u32 %v903_v38, %v900_v37  ;;  %v923_v47 = vrot.slane %v921_v34, 5  ;;  %v2636_v50 = vld [vmem:[%s2578_s8 + $0x1c] sm:$0x1]  ;;  %v278_v51 = vshrl.u32 %v2623_v35, 16 }
  0x1a   : > { %v262_v44 = vsel %vm2617_vm2, %v257_v36, %v261_v19  ;;  %v918_v49 = vor.u32 %v917_v42, %v914_v41  ;;  %v281_v52 = vshll.u32 %v2623_v35, 16  ;;  %v2073_v53 = vld [vmem:[%s2578_s8 + $0x18] sm:$0xf]  ;;  %v287_v56 = vshll.u32 %v2629_v43, 16  ;;  %v2650_v10 = vld [vmem:[%s2578_s8 + $0x1c] sm:$0x1] }
  0x1b   : > { %v276_v48 = vsel %vm2617_vm2, %v271_v40, %v275_v23  ;;  %v905_v55 = vrot.slane %v904_v45, 4  ;;  %v292_v57 = vshrl.u32 %v2626_v39, 16  ;;  %v280_v59 = vrot.slane %v278_v51, 4  ;;  %v2075_v15 = vld [vmem:[%s2578_s8 + $0x20] sm:$0xf] }
  0x1c   : > { %v2005_v54 = vcombine.low %v262_v44, %v276_v48  ;;  %v919_v58 = vrot.slane %v918_v49, 4  ;;  %v283_v60 = vrot.slane %v281_v52, 5  ;;  %v295_v61 = vshll.u32 %v2626_v39, 16  ;;  %v2656_v16 = vld [vmem:[%s2578_s8 + $0x24] sm:$0x1]  ;;  %v2479_v52 = vld [vmem:[%s3074_s1 + $0x8] sm:$0xff]  }
  0x1d   : > { %v910_v62 = vsel %vm2617_vm2, %v905_v55, %v909_v46  ;;  %v1149_v63 = vrot.slane %v2608_v21, 5  ;;  %v294_v0 = vrot.slane %v292_v57, 4  ;;  %v301_v2 = vshll.u32 %v2636_v50, 16  ;;  %v2660_v22 = vld [vmem:[%s2578_s8 + $0x20] sm:$0xf] }
  0x1e   : > { %2291 = vmatprep.mubr.msk.bf16.mxu1 %vm390_vm3, %v2005_v54  ;;  %v924_v11 = vsel %vm2617_vm2, %v919_v58, %v923_v47  ;;  %v284_v12 = vor.u32 %v283_v60, %v280_v59  ;;  %v289_v13 = vrot.slane %v287_v56, 5  ;;  %v297_v14 = vrot.slane %v295_v61, 5  ;;  %v2668_v38 = vld [vmem:[%s2578_s8 + $0x24] sm:$0x1]  ;;  %v2672_v45 = vld [vmem:[%s2578_s8 + $0x28] sm:$0xf] }
  0x1f   : > { %v2089_v17 = vcombine.low %v910_v62, %v924_v11  ;;  %v1153_v18 = vrot.slane %v2612_v25, 5  ;;  %v303_v19 = vrot.slane %v301_v2, 5  ;;  %v926_v20 = vshrl.u32 %v2073_v53, 16  ;;  %v2678_v49 = vld [vmem:[%s2578_s8 + $0x2c] sm:$0x1] }
  0x20   : > { %v285_v23 = vrot.slane %v284_v12, 4  ;;  %v298_v24 = vor.u32 %v297_v14, %v294_v0  ;;  %v929_v26 = vshll.u32 %v2073_v53, 16  ;;  %v935_v27 = vshll.u32 %v2650_v10, 16  ;;  %v2687_v57 = vld [vmem:[%s2578_s8 + $0x30] sm:$0xf] }
  0x21   : > { %2339 = vmatprep.mubr.msk.bf16.mxu0 %vm390_vm3, %v2089_v17  ;;  %v928_v28 = vrot.slane %v926_v20, 4  ;;  %v940_v29 = vshrl.u32 %v2075_v15, 16  ;;  %v943_v31 = vshll.u32 %v2075_v15, 16  ;;  %v949_v32 = vshll.u32 %v2656_v16, 16  ;;  %v2690_v58 = vld [vmem:[%s2578_s8 + $0x34] sm:$0x1] }
  0x22   : > { %v290_v33 = vsel %vm2617_vm2, %v285_v23, %v289_v13  ;;  %v299_v34 = vrot.slane %v298_v24, 4  ;;  %v931_v36 = vrot.slane %v929_v26, 5  ;;  %v937_v37 = vrot.slane %v935_v27, 5  ;;  %v2695_v0 = vld [vmem:[%s2578_s8 + $0x38] sm:$0xf]  ;;  %v2712_v24 = vld [vmem:[%s3074_s1 + $0x20] sm:$0xff]  }
  0x23   : > { %v942_v40 = vrot.slane %v940_v29, 4  ;;  %v945_v41 = vrot.slane %v943_v31, 5  ;;  %v951_v42 = vrot.slane %v949_v32, 5  ;;  %v1157_v44 = vrot.slane %v2650_v10, 5  ;;  %v2478_v15 = vld [vmem:[%s3074_s1 + $0x58] sm:$0xff]  }
  0x24   : > { %v304_v46 = vsel %vm2617_vm2, %v299_v34, %v303_v19  ;;  %v932_v47 = vor.u32 %v931_v36, %v928_v28  ;;  %v1161_v48 = vrot.slane %v2656_v16, 5  ;;  %v306_v51 = vshrl.u32 %v2660_v22, 16  ;;  %v2706_v20 = vld [vmem:[%s2578_s8 + $0x3c] sm:$0x1]  ;;  %v2099_v29 = vld [vmem:[%s2578_s8 + $0x8] sm:$0xe] }
  0x25   : > { %v2006_v53 = vcombine.low %v290_v33, %v304_v46  ;;  %v946_v54 = vor.u32 %v945_v41, %v942_v40  ;;  %v309_v55 = vshll.u32 %v2660_v22, 16  ;;  %v315_v56 = vshll.u32 %v2668_v38, 16  ;;  %v2100_v36 = vld [vmem:[%s2578_s8 + $0x10] sm:$0xe]  ;;  %v2106_v16 = vld [vmem:[%s2578_s8 + $0x40] sm:$0xe] }
  0x26   : > { %v933_v59 = vrot.slane %v932_v47, 4  ;;  %v308_v60 = vrot.slane %v306_v51, 4  ;;  %v320_v61 = vshrl.u32 %v2672_v45, 16  ;;  %v323_v62 = vshll.u32 %v2672_v45, 16  ;;  %v2101_v47 = vld [vmem:[%s2578_s8 + $0x18] sm:$0xe] }
  0x27   : > { %2292 = vmatmul.mubr.msk.bf16.vlgmr.msra.gmra.mrb[0].mxu1 %vm390_vm3, %v2006_v53  ;;  %v947_v2 = vrot.slane %v946_v54, 4  ;;  %v311_v11 = vrot.slane %v309_v55, 5  ;;  %v317_v12 = vrot.slane %v315_v56, 5  ;;  %v329_v13 = vshll.u32 %v2678_v49, 16  ;;  %v2480_v56 = vld [vmem:[%s3074_s1 + $0x60] sm:$0xff]  }
  0x28   : > { %2300 = vmatpush3.bf16.msra.mxu1 %v2572_v4  ;;  %v938_v14 = vsel %vm2617_vm2, %v933_v59, %v937_v37  ;;  %v322_v17 = vrot.slane %v320_v61, 4  ;;  %v325_v19 = vrot.slane %v323_v62, 5  ;;  %v334_v23 = vshrl.u32 %v2687_v57, 16  ;;  %v2102_v59 = vld [vmem:[%s2578_s8 + $0x20] sm:$0xe] }
  0x29   : > { %v952_v4 = vsel %vm2617_vm2, %v947_v2, %v951_v42  ;;  %v312_v26 = vor.u32 %v311_v11, %v308_v60  ;;  %v331_v27 = vrot.slane %v329_v13, 5  ;;  %2301 = vmatprep.subr.bf16.mxu1 %v2479_v52  ;;  %v337_v28 = vshll.u32 %v2687_v57, 16  ;;  %v2211_v46 = vld [vmem:[%s3075_s2] ss:$0 sm:$0xff] }
  0x2a   : > { %v2090_v31 = vcombine.low %v938_v14, %v952_v4  ;;  %v326_v32 = vor.u32 %v325_v19, %v322_v17  ;;  %v336_v33 = vrot.slane %v334_v23, 4  ;;  %v343_v34 = vshll.u32 %v2690_v58, 16  ;;  %v2747_v14 = vld [vmem:[%s2578_s8 + $0x2c] sm:$0x1] }
  0x2b   : > { %v313_v37 = vrot.slane %v312_v26, 4  ;;  %v339_v40 = vrot.slane %v337_v28, 5  ;;  %v348_v41 = vshrl.u32 %v2695_v0, 16  ;;  %v351_v42 = vshll.u32 %v2695_v0, 16  ;;  %v2750_v26 = vld [vmem:[%s2578_s8 + $0x34] sm:$0x1] }
  0x2c   : > { %2340 = vmatmul.mubr.msk.bf16.vlgmr.msra.gmra.mrb[0].mxu0 %vm390_vm3, %v2090_v31  ;;  %v327_v51 = vrot.slane %v326_v32, 4  ;;  %v345_v53 = vrot.slane %v343_v34, 5  ;;  %v357_v54 = vshll.u32 %v2706_v20, 16  ;;  %2302 = vmatpush3.bf16.msra.mxu1 %v2479_v52  ;;  %v2107_v55 = vrot.slane %v2099_v29, 9  ;;  %v2103_v52 = vld [vmem:[%s2578_s8 + $0x28] sm:$0xe] }
  0x2d   : > { %2348 = vmatpush3.bf16.msra.mxu0 %v2583_v5  ;;  %v318_v60 = vsel %vm2617_vm2, %v313_v37, %v317_v12  ;;  %v340_v61 = vor.u32 %v339_v40, %v336_v33  ;;  %v350_v62 = vrot.slane %v348_v41, 4  ;;  %v353_v2 = vrot.slane %v351_v42, 5  ;;  %2311 = vmatprep.subr.bf16.mxu1 %v2712_v24  ;;  %v2104_v28 = vld [vmem:[%s2578_s8 + $0x30] sm:$0xe]  ;;  %v2758_v31 = vld [vmem:[%s2578_s8 + $0x3c] sm:$0x1] }
  0x2e   : > { %2349 = vmatprep.subr.bf16.mxu0 %v2478_v15  ;;  %v332_v11 = vsel %vm2617_vm2, %v327_v51, %v331_v27  ;;  %v359_v13 = vrot.slane %v357_v54, 5  ;;  %v1150_v5 = vsel %vm2724_vm6, %v2107_v55, %v1149_v63  ;;  %v2108_v12 = vrot.slane %v2100_v36, 9  ;;  %v2105_v63 = vld [vmem:[%s2578_s8 + $0x38] sm:$0xe] }
  0x2f   : > { %v2007_v17 = vcombine.low %v318_v60, %v332_v11  ;;  %v341_v19 = vrot.slane %v340_v61, 4  ;;  %v354_v23 = vor.u32 %v353_v2, %v350_v62  ;;  %v2109_v4 = vrot.slane %v2101_v47, 9  ;;  %v578_v60 = vld [vmem:[%s2578_s8 + $0x8] sm:$0xe] }
  0x30   : > { %v1154_v27 = vsel %vm2724_vm6, %v2108_v12, %v1153_v18  ;;  %v2110_v29 = vrot.slane %v2102_v59, 9  ;;  %v2111_v21 = vrot.slane %v2103_v52, 9  ;;  %v2112_v36 = vrot.slane %v2104_v28, 9  ;;  %v577_v59 = vld [vmem:[%s2578_s8] sm:$0xe] }
  0x31   : > { %2350 = vmatpush3.bf16.msra.mxu0 %v2478_v15  ;;  %2295 = vmatprep.mubr.msk.bf16.mxu1 %vm390_vm3, %v2007_v17  ;;  %v346_v32 = vsel %vm2617_vm2, %v341_v19, %v345_v53  ;;  %v355_v33 = vrot.slane %v354_v23, 4  ;;  %v2119_v34 = vcombine.low %v1150_v5, %v1154_v27  ;;  %v1158_v25 = vsel %vm2724_vm6, %v2109_v4, %v1157_v44  ;;  %v2780_v44 = vld [vmem:[%s2578_s8 + $0x44] sm:$0x1]  ;;  %v579_v12 = vld [vmem:[%s2578_s8 + $0x10] sm:$0xe] }
  0x32   : > { %2359 = vmatprep.subr.bf16.mxu0 %v2480_v56  ;;  %v1162_v18 = vsel %vm2724_vm6, %v2110_v29, %v1161_v48  ;;  %v1165_v15 = vrot.slane %v2747_v14, 5  ;;  %v1169_v37 = vrot.slane %v2750_v26, 5  ;;  %v2015_v10 = vcombine.low %v2586_v6, %v2589_v7  ;;  %v2484_v6 = vld [vmem:[%s3074_s1 + $0x68] sm:$0xff]   ;;  %v580_v17 = vld [vmem:[%s2578_s8 + $0x18] sm:$0xe] }
  0x33   : > { %v360_v40 = vsel %vm2617_vm2, %v355_v33, %v359_v13  ;;  %2351 = vmatprep.mubr.msk.bf16.mxu0 %vm390_vm3, %v2119_v34  ;;  %v2120_v48 = vcombine.low %v1158_v25, %v1162_v18  ;;  %v2113_v53 = vrot.slane %v2105_v63, 9  ;;  %v1173_v54 = vrot.slane %v2758_v31, 5  ;;  %v2488_v28 = vld [vmem:[%s2578_s8 + $0x10] ss:$8 sps:$4 sm:$0xff]   ;;  %v581_v29 = vld [vmem:[%s2578_s8 + $0x20] sm:$0xe] }
  0x34   : > { %v2008_v41 = vcombine.low %v346_v32, %v360_v40  ;;  %v1166_v42 = vsel %vm2724_vm6, %v2111_v21, %v1165_v15  ;;  %v1170_v47 = vsel %vm2724_vm6, %v2112_v36, %v1169_v37  ;;  %v2114_v7 = vrot.slane %v2106_v16, 9  ;;  %v582_v33 = vld [vmem:[%s2578_s8 + $0x28] sm:$0xe]  ;;  %v2842_v34 = vld [vmem:[%s2578_s8 + $0x30] sm:$0xe] }
  0x35   : > { %v2121_v51 = vcombine.low %v1166_v42, %v1170_v47  ;;  %v1177_v55 = vrot.slane %v2780_v44, 5  ;;  %v606_v61 = vrot.slane %v2592_v8, 5  ;;  %v610_v62 = vrot.slane %v2596_v9, 5  ;;  %v2809_v8 = vld [vmem:[%s3074_s1 + $0x70] sm:$0xff]   ;;  %v2153_v37 = vld [vmem:[%s2578_s8 + $0x18] sm:$0xf] }
  0x36   : > { %2296 = vmatmul.mubr.msk.bf16.gmra.mrb[4].mxu1 %vm390_vm3, %v2008_v41  ;;  %v614_v2 = vrot.slane %v2629_v43, 5  ;;  %v618_v52 = vrot.slane %v2636_v50, 5  ;;  %v1174_v11 = vsel %vm2724_vm6, %v2113_v53, %v1173_v54  ;;  %v2025_v9 = vrot.slane %v577_v59, 9  ;;  %v2151_v25 = vld [vmem:[%s2578_s8 + $0x10] sm:$0xf]  ;;  %v2493_v50 = vld [vmem:[%s3074_s1 + $0x78] sm:$0xff]  }
  0x37   : > { %2303 = vmatprep.mubr.msk.bf16.mxu1 %vm390_vm3, %v2015_v10  ;;  %v1178_v13 = vsel %vm2724_vm6, %v2114_v7, %v1177_v55  ;;  %v2026_v43 = vrot.slane %v578_v60, 9  ;;  %v2016_v5 = vcombine.low %v2623_v35, %v2626_v39  ;;  %v2017_v19 = vcombine.low %v2660_v22, %v2672_v45  ;;  %v2849_v36 = vld [vmem:[%s2578_s8 + $0x14] sm:$0x1]  ;;  %v2858_v16 = vld [vmem:[%s2578_s8 + $0x1c] sm:$0x1] }
  0x38   : > { %2352 = vmatmul.mubr.msk.bf16.vlgmr.msra.gmra.mrb[0].mxu0 %vm390_vm3, %v2120_v48  ;;  %v991_v23 = vshll.u32 %v2758_v31, 16  ;;  %v2122_v4 = vcombine.low %v1174_v11, %v1178_v13  ;;  %v622_v27 = vrot.slane %v2668_v38, 5  ;;  %v607_v35 = vsel %vm2724_vm6, %v2025_v9, %v606_v61  ;;  %v2834_v38 = vld [vmem:[%s3074_s1 + $0x30] sm:$0xff]   ;;  %v2155_v59 = vld [vmem:[%s2578_s8 + $0x20] sm:$0xf] }
  0x39   : > { %2360 = vmatpush3.bf16.msra.mxu0 %v2480_v56  ;;  %2355 = vmatprep.mubr.msk.bf16.mxu0 %vm390_vm3, %v2121_v51  ;;  %v2486_v56 = vld [vmem:[%s3074_s1 + $0x28] sm:$0xff]   ;;  %v2027_v39 = vrot.slane %v579_v12, 9  ;;  %v626_v21 = vrot.slane %v2678_v49, 5  ;;  %v611_v22 = vsel %vm2724_vm6, %v2026_v43, %v610_v62  ;;  %v2028_v45 = vrot.slane %v580_v17, 9  ;;  %v2492_v53 = vld [vmem:[%s2578_s8 + $0x30] ss:$8 sps:$4 sm:$0xff]  }
  0x3a   : > { %2361 = vmatprep.subr.bf16.mxu0 %v2484_v6  ;;  %v630_v63 = vrot.slane %v2690_v58, 5  ;;  %v634_v32 = vrot.slane %v2706_v20, 5  ;;  %v2018_v18 = vcombine.low %v2687_v57, %v2695_v0  ;;  %v2029_v15 = vrot.slane %v581_v29, 9  ;;  %v2490_v57 = vld [vmem:[%s2578_s8 + $0x20] ss:$8 sps:$4 sm:$0xff]  }
  0x3b   : > { %v1441_v40 = vshrl.u32 %v2151_v25, 16  ;;  %v2855_v10 = vsel %vm2724_vm6, %v2027_v39, %v614_v2  ;;  %v1444_v41 = vshll.u32 %v2151_v25, 16  ;;  %v1450_v48 = vshll.u32 %v2849_v36, 16  ;;  %v584_v62 = vld [vmem:[%s2578_s8 + $0x38] sm:$0xe] }
  0x3c   : > { %v2030_v0 = vrot.slane %v582_v33, 9  ;;  %v1455_v47 = vshrl.u32 %v2153_v37, 16  ;;  %v1458_v51 = vshll.u32 %v2153_v37, 16  ;;  %v2031_v54 = vrot.slane %v2842_v34, 9  ;;  %v2877_v13 = vld [vmem:[%s2578_s8 + $0x24] sm:$0x1] }
  0x3d   : > { %2362 = vmatpush3.bf16.msra.mxu0 %v2484_v6  ;;  %v1443_v42 = vrot.slane %v1441_v40, 4  ;;  %v1446_v6 = vrot.slane %v1444_v41, 5  ;;  %v1452_v7 = vrot.slane %v1450_v48, 5  ;;  %v1464_v55 = vshll.u32 %v2858_v16, 16  ;;  %v2157_v9 = vld [vmem:[%s2578_s8 + $0x28] sm:$0xf] }
  0x3e   : > { %2304 = vmatmul.mubr.msk.bf16.vlgmr.msra.gmra.mrb[0].mxu1 %vm390_vm3, %v2016_v5  ;;  %2371 = vmatprep.subr.bf16.mxu0 %v2809_v8  ;;  %v619_v60 = vsel %vm2724_vm6, %v2028_v45, %v618_v52  ;;  %v2873_v61 = vsel %vm2724_vm6, %v2029_v15, %v622_v27  ;;  %v1457_v2 = vrot.slane %v1455_v47, 4  ;;  %v1460_v11 = vrot.slane %v1458_v51, 5  ;;  %v2494_v49 = vld [vmem:[%s2578_s8 + $0x40] ss:$8 sps:$4 sm:$0xff]   ;;  %v2159_v48 = vld [vmem:[%s2578_s8 + $0x30] sm:$0xf] }
  0x3f   : > { %2312 = vmatpush3.bf16.msra.mxu1 %v2712_v24  ;;  %2307 = vmatprep.mubr.msk.bf16.mxu1 %vm390_vm3, %v2017_v19  ;;  %v2037_v24 = vcombine.low %v607_v35, %v611_v22  ;;  %v1447_v43 = vor.u32 %v1446_v6, %v1443_v42  ;;  %v1466_v5 = vrot.slane %v1464_v55, 5  ;;  %v1469_v12 = vshrl.u32 %v2155_v59, 16  ;;  %v2161_v51 = vld [vmem:[%s2578_s8 + $0x38] sm:$0xf] }
  0x40   : > { %2356 = vmatmul.mubr.msk.bf16.gmra.mrb[4].mxu0 %vm390_vm3, %v2122_v4  ;;  %2313 = vmatprep.subr.bf16.mxu1 %v2486_v56  ;;  %v1472_v17 = vshll.u32 %v2155_v59, 16  ;;  %v1461_v52 = vor.u32 %v1460_v11, %v1457_v2  ;;  %v1478_v19 = vshll.u32 %v2877_v13, 16  ;;  %v1483_v4 = vshrl.u32 %v2157_v9, 16 }
  0x41   : > { %2363 = vmatprep.mubr.msk.bf16.mxu0 %vm390_vm3, %v2488_v28  ;;  %v1486_v28 = vshll.u32 %v2157_v9, 16  ;;  %v1448_v27 = vrot.slane %v1447_v43, 4  ;;  %v1471_v35 = vrot.slane %v1469_v12, 4  ;;  %v627_v22 = vsel %vm2724_vm6, %v2030_v0, %v626_v21  ;;  %v2495_v21 = vld [vmem:[%s3074_s1 + $0x38] sm:$0xff]   ;;  %v2163_v43 = vld [vmem:[%s2578_s8 + $0x40] sm:$0xf] }
  0x42   : > { %v1474_v39 = vrot.slane %v1472_v17, 5  ;;  %v1462_v45 = vrot.slane %v1461_v52, 4  ;;  %v1485_v33 = vrot.slane %v1483_v4, 4  ;;  %v2038_v25 = vcombine.low %v2855_v10, %v619_v60  ;;  %v2945_v17 = vld [vmem:[%s2578_s8 + $0x44] sm:$0x1] }
  0x43   : > { %2314 = vmatpush3.bf16.msra.mxu1 %v2486_v56  ;;  %v2881_v56 = vld [vmem:[%s2578_s8 + $0x2c] sm:$0x1]  ;;  %v1488_v34 = vrot.slane %v1486_v28, 5  ;;  %v2898_v37 = vrot.slane %v1478_v19, 5  ;;  %v1453_v40 = vsel %vm2617_vm2, %v1448_v27, %v1452_v7  ;;  %v2039_v0 = vcombine.low %v2873_v61, %v627_v22 }
  0x44   : > { %2323 = vmatprep.subr.bf16.mxu1 %v2834_v38  ;;  %v1492_v29 = vshll.u32 %v2881_v56, 16  ;;  %v1475_v15 = vor.u32 %v1474_v39, %v1471_v35  ;;  %v2922_v42 = vsel %vm2724_vm6, %v2031_v54, %v630_v63  ;;  %v1497_v6 = vshrl.u32 %v2159_v48, 16 }
  0x45   : > { %v1489_v10 = vor.u32 %v1488_v34, %v1485_v33  ;;  %v1500_v55 = vshll.u32 %v2159_v48, 16  ;;  %v1511_v60 = vshrl.u32 %v2161_v51, 16  ;;  %v1514_v58 = vshll.u32 %v2161_v51, 16 }
  0x46   : > { %2308 = vmatmul.mubr.msk.bf16.gmra.mrb[4].mxu1 %vm390_vm3, %v2018_v18  ;;  %v2032_v18 = vrot.slane %v584_v62, 9  ;;  %v1494_v41 = vrot.slane %v1492_v29, 5  ;;  %v1476_v47 = vrot.slane %v1475_v15, 4  ;;  %v1499_v61 = vrot.slane %v1497_v6, 4  ;;  %v2499_v6 = vld [vmem:[%s3074_s1 + $0x88] sm:$0xff]  }
  0x47   : > { %2315 = vmatprep.mubr.msk.bf16.mxu1 %vm390_vm3, %v2037_v24  ;;  %v2911_v24 = vld [vmem:[%s3074_s1 + $0x80] sm:$0xff]   ;;  %v1490_v7 = vrot.slane %v1489_v10, 4  ;;  %v1502_v2 = vrot.slane %v1500_v55, 5  ;;  %v1513_v9 = vrot.slane %v1511_v60, 4  ;;  %v1516_v12 = vrot.slane %v1514_v58, 5 }
  0x48   : > { %2364 = vmatmul.mubr.msk.bf16.vlgmr.msra.gmra.mrb[0].mxu0 %vm390_vm3, %v2490_v57  ;;  %v2915_v57 = vld [vmem:[%s2578_s8 + $0x34] sm:$0x1]  ;;  %v635_v54 = vsel %vm2724_vm6, %v2032_v18, %v634_v32  ;;  %v1525_v19 = vshrl.u32 %v2163_v43, 16  ;;  %v1528_v4 = vshll.u32 %v2163_v43, 16  ;;  %v1534_v28 = vshll.u32 %v2945_v17, 16 }
  0x49   : > { %2372 = vmatpush3.bf16.msra.mxu0 %v2809_v8  ;;  %2367 = vmatprep.mubr.msk.bf16.mxu0 %vm390_vm3, %v2492_v53  ;;  %v1467_v8 = vsel %vm2617_vm2, %v1462_v45, %v1466_v5  ;;  %v2926_v53 = vld [vmem:[%s2578_s8 + $0x3c] sm:$0x1]  ;;  %v1506_v59 = vshll.u32 %v2915_v57, 16  ;;  %v1481_v5 = vsel %vm2617_vm2, %v1476_v47, %v2898_v37  ;;  %v1495_v20 = vsel %vm2617_vm2, %v1490_v7, %v1494_v41  ;;  %v2182_v47 = vld [vmem:[%s2578_s8 + $0x18] sm:$0xe] }
  0x4a   : > { %2373 = vmatprep.subr.bf16.mxu0 %v2493_v50  ;;  %v2171_v62 = vcombine.low %v1453_v40, %v1467_v8  ;;  %v1520_v63 = vshll.u32 %v2926_v53, 16  ;;  %v1503_v52 = vor.u32 %v1502_v2, %v1499_v61  ;;  %v1517_v27 = vor.u32 %v1516_v12, %v1513_v9  ;;  %v2183_v60 = vld [vmem:[%s2578_s8 + $0x20] sm:$0xe]  ;;  %v2184_v61 = vld [vmem:[%s2578_s8 + $0x28] sm:$0xe] }
  0x4b   : > { %v1508_v11 = vrot.slane %v1506_v59, 5  ;;  %v2040_v22 = vcombine.low %v2922_v42, %v635_v54  ;;  %v1527_v33 = vrot.slane %v1525_v19, 4  ;;  %v1530_v34 = vrot.slane %v1528_v4, 5  ;;  %v2181_v42 = vld [vmem:[%s2578_s8 + $0x10] sm:$0xe] }
  0x4c   : > { %v1522_v32 = vrot.slane %v1520_v63, 5  ;;  %v1504_v45 = vrot.slane %v1503_v52, 4  ;;  %v1518_v18 = vrot.slane %v1517_v27, 4  ;;  %v2172_v40 = vcombine.low %v1481_v5, %v1495_v20  ;;  %v2498_v54 = vld [vmem:[%s2578_s8 + $0x18] ss:$8 sps:$4 sm:$0xff]  }
  0x4d   : > { %2374 = vmatpush3.bf16.msra.mxu0 %v2493_v50  ;;  %v2165_v50 = vld [vmem:[%s2578_s8 + $0x48] sm:$0xf]  ;;  %v1531_v10 = vor.u32 %v1530_v34, %v1527_v33  ;;  %v1536_v41 = vrot.slane %v1534_v28, 5  ;;  %v2189_v55 = vrot.slane %v2181_v42, 9  ;;  %v2190_v59 = vrot.slane %v2182_v47, 9 }
  0x4e   : > { %2316 = vmatmul.mubr.msk.bf16.vlgmr.msra.gmra.mrb[0].mxu1 %vm390_vm3, %v2038_v25  ;;  %2383 = vmatprep.subr.bf16.mxu0 %v2911_v24  ;;  %v1539_v35 = vshrl.u32 %v2165_v50, 16  ;;  %v1542_v39 = vshll.u32 %v2165_v50, 16  ;;  %v2497_v25 = vld [vmem:[%s2578_s8 + $0x8] ss:$8 sps:$4 sm:$0xff]   ;;  %v1509_v8 = vsel %vm2617_vm2, %v1504_v45, %v1508_v11  ;;  %v1523_v48 = vsel %vm2617_vm2, %v1518_v18, %v1522_v32  ;;  %v2186_v50 = vld [vmem:[%s2578_s8 + $0x38] sm:$0xe] }
  0x4f   : > { %2324 = vmatpush3.bf16.msra.mxu1 %v2834_v38  ;;  %2319 = vmatprep.mubr.msk.bf16.mxu1 %vm390_vm3, %v2039_v0  ;;  %v2950_v38 = vld [vmem:[%s2578_s8 + $0x4c] sm:$0x1]  ;;  %v2173_v51 = vcombine.low %v1509_v8, %v1523_v48  ;;  %v1532_v7 = vrot.slane %v1531_v10, 4  ;;  %v963_v58 = vshll.u32 %v2747_v14, 16  ;;  %v977_v63 = vshll.u32 %v2750_v26, 16 }
  0x50   : > { %2368 = vmatmul.mubr.msk.bf16.gmra.mrb[4].mxu0 %vm390_vm3, %v2494_v49  ;;  %2325 = vmatprep.subr.bf16.mxu1 %v2495_v21  ;;  %v1548_v29 = vshll.u32 %v2950_v38, 16  ;;  %v1541_v15 = vrot.slane %v1539_v35, 4  ;;  %v1544_v37 = vrot.slane %v1542_v39, 5  ;;  %v1692_v49 = vrot.slane %v2849_v36, 5  ;;  %v2079_v14 = vld [vmem:[%s2578_s8 + $0x30] sm:$0xf] }
  0x51   : > { %2375 = vmatprep.mubr.msk.bf16.mxu0 %vm390_vm3, %v2171_v62  ;;  %v1696_v36 = vrot.slane %v2858_v16, 5  ;;  %v1700_v16 = vrot.slane %v2877_v13, 5  ;;  %v1537_v2 = vsel %vm2617_vm2, %v1532_v7, %v1536_v41  ;;  %v2191_v43 = vrot.slane %v2183_v60, 9  ;;  %v2077_v13 = vld [vmem:[%s2578_s8 + $0x28] sm:$0xf] }
  0x52   : > { %v1550_v0 = vrot.slane %v1548_v29, 5  ;;  %v1693_v11 = vsel %vm2724_vm6, %v2189_v55, %v1692_v49  ;;  %v2500_v5 = vld [vmem:[%s2578_s8 + $0x28] ss:$8 sps:$4 sm:$0xff]   ;;  %v1704_v20 = vrot.slane %v2881_v56, 5  ;;  %v954_v12 = vshrl.u32 %v2077_v13, 16 }
  0x53   : > { %2326 = vmatpush3.bf16.msra.mxu1 %v2495_v21  ;;  %v1545_v21 = vor.u32 %v1544_v37, %v1541_v15  ;;  %v1697_v9 = vsel %vm2724_vm6, %v2190_v59, %v1696_v36  ;;  %v2185_v32 = vld [vmem:[%s2578_s8 + $0x30] sm:$0xe]  ;;  %v2192_v19 = vrot.slane %v2184_v61, 9  ;;  %v957_v4 = vshll.u32 %v2077_v13, 16  ;;  %v2081_v27 = vld [vmem:[%s2578_s8 + $0x38] sm:$0xf] }
  0x54   : > { %2395 = vmatprep.subr.bf16.mxu1 %v2554_v1  ;;  %v2201_v52 = vcombine.low %v1693_v11, %v1697_v9  ;;  %v968_v28 = vshrl.u32 %v2079_v14, 16  ;;  %v971_v39 = vshll.u32 %v2079_v14, 16  ;;  %v2193_v29 = vrot.slane %v2185_v32, 9  ;;  %v2501_v7 = vld [vmem:[%s2578_s8 + $0x38] ss:$8 sps:$4 sm:$0xff]  }
  0x55   : > { %v1546_v62 = vrot.slane %v1545_v21, 4  ;;  %v959_v45 = vrot.slane %v957_v4, 5  ;;  %v1708_v34 = vrot.slane %v2915_v57, 5  ;;  %v1712_v18 = vrot.slane %v2926_v53, 5  ;;  %v2187_v59 = vld [vmem:[%s2578_s8 + $0x40] sm:$0xe] }
  0x56   : > { %2320 = vmatmul.mubr.msk.bf16.gmra.mrb[4].mxu1 %vm390_vm3, %v2040_v22  ;;  %v2083_v22 = vld [vmem:[%s2578_s8 + $0x40] sm:$0xf]  ;;  %v970_v33 = vrot.slane %v968_v28, 4  ;;  %v973_v56 = vrot.slane %v971_v39, 5  ;;  %v982_v15 = vshrl.u32 %v2081_v27, 16  ;;  %v985_v37 = vshll.u32 %v2081_v27, 16 }
  0x57   : > { %2327 = vmatprep.mubr.msk.bf16.mxu1 %vm390_vm3, %v2497_v25  ;;  %v1551_v26 = vsel %vm2617_vm2, %v1546_v62, %v1550_v0  ;;  %v2194_v25 = vrot.slane %v2186_v50, 9  ;;  %v996_v8 = vshrl.u32 %v2083_v22, 16  ;;  %v999_v10 = vshll.u32 %v2083_v22, 16  ;;  %v2188_v60 = vld [vmem:[%s2578_s8 + $0x48] sm:$0xe] }
  0x58   : > { %2376 = vmatmul.mubr.msk.bf16.vlgmr.msra.gmra.mrb[0].mxu0 %vm390_vm3, %v2172_v40  ;;  %v2174_v35 = vcombine.low %v1537_v2, %v1551_v26  ;;  %v965_v40 = vrot.slane %v963_v58, 5  ;;  %v974_v41 = vor.u32 %v973_v56, %v970_v33  ;;  %v979_v57 = vrot.slane %v977_v63, 5  ;;  %v2213_v22 = vld [vmem:[%s3077_s4] ss:$0 sm:$0xff] }
  0x59   : > { %2384 = vmatpush3.bf16.msra.mxu0 %v2911_v24  ;;  %2379 = vmatprep.mubr.msk.bf16.mxu0 %vm390_vm3, %v2173_v51  ;;  %v956_v24 = vrot.slane %v954_v12, 4  ;;  %v984_v48 = vrot.slane %v982_v15, 4  ;;  %v987_v21 = vrot.slane %v985_v37, 5  ;;  %v1701_v53 = vsel %vm2724_vm6, %v2191_v43, %v1700_v16 }
  0x5a   : > { %2385 = vmatprep.subr.bf16.mxu0 %v2499_v6  ;;  %v998_v42 = vrot.slane %v996_v8, 4  ;;  %v1001_v47 = vrot.slane %v999_v10, 5  ;;  %v975_v36 = vrot.slane %v974_v41, 4  ;;  %v1709_v51 = vsel %vm2724_vm6, %v2193_v29, %v1708_v34 }
  0x5b   : > { %v960_v49 = vor.u32 %v959_v45, %v956_v24  ;;  %v1005_v62 = vshll.u32 %v2780_v44, 16  ;;  %v988_v16 = vor.u32 %v987_v21, %v984_v48  ;;  %v2195_v11 = vrot.slane %v2187_v59, 9 }
  0x5c   : > { %v980_v61 = vsel %vm2617_vm2, %v975_v36, %v979_v57  ;;  %v1002_v58 = vor.u32 %v1001_v47, %v998_v42  ;;  %v1716_v9 = vrot.slane %v2945_v17, 5  ;;  %v2196_v43 = vrot.slane %v2188_v60, 9 }
  0x5d   : > { %2386 = vmatpush3.bf16.msra.mxu0 %v2499_v6  ;;  %v961_v0 = vrot.slane %v960_v49, 4  ;;  %v1713_v6 = vsel %vm2724_vm6, %v2194_v25, %v1712_v18  ;;  %v1720_v13 = vrot.slane %v2950_v38, 5  ;;  %v993_v44 = vrot.slane %v991_v23, 5 }
  0x5e   : > { %2328 = vmatmul.mubr.msk.bf16.vlgmr.msra.gmra.mrb[0].mxu1 %vm390_vm3, %v2498_v54  ;;  %v2203_v2 = vcombine.low %v1709_v51, %v1713_v6  ;;  %v989_v14 = vrot.slane %v988_v16, 4  ;;  %v1003_v26 = vrot.slane %v1002_v58, 4  ;;  %v1717_v17 = vsel %vm2724_vm6, %v2195_v11, %v1716_v9 }
  0x5f   : > { %2397 = vmatpush3.bf16.msra.mxu1 %v2554_v1  ;;  %2331 = vmatprep.mubr.msk.bf16.mxu1 %vm390_vm3, %v2500_v5  ;;  %v1705_v1 = vsel %vm2724_vm6, %v2192_v19, %v1704_v20  ;;  %v966_v55 = vsel %vm2617_vm2, %v961_v0, %v965_v40  ;;  %v1721_v38 = vsel %vm2724_vm6, %v2196_v43, %v1720_v13 }
  0x60   : > { %2380 = vmatmul.mubr.msk.bf16.gmra.mrb[4].mxu0 %vm390_vm3, %v2174_v35  ;;  %2396 = vmatprep.subr.bf16.mxu1 %v2565_v3  ;;  %v2202_v63 = vcombine.low %v1701_v53, %v1705_v1  ;;  %v2091_v54 = vcombine.low %v966_v55, %v980_v61  ;;  %v994_v5 = vsel %vm2617_vm2, %v989_v14, %v993_v44 }
  0x61   : > { %2387 = vmatprep.mubr.msk.bf16.mxu0 %vm390_vm3, %v2201_v52  ;;  %v2204_v23 = vcombine.low %v1717_v17, %v1721_v38 }
  0x63   : > { %2398 = vmatpush3.bf16.msra.mxu1 %v2565_v3  ;;  %v1007_v3 = vrot.slane %v1005_v62, 5 }
  0x65   : > { %v1008_v31 = vsel %vm2617_vm2, %v1003_v26, %v1007_v3 }
  0x66   : > { %2332 = vmatmul.mubr.msk.bf16.gmra.mrb[4].mxu1 %vm390_vm3, %v2501_v7  ;;  %v2092_v20 = vcombine.low %v994_v5, %v1008_v31 }
  0x67   : > { %2343 = vmatprep.mubr.msk.bf16.mxu1 %vm390_vm3, %v2091_v54 }
  0x68   : > { %2388 = vmatmul.mubr.msk.bf16.vlgmr.msra.gmra.mrb[0].mxu0 %vm390_vm3, %v2202_v63 }
  0x69   : > { %2391 = vmatprep.mubr.msk.bf16.mxu0 %vm390_vm3, %v2203_v2 }
  0x70   : > { %2392 = vmatmul.mubr.msk.bf16.gmra.mrb[4].mxu0 %vm390_vm3, %v2204_v23 }
  0x72   : > { %2344 = vmatmul.mubr.msk.bf16.vlgmr.msra.gmra.mrb[4].mxu1 %vm390_vm3, %v2092_v20 }
 0x131   : > { %v2329_v12 = vpop.f32.mrb[0].mxu1 }
 0x132   : > { %v842_v32 = vpop.f32.mrb[1].mxu1 }
 0x133   : > { %v2330_v50 = vpop.f32.mrb[2].mxu1 }
 0x134   : > { %v845_v52 = vpop.f32.mrb[3].mxu1 }
 0x13b   : > { %v2389_v19 = vpop.f32.mrb[0].mxu0 }
 0x13c   : > { %v2399_v4 = vadd.f32 %v2389_v19, %v2329_v12  ;;  %v1797_v28 = vpop.f32.mrb[1].mxu0 }
 0x13d   : > { %v2400_v27 = vadd.f32 %v1797_v28, %v842_v32  ;;  %v2390_v35 = vpop.f32.mrb[2].mxu0 }
 0x13e   : > { %v1845_v24 = vmul.f32 %v2399_v4, %v2211_v46  ;;  %v2401_v39 = vadd.f32 %v2390_v35, %v2330_v50  ;;  %v1800_v29 = vpop.f32.mrb[3].mxu0 }
 0x13f   : > { %v1843_v45 = vmul.f32 %v2400_v27, %v2211_v46  ;;  %v2402_v33 = vadd.f32 %v1800_v29, %v845_v52 }
 0x140   : > { %v1860_v34 = vadd.f32 %v2212_v30, %v1845_v24  ;;  %v1846_v25 = vmul.f32 %v2401_v39, %v2211_v46 }
 0x141   : > { %v1858_v56 = vadd.f32 %v2212_v30, %v1843_v45  ;;  %v1844_v18 = vmul.f32 %v2402_v33, %v2211_v46 }
 0x142   : > { %vm1868_vm7 = vcmp.ge.f32.partialorder %v1860_v34, 0.0  ;;  %v1883_v15 = vmul.f32 %v2213_v22, %v1860_v34  ;;  %v1861_v37 = vadd.f32 %v2212_v30, %v1846_v25 }
 0x143   : > { %vm1866_vm8 = vcmp.ge.f32.partialorder %v1858_v56, 0.0  ;;  %v1881_v49 = vmul.f32 %v2213_v22, %v1858_v56  ;;  %v1859_v40 = vadd.f32 %v2212_v30, %v1844_v18  ;;  %v2393_v8 = vpop.f32.mrb[4].mxu0 }
 0x144   : > { %v1891_v10 = vsel %vm1868_vm7, %v1860_v34, %v1883_v15  ;;  %vm1869_vm10 = vcmp.ge.f32.partialorder %v1861_v37, 0.0  ;;  %v1884_v41 = vmul.f32 %v2213_v22, %v1861_v37  ;;  %v1813_v57 = vpop.f32.mrb[5].mxu0 }
 0x145   : > { %v2227_v48 = vpack.c.bf16 %v1891_v10, %v1891_v10  ;;  %v1889_v21 = vsel %vm1866_vm8, %v1858_v56, %v1881_v49  ;;  %vm1867_vm11 = vcmp.ge.f32.partialorder %v1859_v40, 0.0  ;;  %v1882_v53 = vmul.f32 %v2213_v22, %v1859_v40  ;;  %v2345_v0 = vpop.f32.mrb[4].mxu1  ;;  %v2394_v42 = vpop.f32.mrb[6].mxu0 }
 0x146   : > { %v2225_v47 = vpack.c.bf16 %v1889_v21, %v1889_v21  ;;  %v1892_v1 = vsel %vm1869_vm10, %v1861_v37, %v1884_v41  ;;  %v2403_v36 = vadd.f32 %v2393_v8, %v2345_v0  ;;  %v1100_v51 = vpop.f32.mrb[5].mxu1  ;;  %v1816_v6 = vpop.f32.mrb[7].mxu0 }
 0x147   : > { %1932 = vst.msk [vmem:[%s3052_s23 + $0x8] sm:$0xf] %vm1929_vm9, %v2227_v48  ;;  %v2228_v7 = vpack.c.bf16 %v1892_v1, %v1892_v1  ;;  %v1890_v55 = vsel %vm1867_vm11, %v1859_v40, %v1882_v53  ;;  %v2404_v59 = vadd.f32 %v1813_v57, %v1100_v51  ;;  %v2346_v60 = vpop.f32.mrb[6].mxu1 }
 0x148   : > { %1930 = vst.msk [vmem:[%s3052_s23] sm:$0xf] %vm1929_vm9, %v2225_v47  ;;  %v2226_v62 = vpack.c.bf16 %v1890_v55, %v1890_v55  ;;  %v1849_v61 = vmul.f32 %v2403_v36, %v2211_v46  ;;  %v2405_v16 = vadd.f32 %v2394_v42, %v2346_v60  ;;  %v1103_v58 = vpop.f32.mrb[7].mxu1 }
 0x149   : > { %1933 = vst.msk [vmem:[%s3052_s23 + $0xc] sm:$0xf] %vm1929_vm9, %v2228_v7  ;;  %v1847_v63 = vmul.f32 %v2404_v59, %v2211_v46  ;;  %v2406_v54 = vadd.f32 %v1816_v6, %v1103_v58 }
 0x14a   : > { %1931 = vst.msk [vmem:[%s3052_s23 + $0x4] sm:$0xf] %vm1929_vm9, %v2226_v62  ;;  %v1864_v2 = vadd.f32 %v2212_v30, %v1849_v61  ;;  %v1850_v11 = vmul.f32 %v2405_v16, %v2211_v46 }
 0x14b   : > { %v1862_v9 = vadd.f32 %v2212_v30, %v1847_v63  ;;  %v1848_v43 = vmul.f32 %v2406_v54, %v2211_v46 }
 0x14c   : > { %vm1872_vm12 = vcmp.ge.f32.partialorder %v1864_v2, 0.0  ;;  %v1887_v13 = vmul.f32 %v2213_v22, %v1864_v2  ;;  %v1865_v44 = vadd.f32 %v2212_v30, %v1850_v11 }
 0x14d   : > { %vm1870_vm13 = vcmp.ge.f32.partialorder %v1862_v9, 0.0  ;;  %v1885_v3 = vmul.f32 %v2213_v22, %v1862_v9  ;;  %v1863_v14 = vadd.f32 %v2212_v30, %v1848_v43 }
 0x14e   : > { %v1895_v26 = vsel %vm1872_vm12, %v1864_v2, %v1887_v13  ;;  %vm1873_vm14 = vcmp.ge.f32.partialorder %v1865_v44, 0.0  ;;  %v1888_v17 = vmul.f32 %v2213_v22, %v1865_v44 }
 0x14f   : > { %v2231_v38 = vpack.c.bf16 %v1895_v26, %v1895_v26  ;;  %v1893_v5 = vsel %vm1870_vm13, %v1862_v9, %v1885_v3  ;;  %vm1871_vm15 = vcmp.ge.f32.partialorder %v1863_v14, 0.0  ;;  %v1886_v31 = vmul.f32 %v2213_v22, %v1863_v14 }
 0x150   : > { %v2229_v23 = vpack.c.bf16 %v1893_v5, %v1893_v5  ;;  %v1896_v20 = vsel %vm1873_vm14, %v1865_v44, %v1888_v17 }
 0x151   : > { %1936 = vst.msk [vmem:[%s3052_s23 + $0x18] sm:$0xf] %vm1929_vm9, %v2231_v38  ;;  %v2232_v12 = vpack.c.bf16 %v1896_v20, %v1896_v20  ;;  %v1894_v32 = vsel %vm1871_vm15, %v1863_v14, %v1886_v31 }
 0x152   : > { %1934 = vst.msk [vmem:[%s3052_s23 + $0x10] sm:$0xf] %vm1929_vm9, %v2229_v23  ;;  %v2230_v50 = vpack.c.bf16 %v1894_v32, %v1894_v32 }
 0x153   : > { %1937 = vst.msk [vmem:[%s3052_s23 + $0x1c] sm:$0xf] %vm1929_vm9, %v2232_v12 }
 0x154   : > { %1935 = vst.msk [vmem:[%s3052_s23 + $0x14] sm:$0xf] %vm1929_vm9, %v2230_v50 }
 0x155 PF: > { %s15_s18 = sadd.s32 1, %s2508_s18  }
 0x156   : > { %p12_p4 = scmp.ge.s32.totalorder %s15_s18, 4  }
 0x158   :  { %14 = sbr.rel (!%p12_p4) target bundleno = 1 (0x1), region = 80 }

// kernel: network_forward.9
= control target key start
LH: loop header
LB: loop body
LE: loop exit
PB: predicated region body
PF: predicated region fallthrough
CT: control target
= control target key end

     0   :  { %s1675_s15 = smov 0   ;;  %s1879_s0 = inlined_call_operand.vmem [shape: bf16[8,5,5,32], index: 0, kind: input, shape index: {}]   ;;  %s1880_s1 = inlined_call_operand.vmem [shape: bf16[9,32,32], index: 1, kind: input, shape index: {}]   ;;  %s1881_s2 = inlined_call_operand.vmem [shape: f32[1,32], index: 2, kind: input, shape index: {}]   ;;  %s1882_s3 = inlined_call_operand.vmem [shape: f32[1,32], index: 3, kind: input, shape index: {}]   ;;  %s1883_s4 = inlined_call_operand.vmem [shape: f32[2,16,32], index: 4, kind: output, shape index: {}]  }
   0x1 LB: > { %s1681_s16 = sadd.s32 4294967295, %s1645_s15   ;;  %p1347_p0 = scmp.ge.s32.totalorder %s1645_s15, 1  ;;  %s1645_s15 = sphi %s1675_s15, %s14_s15  }
   0x2   : > { %p164_p1 = scmp.lt.s32.totalorder %s1645_s15, 3 }
   0x4   : > { %p165_p2 = pnand %p1347_p0, %p164_p1 }
   0x5   : > { %v1597_v0 = vld [vmem:[%s1880_s1 + $0x40] sm:$0xff] (!%p165_p2)   ;;  %v1647_v1 = vmov (!%p165_p2), 0.0   ;;  %v1598_v2 = vld [vmem:[%s1880_s1 + $0x10] sm:$0xff] (!%p165_p2)   ;;  %v231_v3 = vlaneseq (!%p165_p2)  ;;  %v1599_v4 = vld [vmem:[%s1880_s1 + $0x48] sm:$0xff] (!%p165_p2)   ;;  %vm1648_vm0 = vmmov (!%p165_p2), 0   ;;  %s1348_s23 = sshll.u32 (!%p165_p2), %s1681_s16, 2 }
   0x6   : > { %168 = sbr.rel (%p165_p2) target bundleno = 301 (0x12d), region = 36  ;;  %1515 = vmatprep.subr.bf16.mxu0 (!%p165_p2), %v1647_v1  ;;  %1483 = vmatprep.subr.bf16.mxu1 (!%p165_p2), %v1647_v1  ;;  %v1600_v5 = vld [vmem:[%s1880_s1 + $0x18] sm:$0xff] (!%p165_p2)   ;;  %p192_p3 = scmp.lt.s32.totalorder (!%p165_p2), %s1348_s23, 7  ;;  %v1649_v6 = vmov (!%p165_p2), 1983009808   ;;  %vm255_vm1 = vcmask (!%p165_p2), 261120  }
   0x7   : > { %1516 = vmatpush3.bf16.msra.mxu0 (!%p165_p2), %v1597_v0  ;;  %1487 = vmatprep.mubr.msk.bf16.mxu1 (!%p165_p2), %vm1648_vm0, %v1647_v1  ;;  %v229_v7 = vunpack.c.l.s4 (!%p165_p2), %v1649_v6  ;;  %v232_v8 = vshrl.u32 (!%p165_p2), %v231_v3, 7  ;;  %vm417_vm2 = vsmask.f32 (!%p165_p2), 1280  ;;  %vm418_vm3 = vsmask.f32 (!%p165_p2), 3336  ;;  %v1606_v13 = vld [vmem:[%s1880_s1] sm:$0xff] (!%p165_p2)  }
   0x8   : > { %1484 = vmatpush3.bf16.msra.mxu1 (!%p165_p2), %v1598_v2  ;;  %1517 = vmatprep.subr.bf16.mxu0 (!%p165_p2), %v1647_v1  ;;  %vm420_vm4 = vsmask.f32 (!%p165_p2), 5392  ;;  %vm422_vm5 = vsmask.f32 (!%p165_p2), 7448  ;;  %v1605_v16 = vld [vmem:[%s1880_s1 + $0x50] sm:$0xff] (!%p165_p2)   ;;  %v1608_v20 = vld [vmem:[%s1880_s1 + $0x8] sm:$0xff] (!%p165_p2)   ;;  %vm1738_vm6 = vmor (!%p165_p2), %vm417_vm2, %vm418_vm3 }
   0x9   : > { %1485 = vmatprep.subr.bf16.mxu1 (!%p165_p2), %v1647_v1  ;;  %1519 = vmatprep.mubr.msk.bf16.mxu0 (!%p165_p2), %vm1648_vm0, %v1647_v1  ;;  %v230_v9 = vunpack.c.0.s8 (!%p165_p2), %v229_v7  ;;  %v1607_v34 = vld [vmem:[%s1880_s1 + $0x58] sm:$0xff] (!%p165_p2)   ;;  %vm1757_vm7 = vmor (!%p165_p2), %vm1738_vm6, %vm420_vm4  ;;  %v1612_v60 = vld [vmem:[%s1880_s1 + $0x20] sm:$0xff] (!%p165_p2)   ;;  %p198_p4 = scmp.lt.s32.totalorder (!%p165_p2), %s1681_s16, 1 }
   0xa   : > { %vm1765_vm8 = vmor (!%p165_p2), %vm1757_vm7, %vm422_vm5 }
   0xb   : > { %1518 = vmatpush3.bf16.msra.mxu0 (!%p165_p2), %v1599_v4  ;;  %v1713_v10 = vsub.s32 (!%p165_p2), %v230_v9, %v232_v8 }
   0xc   : > { %1486 = vmatpush3.bf16.msra.mxu1 (!%p165_p2), %v1600_v5  ;;  %1523 = vmatprep.subr.bf16.mxu0 (!%p165_p2), %v1647_v1 }
   0xd   : > { %s1891_s23 = smov (!%p192_p3, %s1348_s23), 7  ;;  %1491 = vmatprep.subr.bf16.mxu1 %v1647_v1  ;;  %s1893_s16 = smov (!%p198_p4, %s1681_s16), 1 }
   0xe   : > { %s1585_s26 = smul.u32 20, %s1891_s23  ;;  %s1455_s10 = sshll.u32 %s1893_s16, 4 }
   0xf   : > { %s202_s17 = scalar_lea.vmem %s1883_s4, %s1455_s10 }
  0x10   : > { %s1711_s29 = scalar_lea.vmem %s1879_s0, %s1585_s26 }
  0x11   : > { %v1627_v11 = vld.sshfl [vmem:[%s1711_s29 + $0x14] sm:$0xf pattern:$0x76325410] }
  0x12   : > { %v1628_v12 = vld.sshfl [vmem:[%s1711_s29 + $0x1c] sm:$0xf pattern:$0x76325410] }
  0x13   : > { %v1629_v14 = vld.sshfl [vmem:[%s1711_s29 + $0x3c] sm:$0xf pattern:$0x76325410]  ;;  %v242_v17 = vcombine.low %v1627_v11, %v1628_v12  ;;  %v1614_v11 = vld [vmem:[%s1880_s1 + $0x28] sm:$0xff]  }
  0x14   : > { %v1630_v15 = vld.sshfl [vmem:[%s1711_s29 + $0x44] sm:$0xf pattern:$0x76325410] }
  0x15   : > { %v1726_v18 = vld.sshfl [vmem:[%s1711_s29] sm:$0xf pattern:$0x76325410]  ;;  %1488 = vmatmul.mubr.msk.bf16.vlgmr.msra.gmra.mrb[0].mxu1 %vm255_vm1, %v242_v17  ;;  %v679_v22 = vcombine.low %v1629_v14, %v1630_v15 }
  0x16   : > { %v1729_v19 = vld.sshfl [vmem:[%s1711_s29 + $0x8] sm:$0xf pattern:$0x76325410]  ;;  %1492 = vmatpush3.bf16.msra.mxu1 %v1606_v13  ;;  %1495 = vmatprep.mubr.msk.bf16.mxu1 %vm1648_vm0, %v1647_v1 }
  0x17   : > { %v1403_v21 = vld.sshfl [vmem:[%s1711_s29 + $0x28] sm:$0x13 pattern:$0x76325410]  ;;  %1520 = vmatmul.mubr.msk.bf16.vlgmr.msra.gmra.mrb[0].mxu0 %vm255_vm1, %v679_v22  ;;  %1493 = vmatprep.subr.bf16.mxu1 %v1647_v1  ;;  %v320_v56 = vcombine.low %v1726_v18, %v1729_v19 }
  0x18   : > { %v1404_v24 = vld.sshfl [vmem:[%s1711_s29 + $0x2c] sm:$0x13 pattern:$0x76325410]  ;;  %v753_v25 = vcombine.high %v1403_v21, %v1403_v21  ;;  %v779_v28 = vshrl.u32 %v1403_v21, 16  ;;  %v782_v29 = vshll.u32 %v1403_v21, 16  ;;  %1524 = vmatpush3.bf16.msra.mxu0 %v1605_v16  ;;  %1527 = vmatprep.mubr.msk.bf16.mxu0 %vm1648_vm0, %v1647_v1 }
  0x19   : > { %v1405_v26 = vld.sshfl [vmem:[%s1711_s29 + $0x30] sm:$0x13 pattern:$0x76325410]  ;;  %v761_v27 = vcombine.high %v1404_v24, %v1404_v24  ;;  %v793_v33 = vshrl.u32 %v1404_v24, 16  ;;  %v796_v39 = vshll.u32 %v1404_v24, 16  ;;  %1525 = vmatprep.subr.bf16.mxu0 %v1647_v1 }
  0x1a   : > { %v1406_v30 = vld.sshfl [vmem:[%s1711_s29 + $0x34] sm:$0x13 pattern:$0x76325410]  ;;  %v769_v31 = vcombine.high %v1405_v26, %v1405_v26  ;;  %v788_v32 = vshll.u32 %v753_v25, 16  ;;  %v781_v37 = vrot.slane %v779_v28, 6  ;;  %1494 = vmatpush3.bf16.msra.mxu1 %v1608_v20 }
  0x1b   : > { %v777_v36 = vcombine.high %v1406_v30, %v1406_v30  ;;  %v784_v38 = vrot.slane %v782_v29, 7  ;;  %v795_v41 = vrot.slane %v793_v33, 6  ;;  %v802_v42 = vshll.u32 %v761_v27, 16  ;;  %1499 = vmatprep.subr.bf16.mxu1 %v1647_v1 }
  0x1c   : > { %v790_v40 = vrot.slane %v788_v32, 7  ;;  %v807_v43 = vshrl.u32 %v1405_v26, 16  ;;  %v798_v45 = vrot.slane %v796_v39, 7  ;;  %v810_v46 = vshll.u32 %v1405_v26, 16  ;;  %1526 = vmatpush3.bf16.msra.mxu0 %v1607_v34 }
  0x1d   : > { %v785_v44 = vor.u32 %v784_v38, %v781_v37  ;;  %v816_v47 = vshll.u32 %v769_v31, 16  ;;  %v821_v50 = vshrl.u32 %v1406_v30, 16  ;;  %v824_v51 = vshll.u32 %v1406_v30, 16  ;;  %1531 = vmatprep.subr.bf16.mxu0 %v1647_v1 }
  0x1e   : > { %v809_v49 = vrot.slane %v807_v43, 6  ;;  %v799_v53 = vor.u32 %v798_v45, %v795_v41  ;;  %v804_v54 = vrot.slane %v802_v42, 7  ;;  %v812_v55 = vrot.slane %v810_v46, 7 }
  0x1f   : > { %v786_v52 = vrot.slane %v785_v44, 2  ;;  %v823_v57 = vrot.slane %v821_v50, 6  ;;  %v826_v58 = vrot.slane %v824_v51, 7  ;;  %v830_v59 = vshll.u32 %v777_v36, 16 }
  0x20   : > { %v800_v62 = vrot.slane %v799_v53, 2  ;;  %v813_v63 = vor.u32 %v812_v55, %v809_v49  ;;  %v818_v0 = vrot.slane %v816_v47, 7  ;;  %v1366_v2 = vld.sshfl [vmem:[%s1711_s29] sm:$0x13 pattern:$0x76325410] }
  0x21   : > { %v791_v61 = vsel %vm1765_vm8, %v786_v52, %v790_v40  ;;  %v827_v3 = vor.u32 %v826_v58, %v823_v57  ;;  %v832_v4 = vrot.slane %v830_v59, 7  ;;  %v1367_v5 = vld.sshfl [vmem:[%s1711_s29 + $0x4] sm:$0x13 pattern:$0x76325410]  ;;  %v392_v6 = vcombine.high %v1366_v2, %v1366_v2  ;;  %1496 = vmatmul.mubr.msk.bf16.vlgmr.msra.gmra.mrb[0].mxu1 %vm255_vm1, %v320_v56  ;;  %v1613_v57 = vld [vmem:[%s1880_s1 + $0x68] sm:$0xff]  }
  0x22   : > { %v425_v7 = vshrl.u32 %v1366_v2, 16  ;;  %v805_v8 = vsel %vm1765_vm8, %v800_v62, %v804_v54  ;;  %v814_v9 = vrot.slane %v813_v63, 2  ;;  %v1368_v12 = vld.sshfl [vmem:[%s1711_s29 + $0x8] sm:$0x13 pattern:$0x76325410]  ;;  %v400_v13 = vcombine.high %v1367_v5, %v1367_v5  ;;  %1500 = vmatpush3.bf16.msra.mxu1 %v1612_v60  ;;  %1503 = vmatprep.mubr.msk.bf16.mxu1 %vm1648_vm0, %v1647_v1 }
  0x23   : > { %v428_v14 = vshll.u32 %v1366_v2, 16  ;;  %v828_v15 = vrot.slane %v827_v3, 2  ;;  %v839_v16 = vcombine.low %v791_v61, %v805_v8  ;;  %v1369_v17 = vld.sshfl [vmem:[%s1711_s29 + $0xc] sm:$0x13 pattern:$0x76325410]  ;;  %v408_v18 = vcombine.high %v1368_v12, %v1368_v12  ;;  %1501 = vmatprep.subr.bf16.mxu1 %v1647_v1 }
  0x24   : > { %v427_v19 = vrot.slane %v425_v7, 6  ;;  %v819_v20 = vsel %vm1765_vm8, %v814_v9, %v818_v0  ;;  %v416_v21 = vcombine.high %v1369_v17, %v1369_v17  ;;  %v434_v23 = vshll.u32 %v392_v6, 16  ;;  %v1611_v40 = vld [vmem:[%s1880_s1 + $0x60] sm:$0xff]  }
  0x25   : > { %v430_v22 = vrot.slane %v428_v14, 7  ;;  %v833_v24 = vsel %vm1765_vm8, %v828_v15, %v832_v4  ;;  %v847_v25 = vrot.slane %v839_v16, %v1713_v10  ;;  %v439_v26 = vshrl.u32 %v1367_v5, 16  ;;  %v1633_v47 = vld.sshfl [vmem:[%s1711_s29 + $0x4] sm:$0xf pattern:$0x76325410] }
  0x26   : > { %v442_v27 = vshll.u32 %v1367_v5, 16  ;;  %v840_v28 = vcombine.low %v819_v20, %v833_v24  ;;  %v436_v30 = vrot.slane %v434_v23, 7  ;;  %v448_v31 = vshll.u32 %v400_v13, 16  ;;  %1502 = vmatpush3.bf16.msra.mxu1 %v1614_v11  ;;  %v1617_v11 = vld [vmem:[%s1880_s1 + $0x70] sm:$0xff]   ;;  %v1620_v24 = vld [vmem:[%s1880_s1 + $0x38] sm:$0xff]  }
  0x27   : > { %v431_v29 = vor.u32 %v430_v22, %v427_v19  ;;  %v441_v32 = vrot.slane %v439_v26, 6  ;;  %v453_v34 = vshrl.u32 %v1368_v12, 16  ;;  %v456_v35 = vshll.u32 %v1368_v12, 16  ;;  %1507 = vmatprep.subr.bf16.mxu1 %v1647_v1  ;;  %v1618_v13 = vld [vmem:[%s1880_s1 + $0x30] sm:$0xff]   ;;  %v1619_v19 = vld [vmem:[%s1880_s1 + $0x78] sm:$0xff]  }
  0x28   : > { %v444_v33 = vrot.slane %v442_v27, 7  ;;  %v854_v36 = vrot.slane %v840_v28, %v1713_v10  ;;  %v450_v38 = vrot.slane %v448_v31, 7  ;;  %v462_v39 = vshll.u32 %v408_v18, 16 }
  0x29   : > { %v432_v37 = vrot.slane %v431_v29, 2  ;;  %v455_v42 = vrot.slane %v453_v34, 6  ;;  %v458_v43 = vrot.slane %v456_v35, 7  ;;  %v467_v44 = vshrl.u32 %v1369_v17, 16  ;;  %v1625_v29 = vld [vmem:[%s1880_s1 + $0x80] sm:$0xff]  }
  0x2a   : > { %v445_v41 = vor.u32 %v444_v33, %v441_v32  ;;  %v855_v45 = vcombine.low %v847_v25, %v854_v36  ;;  %v470_v46 = vshll.u32 %v1369_v17, 16  ;;  %v1634_v49 = vld.sshfl [vmem:[%s1711_s29 + $0xc] sm:$0xf pattern:$0x76325410]  ;;  %v476_v53 = vshll.u32 %v416_v21, 16 }
  0x2b   : > { %v459_v51 = vor.u32 %v458_v43, %v455_v42  ;;  %v469_v52 = vrot.slane %v467_v44, 6  ;;  %v437_v54 = vsel %vm1765_vm8, %v432_v37, %v436_v30  ;;  %v464_v55 = vrot.slane %v462_v39, 7  ;;  %v1443_v5 = vld.sshfl [vmem:[%s1711_s29 + $0x10] sm:$0x13 pattern:$0x76325410] }
  0x2c   : > { %v446_v50 = vrot.slane %v445_v41, 2  ;;  %1528 = vmatmul.mubr.msk.bf16.vlgmr.msra.gmra.mrb[0].mxu0 %vm255_vm1, %v855_v45  ;;  %v472_v56 = vrot.slane %v470_v46, 7  ;;  %v478_v61 = vrot.slane %v476_v53, 7  ;;  %v944_v6 = vcombine.low %v1633_v47, %v1634_v49  ;;  %v1626_v33 = vld [vmem:[%s1880_s1 + $0x88] sm:$0xff]   ;;  %v1451_v41 = vld [vmem:[%s1881_s2] ss:$0 sm:$0xff] }
  0x2d   : > { %1532 = vmatpush3.bf16.msra.mxu0 %v1611_v40  ;;  %1535 = vmatprep.mubr.msk.bf16.mxu0 %vm1648_vm0, %v1647_v1  ;;  %v460_v59 = vrot.slane %v459_v51, 2  ;;  %v1175_v7 = vshrl.u32 %v1443_v5, 16  ;;  %v1178_v8 = vshll.u32 %v1443_v5, 16  ;;  %v1131_v12 = vcombine.high %v1443_v5, %v1443_v5 }
  0x2e   : > { %v451_v58 = vsel %vm1765_vm8, %v446_v50, %v450_v38  ;;  %1533 = vmatprep.subr.bf16.mxu0 %v1647_v1  ;;  %v473_v60 = vor.u32 %v472_v56, %v469_v52  ;;  %v1635_v17 = vld.sshfl [vmem:[%s1711_s29 + $0x18] sm:$0xf pattern:$0x76325410] }
  0x2f   : > { %v485_v62 = vcombine.low %v437_v54, %v451_v58  ;;  %v465_v63 = vsel %vm1765_vm8, %v460_v59, %v464_v55  ;;  %v1177_v14 = vrot.slane %v1175_v7, 6  ;;  %v1180_v15 = vrot.slane %v1178_v8, 7  ;;  %v1636_v18 = vld.sshfl [vmem:[%s1711_s29 + $0x20] sm:$0xf pattern:$0x76325410] }
  0x30   : > { %v474_v0 = vrot.slane %v473_v60, 2  ;;  %v1637_v20 = vld.sshfl [vmem:[%s1711_s29 + $0x28] sm:$0xf pattern:$0x76325410]  ;;  %v1184_v23 = vshll.u32 %v1131_v12, 16  ;;  %v1033_v27 = vcombine.low %v1635_v17, %v1636_v18  ;;  %v1193_v31 = vcombine.low %v451_v58, %v465_v63 }
  0x31   : > { %1534 = vmatpush3.bf16.msra.mxu0 %v1613_v57  ;;  %v493_v4 = vrot.slane %v485_v62, %v1713_v10  ;;  %v1638_v21 = vld.sshfl [vmem:[%s1711_s29 + $0x30] sm:$0xf pattern:$0x76325410]  ;;  %v1181_v22 = vor.u32 %v1180_v15, %v1177_v14 }
  0x32   : > { %1539 = vmatprep.subr.bf16.mxu0 %v1647_v1  ;;  %v479_v2 = vsel %vm1765_vm8, %v474_v0, %v478_v61  ;;  %v1186_v26 = vrot.slane %v1184_v23, 7  ;;  %v590_v28 = vcombine.low %v1637_v20, %v1638_v21  ;;  %v1201_v48 = vrot.slane %v1193_v31, %v1713_v10 }
  0x33   : > { %v486_v3 = vcombine.low %v465_v63, %v479_v2  ;;  %v1182_v25 = vrot.slane %v1181_v22, 2 }
  0x35   : > { %v500_v9 = vrot.slane %v486_v3, %v1713_v10  ;;  %v1187_v30 = vsel %vm1765_vm8, %v1182_v25, %v1186_v26 }
  0x36   : > { %v1194_v32 = vcombine.low %v479_v2, %v1187_v30 }
  0x37   : > { %v501_v16 = vcombine.low %v493_v4, %v500_v9 }
  0x38   : > { %1536 = vmatmul.mubr.msk.bf16.vlgmr.msra.gmra.mrb[0].mxu0 %vm255_vm1, %v944_v6  ;;  %v1208_v34 = vrot.slane %v1194_v32, %v1713_v10  ;;  %v1452_v10 = vld [vmem:[%s1882_s3] ss:$0 sm:$0xff] }
  0x39   : > { %1504 = vmatmul.mubr.msk.bf16.vlgmr.msra.gmra.mrb[0].mxu1 %vm255_vm1, %v501_v16  ;;  %1540 = vmatpush3.bf16.msra.mxu0 %v1617_v11 }
  0x3a   : > { %1508 = vmatpush3.bf16.msra.mxu1 %v1618_v13  ;;  %1541 = vmatprep.subr.bf16.mxu0 %v1647_v1  ;;  %v1209_v35 = vcombine.low %v1201_v48, %v1208_v34 }
  0x3b   : > { %1509 = vmatprep.subr.bf16.mxu1 %v1647_v1  ;;  %1511 = vmatprep.mubr.msk.bf16.mxu1 %vm1648_vm0, %v1647_v1 }
  0x3c   : > { %1543 = vmatprep.mubr.msk.bf16.mxu0 %vm1648_vm0, %v1647_v1 }
  0x3d   : > { %1542 = vmatpush3.bf16.msra.mxu0 %v1619_v19 }
  0x3e   : > { %1510 = vmatpush3.bf16.msra.mxu1 %v1620_v24  ;;  %1547 = vmatprep.subr.bf16.mxu0 %v1647_v1 }
  0x44   : > { %1544 = vmatmul.mubr.msk.bf16.vlgmr.msra.gmra.mrb[0].mxu0 %vm255_vm1, %v1033_v27 }
  0x45   : > { %1512 = vmatmul.mubr.msk.bf16.vlgmr.msra.gmra.mrb[0].mxu1 %vm255_vm1, %v590_v28  ;;  %1548 = vmatpush3.bf16.msra.mxu0 %v1625_v29 }
  0x46   : > { %1549 = vmatprep.subr.bf16.mxu0 %v1647_v1  ;;  %1551 = vmatprep.mubr.msk.bf16.mxu0 %vm1648_vm0, %v1647_v1 }
  0x49   : > { %1550 = vmatpush3.bf16.msra.mxu0 %v1626_v33 }
  0x50   : > { %1552 = vmatmul.mubr.msk.bf16.vlgmr.msra.gmra.mrb[0].mxu0 %vm255_vm1, %v1209_v35 }
 0x118   : > { %v640_v36 = vpop.f32.mrb[0].mxu1 }
 0x119   : > { %v1513_v37 = vpop.f32.mrb[1].mxu1 }
 0x11a   : > { %v643_v38 = vpop.f32.mrb[2].mxu1 }
 0x11b   : > { %v1514_v39 = vpop.f32.mrb[3].mxu1 }
 0x123   : > { %v1259_v40 = vpop.f32.mrb[0].mxu0 }
 0x124   : > { %v1555_v1 = vadd.f32 %v1259_v40, %v640_v36  ;;  %v1553_v42 = vpop.f32.mrb[1].mxu0 }
 0x125   : > { %v1262_v43 = vpop.f32.mrb[2].mxu0 }
 0x126   : > { %v1275_v44 = vmul.f32 %v1555_v1, %v1451_v41  ;;  %v1556_v45 = vadd.f32 %v1262_v43, %v643_v38  ;;  %v1554_v46 = vpop.f32.mrb[3].mxu0 }
 0x128   : > { %v1284_v47 = vadd.f32 %v1452_v10, %v1275_v44  ;;  %v1276_v49 = vmul.f32 %v1556_v45, %v1451_v41 }
 0x12a   : > { %1286 = vst.msk [vmem:[%s202_s17] sm:$0xff] %vm255_vm1, %v1284_v47  ;;  %v1285_v50 = vadd.f32 %v1452_v10, %v1276_v49 }
 0x12c   : > { %1287 = vst.msk [vmem:[%s202_s17 + $0x8] sm:$0xff] %vm255_vm1, %v1285_v50 }
 0x12d PF: > { %s14_s15 = sadd.s32 1, %s1645_s15  }
 0x12e   : > { %p11_p5 = scmp.ge.s32.totalorder %s14_s15, 4  }
 0x130   :  { %13 = sbr.rel (!%p11_p5) target bundleno = 1 (0x1), region = 79 }

</bundles_post_ra>
